<compile_context>
chip_gen: v5e
topology: v5e:2x2
jax: 0.10.0
libtpu: 0.0.40
codegen_flags: <defaults>
</compile_context>

<pallas_src>
import jax
import jax.numpy as jnp
from jax.experimental import pallas as pl
from jax.experimental.pallas import tpu as pltpu


def _round_up(v, m):
    return -(-v // m) * m


def _chip_has_bf16_eup():
    """v6e / v7x have bf16 VPU/EUP; v5e and older do not."""
    try:
        kind = jax.devices()[0].device_kind.lower()
    except Exception:
        return False
    if any(old in kind for old in ("v2", "v3", "v4", "v5")):
        return False
    return True


def _vmem_cap_bytes():
    """Generation-aware VMEM cap (v7x only has 64 MiB physical)."""
    try:
        return int(0.85 * pltpu.get_tpu_info().vmem_capacity_bytes)
    except Exception:
        return 48 << 20  # conservative fallback (safe even on v7x)


def _make_lstm_kernel(*, num_chains, nonlin_bf16):
    """Build the per-block LSTM recurrence kernel.

    Refs:
      x_ref    : (D, T, bm)   channel-major trajectories (agents on lanes)
      wih_ref  : (4H, D)      input->gate weights, rows permuted to [i|f|o|g]
      whh_ref  : (4H, H)      hidden->gate weights (same row permutation)
      b_ref    : (4H, 1)      fused bias b_ih + b_hh (same permutation)
      h_out_ref: (H, bm)      final hidden state for this block
    """

    def kernel(x_ref, wih_ref, whh_ref, b_ref, h_out_ref):
        D_in, T, bm = x_ref.shape
        H = whh_ref.shape[1]
        bm_c = bm // num_chains
        f32 = jnp.float32

        # Hoisted, vreg-resident small operands.
        whh = whh_ref[...]                                  # (4H, H)
        bias = b_ref[...].astype(f32)                       # (4H, 1)
        wih = wih_ref[...].astype(f32)                      # (4H, D)
        wih_cols = [wih[:, d:d + 1] for d in range(D_in)]   # D x (4H, 1)

        def _sigmoid(z):
            # 0.5*(tanh(0.5 z)+1): one EUP pass per element instead of exp + recip.
            return 0.5 * jnp.tanh(0.5 * z) + 0.5

        def step(t, carry):
            new = []
            # num_chains independent h/c chains: their MXU / EUP / VPU work is
            # mutually independent, so the LLO scheduler interleaves them and
            # hides the per-step serial latency.
            for ci in range(num_chains):
                h, c = carry[2 * ci], carry[2 * ci + 1]
                lanes = pl.ds(ci * bm_c, bm_c)

                # Inline input projection: D rank-1 broadcast FMAs on (4H, bm_c)
                # (D=2 is far too small for an MXU pass; lands in VALU slack).
                xproj = bias
                for d in range(D_in):
                    x_t = x_ref[d, pl.ds(t, 1), lanes].astype(f32)   # (1, bm_c)
                    xproj = xproj + x_t * wih_cols[d]                # (4H, bm_c)

                gates = xproj + jnp.dot(                             # (4H, bm_c)
                    whh, h.astype(whh.dtype), preferred_element_type=f32)

                gnl = gates.astype(jnp.bfloat16) if nonlin_bf16 else gates
                sig = _sigmoid(gnl[0:3 * H])                         # contiguous [i|f|o]
                g = jnp.tanh(gnl[3 * H:4 * H]).astype(f32)
                i = sig[0:H].astype(f32)
                f = sig[H:2 * H].astype(f32)
                o = sig[2 * H:3 * H].astype(f32)

                c = f * c + i * g                                    # f32 state update
                tc = (jnp.tanh(c.astype(jnp.bfloat16)).astype(f32)
                      if nonlin_bf16 else jnp.tanh(c))
                h = o * tc
                new += [h, c]
            return tuple(new)

        init = tuple(jnp.zeros((H, bm_c), f32) for _ in range(2 * num_chains))
        unroll = True if T <= 16 else 8                              # partial unroll for long T
        fin = jax.lax.fori_loop(0, T, step, init, unroll=unroll)

        for ci in range(num_chains):
            h_out_ref[:, ci * bm_c:(ci + 1) * bm_c] = fin[2 * ci].astype(h_out_ref.dtype)

    return kernel


def agent_feature_encoder(x, w_ih, w_hh, b_ih, b_hh, *, block_m=None,
                          mxu_bf16=True, nonlin_bf16=None):
    """x: [B, N, T, D] -> [B, N, H] (last hidden state of a 1-layer LSTM).

    w_ih: [4H, D], w_hh: [4H, H], b_ih/b_hh: [4H] in PyTorch [i|f|g|o] gate order.
    """
    B, N, T, D = x.shape
    H = w_hh.shape[1]
    M = B * N

    if nonlin_bf16 is None:
        nonlin_bf16 = _chip_has_bf16_eup()

    # Pad agent rows to a multiple of 256: every output store is lane-dense and the
    # grid always has >= 2 blocks (v7x megacore + cross-step DMA/compute pipelining).
    M_pad = max(256, _round_up(M, 256))

    if block_m is None:
        for cand in (1024, 512, 256, 128):
            if M_pad % cand == 0 and M_pad // cand >= 2:
                block_m = cand
                break
    assert M_pad % block_m == 0 and block_m % 128 == 0
    num_chains = 2 if block_m >= 256 else 1

    # ---- wrapper-side layout plumbing (plain JAX) ----------------------------
    # TODO(synk): this channel-major transpose is a strided HBM shuffle for large M;
    # prefer a channel-major producer or fold it into the kernel's per-block load.
    x_flat = x.reshape(M, T, D)
    if M_pad != M:
        x_flat = jnp.concatenate(
            [x_flat, jnp.zeros((M_pad - M, T, D), x.dtype)], axis=0)
    x_cm = jnp.transpose(x_flat, (2, 1, 0))                          # (D, T, M_pad)

    # permute gate rows [i|f|g|o] -> [i|f|o|g] so sigmoid / tanh act on contiguous slabs
    perm = jnp.concatenate([
        jnp.arange(0, 2 * H),        # i, f
        jnp.arange(3 * H, 4 * H),    # o
        jnp.arange(2 * H, 3 * H),    # g
    ])
    wih_p = w_ih[perm].astype(jnp.float32)                           # (4H, D)
    whh_p = w_hh[perm].astype(jnp.bfloat16 if mxu_bf16 else jnp.float32)
    bias_p = (b_ih + b_hh)[perm].reshape(4 * H, 1).astype(jnp.float32)

    # ---- VMEM budget: no scratch any more, so this normally stays None. ------
    est = 4 * (2 * D * T * block_m                       # double-buffered x block
               + 2 * _round_up(H, 8) * block_m           # double-buffered output block
               + 3 * _round_up(4 * H, 8) * 128)          # weights + bias
    vmem_limit = None
    if est > (16 << 20):
        vmem_limit = min(int(est * 1.5), _vmem_cap_bytes())

    kernel = _make_lstm_kernel(num_chains=num_chains, nonlin_bf16=nonlin_bf16)

    out = pl.pallas_call(
        kernel,
        out_shape=jax.ShapeDtypeStruct((H, M_pad), x.dtype),
        grid_spec=pltpu.PrefetchScalarGridSpec(
            num_scalar_prefetch=0,
            grid=(M_pad // block_m,),
            in_specs=[
                pl.BlockSpec((D, T, block_m), lambda i: (0, 0, i)),
                pl.BlockSpec((4 * H, D), lambda i: (0, 0)),
                pl.BlockSpec((4 * H, H), lambda i: (0, 0)),
                pl.BlockSpec((4 * H, 1), lambda i: (0, 0)),
            ],
            out_specs=pl.BlockSpec((H, block_m), lambda i: (0, i)),
        ),
        compiler_params=pltpu.CompilerParams(
            dimension_semantics=("parallel",),
            vmem_limit_bytes=vmem_limit,
        ),
    )(x_cm, wih_p, whh_p, bias_p)

    return out[:, :M].T.reshape(B, N, H)


def _lstm_reference(x, w_ih, w_hh, b_ih, b_hh):
    """Pure-JAX reference matching torch.nn.LSTM (1 layer, batch_first)."""
    B, N, T, D = x.shape
    H = w_hh.shape[1]
    xs = x.reshape(B * N, T, D).astype(jnp.float32)

    def step(carry, xt):
        h, c = carry
        gates = xt @ w_ih.T + b_ih + h @ w_hh.T + b_hh
        i = jax.nn.sigmoid(gates[:, 0 * H:1 * H])
        f = jax.nn.sigmoid(gates[:, 1 * H:2 * H])
        g = jnp.tanh(gates[:, 2 * H:3 * H])
        o = jax.nn.sigmoid(gates[:, 3 * H:4 * H])
        c = f * c + i * g
        h = o * jnp.tanh(c)
        return (h, c), None

    h0 = jnp.zeros((B * N, H), jnp.float32)
    c0 = jnp.zeros((B * N, H), jnp.float32)
    (hT, _), _ = jax.lax.scan(step, (h0, c0), jnp.transpose(xs, (1, 0, 2)))
    return hT.reshape(B, N, H)


if __name__ == "__main__":
    # small shapes consistent with the module: B=2 scenes, N=4 agents,
    # T=8 observed steps, input_dim=2 (x, y), hidden_dim=64 (module default)
    B, N, T, D, H = 2, 4, 8, 2, 64

    key = jax.random.PRNGKey(0)
    kx, k1, k2, k3, k4 = jax.random.split(key, 5)

    x = jax.random.normal(kx, (B, N, T, D), dtype=jnp.float32)

    # deterministic PyTorch-style init: U(-1/sqrt(H), 1/sqrt(H))
    bound = 1.0 / (H ** 0.5)
    w_ih = jax.random.uniform(k1, (4 * H, D), jnp.float32, -bound, bound)
    w_hh = jax.random.uniform(k2, (4 * H, H), jnp.float32, -bound, bound)
    b_ih = jax.random.uniform(k3, (4 * H,), jnp.float32, -bound, bound)
    b_hh = jax.random.uniform(k4, (4 * H,), jnp.float32, -bound, bound)

    ref = jax.block_until_ready(_lstm_reference(x, w_ih, w_hh, b_ih, b_hh))

    # Exact path (f32 MXU operands + f32 nonlinearities): tight tolerance.
    out_exact = jax.block_until_ready(
        agent_feature_encoder(x, w_ih, w_hh, b_ih, b_hh,
                              mxu_bf16=False, nonlin_bf16=False))
    assert out_exact.shape == (B, N, H)
    err = float(jnp.max(jnp.abs(out_exact - ref)))
    assert err < 1e-4, f"exact-path max abs error {err}"

    # Fast path (defaults: bf16 MXU operands; bf16 nonlinearities on v6e/v7x):
    # loose sanity tolerance for the reduced-precision configuration.
    out_fast = jax.block_until_ready(
        agent_feature_encoder(x, w_ih, w_hh, b_ih, b_hh))
    err_fast = float(jnp.max(jnp.abs(out_fast - ref)))
    assert err_fast < 1e-1, f"fast-path max abs error {err_fast}"

    print("KERNEL_OK")
</pallas_src>

<mosaic_0001>
module attributes {stable_mosaic.version = 11 : i64} {
  func.func @kernel(%arg0: i32, %arg1: memref<2x8x128xf32, #tpu.memory_space<vmem>>, %arg2: memref<256x2xf32, #tpu.memory_space<vmem>>, %arg3: memref<256x64xf32, #tpu.memory_space<vmem>>, %arg4: memref<256x1xf32, #tpu.memory_space<vmem>>, %arg5: memref<64x128xf32, #tpu.memory_space<vmem>>) attributes {dimension_semantics = [#tpu.dimension_semantics<parallel>], iteration_bounds = array<i64: 2>, scalar_prefetch = 0 : i64, scratch_operands = 0 : i64, tpu.core_type = #tpu.core_type<tc>, window_params = [{transform_indices = @transform_0, window_bounds = array<i64: 2, 8, 128>}, {pipeline_mode = #tpu.pipeline_mode<synchronous>, transform_indices = @transform_1, window_bounds = array<i64: 256, 2>}, {pipeline_mode = #tpu.pipeline_mode<synchronous>, transform_indices = @transform_2, window_bounds = array<i64: 256, 64>}, {pipeline_mode = #tpu.pipeline_mode<synchronous>, transform_indices = @transform_3, window_bounds = array<i64: 256, 1>}, {transform_indices = @transform_4, window_bounds = array<i64: 64, 128>}]} {
    %c0 = arith.constant 0 : index
    %c0_0 = arith.constant 0 : index
    %0 = vector.load %arg3[%c0, %c0_0] : memref<256x64xf32, #tpu.memory_space<vmem>>, vector<256x64xf32>
    %c0_1 = arith.constant 0 : index
    %c0_2 = arith.constant 0 : index
    %1 = vector.load %arg4[%c0_1, %c0_2] : memref<256x1xf32, #tpu.memory_space<vmem>>, vector<256x1xf32>
    %c0_3 = arith.constant 0 : index
    %c0_4 = arith.constant 0 : index
    %2 = vector.load %arg2[%c0_3, %c0_4] : memref<256x2xf32, #tpu.memory_space<vmem>>, vector<256x2xf32>
    %3 = vector.extract_strided_slice %2 {offsets = [0, 0], sizes = [256, 1], strides = [1, 1]} : vector<256x2xf32> to vector<256x1xf32>
    %4 = vector.extract_strided_slice %2 {offsets = [0, 1], sizes = [256, 1], strides = [1, 1]} : vector<256x2xf32> to vector<256x1xf32>
    %cst = arith.constant 0.000000e+00 : f32
    %5 = vector.broadcast %cst : f32 to vector<64x128xf32>
    %cst_5 = arith.constant 0.000000e+00 : f32
    %6 = vector.broadcast %cst_5 : f32 to vector<64x128xf32>
    %c0_i32 = arith.constant 0 : i32
    %c0_6 = arith.constant 0 : index
    %7 = arith.index_cast %c0_i32 : i32 to index
    %c0_7 = arith.constant 0 : index
    %8 = vector.load %arg1[%c0_6, %7, %c0_7] : memref<2x8x128xf32, #tpu.memory_space<vmem>>, vector<1x1x128xf32>
    %9 = vector.shape_cast %8 : vector<1x1x128xf32> to vector<1x128xf32>
    %10 = vector.broadcast %9 : vector<1x128xf32> to vector<256x128xf32>
    %11 = vector.broadcast %3 : vector<256x1xf32> to vector<256x128xf32>
    %12 = arith.mulf %10, %11 : vector<256x128xf32>
    %13 = vector.broadcast %1 : vector<256x1xf32> to vector<256x128xf32>
    %14 = arith.addf %13, %12 : vector<256x128xf32>
    %c1 = arith.constant 1 : index
    %15 = arith.index_cast %c0_i32 : i32 to index
    %c0_8 = arith.constant 0 : index
    %16 = vector.load %arg1[%c1, %15, %c0_8] : memref<2x8x128xf32, #tpu.memory_space<vmem>>, vector<1x1x128xf32>
    %17 = vector.shape_cast %16 : vector<1x1x128xf32> to vector<1x128xf32>
    %18 = vector.broadcast %17 : vector<1x128xf32> to vector<256x128xf32>
    %19 = vector.broadcast %4 : vector<256x1xf32> to vector<256x128xf32>
    %20 = arith.mulf %18, %19 : vector<256x128xf32>
    %21 = arith.addf %14, %20 : vector<256x128xf32>
    %cst_9 = arith.constant dense<0.000000e+00> : vector<256x128xf32>
    %22 = tpu.matmul %0, %5, %cst_9 {dimension_numbers = #tpu.dot_dimension_numbers<[1], [0], [0], [1], [0, 0, 1, 1], [], []>} : vector<256x64xf32>, vector<64x128xf32>, vector<256x128xf32> -> vector<256x128xf32>
    %23 = arith.addf %21, %22 : vector<256x128xf32>
    %24 = vector.extract_strided_slice %23 {offsets = [0, 0], sizes = [192, 128], strides = [1, 1]} : vector<256x128xf32> to vector<192x128xf32>
    %cst_10 = arith.constant 5.000000e-01 : f32
    %25 = vector.broadcast %cst_10 : f32 to vector<192x128xf32>
    %26 = arith.mulf %25, %24 : vector<192x128xf32>
    %27 = math.tanh %26 : vector<192x128xf32>
    %cst_11 = arith.constant 5.000000e-01 : f32
    %28 = vector.broadcast %cst_11 : f32 to vector<192x128xf32>
    %29 = arith.mulf %28, %27 : vector<192x128xf32>
    %cst_12 = arith.constant 5.000000e-01 : f32
    %30 = vector.broadcast %cst_12 : f32 to vector<192x128xf32>
    %31 = arith.addf %29, %30 : vector<192x128xf32>
    %32 = vector.extract_strided_slice %23 {offsets = [192, 0], sizes = [64, 128], strides = [1, 1]} : vector<256x128xf32> to vector<64x128xf32>
    %33 = math.tanh %32 : vector<64x128xf32>
    %34 = vector.extract_strided_slice %31 {offsets = [0, 0], sizes = [64, 128], strides = [1, 1]} : vector<192x128xf32> to vector<64x128xf32>
    %35 = vector.extract_strided_slice %31 {offsets = [64, 0], sizes = [64, 128], strides = [1, 1]} : vector<192x128xf32> to vector<64x128xf32>
    %36 = vector.extract_strided_slice %31 {offsets = [128, 0], sizes = [64, 128], strides = [1, 1]} : vector<192x128xf32> to vector<64x128xf32>
    %37 = arith.mulf %35, %6 : vector<64x128xf32>
    %38 = arith.mulf %34, %33 : vector<64x128xf32>
    %39 = arith.addf %37, %38 : vector<64x128xf32>
    %40 = math.tanh %39 : vector<64x128xf32>
    %41 = arith.mulf %36, %40 : vector<64x128xf32>
    %c1_i32 = arith.constant 1 : i32
    %c0_13 = arith.constant 0 : index
    %42 = arith.index_cast %c1_i32 : i32 to index
    %c0_14 = arith.constant 0 : index
    %43 = vector.load %arg1[%c0_13, %42, %c0_14] : memref<2x8x128xf32, #tpu.memory_space<vmem>>, vector<1x1x128xf32>
    %44 = vector.shape_cast %43 : vector<1x1x128xf32> to vector<1x128xf32>
    %45 = vector.broadcast %44 : vector<1x128xf32> to vector<256x128xf32>
    %46 = vector.broadcast %3 : vector<256x1xf32> to vector<256x128xf32>
    %47 = arith.mulf %45, %46 : vector<256x128xf32>
    %48 = vector.broadcast %1 : vector<256x1xf32> to vector<256x128xf32>
    %49 = arith.addf %48, %47 : vector<256x128xf32>
    %c1_15 = arith.constant 1 : index
    %50 = arith.index_cast %c1_i32 : i32 to index
    %c0_16 = arith.constant 0 : index
    %51 = vector.load %arg1[%c1_15, %50, %c0_16] : memref<2x8x128xf32, #tpu.memory_space<vmem>>, vector<1x1x128xf32>
    %52 = vector.shape_cast %51 : vector<1x1x128xf32> to vector<1x128xf32>
    %53 = vector.broadcast %52 : vector<1x128xf32> to vector<256x128xf32>
    %54 = vector.broadcast %4 : vector<256x1xf32> to vector<256x128xf32>
    %55 = arith.mulf %53, %54 : vector<256x128xf32>
    %56 = arith.addf %49, %55 : vector<256x128xf32>
    %cst_17 = arith.constant dense<0.000000e+00> : vector<256x128xf32>
    %57 = tpu.matmul %0, %41, %cst_17 {dimension_numbers = #tpu.dot_dimension_numbers<[1], [0], [0], [1], [0, 0, 1, 1], [], []>} : vector<256x64xf32>, vector<64x128xf32>, vector<256x128xf32> -> vector<256x128xf32>
    %58 = arith.addf %56, %57 : vector<256x128xf32>
    %59 = vector.extract_strided_slice %58 {offsets = [0, 0], sizes = [192, 128], strides = [1, 1]} : vector<256x128xf32> to vector<192x128xf32>
    %cst_18 = arith.constant 5.000000e-01 : f32
    %60 = vector.broadcast %cst_18 : f32 to vector<192x128xf32>
    %61 = arith.mulf %60, %59 : vector<192x128xf32>
    %62 = math.tanh %61 : vector<192x128xf32>
    %cst_19 = arith.constant 5.000000e-01 : f32
    %63 = vector.broadcast %cst_19 : f32 to vector<192x128xf32>
    %64 = arith.mulf %63, %62 : vector<192x128xf32>
    %cst_20 = arith.constant 5.000000e-01 : f32
    %65 = vector.broadcast %cst_20 : f32 to vector<192x128xf32>
    %66 = arith.addf %64, %65 : vector<192x128xf32>
    %67 = vector.extract_strided_slice %58 {offsets = [192, 0], sizes = [64, 128], strides = [1, 1]} : vector<256x128xf32> to vector<64x128xf32>
    %68 = math.tanh %67 : vector<64x128xf32>
    %69 = vector.extract_strided_slice %66 {offsets = [0, 0], sizes = [64, 128], strides = [1, 1]} : vector<192x128xf32> to vector<64x128xf32>
    %70 = vector.extract_strided_slice %66 {offsets = [64, 0], sizes = [64, 128], strides = [1, 1]} : vector<192x128xf32> to vector<64x128xf32>
    %71 = vector.extract_strided_slice %66 {offsets = [128, 0], sizes = [64, 128], strides = [1, 1]} : vector<192x128xf32> to vector<64x128xf32>
    %72 = arith.mulf %70, %39 : vector<64x128xf32>
    %73 = arith.mulf %69, %68 : vector<64x128xf32>
    %74 = arith.addf %72, %73 : vector<64x128xf32>
    %75 = math.tanh %74 : vector<64x128xf32>
    %76 = arith.mulf %71, %75 : vector<64x128xf32>
    %c2_i32 = arith.constant 2 : i32
    %c0_21 = arith.constant 0 : index
    %77 = arith.index_cast %c2_i32 : i32 to index
    %c0_22 = arith.constant 0 : index
    %78 = vector.load %arg1[%c0_21, %77, %c0_22] : memref<2x8x128xf32, #tpu.memory_space<vmem>>, vector<1x1x128xf32>
    %79 = vector.shape_cast %78 : vector<1x1x128xf32> to vector<1x128xf32>
    %80 = vector.broadcast %79 : vector<1x128xf32> to vector<256x128xf32>
    %81 = vector.broadcast %3 : vector<256x1xf32> to vector<256x128xf32>
    %82 = arith.mulf %80, %81 : vector<256x128xf32>
    %83 = vector.broadcast %1 : vector<256x1xf32> to vector<256x128xf32>
    %84 = arith.addf %83, %82 : vector<256x128xf32>
    %c1_23 = arith.constant 1 : index
    %85 = arith.index_cast %c2_i32 : i32 to index
    %c0_24 = arith.constant 0 : index
    %86 = vector.load %arg1[%c1_23, %85, %c0_24] : memref<2x8x128xf32, #tpu.memory_space<vmem>>, vector<1x1x128xf32>
    %87 = vector.shape_cast %86 : vector<1x1x128xf32> to vector<1x128xf32>
    %88 = vector.broadcast %87 : vector<1x128xf32> to vector<256x128xf32>
    %89 = vector.broadcast %4 : vector<256x1xf32> to vector<256x128xf32>
    %90 = arith.mulf %88, %89 : vector<256x128xf32>
    %91 = arith.addf %84, %90 : vector<256x128xf32>
    %cst_25 = arith.constant dense<0.000000e+00> : vector<256x128xf32>
    %92 = tpu.matmul %0, %76, %cst_25 {dimension_numbers = #tpu.dot_dimension_numbers<[1], [0], [0], [1], [0, 0, 1, 1], [], []>} : vector<256x64xf32>, vector<64x128xf32>, vector<256x128xf32> -> vector<256x128xf32>
    %93 = arith.addf %91, %92 : vector<256x128xf32>
    %94 = vector.extract_strided_slice %93 {offsets = [0, 0], sizes = [192, 128], strides = [1, 1]} : vector<256x128xf32> to vector<192x128xf32>
    %cst_26 = arith.constant 5.000000e-01 : f32
    %95 = vector.broadcast %cst_26 : f32 to vector<192x128xf32>
    %96 = arith.mulf %95, %94 : vector<192x128xf32>
    %97 = math.tanh %96 : vector<192x128xf32>
    %cst_27 = arith.constant 5.000000e-01 : f32
    %98 = vector.broadcast %cst_27 : f32 to vector<192x128xf32>
    %99 = arith.mulf %98, %97 : vector<192x128xf32>
    %cst_28 = arith.constant 5.000000e-01 : f32
    %100 = vector.broadcast %cst_28 : f32 to vector<192x128xf32>
    %101 = arith.addf %99, %100 : vector<192x128xf32>
    %102 = vector.extract_strided_slice %93 {offsets = [192, 0], sizes = [64, 128], strides = [1, 1]} : vector<256x128xf32> to vector<64x128xf32>
    %103 = math.tanh %102 : vector<64x128xf32>
    %104 = vector.extract_strided_slice %101 {offsets = [0, 0], sizes = [64, 128], strides = [1, 1]} : vector<192x128xf32> to vector<64x128xf32>
    %105 = vector.extract_strided_slice %101 {offsets = [64, 0], sizes = [64, 128], strides = [1, 1]} : vector<192x128xf32> to vector<64x128xf32>
    %106 = vector.extract_strided_slice %101 {offsets = [128, 0], sizes = [64, 128], strides = [1, 1]} : vector<192x128xf32> to vector<64x128xf32>
    %107 = arith.mulf %105, %74 : vector<64x128xf32>
    %108 = arith.mulf %104, %103 : vector<64x128xf32>
    %109 = arith.addf %107, %108 : vector<64x128xf32>
    %110 = math.tanh %109 : vector<64x128xf32>
    %111 = arith.mulf %106, %110 : vector<64x128xf32>
    %c3_i32 = arith.constant 3 : i32
    %c0_29 = arith.constant 0 : index
    %112 = arith.index_cast %c3_i32 : i32 to index
    %c0_30 = arith.constant 0 : index
    %113 = vector.load %arg1[%c0_29, %112, %c0_30] : memref<2x8x128xf32, #tpu.memory_space<vmem>>, vector<1x1x128xf32>
    %114 = vector.shape_cast %113 : vector<1x1x128xf32> to vector<1x128xf32>
    %115 = vector.broadcast %114 : vector<1x128xf32> to vector<256x128xf32>
    %116 = vector.broadcast %3 : vector<256x1xf32> to vector<256x128xf32>
    %117 = arith.mulf %115, %116 : vector<256x128xf32>
    %118 = vector.broadcast %1 : vector<256x1xf32> to vector<256x128xf32>
    %119 = arith.addf %118, %117 : vector<256x128xf32>
    %c1_31 = arith.constant 1 : index
    %120 = arith.index_cast %c3_i32 : i32 to index
    %c0_32 = arith.constant 0 : index
    %121 = vector.load %arg1[%c1_31, %120, %c0_32] : memref<2x8x128xf32, #tpu.memory_space<vmem>>, vector<1x1x128xf32>
    %122 = vector.shape_cast %121 : vector<1x1x128xf32> to vector<1x128xf32>
    %123 = vector.broadcast %122 : vector<1x128xf32> to vector<256x128xf32>
    %124 = vector.broadcast %4 : vector<256x1xf32> to vector<256x128xf32>
    %125 = arith.mulf %123, %124 : vector<256x128xf32>
    %126 = arith.addf %119, %125 : vector<256x128xf32>
    %cst_33 = arith.constant dense<0.000000e+00> : vector<256x128xf32>
    %127 = tpu.matmul %0, %111, %cst_33 {dimension_numbers = #tpu.dot_dimension_numbers<[1], [0], [0], [1], [0, 0, 1, 1], [], []>} : vector<256x64xf32>, vector<64x128xf32>, vector<256x128xf32> -> vector<256x128xf32>
    %128 = arith.addf %126, %127 : vector<256x128xf32>
    %129 = vector.extract_strided_slice %128 {offsets = [0, 0], sizes = [192, 128], strides = [1, 1]} : vector<256x128xf32> to vector<192x128xf32>
    %cst_34 = arith.constant 5.000000e-01 : f32
    %130 = vector.broadcast %cst_34 : f32 to vector<192x128xf32>
    %131 = arith.mulf %130, %129 : vector<192x128xf32>
    %132 = math.tanh %131 : vector<192x128xf32>
    %cst_35 = arith.constant 5.000000e-01 : f32
    %133 = vector.broadcast %cst_35 : f32 to vector<192x128xf32>
    %134 = arith.mulf %133, %132 : vector<192x128xf32>
    %cst_36 = arith.constant 5.000000e-01 : f32
    %135 = vector.broadcast %cst_36 : f32 to vector<192x128xf32>
    %136 = arith.addf %134, %135 : vector<192x128xf32>
    %137 = vector.extract_strided_slice %128 {offsets = [192, 0], sizes = [64, 128], strides = [1, 1]} : vector<256x128xf32> to vector<64x128xf32>
    %138 = math.tanh %137 : vector<64x128xf32>
    %139 = vector.extract_strided_slice %136 {offsets = [0, 0], sizes = [64, 128], strides = [1, 1]} : vector<192x128xf32> to vector<64x128xf32>
    %140 = vector.extract_strided_slice %136 {offsets = [64, 0], sizes = [64, 128], strides = [1, 1]} : vector<192x128xf32> to vector<64x128xf32>
    %141 = vector.extract_strided_slice %136 {offsets = [128, 0], sizes = [64, 128], strides = [1, 1]} : vector<192x128xf32> to vector<64x128xf32>
    %142 = arith.mulf %140, %109 : vector<64x128xf32>
    %143 = arith.mulf %139, %138 : vector<64x128xf32>
    %144 = arith.addf %142, %143 : vector<64x128xf32>
    %145 = math.tanh %144 : vector<64x128xf32>
    %146 = arith.mulf %141, %145 : vector<64x128xf32>
    %c4_i32 = arith.constant 4 : i32
    %c0_37 = arith.constant 0 : index
    %147 = arith.index_cast %c4_i32 : i32 to index
    %c0_38 = arith.constant 0 : index
    %148 = vector.load %arg1[%c0_37, %147, %c0_38] : memref<2x8x128xf32, #tpu.memory_space<vmem>>, vector<1x1x128xf32>
    %149 = vector.shape_cast %148 : vector<1x1x128xf32> to vector<1x128xf32>
    %150 = vector.broadcast %149 : vector<1x128xf32> to vector<256x128xf32>
    %151 = vector.broadcast %3 : vector<256x1xf32> to vector<256x128xf32>
    %152 = arith.mulf %150, %151 : vector<256x128xf32>
    %153 = vector.broadcast %1 : vector<256x1xf32> to vector<256x128xf32>
    %154 = arith.addf %153, %152 : vector<256x128xf32>
    %c1_39 = arith.constant 1 : index
    %155 = arith.index_cast %c4_i32 : i32 to index
    %c0_40 = arith.constant 0 : index
    %156 = vector.load %arg1[%c1_39, %155, %c0_40] : memref<2x8x128xf32, #tpu.memory_space<vmem>>, vector<1x1x128xf32>
    %157 = vector.shape_cast %156 : vector<1x1x128xf32> to vector<1x128xf32>
    %158 = vector.broadcast %157 : vector<1x128xf32> to vector<256x128xf32>
    %159 = vector.broadcast %4 : vector<256x1xf32> to vector<256x128xf32>
    %160 = arith.mulf %158, %159 : vector<256x128xf32>
    %161 = arith.addf %154, %160 : vector<256x128xf32>
    %cst_41 = arith.constant dense<0.000000e+00> : vector<256x128xf32>
    %162 = tpu.matmul %0, %146, %cst_41 {dimension_numbers = #tpu.dot_dimension_numbers<[1], [0], [0], [1], [0, 0, 1, 1], [], []>} : vector<256x64xf32>, vector<64x128xf32>, vector<256x128xf32> -> vector<256x128xf32>
    %163 = arith.addf %161, %162 : vector<256x128xf32>
    %164 = vector.extract_strided_slice %163 {offsets = [0, 0], sizes = [192, 128], strides = [1, 1]} : vector<256x128xf32> to vector<192x128xf32>
    %cst_42 = arith.constant 5.000000e-01 : f32
    %165 = vector.broadcast %cst_42 : f32 to vector<192x128xf32>
    %166 = arith.mulf %165, %164 : vector<192x128xf32>
    %167 = math.tanh %166 : vector<192x128xf32>
    %cst_43 = arith.constant 5.000000e-01 : f32
    %168 = vector.broadcast %cst_43 : f32 to vector<192x128xf32>
    %169 = arith.mulf %168, %167 : vector<192x128xf32>
    %cst_44 = arith.constant 5.000000e-01 : f32
    %170 = vector.broadcast %cst_44 : f32 to vector<192x128xf32>
    %171 = arith.addf %169, %170 : vector<192x128xf32>
    %172 = vector.extract_strided_slice %163 {offsets = [192, 0], sizes = [64, 128], strides = [1, 1]} : vector<256x128xf32> to vector<64x128xf32>
    %173 = math.tanh %172 : vector<64x128xf32>
    %174 = vector.extract_strided_slice %171 {offsets = [0, 0], sizes = [64, 128], strides = [1, 1]} : vector<192x128xf32> to vector<64x128xf32>
    %175 = vector.extract_strided_slice %171 {offsets = [64, 0], sizes = [64, 128], strides = [1, 1]} : vector<192x128xf32> to vector<64x128xf32>
    %176 = vector.extract_strided_slice %171 {offsets = [128, 0], sizes = [64, 128], strides = [1, 1]} : vector<192x128xf32> to vector<64x128xf32>
    %177 = arith.mulf %175, %144 : vector<64x128xf32>
    %178 = arith.mulf %174, %173 : vector<64x128xf32>
    %179 = arith.addf %177, %178 : vector<64x128xf32>
    %180 = math.tanh %179 : vector<64x128xf32>
    %181 = arith.mulf %176, %180 : vector<64x128xf32>
    %c5_i32 = arith.constant 5 : i32
    %c0_45 = arith.constant 0 : index
    %182 = arith.index_cast %c5_i32 : i32 to index
    %c0_46 = arith.constant 0 : index
    %183 = vector.load %arg1[%c0_45, %182, %c0_46] : memref<2x8x128xf32, #tpu.memory_space<vmem>>, vector<1x1x128xf32>
    %184 = vector.shape_cast %183 : vector<1x1x128xf32> to vector<1x128xf32>
    %185 = vector.broadcast %184 : vector<1x128xf32> to vector<256x128xf32>
    %186 = vector.broadcast %3 : vector<256x1xf32> to vector<256x128xf32>
    %187 = arith.mulf %185, %186 : vector<256x128xf32>
    %188 = vector.broadcast %1 : vector<256x1xf32> to vector<256x128xf32>
    %189 = arith.addf %188, %187 : vector<256x128xf32>
    %c1_47 = arith.constant 1 : index
    %190 = arith.index_cast %c5_i32 : i32 to index
    %c0_48 = arith.constant 0 : index
    %191 = vector.load %arg1[%c1_47, %190, %c0_48] : memref<2x8x128xf32, #tpu.memory_space<vmem>>, vector<1x1x128xf32>
    %192 = vector.shape_cast %191 : vector<1x1x128xf32> to vector<1x128xf32>
    %193 = vector.broadcast %192 : vector<1x128xf32> to vector<256x128xf32>
    %194 = vector.broadcast %4 : vector<256x1xf32> to vector<256x128xf32>
    %195 = arith.mulf %193, %194 : vector<256x128xf32>
    %196 = arith.addf %189, %195 : vector<256x128xf32>
    %cst_49 = arith.constant dense<0.000000e+00> : vector<256x128xf32>
    %197 = tpu.matmul %0, %181, %cst_49 {dimension_numbers = #tpu.dot_dimension_numbers<[1], [0], [0], [1], [0, 0, 1, 1], [], []>} : vector<256x64xf32>, vector<64x128xf32>, vector<256x128xf32> -> vector<256x128xf32>
    %198 = arith.addf %196, %197 : vector<256x128xf32>
    %199 = vector.extract_strided_slice %198 {offsets = [0, 0], sizes = [192, 128], strides = [1, 1]} : vector<256x128xf32> to vector<192x128xf32>
    %cst_50 = arith.constant 5.000000e-01 : f32
    %200 = vector.broadcast %cst_50 : f32 to vector<192x128xf32>
    %201 = arith.mulf %200, %199 : vector<192x128xf32>
    %202 = math.tanh %201 : vector<192x128xf32>
    %cst_51 = arith.constant 5.000000e-01 : f32
    %203 = vector.broadcast %cst_51 : f32 to vector<192x128xf32>
    %204 = arith.mulf %203, %202 : vector<192x128xf32>
    %cst_52 = arith.constant 5.000000e-01 : f32
    %205 = vector.broadcast %cst_52 : f32 to vector<192x128xf32>
    %206 = arith.addf %204, %205 : vector<192x128xf32>
    %207 = vector.extract_strided_slice %198 {offsets = [192, 0], sizes = [64, 128], strides = [1, 1]} : vector<256x128xf32> to vector<64x128xf32>
    %208 = math.tanh %207 : vector<64x128xf32>
    %209 = vector.extract_strided_slice %206 {offsets = [0, 0], sizes = [64, 128], strides = [1, 1]} : vector<192x128xf32> to vector<64x128xf32>
    %210 = vector.extract_strided_slice %206 {offsets = [64, 0], sizes = [64, 128], strides = [1, 1]} : vector<192x128xf32> to vector<64x128xf32>
    %211 = vector.extract_strided_slice %206 {offsets = [128, 0], sizes = [64, 128], strides = [1, 1]} : vector<192x128xf32> to vector<64x128xf32>
    %212 = arith.mulf %210, %179 : vector<64x128xf32>
    %213 = arith.mulf %209, %208 : vector<64x128xf32>
    %214 = arith.addf %212, %213 : vector<64x128xf32>
    %215 = math.tanh %214 : vector<64x128xf32>
    %216 = arith.mulf %211, %215 : vector<64x128xf32>
    %c6_i32 = arith.constant 6 : i32
    %c0_53 = arith.constant 0 : index
    %217 = arith.index_cast %c6_i32 : i32 to index
    %c0_54 = arith.constant 0 : index
    %218 = vector.load %arg1[%c0_53, %217, %c0_54] : memref<2x8x128xf32, #tpu.memory_space<vmem>>, vector<1x1x128xf32>
    %219 = vector.shape_cast %218 : vector<1x1x128xf32> to vector<1x128xf32>
    %220 = vector.broadcast %219 : vector<1x128xf32> to vector<256x128xf32>
    %221 = vector.broadcast %3 : vector<256x1xf32> to vector<256x128xf32>
    %222 = arith.mulf %220, %221 : vector<256x128xf32>
    %223 = vector.broadcast %1 : vector<256x1xf32> to vector<256x128xf32>
    %224 = arith.addf %223, %222 : vector<256x128xf32>
    %c1_55 = arith.constant 1 : index
    %225 = arith.index_cast %c6_i32 : i32 to index
    %c0_56 = arith.constant 0 : index
    %226 = vector.load %arg1[%c1_55, %225, %c0_56] : memref<2x8x128xf32, #tpu.memory_space<vmem>>, vector<1x1x128xf32>
    %227 = vector.shape_cast %226 : vector<1x1x128xf32> to vector<1x128xf32>
    %228 = vector.broadcast %227 : vector<1x128xf32> to vector<256x128xf32>
    %229 = vector.broadcast %4 : vector<256x1xf32> to vector<256x128xf32>
    %230 = arith.mulf %228, %229 : vector<256x128xf32>
    %231 = arith.addf %224, %230 : vector<256x128xf32>
    %cst_57 = arith.constant dense<0.000000e+00> : vector<256x128xf32>
    %232 = tpu.matmul %0, %216, %cst_57 {dimension_numbers = #tpu.dot_dimension_numbers<[1], [0], [0], [1], [0, 0, 1, 1], [], []>} : vector<256x64xf32>, vector<64x128xf32>, vector<256x128xf32> -> vector<256x128xf32>
    %233 = arith.addf %231, %232 : vector<256x128xf32>
    %234 = vector.extract_strided_slice %233 {offsets = [0, 0], sizes = [192, 128], strides = [1, 1]} : vector<256x128xf32> to vector<192x128xf32>
    %cst_58 = arith.constant 5.000000e-01 : f32
    %235 = vector.broadcast %cst_58 : f32 to vector<192x128xf32>
    %236 = arith.mulf %235, %234 : vector<192x128xf32>
    %237 = math.tanh %236 : vector<192x128xf32>
    %cst_59 = arith.constant 5.000000e-01 : f32
    %238 = vector.broadcast %cst_59 : f32 to vector<192x128xf32>
    %239 = arith.mulf %238, %237 : vector<192x128xf32>
    %cst_60 = arith.constant 5.000000e-01 : f32
    %240 = vector.broadcast %cst_60 : f32 to vector<192x128xf32>
    %241 = arith.addf %239, %240 : vector<192x128xf32>
    %242 = vector.extract_strided_slice %233 {offsets = [192, 0], sizes = [64, 128], strides = [1, 1]} : vector<256x128xf32> to vector<64x128xf32>
    %243 = math.tanh %242 : vector<64x128xf32>
    %244 = vector.extract_strided_slice %241 {offsets = [0, 0], sizes = [64, 128], strides = [1, 1]} : vector<192x128xf32> to vector<64x128xf32>
    %245 = vector.extract_strided_slice %241 {offsets = [64, 0], sizes = [64, 128], strides = [1, 1]} : vector<192x128xf32> to vector<64x128xf32>
    %246 = vector.extract_strided_slice %241 {offsets = [128, 0], sizes = [64, 128], strides = [1, 1]} : vector<192x128xf32> to vector<64x128xf32>
    %247 = arith.mulf %245, %214 : vector<64x128xf32>
    %248 = arith.mulf %244, %243 : vector<64x128xf32>
    %249 = arith.addf %247, %248 : vector<64x128xf32>
    %250 = math.tanh %249 : vector<64x128xf32>
    %251 = arith.mulf %246, %250 : vector<64x128xf32>
    %c7_i32 = arith.constant 7 : i32
    %c0_61 = arith.constant 0 : index
    %252 = arith.index_cast %c7_i32 : i32 to index
    %c0_62 = arith.constant 0 : index
    %253 = vector.load %arg1[%c0_61, %252, %c0_62] : memref<2x8x128xf32, #tpu.memory_space<vmem>>, vector<1x1x128xf32>
    %254 = vector.shape_cast %253 : vector<1x1x128xf32> to vector<1x128xf32>
    %255 = vector.broadcast %254 : vector<1x128xf32> to vector<256x128xf32>
    %256 = vector.broadcast %3 : vector<256x1xf32> to vector<256x128xf32>
    %257 = arith.mulf %255, %256 : vector<256x128xf32>
    %258 = vector.broadcast %1 : vector<256x1xf32> to vector<256x128xf32>
    %259 = arith.addf %258, %257 : vector<256x128xf32>
    %c1_63 = arith.constant 1 : index
    %260 = arith.index_cast %c7_i32 : i32 to index
    %c0_64 = arith.constant 0 : index
    %261 = vector.load %arg1[%c1_63, %260, %c0_64] : memref<2x8x128xf32, #tpu.memory_space<vmem>>, vector<1x1x128xf32>
    %262 = vector.shape_cast %261 : vector<1x1x128xf32> to vector<1x128xf32>
    %263 = vector.broadcast %262 : vector<1x128xf32> to vector<256x128xf32>
    %264 = vector.broadcast %4 : vector<256x1xf32> to vector<256x128xf32>
    %265 = arith.mulf %263, %264 : vector<256x128xf32>
    %266 = arith.addf %259, %265 : vector<256x128xf32>
    %cst_65 = arith.constant dense<0.000000e+00> : vector<256x128xf32>
    %267 = tpu.matmul %0, %251, %cst_65 {dimension_numbers = #tpu.dot_dimension_numbers<[1], [0], [0], [1], [0, 0, 1, 1], [], []>} : vector<256x64xf32>, vector<64x128xf32>, vector<256x128xf32> -> vector<256x128xf32>
    %268 = arith.addf %266, %267 : vector<256x128xf32>
    %269 = vector.extract_strided_slice %268 {offsets = [0, 0], sizes = [192, 128], strides = [1, 1]} : vector<256x128xf32> to vector<192x128xf32>
    %cst_66 = arith.constant 5.000000e-01 : f32
    %270 = vector.broadcast %cst_66 : f32 to vector<192x128xf32>
    %271 = arith.mulf %270, %269 : vector<192x128xf32>
    %272 = math.tanh %271 : vector<192x128xf32>
    %cst_67 = arith.constant 5.000000e-01 : f32
    %273 = vector.broadcast %cst_67 : f32 to vector<192x128xf32>
    %274 = arith.mulf %273, %272 : vector<192x128xf32>
    %cst_68 = arith.constant 5.000000e-01 : f32
    %275 = vector.broadcast %cst_68 : f32 to vector<192x128xf32>
    %276 = arith.addf %274, %275 : vector<192x128xf32>
    %277 = vector.extract_strided_slice %268 {offsets = [192, 0], sizes = [64, 128], strides = [1, 1]} : vector<256x128xf32> to vector<64x128xf32>
    %278 = math.tanh %277 : vector<64x128xf32>
    %279 = vector.extract_strided_slice %276 {offsets = [0, 0], sizes = [64, 128], strides = [1, 1]} : vector<192x128xf32> to vector<64x128xf32>
    %280 = vector.extract_strided_slice %276 {offsets = [64, 0], sizes = [64, 128], strides = [1, 1]} : vector<192x128xf32> to vector<64x128xf32>
    %281 = vector.extract_strided_slice %276 {offsets = [128, 0], sizes = [64, 128], strides = [1, 1]} : vector<192x128xf32> to vector<64x128xf32>
    %282 = arith.mulf %280, %249 : vector<64x128xf32>
    %283 = arith.mulf %279, %278 : vector<64x128xf32>
    %284 = arith.addf %282, %283 : vector<64x128xf32>
    %285 = math.tanh %284 : vector<64x128xf32>
    %286 = arith.mulf %281, %285 : vector<64x128xf32>
    %c8_i32 = arith.constant 8 : i32
    %c0_69 = arith.constant 0 : index
    %c0_70 = arith.constant 0 : index
    %287 = vector.load %arg5[%c0_69, %c0_70] : memref<64x128xf32, #tpu.memory_space<vmem>>, vector<64x128xf32>
    tpu.vector_store %arg5[%c0_69, %c0_70], %286 {strides = array<i32>} : memref<64x128xf32, #tpu.memory_space<vmem>>, vector<64x128xf32>,
    return
  }
  func.func @transform_0(%arg0: i32) -> (i32, i32, i32) {
    %c0_i32 = arith.constant 0 : i32
    %c0_i32_0 = arith.constant 0 : i32
    %c0_i32_1 = arith.constant 0 : i32
    return %c0_i32, %c0_i32_0, %arg0 : i32, i32, i32
  }
  func.func @transform_1(%arg0: i32) -> (i32, i32) {
    %c0_i32 = arith.constant 0 : i32
    %c0_i32_0 = arith.constant 0 : i32
    %c0_i32_1 = arith.constant 0 : i32
    return %c0_i32, %c0_i32_0 : i32, i32
  }
  func.func @transform_2(%arg0: i32) -> (i32, i32) {
    %c0_i32 = arith.constant 0 : i32
    %c0_i32_0 = arith.constant 0 : i32
    %c0_i32_1 = arith.constant 0 : i32
    return %c0_i32, %c0_i32_0 : i32, i32
  }
  func.func @transform_3(%arg0: i32) -> (i32, i32) {
    %c0_i32 = arith.constant 0 : i32
    %c0_i32_0 = arith.constant 0 : i32
    %c0_i32_1 = arith.constant 0 : i32
    return %c0_i32, %c0_i32_0 : i32, i32
  }
  func.func @transform_4(%arg0: i32) -> (i32, i32) {
    %c0_i32 = arith.constant 0 : i32
    %c0_i32_0 = arith.constant 0 : i32
    return %c0_i32, %arg0 : i32, i32
  }
}

</mosaic_0001>

<bundles_post_ra>
// kernel: tpu_custom_call.1
= control target key start
LH: loop header
LB: loop body
LE: loop exit
PB: predicated region body
PF: predicated region fallthrough
CT: control target
= control target key end

     0   :  { %9 = vsyncpa [#allocation4], 0  ;;  %s9956_s0 = inlined_call_operand.vmem [shape: f32[2,8,256], index: 0, kind: input, shape index: {}]   ;;  %s9957_s1 = inlined_call_operand.vmem [shape: f32[256,2], index: 1, kind: input, shape index: {}]   ;;  %s9958_s2 = inlined_call_operand.vmem [shape: f32[256,64], index: 2, kind: input, shape index: {}]   ;;  %s9959_s3 = inlined_call_operand.vmem [shape: f32[256,1], index: 3, kind: input, shape index: {}]   ;;  %s9960_s4 = inlined_call_operand.hbm [shape: f32[64,256], index: 4, kind: output, shape index: {}]  }
   0x1   :  { %11 = vsyncpa [#allocation4 + $0x1], 0  ;;  %s5568_s15 = smov 0   ;;  %s5570_s16 = smov 0  }
   0x2   :  { %s5572_s17 = smov 0   ;;  %s5574_s18 = smov 0  }
   0x3 LB: > { %s4335_s19 = sadd.s32 4294967295, %s5535_s18   ;;  %s4336_s20 = sadd.s32 4294967294, %s5535_s18   ;;  %s5535_s18 = sphi %s5574_s18, %s11524_s18   ;;  %s5531_s17 = sphi %s5572_s17, %s11523_s17   ;;  %s5527_s16 = sphi %s5570_s16, %s11522_s16   ;;  %s5523_s15 = sphi %s5568_s15, %s11521_s15  }
   0x4   : > { %s5591_s21 = sadd.s32 1, %s5535_s18   ;;  %s24_s22 = sadd.s32 1, %s5531_s17 }
   0x5   : > { %s21_s23 = ssub.s32 %s5535_s18, %s5591_s21  ;;  %p31_p0 = scmp.ne.s32.totalorder %s5531_s17, %s5527_s16 }
   0x6   : > { %p22_p1 = scmp.eq.s32.totalorder %s21_s23, 0  ;;  %p32_p2 = scmp.eq.s32.totalorder %s5535_s18, 0 }
   0x7   : > { %p124_p3 = scmp.eq.s32.totalorder %s4335_s19, 1  ;;  %p129_p4 = scmp.ne.s32.totalorder %s5527_s16, %s5523_s15 }
   0x8   : > { %s5604_s24 = scalar_select %p22_p1, %s5531_s17, %s24_s22  }
   0x9   : > { %p33_p5 = por %p32_p2, %p31_p0  ;;  %p5606_p6 = por %p124_p3, %p31_p0 }
   0xa   : > { %p130_p7 = scmp.eq.s32.totalorder %s4336_s20, 1  ;;  %p4338_p9 = scmp.ge.s32.totalorder %s5535_s18, 2 }
   0xc   : > { %p5610_p8 = por %p130_p7, %p129_p4  ;;  %155 = sbr.rel (%p4338_p9) target bundleno = 23 (0x17), region = 28 }
  0x11   : > { %158 = sbr.rel (!%p33_p5) target bundleno = 23 (0x17), region = 32  ;;  %s160_s27 = sand.u32 (%p33_p5), 1, %s5531_s17  }
  0x12   : > { %s4340_s28 = sshll.u32 (%p33_p5), %s5535_s18, 3  ;;  %s4339_s29 = sshll.u32 (%p33_p5), %s160_s27, 4 }
  0x13   : > { %s164_s6 = scalar_lea.vmem (%p33_p5), %s9956_s0, %s4340_s28  ;;  %s162_s7 = scalar_lea.vmem (%p33_p5), [#allocation2], %s4339_s29 }
  0x14   : > { %v195_v0 = vld [vmem:[%s164_s6] sm:$0xff] (%p33_p5)  ;;  %v197_v1 = vld [vmem:[%s164_s6 + $0x10] sm:$0xff] (%p33_p5) }
  0x15   : > { %196 = vst [vmem:[%s162_s7] sm:$0xff] (%p33_p5), %v195_v0 }
  0x16   : > { %198 = vst [vmem:[%s162_s7 + $0x8] sm:$0xff] %v197_v1 }
  0x17 PF: > { %p4341_p10 = scmp.ge.s32.totalorder %s5535_s18, 1  ;;  %p203_p11 = scmp.lt.s32.totalorder %s5535_s18, 3 }
  0x19   : > { %p204_p12 = pnand %p4341_p10, %p203_p11 }
  0x1b   : > { %207 = sbr.rel (%p204_p12) target bundleno = 3357 (0xd1d), region = 70 }
  0x20   : > { %v5627_v2 = vld [vmem:[%s9957_s1 + $0x38] sm:$0xff]  ;;  %v305_v3 = vld [vmem:[%s9957_s1 + $0x30] sm:$0xff]  ;;  %v5537_v4 = vmov 0.0   ;;  %v9963_v5 = vmov 1   ;;  %v235_v7 = vld [vmem:[%s9958_s2] sm:$0xff]  ;;  %vm912_vm0 = vcmask 523264  }
  0x21   : > { %1024 = vmatpush.msra.mxu0 %v5537_v4  ;;  %4659 = vset.pattern.permute.xlu0 %v9963_v5  ;;  %v274_v6 = vld [vmem:[%s9959_s3 + $0x38] sm:$0xff]  ;;  %s5640_s22 = sand.u32 1, %s5527_s16   ;;  %v9961_v8 = vmov 0   ;;  %v313_v9 = vld [vmem:[%s9957_s1 + $0x70] sm:$0xff]  ;;  %v304_v10 = vld [vmem:[%s9957_s1 + $0x28] sm:$0xff]  ;;  %s4609_s20 = sshll.u32 %s4335_s19, 3 }
  0x22   : > { %4658 = vset.pattern.permute.xlu2 %v9961_v8  ;;  %4657 = vset.pattern.permute.xlu1 %v9961_v8  ;;  %s4342_s23 = sshll.u32 %s5640_s22, 4  ;;  %v282_v11 = vld [vmem:[%s9959_s3 + $0x78] sm:$0xff]  ;;  %v236_v12 = vld [vmem:[%s9958_s2 + $0x8] sm:$0xff]  ;;  %v237_v14 = vld [vmem:[%s9958_s2 + $0x10] sm:$0xff]  ;;  %s4264_s29 = scalar_lea.hbm %s9960_s4, %s4609_s20 }
  0x23   : > { %749 = vperm.xlu0 %4659, %v5627_v2   ;;  %365 = vperm.xlu1 %4657, %v305_v3   ;;  %s5647_s27 = scalar_lea.vmem [#allocation2], %s4342_s23  ;;  %v330_v13 = vld [vmem:[%s9957_s1 + $0xf8] sm:$0xff]  ;;  %v5676_v16 = vld [vmem:[%s9957_s1 + $0xe8] sm:$0xff]  ;;  %v273_v17 = vld [vmem:[%s9959_s3 + $0x30] sm:$0xff]  ;;  %s4267_s5 = sshll.u32 %s4264_s29, 4  ;;  %s4268_s5 = int_to_ptr.hbm [resolvable:$true] %s4267_s5 }
  0x24   : > { %562 = vperm.xlu2 %4658, %v274_v6   ;;  %4345 = vmatmul.msk.f32.vlgmr.msra.gmra.mxu0 %vm912_vm0, %v235_v7  ;;  %v314_v15 = vld [vmem:[%s9957_s1 + $0x78] sm:$0xff]  ;;  %v312_v19 = vld [vmem:[%s9957_s1 + $0x68] sm:$0xff]  ;;  %v239_v21 = vld [vmem:[%s9958_s2 + $0x20] sm:$0xff]  ;;  %s4254_s19 = scalar_lea.sflag [#allocation4], %s5640_s22  ;;  %s5487_s6 = sshra.s32 %s4268_s5, 4  ;;  %s5488_s6 = int_to_ptr.hbm [resolvable:$true] %s5487_s6 }
  0x25   : > { %v238_v18 = vld [vmem:[%s9958_s2 + $0x18] sm:$0xff]  ;;  %v5693_v20 = vld [vmem:[%s9957_s1 + $0x8] sm:$0xff]  ;;  %v5705_v22 = vld [vmem:[%s9957_s1 + $0xb0] sm:$0xff]  ;;  %s5489_s7 = scalar_lea.hbm %s5488_s6, 64  ;;  %s5493_s10 = scalar_lea.hbm %s9960_s4, 128 }
  0x26   : > { %v240_v23 = vld [vmem:[%s9958_s2 + $0x28] sm:$0xff]  ;;  %v311_v24 = vld [vmem:[%s9957_s1 + $0x60] sm:$0xff]  ;;  %v241_v26 = vld [vmem:[%s9958_s2 + $0x30] sm:$0xff]  ;;  %p5490_p13 = scmp.ne.s32.totalorder %s5488_s6, %s5489_s7  ;;  %p5494_p2 = scmp.lt.s32.totalorder %s5488_s6, %s9960_s4 }
  0x27   : > { %v303_v25 = vld [vmem:[%s9957_s1 + $0x20] sm:$0xff]  ;;  %v280_v27 = vld [vmem:[%s9959_s3 + $0x68] sm:$0xff]  ;;  %v242_v29 = vld [vmem:[%s9958_s2 + $0x38] sm:$0xff]  ;;  %p5495_p3 = scmp.lt.s32.totalorder %s5493_s10, %s5489_s7 }
  0x28   : > { %v272_v28 = vld [vmem:[%s9959_s3 + $0x28] sm:$0xff]  ;;  %v302_v30 = vld [vmem:[%s9957_s1 + $0x18] sm:$0xff]  ;;  %v243_v31 = vld [vmem:[%s9958_s2 + $0x40] sm:$0xff]  ;;  %p5491_p0 = pnand %p5490_p13, %p5606_p6 }
  0x29   : > { %v281_v32 = vld [vmem:[%s9959_s3 + $0x70] sm:$0xff]  ;;  %v310_v34 = vld [vmem:[%s9957_s1 + $0x58] sm:$0xff]  ;;  %v244_v35 = vld [vmem:[%s9958_s2 + $0x48] sm:$0xff]  ;;  %p5496_p4 = por %p5495_p3, %p5494_p2 }
  0x2a   : > { %v329_v33 = vld [vmem:[%s9957_s1 + $0xf0] sm:$0xff]  ;;  %v298_v36 = vld [vmem:[%s9959_s3 + $0xf8] sm:$0xff]  ;;  %v279_v37 = vld [vmem:[%s9959_s3 + $0x60] sm:$0xff]  ;;  %p5492_p1 = pneg %p5491_p0 }
  0x2b   : > { %405 = vperm.xlu1 %4657, %v313_v9   ;;  %741 = vperm.xlu0 %4659, %v304_v10   ;;  %v245_v38 = vld [vmem:[%s9958_s2 + $0x50] sm:$0xff]  ;;  %v271_v39 = vld [vmem:[%s9959_s3 + $0x20] sm:$0xff]  ;;  %v246_v40 = vld [vmem:[%s9958_s2 + $0x58] sm:$0xff] }
  0x2c   : > { %602 = vperm.xlu2 %4658, %v282_v11   ;;  %4346 = vmatmul.msk.f32.gmra.mxu0 %vm912_vm0, %v236_v12  ;;  %v278_v41 = vld [vmem:[%s9959_s3 + $0x58] sm:$0xff]  ;;  %v5783_v42 = vld [vmem:[%s9957_s1 + $0x50] sm:$0xff]  ;;  %v247_v45 = vld [vmem:[%s9958_s2 + $0x60] sm:$0xff]  ;;  %p5497_p5 = pnand %p5496_p4, %p5492_p1 }
  0x2d   : > { %v5792_v44 = vld [vmem:[%s9957_s1 + $0x10] sm:$0xff]  ;;  %v5800_v46 = vld [vmem:[%s9957_s1 + $0xb8] sm:$0xff]  ;;  %v248_v49 = vld [vmem:[%s9958_s2 + $0x68] sm:$0xff] }
  0x2e   : > { %v270_v47 = vld [vmem:[%s9959_s3 + $0x18] sm:$0xff]  ;;  %v5817_v50 = vld [vmem:[%s9957_s1 + $0xe0] sm:$0xff]  ;;  %v297_v52 = vld [vmem:[%s9959_s3 + $0xf0] sm:$0xff] }
  0x2f   : > { %v249_v53 = vld [vmem:[%s9958_s2 + $0x70] sm:$0xff]  ;;  %v296_v54 = vld [vmem:[%s9959_s3 + $0xe8] sm:$0xff]  ;;  %v250_v57 = vld [vmem:[%s9958_s2 + $0x78] sm:$0xff] }
  0x30   : > { %v5845_v58 = vld [vmem:[%s9957_s1 + $0x40] sm:$0xff]  ;;  %v5857_v61 = vld [vmem:[%s9957_s1 + $0x48] sm:$0xff] }
  0x31   : > { %v251_v63 = vld [vmem:[%s9958_s2 + $0x80] sm:$0xff]  ;;  %v252_v6 = vld [vmem:[%s9958_s2 + $0x88] sm:$0xff] }
  0x32   : > { %v275_v0 = vld [vmem:[%s9959_s3 + $0x40] sm:$0xff] }
  0x33   : > { %4660 = vset.pattern.permute.xlu1 %v9963_v5  ;;  %845 = vperm.xlu0 %4659, %v330_v13   ;;  %v5887_v7 = vld [vmem:[%s9957_s1 + $0xa0] sm:$0xff] }
  0x34   : > { %360 = vperm.xlu2 %4658, %v304_v10   ;;  %4347 = vmatmul.msk.f32.gmra.mxu0 %vm912_vm0, %v237_v14  ;;  %v5907_v14 = vld [vmem:[%s9957_s1 + $0xc8] sm:$0xff] }
  0x35   : > { %781 = vperm.xlu1 %4660, %v314_v15  }
  0x3b   : > { %837 = vperm.xlu0 %4659, %v5676_v16  }
  0x3c   : > { %557 = vperm.xlu2 %4658, %v273_v17   ;;  %4348 = vmatmul.msk.f32.gmra.mxu0 %vm912_vm0, %v238_v18 }
  0x3d   : > { %4661 = vset.pattern.permute.xlu1 %v9961_v8 }
  0x3e   : > { %400 = vperm.xlu1 %4661, %v312_v19  }
  0x43   : > { %725 = vperm.xlu0 %4659, %v5693_v20  }
  0x44   : > { %4663 = vset.pattern.permute.xlu2 %v9963_v5  ;;  %4349 = vmatmul.msk.f32.gmra.mxu0 %vm912_vm0, %v239_v21  ;;  %v5931_v21 = vld [vmem:[%s9957_s1 + $0x98] sm:$0xff] }
  0x45   : > { %777 = vperm.xlu2 %4663, %v313_v9   ;;  %v269_v9 = vld [vmem:[%s9959_s3 + $0x10] sm:$0xff] }
  0x46   : > { %4662 = vset.pattern.permute.xlu1 %v9963_v5 }
  0x47   : > { %745 = vperm.xlu1 %4662, %v305_v3  }
  0x4b   : > { %809 = vperm.xlu0 %4659, %v5705_v22  }
  0x4c   : > { %4350 = vmatmul.msk.f32.gmra.mxu0 %vm912_vm0, %v240_v23 }
  0x4d   : > { %4665 = vset.pattern.permute.xlu2 %v9961_v8 }
  0x4e   : > { %395 = vperm.xlu2 %4665, %v311_v24  }
  0x4f   : > { %4664 = vset.pattern.permute.xlu1 %v9961_v8 }
  0x50   : > { %355 = vperm.xlu1 %4664, %v303_v25  }
  0x53   : > { %4686 = vset.pattern.permute.xlu0 %v9961_v8 }
  0x54   : > { %4351 = vmatmul.msk.f32.gmra.mxu0 %vm912_vm0, %v241_v26  ;;  %370 = vperm.xlu0 %4686, %v5627_v2   ;;  %v277_v2 = vld [vmem:[%s9959_s3 + $0x50] sm:$0xff]  ;;  %v5947_v26 = vld [vmem:[%s9957_s1] sm:$0xff] }
  0x56   : > { %592 = vperm.xlu2 %4665, %v280_v27   ;;  %v255_v27 = vld [vmem:[%s9958_s2 + $0xa0] sm:$0xff] }
  0x58   : > { %552 = vperm.xlu1 %4664, %v272_v28  }
  0x5c   : > { %4352 = vmatmul.msk.f32.gmra.mxu0 %vm912_vm0, %v242_v29  ;;  %410 = vperm.xlu0 %4686, %v314_v15   ;;  %v5957_v29 = vld [vmem:[%s9957_s1 + $0xc0] sm:$0xff] }
  0x5e   : > { %350 = vperm.xlu2 %4665, %v302_v30  }
  0x60   : > { %4666 = vset.pattern.permute.xlu1 %v9963_v5 }
  0x61   : > { %773 = vperm.xlu1 %4666, %v312_v19   ;;  %v290_v19 = vld [vmem:[%s9959_s3 + $0xb8] sm:$0xff] }
  0x64   : > { %4353 = vmatmul.msk.f32.gmra.mxu0 %vm912_vm0, %v243_v31  ;;  %597 = vperm.xlu0 %4686, %v281_v32   ;;  %v268_v32 = vld [vmem:[%s9959_s3 + $0x8] sm:$0xff] }
  0x66   : > { %485 = vperm.xlu2 %4665, %v329_v33  }
  0x69   : > { %4667 = vset.pattern.permute.xlu1 %v9961_v8 }
  0x6a   : > { %390 = vperm.xlu1 %4667, %v310_v34  }
  0x6c   : > { %4354 = vmatmul.msk.f32.gmra.mxu0 %vm912_vm0, %v244_v35  ;;  %490 = vperm.xlu0 %4686, %v330_v13   ;;  %v253_v13 = vld [vmem:[%s9958_s2 + $0x90] sm:$0xff] }
  0x6d   : > { %v5981_v35 = vld [vmem:[%s9957_s1 + $0x90] sm:$0xff] }
  0x6e   : > { %682 = vperm.xlu2 %4665, %v298_v36   ;;  %v5988_v36 = vld [vmem:[%s9957_s1 + $0xd8] sm:$0xff] }
  0x72   : > { %587 = vperm.xlu1 %4667, %v279_v37  }
  0x74   : > { %4355 = vmatmul.msk.f32.gmra.mxu0 %vm912_vm0, %v245_v38  ;;  %547 = vperm.xlu0 %4686, %v271_v39   ;;  %v295_v39 = vld [vmem:[%s9959_s3 + $0xe0] sm:$0xff] }
  0x76   : > { %4669 = vset.pattern.permute.xlu2 %v9963_v5 }
  0x77   : > { %769 = vperm.xlu2 %4669, %v311_v24  }
  0x7a   : > { %4668 = vset.pattern.permute.xlu1 %v9963_v5 }
  0x7b   : > { %737 = vperm.xlu1 %4668, %v303_v25  }
  0x7c   : > { %4356 = vmatmul.msk.f32.gmra.mxu0 %vm912_vm0, %v246_v40  ;;  %582 = vperm.xlu0 %4686, %v278_v41   ;;  %v257_v40 = vld [vmem:[%s9958_s2 + $0xb0] sm:$0xff] }
  0x7e   : > { %v5785_v43 = vpop.permute.xlu2 %562 }
  0x7f   : > { %10323 = vst [vmem:[#allocation6_spill] sm:$0xff] %v5785_v43  ;;  %4671 = vset.pattern.permute.xlu2 %v9961_v8 }
  0x80   : > { %385 = vperm.xlu2 %4671, %v5783_v42  }
  0x83   : > { %4670 = vset.pattern.permute.xlu1 %v9961_v8 }
  0x84   : > { %345 = vperm.xlu1 %4670, %v5792_v44   ;;  %4357 = vmatmul.msk.f32.gmra.mxu0 %vm912_vm0, %v247_v45  ;;  %v276_v45 = vld [vmem:[%s9959_s3 + $0x48] sm:$0xff] }
  0x85   : > { %450 = vperm.xlu0 %4686, %v5800_v46  }
  0x86   : > { %v5809_v48 = vpop.permute.xlu2 %602 }
  0x87   : > { %10324 = vst [vmem:[#allocation7_spill] sm:$0xff] %v5809_v48 }
  0x88   : > { %542 = vperm.xlu2 %4671, %v270_v47   ;;  %v258_v47 = vld [vmem:[%s9958_s2 + $0xb8] sm:$0xff] }
  0x8c   : > { %480 = vperm.xlu1 %4670, %v5676_v16   ;;  %4358 = vmatmul.msk.f32.gmra.mxu0 %vm912_vm0, %v248_v49 }
  0x8d   : > { %475 = vperm.xlu0 %4686, %v5817_v50  }
  0x8e   : > { %v5822_v51 = vpop.permute.xlu2 %360 }
  0x8f   : > { %10325 = vst [vmem:[#allocation8_spill] sm:$0xff] %v5822_v51 }
  0x90   : > { %4672 = vset.pattern.permute.xlu2 %v9963_v5 }
  0x91   : > { %733 = vperm.xlu2 %4672, %v302_v30  }
  0x94   : > { %677 = vperm.xlu1 %4670, %v297_v52   ;;  %4359 = vmatmul.msk.f32.gmra.mxu0 %vm912_vm0, %v249_v53  ;;  %v285_v52 = vld [vmem:[%s9959_s3 + $0x90] sm:$0xff] }
  0x95   : > { %672 = vperm.xlu0 %4686, %v296_v54   ;;  %v5835_v55 = vpop.permute.xlu1 %365  ;;  %v5910_v15 = vpop.permute.xlu0 %749 }
  0x96   : > { %10326 = vst [vmem:[#allocation9_spill] sm:$0xff] %v5835_v55  ;;  %v5837_v56 = vpop.permute.xlu2 %557 }
  0x97   : > { %10327 = vst [vmem:[#allocation10_spill] sm:$0xff] %v5837_v56 }
  0x98   : > { %10337 = vst [vmem:[#allocation20_spill] sm:$0xff] %v5910_v15 }
  0x99   : > { %841 = vperm.xlu2 %4672, %v329_v33   ;;  %v256_v33 = vld [vmem:[%s9958_s2 + $0xa8] sm:$0xff] }
  0x9c   : > { %4673 = vset.pattern.permute.xlu1 %v9963_v5  ;;  %4360 = vmatmul.msk.f32.gmra.mxu0 %vm912_vm0, %v250_v57 }
  0x9d   : > { %765 = vperm.xlu1 %4673, %v310_v34   ;;  %375 = vperm.xlu0 %4686, %v5845_v58   ;;  %v5850_v59 = vpop.permute.xlu1 %405  ;;  %v5936_v23 = vpop.permute.xlu0 %741 }
  0x9e   : > { %10328 = vst [vmem:[#allocation11_spill] sm:$0xff] %v5850_v59 }
  0x9f   : > { %v5852_v60 = vpop.permute.xlu2 %777  ;;  %10340 = vst [vmem:[#allocation23_spill] sm:$0xff] %v5936_v23 }
  0xa0   : > { %10329 = vst [vmem:[#allocation12_spill] sm:$0xff] %v5852_v60 }
  0xa1   : > { %4675 = vset.pattern.permute.xlu2 %v9961_v8  ;;  %v5860_v62 = vpop.f32.mrf.mxu0 }
  0xa2   : > { %10330 = vst [vmem:[#allocation13_spill] sm:$0xff] %v5860_v62  ;;  %380 = vperm.xlu2 %4675, %v5857_v61  }
  0xa4   : > { %4361 = vmatmul.msk.f32.gmra.mxu0 %vm912_vm0, %v251_v63  ;;  %v259_v63 = vld [vmem:[%s9958_s2 + $0xc0] sm:$0xff] }
  0xa5   : > { %4674 = vset.pattern.permute.xlu1 %v9961_v8  ;;  %567 = vperm.xlu0 %4686, %v275_v0  }
  0xa6   : > { %340 = vperm.xlu1 %4674, %v5693_v20   ;;  %v254_v20 = vld [vmem:[%s9958_s2 + $0x98] sm:$0xff] }
  0xa7   : > { %v5872_v1 = vpop.permute.xlu1 %781 }
  0xa8   : > { %10331 = vst [vmem:[#allocation14_spill] sm:$0xff] %v5872_v1  ;;  %v5877_v3 = vpop.permute.xlu2 %395 }
  0xa9   : > { %10332 = vst [vmem:[#allocation15_spill] sm:$0xff] %v5877_v3  ;;  %v5879_v4 = vpop.f32.mrf.mxu0 }
  0xaa   : > { %10333 = vst [vmem:[#allocation16_spill] sm:$0xff] %v5879_v4  ;;  %577 = vperm.xlu2 %4675, %v277_v2   ;;  %v284_v2 = vld [vmem:[%s9959_s3 + $0x88] sm:$0xff] }
  0xac   : > { %4362 = vmatmul.msk.f32.gmra.mxu0 %vm912_vm0, %v252_v6 }
  0xad   : > { %435 = vperm.xlu0 %4686, %v5887_v7  }
  0xae   : > { %537 = vperm.xlu1 %4674, %v269_v9  }
  0xb0   : > { %v5894_v10 = vpop.permute.xlu1 %400  ;;  %v5896_v11 = vpop.permute.xlu2 %592 }
  0xb1   : > { %10334 = vst [vmem:[#allocation17_spill] sm:$0xff] %v5894_v10  ;;  %v5898_v12 = vpop.f32.mrf.mxu0 }
  0xb2   : > { %10335 = vst [vmem:[#allocation18_spill] sm:$0xff] %v5896_v11  ;;  %4677 = vset.pattern.permute.xlu2 %v9963_v5 }
  0xb3   : > { %10336 = vst [vmem:[#allocation19_spill] sm:$0xff] %v5898_v12  ;;  %761 = vperm.xlu2 %4677, %v5783_v42   ;;  %v291_v42 = vld [vmem:[%s9959_s3 + $0xc0] sm:$0xff] }
  0xb4   : > { %4363 = vmatmul.msk.f32.gmra.mxu0 %vm912_vm0, %v253_v13 }
  0xb5   : > { %460 = vperm.xlu0 %4686, %v5907_v14  }
  0xb6   : > { %4676 = vset.pattern.permute.xlu1 %v9963_v5 }
  0xb7   : > { %729 = vperm.xlu1 %4676, %v5792_v44  }
  0xb8   : > { %v5916_v16 = vpop.permute.xlu2 %350 }
  0xb9   : > { %10338 = vst [vmem:[#allocation21_spill] sm:$0xff] %v5916_v16  ;;  %v5918_v17 = vpop.permute.xlu1 %745  ;;  %v5920_v18 = vpop.f32.mrf.mxu0 }
  0xba   : > { %10339 = vst [vmem:[#allocation22_spill] sm:$0xff] %v5918_v17 }
  0xbb   : > { %4679 = vset.pattern.permute.xlu2 %v9961_v8 }
  0xbc   : > { %642 = vperm.xlu2 %4679, %v290_v19   ;;  %4364 = vmatmul.msk.f32.gmra.mxu0 %vm912_vm0, %v254_v20  ;;  %v260_v19 = vld [vmem:[%s9958_s2 + $0xc8] sm:$0xff] }
  0xbd   : > { %430 = vperm.xlu0 %4686, %v5931_v21  }
  0xbf   : > { %4678 = vset.pattern.permute.xlu1 %v9961_v8 }
  0xc0   : > { %445 = vperm.xlu1 %4678, %v5705_v22   ;;  %v5940_v24 = vpop.permute.xlu2 %485  ;;  %v5962_v22 = vpop.permute.xlu0 %845 }
  0xc1   : > { %10341 = vst [vmem:[#allocation24_spill] sm:$0xff] %v5940_v24  ;;  %v5942_v25 = vpop.f32.mrf.mxu0 }
  0xc2   : > { %v5952_v28 = vpop.permute.xlu1 %355  ;;  %10343 = vst [vmem:[#allocation26_spill] sm:$0xff] %v5962_v22 }
  0xc3   : > { %10342 = vst [vmem:[#allocation25_spill] sm:$0xff] %v5952_v28 }
  0xc4   : > { %335 = vperm.xlu2 %4679, %v5947_v26   ;;  %4365 = vmatmul.msk.f32.gmra.mxu0 %vm912_vm0, %v255_v27  ;;  %v267_v27 = vld [vmem:[%s9959_s3] sm:$0xff] }
  0xc5   : > { %455 = vperm.xlu0 %4686, %v5957_v29  }
  0xc8   : > { %4680 = vset.pattern.permute.xlu1 %v9963_v5  ;;  %v5965_v30 = vpop.permute.xlu2 %682  ;;  %v6001_v41 = vpop.permute.xlu0 %837 }
  0xc9   : > { %10344 = vst [vmem:[#allocation27_spill] sm:$0xff] %v5965_v30  ;;  %813 = vperm.xlu1 %4680, %v5800_v46   ;;  %v5968_v31 = vpop.f32.mrf.mxu0 }
  0xca   : > { %v5976_v34 = vpop.permute.xlu1 %552  ;;  %10347 = vst [vmem:[#allocation30_spill] sm:$0xff] %v6001_v41 }
  0xcb   : > { %10345 = vst [vmem:[#allocation28_spill] sm:$0xff] %v5976_v34 }
  0xcc   : > { %532 = vperm.xlu2 %4679, %v268_v32   ;;  %4366 = vmatmul.msk.f32.gmra.mxu0 %vm912_vm0, %v256_v33 }
  0xcd   : > { %425 = vperm.xlu0 %4686, %v5981_v35  }
  0xd0   : > { %v6023_v53 = vpop.permute.xlu0 %725 }
  0xd1   : > { %4681 = vset.pattern.permute.xlu1 %v9961_v8  ;;  %v5991_v37 = vpop.f32.mrf.mxu0  ;;  %v5993_v38 = vpop.permute.xlu2 %769  ;;  %10350 = vst [vmem:[#allocation33_spill] sm:$0xff] %v6023_v53 }
  0xd2   : > { %10346 = vst [vmem:[#allocation29_spill] sm:$0xff] %v5993_v38  ;;  %470 = vperm.xlu1 %4681, %v5988_v36  }
  0xd3   : > { %v6007_v44 = vpop.permute.xlu1 %773 }
  0xd4   : > { %10348 = vst [vmem:[#allocation31_spill] sm:$0xff] %v6007_v44  ;;  %667 = vperm.xlu2 %4679, %v295_v39   ;;  %4367 = vmatmul.msk.f32.gmra.mxu0 %vm912_vm0, %v257_v40  ;;  %v325_v40 = vld [vmem:[%s9957_s1 + $0xd0] sm:$0xff] }
  0xd5   : > { %647 = vperm.xlu0 %4686, %v291_v42   ;;  %v261_v42 = vld [vmem:[%s9958_s2 + $0xd0] sm:$0xff] }
  0xd8   : > { %v6049_v9 = vpop.permute.xlu0 %809 }
  0xd9   : > { %v6013_v46 = vpop.f32.mrf.mxu0  ;;  %10355 = vst [vmem:[#allocation38_spill] sm:$0xff] %v6049_v9 }
  0xda   : > { %v6018_v49 = vpop.permute.xlu2 %385  ;;  %572 = vperm.xlu1 %4681, %v276_v45  }
  0xdb   : > { %10349 = vst [vmem:[#allocation32_spill] sm:$0xff] %v6018_v49 }
  0xdc   : > { %v6025_v54 = vpop.permute.xlu1 %390  ;;  %4683 = vset.pattern.permute.xlu2 %v9963_v5  ;;  %4368 = vmatmul.msk.f32.gmra.mxu0 %vm912_vm0, %v258_v47 }
  0xdd   : > { %10351 = vst [vmem:[#allocation34_spill] sm:$0xff] %v6025_v54  ;;  %617 = vperm.xlu0 %4686, %v285_v52   ;;  %833 = vperm.xlu2 %4683, %v5817_v50   ;;  %v289_v50 = vld [vmem:[%s9959_s3 + $0xb0] sm:$0xff] }
  0xe0   : > { %v6069_v33 = vpop.permute.xlu0 %370 }
  0xe1   : > { %v6030_v57 = vpop.f32.mrf.mxu0  ;;  %10359 = vst [vmem:[#allocation42_spill] sm:$0xff] %v6069_v33 }
  0xe2   : > { %10352 = vst [vmem:[#allocation35_spill] sm:$0xff] %v6030_v57  ;;  %v6035_v0 = vpop.permute.xlu2 %542  ;;  %4682 = vset.pattern.permute.xlu1 %v9963_v5  ;;  %v10368_v57 = vmov 1  }
  0xe3   : > { %10353 = vst [vmem:[#allocation36_spill] sm:$0xff] %v6035_v0  ;;  %757 = vperm.xlu1 %4682, %v5857_v61   ;;  %v320_v61 = vld [vmem:[%s9957_s1 + $0xa8] sm:$0xff] }
  0xe4   : > { %v6045_v6 = vpop.permute.xlu1 %587  ;;  %4369 = vmatmul.msk.f32.gmra.mxu0 %vm912_vm0, %v259_v63  ;;  %v294_v63 = vld [vmem:[%s9959_s3 + $0xd8] sm:$0xff] }
  0xe5   : > { %10354 = vst [vmem:[#allocation37_spill] sm:$0xff] %v6045_v6  ;;  %612 = vperm.xlu0 %4686, %v284_v2   ;;  %4685 = vset.pattern.permute.xlu2 %v9961_v8  ;;  %v262_v2 = vld [vmem:[%s9958_s2 + $0xd8] sm:$0xff] }
  0xe6   : > { %637 = vperm.xlu2 %4685, %v289_v50  }
  0xe8   : > { %v6094_v50 = vpop.permute.xlu0 %410 }
  0xe9   : > { %v6051_v13 = vpop.f32.mrf.mxu0  ;;  %10362 = vst [vmem:[#allocation45_spill] sm:$0xff] %v6094_v50 }
  0xea   : > { %10356 = vst [vmem:[#allocation39_spill] sm:$0xff] %v6051_v13  ;;  %v6127_v13 = vld [vmem:[%s9958_s2 + $0xe8] sm:$0xff] }
  0xeb   : > { %v6059_v20 = vpop.permute.xlu2 %733  ;;  %4684 = vset.pattern.permute.xlu1 %v9961_v8  ;;  %10370 = vst [vmem:[#allocation52_spill] sm:$0xff] %v6127_v13 }
  0xec   : > { %10357 = vst [vmem:[#allocation40_spill] sm:$0xff] %v6059_v20  ;;  %440 = vperm.xlu1 %4684, %v320_v61   ;;  %4370 = vmatmul.msk.f32.gmra.mxu0 %vm912_vm0, %v260_v19 }
  0xed   : > { %v6066_v32 = vpop.permute.xlu1 %737  ;;  %4692 = vset.pattern.permute.xlu0 %v9963_v5 }
  0xee   : > { %10358 = vst [vmem:[#allocation41_spill] sm:$0xff] %v6066_v32  ;;  %527 = vperm.xlu2 %4685, %v267_v27  }
  0xf0   : > { %v6109_v8 = vpop.permute.xlu0 %597 }
  0xf1   : > { %v6071_v39 = vpop.f32.mrf.mxu0  ;;  %10366 = vst [vmem:[#allocation49_spill] sm:$0xff] %v6109_v8 }
  0xf3   : > { %v6079_v45 = vpop.permute.xlu2 %841 }
  0xf4   : > { %10360 = vst [vmem:[#allocation43_spill] sm:$0xff] %v6079_v45  ;;  %465 = vperm.xlu1 %4684, %v325_v40   ;;  %4371 = vmatmul.msk.f32.gmra.mxu0 %vm912_vm0, %v261_v42  ;;  %v6107_v42 = vld [vmem:[%s9958_s2 + $0xe0] sm:$0xff]  ;;  %v6165_v45 = vld [vmem:[%s9958_s2 + $0xf8] sm:$0xff] }
  0xf5   : > { %10365 = vst [vmem:[#allocation48_spill] sm:$0xff] %v6107_v42 }
  0xf6   : > { %v6082_v47 = vpop.permute.xlu1 %345  ;;  %4687 = vset.pattern.permute.xlu2 %v9963_v5  ;;  %10380 = vst [vmem:[#allocation61_spill] sm:$0xff] %v6165_v45 }
  0xf7   : > { %10361 = vst [vmem:[#allocation44_spill] sm:$0xff] %v6082_v47  ;;  %721 = vperm.xlu2 %4687, %v5947_v26  }
  0xf8   : > { %v6137_v62 = vpop.permute.xlu0 %490 }
  0xf9   : > { %v6086_v52 = vpop.f32.mrf.mxu0  ;;  %10373 = vst [vmem:[#allocation54_spill] sm:$0xff] %v6137_v62 }
  0xfc   : > { %v6096_v19 = vpop.permute.xlu2 %380  ;;  %662 = vperm.xlu1 %4684, %v294_v63   ;;  %4372 = vmatmul.msk.f32.gmra.mxu0 %vm912_vm0, %v262_v2 }
  0xfd   : > { %10363 = vst [vmem:[#allocation46_spill] sm:$0xff] %v6096_v19  ;;  %v6146_v19 = vld [vmem:[%s9958_s2 + $0xf0] sm:$0xff] }
  0xfe   : > { %v6099_v27 = vpop.permute.xlu1 %480  ;;  %10375 = vst [vmem:[#allocation56_spill] sm:$0xff] %v6146_v19 }
  0xff   : > { %10364 = vst [vmem:[#allocation47_spill] sm:$0xff] %v6099_v27  ;;  %829 = vperm.xlu2 %4687, %v5988_v36   ;;  %v315_v36 = vld [vmem:[%s9957_s1 + $0x80] sm:$0xff]  ;;  %v292_v27 = vld [vmem:[%s9959_s3 + $0xc8] sm:$0xff] }
 0x100   : > { %785 = vperm.xlu0 %4692, %v315_v36  }
 0x101   : > { %v6102_v26 = vpop.f32.mrf.mxu0 }
 0x104   : > { %v6111_v5 = vpop.permute.xlu2 %577  ;;  %4688 = vset.pattern.permute.xlu1 %v10368_v57  ;;  %4373 = vmatmul.msk.f32.gmra.mxu0 %vm912_vm0, %v6107_v42  ;;  %v288_v42 = vld [vmem:[%s9959_s3 + $0xa8] sm:$0xff] }
 0x105   : > { %10367 = vst [vmem:[#allocation50_spill] sm:$0xff] %v6111_v5  ;;  %753 = vperm.xlu1 %4688, %v5845_v58  }
 0x106   : > { %v6117_v63 = vpop.permute.xlu1 %677 }
 0x107   : > { %10369 = vst [vmem:[#allocation51_spill] sm:$0xff] %v6117_v63  ;;  %805 = vperm.xlu2 %4687, %v320_v61   ;;  %v10372_v61 = vmov 0  }
 0x109   : > { %v6122_v2 = vpop.f32.mrf.mxu0 }
 0x10c   : > { %4374 = vmatmul.msk.f32.gmra.mxu0 %vm912_vm0, %v6127_v13  ;;  %v293_v13 = vld [vmem:[%s9959_s3 + $0xd0] sm:$0xff] }
 0x10d   : > { %v6134_v58 = vpop.permute.xlu2 %761  ;;  %4689 = vset.pattern.permute.xlu1 %v10372_v61 }
 0x10e   : > { %10371 = vst [vmem:[#allocation53_spill] sm:$0xff] %v6134_v58  ;;  %632 = vperm.xlu1 %4689, %v288_v42  }
 0x10f   : > { %v6139_v12 = vpop.permute.xlu1 %765  ;;  %825 = vperm.xlu2 %4687, %v325_v40   ;;  %v6156_v40 = vpop.permute.xlu0 %547 }
 0x110   : > { %10374 = vst [vmem:[#allocation55_spill] sm:$0xff] %v6139_v12 }
 0x111   : > { %v6141_v4 = vpop.f32.mrf.mxu0  ;;  %10377 = vst [vmem:[#allocation58_spill] sm:$0xff] %v6156_v40 }
 0x114   : > { %4375 = vmatmul.msk.f32.gmra.mxu0 %vm912_vm0, %v6146_v19  ;;  %v287_v19 = vld [vmem:[%s9959_s3 + $0xa0] sm:$0xff] }
 0x116   : > { %v6153_v47 = vpop.permute.xlu2 %642  ;;  %657 = vperm.xlu1 %4689, %v293_v13  }
 0x117   : > { %10376 = vst [vmem:[#allocation57_spill] sm:$0xff] %v6153_v47  ;;  %801 = vperm.xlu2 %4687, %v5887_v7  }
 0x118   : > { %v6158_v42 = vpop.permute.xlu1 %340 }
 0x119   : > { %10378 = vst [vmem:[#allocation59_spill] sm:$0xff] %v6158_v42  ;;  %v6160_v63 = vpop.f32.mrf.mxu0  ;;  %v6179_v42 = vpop.permute.xlu0 %582 }
 0x11a   : > { %10379 = vst [vmem:[#allocation60_spill] sm:$0xff] %v6160_v63 }
 0x11b   : > { %10384 = vst [vmem:[#allocation65_spill] sm:$0xff] %v6179_v42 }
 0x11c   : > { %4376 = vmatmul.msk.f32.gmra.mxu0 %vm912_vm0, %v6165_v45 }
 0x11e   : > { %v6172_v13 = vpop.permute.xlu2 %335  ;;  %627 = vperm.xlu1 %4689, %v287_v19  }
 0x11f   : > { %10381 = vst [vmem:[#allocation62_spill] sm:$0xff] %v6172_v13  ;;  %821 = vperm.xlu2 %4687, %v5907_v14   ;;  %v286_v14 = vld [vmem:[%s9959_s3 + $0x98] sm:$0xff] }
 0x120   : > { %v6175_v7 = vpop.permute.xlu1 %537 }
 0x121   : > { %10382 = vst [vmem:[#allocation63_spill] sm:$0xff] %v6175_v7  ;;  %v6177_v47 = vpop.f32.mrf.mxu0  ;;  %v316_v7 = vld [vmem:[%s9957_s1 + $0x88] sm:$0xff] }
 0x122   : > { %10383 = vst [vmem:[#allocation64_spill] sm:$0xff] %v6177_v47  ;;  %v6194_v47 = vpop.permute.xlu0 %450 }
 0x123   : > { %10388 = vst [vmem:[#allocation69_spill] sm:$0xff] %v6194_v47 }
 0x126   : > { %652 = vperm.xlu1 %4689, %v292_v27   ;;  %v6184_v63 = vpop.permute.xlu2 %532 }
 0x127   : > { %10385 = vst [vmem:[#allocation66_spill] sm:$0xff] %v6184_v63  ;;  %797 = vperm.xlu2 %4687, %v5931_v21  }
 0x129   : > { %v6187_v45 = vpop.permute.xlu1 %729  ;;  %v6189_v19 = vpop.f32.mrf.mxu0 }
 0x12a   : > { %10386 = vst [vmem:[#allocation67_spill] sm:$0xff] %v6187_v45 }
 0x12b   : > { %10387 = vst [vmem:[#allocation68_spill] sm:$0xff] %v6189_v19  ;;  %v6206_v19 = vpop.permute.xlu0 %475 }
 0x12c   : > { %10392 = vst [vmem:[#allocation73_spill] sm:$0xff] %v6206_v19  ;;  %v6255_v19 = vld [vmem:[%s5647_s27] ss:$0 sm:$0xff] }
 0x12e   : > { %622 = vperm.xlu1 %4689, %v286_v14   ;;  %v6199_v27 = vpop.permute.xlu2 %667 }
 0x12f   : > { %10389 = vst [vmem:[#allocation70_spill] sm:$0xff] %v6199_v27  ;;  %4691 = vset.pattern.permute.xlu2 %v10372_v61  ;;  %v283_v61 = vld [vmem:[%s9959_s3 + $0x80] sm:$0xff] }
 0x130   : > { %420 = vperm.xlu2 %4691, %v316_v7  }
 0x131   : > { %v6202_v21 = vpop.f32.mrf.mxu0 }
 0x132   : > { %10390 = vst [vmem:[#allocation71_spill] sm:$0xff] %v6202_v21  ;;  %v6204_v45 = vpop.permute.xlu1 %445 }
 0x133   : > { %10391 = vst [vmem:[#allocation72_spill] sm:$0xff] %v6204_v45  ;;  %v6220_v21 = vpop.permute.xlu0 %672 }
 0x134   : > { %10396 = vst [vmem:[#allocation77_spill] sm:$0xff] %v6220_v21 }
 0x136   : > { %4690 = vset.pattern.permute.xlu1 %v10368_v57 }
 0x137   : > { %817 = vperm.xlu1 %4690, %v5957_v29   ;;  %v6210_v13 = vpop.permute.xlu2 %833 }
 0x138   : > { %10393 = vst [vmem:[#allocation74_spill] sm:$0xff] %v6210_v13  ;;  %415 = vperm.xlu2 %4691, %v315_v36  }
 0x139   : > { %v6212_v63 = vpop.f32.mrf.mxu0 }
 0x13a   : > { %10394 = vst [vmem:[#allocation75_spill] sm:$0xff] %v6212_v63 }
 0x13b   : > { %v6214_v14 = vpop.permute.xlu1 %813 }
 0x13c   : > { %10395 = vst [vmem:[#allocation76_spill] sm:$0xff] %v6214_v14  ;;  %v6232_v14 = vpop.permute.xlu0 %375 }
 0x13d   : > { %10402 = vst [vmem:[#allocation83_spill] sm:$0xff] %v6232_v14 }
 0x13f   : > { %793 = vperm.xlu1 %4690, %v5981_v35  }
 0x140   : > { %v6222_v27 = vpop.permute.xlu2 %637  ;;  %607 = vperm.xlu2 %4691, %v283_v61  }
 0x141   : > { %10397 = vst [vmem:[#allocation78_spill] sm:$0xff] %v6222_v27  ;;  %v6224_v57 = vpop.f32.mrf.mxu0 }
 0x142   : > { %10398 = vst [vmem:[#allocation79_spill] sm:$0xff] %v6224_v57 }
 0x144   : > { %v6226_v29 = vpop.permute.xlu1 %470  ;;  %v6240_v61 = vpop.permute.xlu0 %567 }
 0x145   : > { %10399 = vst [vmem:[#allocation80_spill] sm:$0xff] %v6226_v29 }
 0x146   : > { %10406 = vst [vmem:[#allocation87_spill] sm:$0xff] %v6240_v61 }
 0x147   : > { %789 = vperm.xlu1 %4690, %v316_v7  }
 0x148   : > { %v6228_v36 = vpop.permute.xlu2 %527 }
 0x149   : > { %10400 = vst [vmem:[#allocation81_spill] sm:$0xff] %v6228_v36  ;;  %v6230_v63 = vpop.f32.mrf.mxu0 }
 0x14a   : > { %10401 = vst [vmem:[#allocation82_spill] sm:$0xff] %v6230_v63 }
 0x14c   : > { %v6234_v13 = vpop.permute.xlu1 %572  ;;  %v6248_v29 = vpop.permute.xlu0 %435 }
 0x14d   : > { %10403 = vst [vmem:[#allocation84_spill] sm:$0xff] %v6234_v13  ;;  %v498_v13 = vmul.f32 %v6255_v19, %v5822_v51  ;;  %v500_v51 = vmul.f32 %v6255_v19, %v6069_v33  ;;  %v506_v33 = vmul.f32 %v6255_v19, %v5894_v10 }
 0x14e   : > { %10410 = vst [vmem:[#allocation91_spill] sm:$0xff] %v6248_v29 }
 0x151   : > { %v6236_v35 = vpop.f32.mrf.mxu0  ;;  %v6238_v45 = vpop.permute.xlu2 %721 }
 0x152   : > { %10404 = vst [vmem:[#allocation85_spill] sm:$0xff] %v6236_v35  ;;  %v6260_v35 = vld [vmem:[%s5647_s27 + $0x8] ss:$0 sm:$0xff] }
 0x153   : > { %10405 = vst [vmem:[#allocation86_spill] sm:$0xff] %v6238_v45  ;;  %v853_v29 = vmul.f32 %v6260_v35, %v5936_v23  ;;  %v496_v23 = vmul.f32 %v6255_v19, %v5916_v16 }
 0x155   : > { %v6242_v57 = vpop.permute.xlu1 %757 }
 0x156   : > { %10407 = vst [vmem:[#allocation88_spill] sm:$0xff] %v6242_v57 }
 0x159   : > { %v6244_v27 = vpop.f32.mrf.mxu0  ;;  %v6246_v7 = vpop.permute.xlu2 %829 }
 0x15a   : > { %10408 = vst [vmem:[#allocation89_spill] sm:$0xff] %v6244_v27  ;;  %v6266_v27 = vpop.permute.xlu0 %460 }
 0x15b   : > { %10409 = vst [vmem:[#allocation90_spill] sm:$0xff] %v6246_v7  ;;  %v690_v7 = vadd.f32 %v5976_v34, %v498_v13  ;;  %v505_v13 = vmul.f32 %v6255_v19, %v5877_v3  ;;  %v692_v34 = vadd.f32 %v5785_v43, %v500_v51  ;;  %v497_v51 = vmul.f32 %v6255_v19, %v5952_v28 }
 0x15c   : > { %10415 = vst [vmem:[#allocation96_spill] sm:$0xff] %v6266_v27  ;;  %v861_v3 = vmul.f32 %v6260_v35, %v6007_v44  ;;  %v852_v43 = vmul.f32 %v6260_v35, %v6066_v32 }
 0x15d   : > { %v885_v61 = vadd.f32 %v853_v29, %v690_v7  ;;  %v697_v29 = vadd.f32 %v6045_v6, %v505_v13  ;;  %v851_v7 = vmul.f32 %v6260_v35, %v6059_v20  ;;  %v698_v6 = vadd.f32 %v5896_v11, %v506_v33 }
 0x15e   : > { %v6250_v36 = vpop.permute.xlu1 %440  ;;  %v689_v44 = vadd.f32 %v6156_v40, %v497_v51 }
 0x15f   : > { %10411 = vst [vmem:[#allocation92_spill] sm:$0xff] %v6250_v36  ;;  %v893_v32 = vadd.f32 %v861_v3, %v698_v6  ;;  %v862_v6 = vmul.f32 %v6260_v35, %v5852_v60 }
 0x160   : > { %v884_v27 = vadd.f32 %v852_v43, %v689_v44 }
 0x161   : > { %v6252_v63 = vpop.f32.mrf.mxu0  ;;  %v6262_v45 = vpop.permute.xlu2 %805 }
 0x162   : > { %10412 = vst [vmem:[#allocation93_spill] sm:$0xff] %v6252_v63  ;;  %v499_v63 = vmul.f32 %v6255_v19, %v5835_v55  ;;  %v855_v55 = vmul.f32 %v6260_v35, %v5910_v15  ;;  %v6310_v28 = vpop.permute.xlu0 %430 }
 0x163   : > { %10413 = vst [vmem:[#allocation94_spill] sm:$0xff] %v6262_v45  ;;  %v854_v45 = vmul.f32 %v6260_v35, %v5918_v17 }
 0x164   : > { %v887_v20 = vadd.f32 %v855_v55, %v692_v34  ;;  %10419 = vst [vmem:[#allocation100_spill] sm:$0xff] %v6310_v28  ;;  %v507_v55 = vmul.f32 %v6255_v19, %v5850_v59 }
 0x166   : > { %v6264_v57 = vpop.permute.xlu1 %465  ;;  %v1129_v10 = vadd.f32 %v6013_v46, %v887_v20  ;;  %v699_v43 = vadd.f32 %v6109_v8, %v507_v55 }
 0x167   : > { %10414 = vst [vmem:[#allocation95_spill] sm:$0xff] %v6264_v57  ;;  %v691_v57 = vadd.f32 %v5837_v56, %v499_v63  ;;  %v860_v63 = vmul.f32 %v6260_v35, %v5993_v38  ;;  %v688_v38 = vadd.f32 %v6035_v0, %v496_v23 }
 0x168   : > { %v1161_v33 = vmul.f32 0.5, %v1129_v10 }
 0x169   : > { %v6273_v36 = vpop.f32.mrf.mxu0  ;;  %v886_v17 = vadd.f32 %v854_v45, %v691_v57  ;;  %v6300_v16 = vpop.permute.xlu2 %825  ;;  %v1127_v45 = vadd.f32 %v5968_v31, %v885_v61  ;;  %v892_v15 = vadd.f32 %v860_v63, %v697_v29  ;;  %v883_v56 = vadd.f32 %v851_v7, %v688_v38 }
 0x16a   : > { %10416 = vst [vmem:[#allocation97_spill] sm:$0xff] %v6273_v36  ;;  %v1126_v38 = vadd.f32 %v5942_v25, %v884_v27  ;;  %v6331_v10 = vpop.permute.xlu0 %455  ;;  %v503_v25 = vmul.f32 %v6255_v19, %v6018_v49  ;;  %v504_v27 = vmul.f32 %v6255_v19, %v6025_v54  ;;  %v859_v29 = vmul.f32 %v6260_v35, %v6139_v12  ;;  %v10432_v49 = vld [vmem:[#allocation66_spill] sm:$0xff] }
 0x16b   : > { %10418 = vst [vmem:[#allocation99_spill] sm:$0xff] %v6300_v16  ;;  %v1128_v57 = vadd.f32 %v5991_v37, %v886_v17  ;;  %v1159_v31 = vmul.f32 0.5, %v1127_v45  ;;  %v1134_v17 = vadd.f32 %v6102_v26, %v892_v15  ;;  %v1135_v37 = vadd.f32 %v6122_v2, %v893_v32 }
 0x16c   : > { %v1125_v34 = vadd.f32 %v5920_v18, %v883_v56  ;;  %v508_v56 = vmul.f32 %v6255_v19, %v6094_v50  ;;  %10422 = vst [vmem:[#allocation103_spill] sm:$0xff] %v6331_v10  ;;  %v1158_v18 = vmul.f32 0.5, %v1126_v38  ;;  %v858_v32 = vmul.f32 %v6260_v35, %v6134_v58 }
 0x16d   : > { %v1160_v61 = vmul.f32 0.5, %v1128_v57  ;;  %4709 = vtanh.f32 %v1159_v31  ;;  %v1166_v3 = vmul.f32 0.5, %v1134_v17  ;;  %v1167_v15 = vmul.f32 0.5, %v1135_v37 }
 0x16e   : > { %v6289_v36 = vpop.permute.xlu1 %662  ;;  %v1157_v20 = vmul.f32 0.5, %v1125_v34  ;;  %v894_v26 = vadd.f32 %v862_v6, %v699_v43  ;;  %v695_v7 = vadd.f32 %v6111_v5, %v503_v25  ;;  %v524_v45 = vmul.f32 %v6255_v19, %v6137_v62 }
 0x16f   : > { %10417 = vst [vmem:[#allocation98_spill] sm:$0xff] %v6289_v36  ;;  %4711 = vtanh.f32 %v1160_v61  ;;  %v696_v57 = vadd.f32 %v6179_v42, %v504_v27  ;;  %v700_v61 = vadd.f32 %v5809_v48, %v508_v56  ;;  %v863_v43 = vmul.f32 %v6260_v35, %v5872_v1 }
 0x170   : > { %4713 = vtanh.f32 %v1161_v33  ;;  %v1136_v51 = vadd.f32 %v6141_v4, %v894_v26  ;;  %v890_v37 = vadd.f32 %v858_v32, %v695_v7  ;;  %v879_v6 = vmul.f32 %v6260_v35, %v5962_v22 }
 0x171   : > { %v6306_v13 = vpop.f32.mrf.mxu0  ;;  %v6325_v46 = vpop.permute.xlu2 %801  ;;  %4715 = vtanh.f32 %v1166_v3  ;;  %v891_v38 = vadd.f32 %v859_v29, %v696_v57  ;;  %v849_v56 = vmul.f32 %v6260_v35, %v6023_v53  ;;  %v523_v25 = vmul.f32 %v6255_v19, %v5940_v24 }
 0x172   : > { %10421 = vst [vmem:[#allocation102_spill] sm:$0xff] %v6325_v46  ;;  %4717 = vtanh.f32 %v1167_v15  ;;  %v1168_v4 = vmul.f32 0.5, %v1136_v51  ;;  %v716_v15 = vadd.f32 %v5965_v30, %v524_v45  ;;  %v895_v26 = vadd.f32 %v863_v43, %v700_v61  ;;  %v6371_v45 = vpop.permute.xlu0 %425  ;;  %v10426_v43 = vld [vmem:[#allocation60_spill] sm:$0xff] }
 0x173   : > { %v4710_v2 = vpop.eup %4709  ;;  %4719 = vtanh.f32 %v1157_v20  ;;  %v877_v27 = vmul.f32 %v6260_v35, %v6001_v41  ;;  %v1132_v29 = vadd.f32 %v6071_v39, %v890_v37  ;;  %10425 = vst [vmem:[#allocation106_spill] sm:$0xff] %v6371_v45  ;;  %v1133_v5 = vadd.f32 %v6086_v52, %v891_v38  ;;  %v10428_v39 = vld [vmem:[#allocation47_spill] sm:$0xff] }
 0x174   : > { %4721 = vtanh.f32 %v1158_v18  ;;  %v1207_v33 = vmul.f32 0.5, %v4710_v2  ;;  %v6364_v2 = vmul.f32 %v6260_v35, %v6049_v9  ;;  %v1137_v12 = vadd.f32 %v10426_v43, %v895_v26 }
 0x175   : > { %v4712_v63 = vpop.eup %4711  ;;  %4723 = vtanh.f32 %v1168_v4  ;;  %v6377_v42 = vadd.f32 %v879_v6, %v716_v15  ;;  %v522_v37 = vmul.f32 %v6255_v19, %v10428_v39  ;;  %v10431_v4 = vld [vmem:[#allocation51_spill] sm:$0xff]  ;;  %v1164_v26 = vmul.f32 0.5, %v1132_v29  ;;  %v10434_v29 = vld [vmem:[#allocation46_spill] sm:$0xff] }
 0x176   : > { %v4714_v55 = vpop.eup %4713  ;;  %v1208_v34 = vmul.f32 0.5, %v4712_v63  ;;  %v6373_v57 = vadd.f32 0.5, %v1207_v33  ;;  %v10430_v33 = vld [vmem:[#allocation59_spill] sm:$0xff]  ;;  %v501_v39 = vmul.f32 %v6255_v19, %v6232_v14 }
 0x177   : > { %v6318_v23 = vpop.permute.xlu1 %753  ;;  %v4716_v3 = vpop.eup %4715  ;;  %v1209_v58 = vmul.f32 0.5, %v4714_v55  ;;  %v494_v0 = vmul.f32 %v6255_v19, %v10430_v33  ;;  %v516_v55 = vmul.f32 %v6255_v19, %v6194_v47  ;;  %v714_v6 = vadd.f32 %v6220_v21, %v522_v37 }
 0x178   : > { %10420 = vst [vmem:[#allocation101_spill] sm:$0xff] %v6318_v23  ;;  %v4718_v20 = vpop.eup %4717  ;;  %v6369_v7 = vadd.f32 0.5, %v1208_v34  ;;  %v1214_v51 = vmul.f32 0.5, %v4716_v3  ;;  %v10429_v34 = vld [vmem:[#allocation43_spill] sm:$0xff]  ;;  %4725 = vtanh.f32 %v1164_v26  ;;  %v10441_v26 = vld [vmem:[#allocation74_spill] sm:$0xff] }
 0x179   : > { %v6323_v44 = vpop.f32.mrf.mxu0  ;;  %v6358_v18 = vpop.permute.xlu2 %821  ;;  %v1215_v61 = vmul.f32 0.5, %v4718_v20  ;;  %v878_v3 = vmul.f32 %v6260_v35, %v10429_v34  ;;  %v715_v20 = vadd.f32 %v10431_v4, %v523_v25  ;;  %v1169_v34 = vmul.f32 0.5, %v1137_v12 }
 0x17a   : > { %10424 = vst [vmem:[#allocation105_spill] sm:$0xff] %v6358_v18  ;;  %v4720_v32 = vpop.eup %4719  ;;  %v1238_v15 = vadd.f32 0.5, %v1214_v51  ;;  %v686_v41 = vadd.f32 %v10432_v49, %v494_v0  ;;  %v6394_v33 = vadd.f32 0.5, %v1209_v58  ;;  %v6400_v51 = vmul.f32 %v6255_v19, %v10434_v29  ;;  %v10436_v58 = vld [vmem:[#allocation57_spill] sm:$0xff] }
 0x17b   : > { %v4722_v63 = vpop.eup %4721  ;;  %v1205_v54 = vmul.f32 0.5, %v4720_v32  ;;  %v1165_v32 = vmul.f32 0.5, %v1133_v5  ;;  %v1239_v43 = vadd.f32 0.5, %v1215_v61  ;;  %v10435_v5 = vld [vmem:[#allocation73_spill] sm:$0xff]  ;;  %v910_v12 = vadd.f32 %v878_v3, %v715_v20  ;;  %v10440_v3 = vld [vmem:[#allocation72_spill] sm:$0xff] }
 0x17c   : > { %v1206_v52 = vmul.f32 0.5, %v4722_v63  ;;  %v10433_v63 = vld [vmem:[#allocation44_spill] sm:$0xff]  ;;  %v4724_v37 = vpop.eup %4723  ;;  %v521_v61 = vmul.f32 %v6255_v19, %v10435_v5  ;;  %v6408_v0 = vmul.f32 0.0, %v1238_v15  ;;  %v708_v49 = vadd.f32 %v10436_v58, %v516_v55  ;;  %v10447_v58 = vld [vmem:[#allocation91_spill] sm:$0xff] }
 0x17d   : > { %v495_v25 = vmul.f32 %v6255_v19, %v10433_v63  ;;  %v6402_v47 = vadd.f32 0.5, %v1205_v54  ;;  %v909_v63 = vadd.f32 %v877_v27, %v714_v6  ;;  %4727 = vtanh.f32 %v1165_v32  ;;  %v10438_v54 = vld [vmem:[#allocation87_spill] sm:$0xff]  ;;  %v10443_v27 = vld [vmem:[#allocation92_spill] sm:$0xff]  ;;  %v10444_v32 = vld [vmem:[#allocation62_spill] sm:$0xff] }
 0x17e   : > { %v6406_v4 = vadd.f32 0.5, %v1206_v52  ;;  %v6413_v29 = vmul.f32 0.0, %v1239_v43  ;;  %v6416_v21 = vadd.f32 %v10438_v54, %v501_v39  ;;  %4729 = vtanh.f32 %v1169_v34  ;;  %v6418_v52 = vpop.permute.xlu0 %647  ;;  %v10445_v43 = vld [vmem:[#allocation76_spill] sm:$0xff]  ;;  %v6439_v24 = vpop.eup %4725 }
 0x17f   : > { %v881_v9 = vadd.f32 %v849_v56, %v686_v41  ;;  %v1216_v5 = vmul.f32 0.5, %v4724_v37  ;;  %10439 = vst [vmem:[#allocation108_spill] sm:$0xff] %v6418_v52  ;;  %v515_v20 = vmul.f32 %v6255_v19, %v10440_v3  ;;  %v876_v15 = vmul.f32 %v6260_v35, %v10441_v26  ;;  %v10446_v56 = vld [vmem:[#allocation70_spill] sm:$0xff]  ;;  %v10449_v26 = vld [vmem:[#allocation80_spill] sm:$0xff] }
 0x180   : > { %v6346_v31 = vpop.permute.xlu1 %632  ;;  %v514_v6 = vmul.f32 %v6255_v19, %v10443_v27  ;;  %v493_v39 = vmul.f32 %v6255_v19, %v10444_v32  ;;  %v871_v41 = vmul.f32 %v6260_v35, %v10445_v43  ;;  %v713_v34 = vadd.f32 %v10446_v56, %v521_v61  ;;  %v10448_v3 = vld [vmem:[#allocation78_spill] sm:$0xff]  ;;  %v10450_v32 = vld [vmem:[#allocation67_spill] sm:$0xff]  ;;  %v10451_v56 = vld [vmem:[#allocation16_spill] sm:$0xff] }
 0x181   : > { %10423 = vst [vmem:[#allocation104_spill] sm:$0xff] %v6346_v31  ;;  %v6349_v17 = vpop.f32.mrf.mxu0  ;;  %v6411_v14 = vpop.permute.xlu2 %797  ;;  %v513_v54 = vmul.f32 %v6255_v19, %v10447_v58  ;;  %v707_v53 = vadd.f32 %v10448_v3, %v515_v20  ;;  %v520_v22 = vmul.f32 %v6255_v19, %v10449_v26  ;;  %v850_v8 = vmul.f32 %v6260_v35, %v10450_v32  ;;  %v10452_v20 = vld [vmem:[#allocation90_spill] sm:$0xff] }
 0x182   : > { %10437 = vst [vmem:[#allocation107_spill] sm:$0xff] %v6411_v14  ;;  %v706_v27 = vadd.f32 %v6346_v31, %v514_v6  ;;  %v1123_v11 = vadd.f32 %v10451_v56, %v881_v9  ;;  %v875_v3 = vmul.f32 %v6260_v35, %v10452_v20  ;;  %v908_v26 = vadd.f32 %v876_v15, %v713_v34  ;;  %v10454_v31 = vld [vmem:[#allocation86_spill] sm:$0xff]  ;;  %v10455_v9 = vld [vmem:[#allocation63_spill] sm:$0xff]  ;;  %v10457_v15 = vld [vmem:[#allocation89_spill] sm:$0xff] }
 0x183   : > { %v4728_v1 = vpop.eup %4727  ;;  %v712_v58 = vadd.f32 %v6289_v36, %v520_v22  ;;  %v848_v48 = vmul.f32 %v6260_v35, %v10454_v31  ;;  %v903_v32 = vadd.f32 %v871_v41, %v708_v49  ;;  %v902_v56 = vadd.f32 %v6364_v2, %v707_v53  ;;  %v10458_v31 = vld [vmem:[#allocation85_spill] sm:$0xff] }
 0x185   : > { %v1145_v34 = vadd.f32 %v10457_v15, %v903_v32  ;;  %v1144_v49 = vadd.f32 %v10458_v31, %v902_v56  ;;  %v10463_v31 = vld [vmem:[#allocation82_spill] sm:$0xff] }
 0x188   : > { %v6379_v40 = vpop.permute.xlu1 %657 }
 0x189   : > { %10427 = vst [vmem:[#allocation60_spill] sm:$0xff] %v6379_v40  ;;  %v1113_v38 = vpop.f32.mrf.mxu0 }
 0x18a   : > { %v1151_v43 = vadd.f32 %v1113_v38, %v909_v63  ;;  %v868_v38 = vmul.f32 %v6260_v35, %v6325_v46  ;;  %v687_v63 = vadd.f32 %v10455_v9, %v495_v25  ;;  %v6460_v41 = vpop.permute.xlu2 %420  ;;  %v1240_v9 = vadd.f32 0.5, %v1216_v5 }
 0x18b   : > { %10459 = vst [vmem:[#allocation16_spill] sm:$0xff] %v6460_v41  ;;  %v1177_v5 = vmul.f32 0.5, %v1145_v34 }
 0x18c   : > { %v882_v25 = vadd.f32 %v850_v8, %v687_v63 }
 0x190   : > { %v6424_v55 = vpop.permute.xlu1 %627 }
 0x191   : > { %10442 = vst [vmem:[#allocation109_spill] sm:$0xff] %v6424_v55  ;;  %v1116_v37 = vpop.f32.mrf.mxu0  ;;  %v705_v61 = vadd.f32 %v6424_v55, %v513_v54  ;;  %v10456_v54 = vld [vmem:[#allocation81_spill] sm:$0xff] }
 0x192   : > { %v1152_v30 = vadd.f32 %v1116_v37, %v910_v12  ;;  %v10453_v12 = vld [vmem:[#allocation94_spill] sm:$0xff]  ;;  %v4730_v37 = vpop.eup %4729  ;;  %v685_v22 = vadd.f32 %v10456_v54, %v493_v39  ;;  %v10461_v39 = vld [vmem:[#allocation88_spill] sm:$0xff] }
 0x193   : > { %v869_v6 = vmul.f32 %v6260_v35, %v10453_v12  ;;  %v1150_v12 = vadd.f32 %v6349_v17, %v908_v26  ;;  %v900_v20 = vadd.f32 %v868_v38, %v705_v61  ;;  %v1217_v36 = vmul.f32 0.5, %v4730_v37  ;;  %v10464_v61 = vld [vmem:[#allocation84_spill] sm:$0xff]  ;;  %v10465_v37 = vld [vmem:[#allocation79_spill] sm:$0xff] }
 0x194   : > { %4731 = vtanh.f32 %v1152_v30  ;;  %v907_v30 = vadd.f32 %v875_v3, %v712_v58  ;;  %v857_v53 = vmul.f32 %v6260_v35, %v10461_v39  ;;  %v880_v32 = vadd.f32 %v848_v48, %v685_v22  ;;  %v10466_v48 = vld [vmem:[#allocation19_spill] sm:$0xff] }
 0x195   : > { %v901_v55 = vadd.f32 %v869_v6, %v706_v27  ;;  %4733 = vtanh.f32 %v1151_v43  ;;  %v1155_v27 = vmul.f32 0.5, %v1123_v11  ;;  %v6466_v6 = vpop.permute.xlu0 %617  ;;  %v1213_v3 = vmul.f32 0.5, %v4728_v1 }
 0x196   : > { %10462 = vst [vmem:[#allocation85_spill] sm:$0xff] %v6466_v6  ;;  %v1149_v17 = vadd.f32 %v6323_v44, %v907_v30  ;;  %v694_v8 = vadd.f32 %v10464_v61, %v6400_v51  ;;  %4735 = vtanh.f32 %v1150_v12  ;;  %v1142_v38 = vadd.f32 %v10465_v37, %v900_v20  ;;  %v10468_v20 = vld [vmem:[#allocation95_spill] sm:$0xff] }
 0x197   : > { %v1143_v58 = vadd.f32 %v10463_v31, %v901_v55  ;;  %v1241_v63 = vadd.f32 0.5, %v1217_v36  ;;  %v1176_v11 = vmul.f32 0.5, %v1144_v49  ;;  %v1124_v22 = vadd.f32 %v10466_v48, %v882_v25  ;;  %v6490_v31 = vpop.permute.xlu2 %415 }
 0x198   : > { %v6462_v46 = vpop.permute.xlu1 %652  ;;  %v1264_v44 = vmul.f32 0.0, %v1240_v9  ;;  %v889_v15 = vadd.f32 %v857_v53, %v694_v8  ;;  %v856_v1 = vmul.f32 %v6260_v35, %v6318_v23  ;;  %v519_v36 = vmul.f32 %v6255_v19, %v10468_v20  ;;  %10470 = vst [vmem:[#allocation79_spill] sm:$0xff] %v6490_v31 }
 0x199   : > { %10460 = vst [vmem:[#allocation89_spill] sm:$0xff] %v6462_v46  ;;  %v1119_v2 = vpop.f32.mrf.mxu0  ;;  %v1175_v12 = vmul.f32 0.5, %v1143_v58  ;;  %v1174_v34 = vmul.f32 0.5, %v1142_v38  ;;  %v512_v49 = vmul.f32 %v6255_v19, %v6310_v28  ;;  %v1265_v9 = vmul.f32 0.0, %v1241_v63 }
 0x19a   : > { %v1153_v26 = vadd.f32 %v1119_v2, %v6377_v42  ;;  %v4732_v43 = vpop.eup %4731  ;;  %v10467_v42 = vld [vmem:[#allocation13_spill] sm:$0xff]  ;;  %v1156_v53 = vmul.f32 0.5, %v1124_v22  ;;  %v888_v8 = vadd.f32 %v856_v1, %v6416_v21  ;;  %v874_v37 = vmul.f32 %v6260_v35, %v6300_v16 }
 0x19b   : > { %v4734_v56 = vpop.eup %4733  ;;  %v1122_v55 = vadd.f32 %v10467_v42, %v880_v32  ;;  %v1272_v51 = vmul.f32 %v4732_v43, %v6369_v7  ;;  %v867_v32 = vmul.f32 %v6260_v35, %v6411_v14  ;;  %v10472_v43 = vld [vmem:[#allocation39_spill] sm:$0xff] }
 0x19c   : > { %4737 = vtanh.f32 %v1153_v26  ;;  %v1271_v30 = vmul.f32 %v4734_v56, %v6373_v57  ;;  %v4736_v2 = vpop.eup %4735  ;;  %v1131_v57 = vadd.f32 %v10472_v43, %v889_v15  ;;  %v873_v43 = vmul.f32 %v6260_v35, %v6358_v18 }
 0x19d   : > { %4739 = vtanh.f32 %v1155_v27  ;;  %v711_v27 = vadd.f32 %v6379_v40, %v519_v36  ;;  %v6492_v58 = vadd.f32 %v1272_v51, %v1264_v44  ;;  %v6501_v48 = vpop.permute.xlu0 %612  ;;  %v1270_v22 = vmul.f32 %v4736_v2, %v6406_v4  ;;  %v10477_v51 = vld [vmem:[#allocation96_spill] sm:$0xff]  ;;  %v10478_v4 = vld [vmem:[#allocation35_spill] sm:$0xff] }
 0x19e   : > { %4741 = vtanh.f32 %v1149_v17  ;;  %v1154_v17 = vmul.f32 0.5, %v1122_v55  ;;  %10473 = vst [vmem:[#allocation13_spill] sm:$0xff] %v6501_v48  ;;  %v6505_v56 = vadd.f32 %v1271_v30, %v6413_v29  ;;  %v1237_v44 = vadd.f32 0.5, %v1213_v3  ;;  %v10476_v55 = vld [vmem:[#allocation75_spill] sm:$0xff] }
 0x19f   : > { %4743 = vtanh.f32 %v1177_v5  ;;  %10471 = vst [vmem:[#allocation19_spill] sm:$0xff] %v6492_v58  ;;  %v906_v15 = vadd.f32 %v874_v37, %v711_v27  ;;  %v517_v36 = vmul.f32 %v6255_v19, %v6331_v10  ;;  %v1130_v29 = vadd.f32 %v10478_v4, %v888_v8 }
 0x1a0   : > { %4745 = vtanh.f32 %v1176_v11  ;;  %v6484_v25 = vpop.permute.xlu1 %622  ;;  %10474 = vst [vmem:[#allocation39_spill] sm:$0xff] %v6505_v56  ;;  %v6521_v2 = vadd.f32 %v1270_v22, %v6408_v0 }
 0x1a1   : > { %10469 = vst [vmem:[#allocation82_spill] sm:$0xff] %v6484_v25  ;;  %v704_v7 = vadd.f32 %v6484_v25, %v512_v49  ;;  %4747 = vtanh.f32 %v1175_v12  ;;  %v518_v12 = vmul.f32 %v6255_v19, %v10477_v51  ;;  %v1163_v49 = vmul.f32 0.5, %v1131_v57  ;;  %v10556_v25 = vld [vmem:[#allocation25_spill] sm:$0xff] }
 0x1a2   : > { %v4738_v26 = vpop.eup %4737  ;;  %4749 = vtanh.f32 %v1174_v34  ;;  %10479 = vst [vmem:[#allocation75_spill] sm:$0xff] %v6521_v2  ;;  %v1162_v37 = vmul.f32 0.5, %v1130_v29 }
 0x1a3   : > { %v6496_v5 = vpop.eup %4739  ;;  %v1273_v38 = vmul.f32 %v4738_v26, %v6394_v33  ;;  %v899_v63 = vadd.f32 %v867_v32, %v704_v7  ;;  %4751 = vtanh.f32 %v1156_v53  ;;  %v710_v30 = vadd.f32 %v6462_v46, %v518_v12  ;;  %v10563_v46 = vld [vmem:[#allocation37_spill] sm:$0xff] }
 0x1a4   : > { %v4742_v11 = vpop.eup %4741  ;;  %4753 = vtanh.f32 %v1154_v17  ;;  %v709_v7 = vadd.f32 %v6418_v52, %v517_v36  ;;  %v1148_v17 = vadd.f32 %v6306_v13, %v906_v15  ;;  %v1212_v36 = vmul.f32 0.5, %v6439_v24 }
 0x1a5   : > { %v4744_v21 = vpop.eup %4743  ;;  %v6507_v42 = vadd.f32 %v1273_v38, %v1265_v9  ;;  %v1141_v1 = vadd.f32 %v10476_v55, %v899_v63  ;;  %4755 = vtanh.f32 %v6492_v58  ;;  %v1269_v3 = vmul.f32 %v4742_v11, %v6402_v47 }
 0x1a6   : > { %v4746_v33 = vpop.eup %4745  ;;  %v1225_v53 = vmul.f32 0.5, %v4744_v21  ;;  %v1261_v47 = vmul.f32 0.0, %v1237_v44  ;;  %v509_v11 = vmul.f32 %v6255_v19, %v6490_v31  ;;  %v905_v13 = vadd.f32 %v873_v43, %v710_v30  ;;  %v6537_v44 = vpop.permute.xlu0 %785 }
 0x1a7   : > { %10475 = vst [vmem:[#allocation110_spill] sm:$0xff] %v6507_v42  ;;  %4757 = vtanh.f32 %v6507_v42  ;;  %v1173_v34 = vmul.f32 0.5, %v1141_v1  ;;  %v4748_v9 = vpop.eup %4747  ;;  %v1224_v8 = vmul.f32 0.5, %v4746_v33  ;;  %v6539_v21 = vpop.permute.xlu2 %607 }
 0x1a8   : > { %4759 = vtanh.f32 %v6505_v56  ;;  %v4750_v27 = vpop.eup %4749  ;;  %v1223_v38 = vmul.f32 0.5, %v4748_v9  ;;  %v6533_v63 = vadd.f32 %v1269_v3, %v1261_v47  ;;  %10482 = vst [vmem:[#allocation112_spill] sm:$0xff] %v6537_v44  ;;  %v1249_v15 = vadd.f32 0.5, %v1225_v53  ;;  %v10484_v47 = vld [vmem:[#allocation97_spill] sm:$0xff] }
 0x1a9   : > { %v6524_v32 = vpop.permute.xlu1 %817  ;;  %4761 = vtanh.f32 %v1173_v34  ;;  %v4752_v26 = vpop.eup %4751  ;;  %10483 = vst [vmem:[#allocation113_spill] sm:$0xff] %v6539_v21  ;;  %v1222_v55 = vmul.f32 0.5, %v4750_v27  ;;  %v1248_v3 = vadd.f32 0.5, %v1224_v8  ;;  %v511_v34 = vmul.f32 %v6255_v19, %v6371_v45 }
 0x1aa   : > { %10480 = vst [vmem:[#allocation35_spill] sm:$0xff] %v6524_v32  ;;  %v872_v57 = vmul.f32 %v6260_v35, %v6524_v32  ;;  %v6531_v0 = vpop.eup %4753  ;;  %4763 = vtanh.f32 %v1163_v49  ;;  %v1204_v12 = vmul.f32 0.5, %v4752_v26  ;;  %v1247_v9 = vadd.f32 0.5, %v1223_v38 }
 0x1ab   : > { %10481 = vst [vmem:[#allocation111_spill] sm:$0xff] %v6533_v63  ;;  %v4756_v22 = vpop.eup %4755  ;;  %4765 = vtanh.f32 %v6521_v2  ;;  %v701_v30 = vadd.f32 %v6539_v21, %v509_v11  ;;  %v864_v53 = vmul.f32 %v6260_v35, %v6537_v44  ;;  %v1246_v24 = vadd.f32 0.5, %v1222_v55  ;;  %v10542_v2 = vld [vmem:[#allocation8_spill] sm:$0xff] }
 0x1ac   : > { %v904_v33 = vadd.f32 %v872_v57, %v709_v7  ;;  %4767 = vtanh.f32 %v1148_v17  ;;  %v1296_v27 = vmul.f32 %v4756_v22, %v1248_v3  ;;  %v1147_v17 = vadd.f32 %v10484_v47, %v905_v13  ;;  %v10486_v57 = vld [vmem:[#allocation93_spill] sm:$0xff]  ;;  %v10559_v21 = vld [vmem:[#allocation24_spill] sm:$0xff] }
 0x1ad   : > { %v4758_v1 = vpop.eup %4757  ;;  %4769 = vtanh.f32 %v1162_v37  ;;  %v703_v11 = vadd.f32 %v6466_v6, %v511_v34  ;;  %v1228_v22 = vadd.f32 0.5, %v1204_v12  ;;  %v1236_v55 = vadd.f32 0.5, %v1212_v36 }
 0x1ae   : > { %v4760_v4 = vpop.eup %4759  ;;  %v1297_v29 = vmul.f32 %v4758_v1, %v1249_v15  ;;  %4771 = vtanh.f32 %v6533_v63  ;;  %v1146_v8 = vadd.f32 %v10486_v57, %v904_v33  ;;  %v896_v47 = vadd.f32 %v864_v53, %v701_v30 }
 0x1af   : > { %v4762_v49 = vpop.eup %4761  ;;  %v1295_v38 = vmul.f32 %v4760_v4, %v1247_v9  ;;  %4773 = vtanh.f32 %v1147_v17  ;;  %v10487_v4 = vld [vmem:[#allocation71_spill] sm:$0xff]  ;;  %v510_v34 = vmul.f32 %v6255_v19, %v6460_v41  ;;  %v1203_v12 = vmul.f32 0.5, %v6496_v5  ;;  %v10575_v41 = vld [vmem:[#allocation34_spill] sm:$0xff] }
 0x1b0   : > { %1438 = vmatpush.msra.mxu1 %v1297_v29  ;;  %v1221_v7 = vmul.f32 0.5, %v4762_v49  ;;  %v4764_v26 = vpop.eup %4763  ;;  %4775 = vtanh.f32 %v1146_v8  ;;  %v1202_v30 = vmul.f32 0.5, %v6531_v0 }
 0x1b1   : > { %v6550_v43 = vpop.permute.xlu1 %793  ;;  %v4766_v37 = vpop.eup %4765  ;;  %v1211_v36 = vmul.f32 0.5, %v4764_v26  ;;  %v1227_v26 = vadd.f32 0.5, %v1203_v12 }
 0x1b2   : > { %10485 = vst [vmem:[#allocation97_spill] sm:$0xff] %v6550_v43  ;;  %1439 = vmatpush.msra.mxu1 %v1296_v27  ;;  %v1245_v15 = vadd.f32 0.5, %v1221_v7  ;;  %v866_v1 = vmul.f32 %v6260_v35, %v6550_v43  ;;  %v4768_v29 = vpop.eup %4767  ;;  %v1294_v13 = vmul.f32 %v4766_v37, %v1246_v24  ;;  %v1260_v7 = vmul.f32 0.0, %v1236_v55  ;;  %v10488_v24 = vld [vmem:[#allocation64_spill] sm:$0xff] }
 0x1b3   : > { %v4770_v3 = vpop.eup %4769  ;;  %v1268_v27 = vmul.f32 %v4768_v29, %v1228_v22  ;;  %v1138_v37 = vadd.f32 %v10488_v24, %v896_v47  ;;  %v1226_v29 = vadd.f32 0.5, %v1202_v30  ;;  %v10491_v55 = vld [vmem:[#allocation68_spill] sm:$0xff] }
 0x1b4   : > { %1440 = vmatpush.msra.mxu1 %v1295_v38  ;;  %v898_v49 = vadd.f32 %v866_v1, %v703_v11  ;;  %v4772_v63 = vpop.eup %4771  ;;  %v1210_v53 = vmul.f32 0.5, %v4770_v3  ;;  %v702_v38 = vadd.f32 %v6501_v48, %v510_v34  ;;  %v10557_v48 = vld [vmem:[#allocation31_spill] sm:$0xff] }
 0x1b5   : > { %v1293_v33 = vmul.f32 %v4772_v63, %v1245_v15  ;;  %v4774_v63 = vpop.eup %4773  ;;  %v6564_v8 = vadd.f32 %v1268_v27, %v1260_v7  ;;  %v1235_v15 = vadd.f32 0.5, %v1211_v36  ;;  %v1170_v1 = vmul.f32 0.5, %v1138_v37 }
 0x1b6   : > { %1441 = vmatpush.msra.mxu1 %v1294_v13  ;;  %v1140_v9 = vadd.f32 %v10487_v4, %v898_v49  ;;  %v4776_v5 = vpop.eup %4775  ;;  %v1234_v22 = vadd.f32 0.5, %v1210_v53  ;;  %v1267_v0 = vmul.f32 %v4774_v63, %v1227_v26  ;;  %v6580_v26 = vld [vmem:[%s9958_s2] sm:$0xff] }
 0x1b7   : > { %10490 = vst [vmem:[#allocation71_spill] sm:$0xff] %v6564_v8  ;;  %v1266_v13 = vmul.f32 %v4776_v5, %v1226_v29  ;;  %v1259_v49 = vmul.f32 0.0, %v1235_v15  ;;  %v6587_v15 = vld [vmem:[%s9958_s2 + $0x8] sm:$0xff]  ;;  %v6608_v29 = vld [vmem:[%s9958_s2 + $0x20] sm:$0xff] }
 0x1b8   : > { %1442 = vmatpush.msra.mxu1 %v1293_v33  ;;  %v1172_v57 = vmul.f32 0.5, %v1140_v9  ;;  %v1258_v4 = vmul.f32 0.0, %v1234_v22  ;;  %10494 = vst [vmem:[#allocation114_spill] sm:$0xff] %v6580_v26  ;;  %v6615_v22 = vld [vmem:[%s9958_s2 + $0x28] sm:$0xff] }
 0x1b9   : > { %v6562_v17 = vpop.permute.xlu1 %789  ;;  %10495 = vst [vmem:[#allocation115_spill] sm:$0xff] %v6587_v15 }
 0x1ba   : > { %10489 = vst [vmem:[#allocation93_spill] sm:$0xff] %v6562_v17  ;;  %4777 = vtanh.f32 %v1172_v57  ;;  %v865_v19 = vmul.f32 %v6260_v35, %v6562_v17  ;;  %v6571_v35 = vadd.f32 %v1267_v0, %v1259_v49  ;;  %v6573_v27 = vadd.f32 %v1266_v13, %v1258_v4  ;;  %v6622_v0 = vld [vmem:[%s9958_s2 + $0x30] sm:$0xff]  ;;  %v6643_v13 = vld [vmem:[%s9958_s2 + $0x48] sm:$0xff] }
 0x1bb   : > { %4779 = vtanh.f32 %v6564_v8  ;;  %10498 = vst [vmem:[#allocation118_spill] sm:$0xff] %v6608_v29  ;;  %v6650_v49 = vld [vmem:[%s9958_s2 + $0x50] sm:$0xff]  ;;  %v6671_v4 = vld [vmem:[%s9958_s2 + $0x68] sm:$0xff] }
 0x1bc   : > { %v897_v11 = vadd.f32 %v865_v19, %v702_v38  ;;  %4781 = vtanh.f32 %v1170_v1  ;;  %10492 = vst [vmem:[#allocation64_spill] sm:$0xff] %v6571_v35  ;;  %v6601_v1 = vld [vmem:[%s9958_s2 + $0x18] sm:$0xff] }
 0x1bd   : > { %10493 = vst [vmem:[#allocation68_spill] sm:$0xff] %v6573_v27 }
 0x1be   : > { %v1139_v3 = vadd.f32 %v10491_v55, %v897_v11  ;;  %v6594_v11 = vld [vmem:[%s9958_s2 + $0x10] sm:$0xff]  ;;  %10497 = vst [vmem:[#allocation117_spill] sm:$0xff] %v6601_v1  ;;  %v6629_v55 = vld [vmem:[%s9958_s2 + $0x38] sm:$0xff] }
 0x1bf   : > { %10496 = vst [vmem:[#allocation116_spill] sm:$0xff] %v6594_v11 }
 0x1c0   : > { %v4778_v47 = vpop.eup %4777  ;;  %v1171_v33 = vmul.f32 0.5, %v1139_v3  ;;  %10499 = vst [vmem:[#allocation119_spill] sm:$0xff] %v6615_v22  ;;  %v6636_v3 = vld [vmem:[%s9958_s2 + $0x40] sm:$0xff] }
 0x1c1   : > { %v1220_v9 = vmul.f32 0.5, %v4778_v47  ;;  %v4780_v7 = vpop.eup %4779  ;;  %10500 = vst [vmem:[#allocation120_spill] sm:$0xff] %v6622_v0  ;;  %v6657_v47 = vld [vmem:[%s9958_s2 + $0x58] sm:$0xff] }
 0x1c2   : > { %4783 = vtanh.f32 %v1171_v33  ;;  %v4782_v36 = vpop.eup %4781  ;;  %10501 = vst [vmem:[#allocation121_spill] sm:$0xff] %v6629_v55  ;;  %v6664_v33 = vld [vmem:[%s9958_s2 + $0x60] sm:$0xff] }
 0x1c3   : > { %v1244_v34 = vadd.f32 0.5, %v1220_v9  ;;  %4785 = vtanh.f32 %v6571_v35  ;;  %v1218_v37 = vmul.f32 0.5, %v4782_v36  ;;  %10502 = vst [vmem:[#allocation122_spill] sm:$0xff] %v6636_v3  ;;  %v6678_v9 = vld [vmem:[%s9958_s2 + $0x70] sm:$0xff]  ;;  %v10541_v35 = vld [vmem:[#allocation42_spill] sm:$0xff] }
 0x1c4   : > { %4787 = vtanh.f32 %v6573_v27  ;;  %10503 = vst [vmem:[#allocation123_spill] sm:$0xff] %v6643_v13  ;;  %v6837_v27 = vld [vmem:[%s5647_s27 + $0x9] ss:$0 sm:$0xff] }
 0x1c5   : > { %v1292_v12 = vmul.f32 %v4780_v7, %v1244_v34  ;;  %v1242_v19 = vadd.f32 0.5, %v1218_v37  ;;  %10504 = vst [vmem:[#allocation124_spill] sm:$0xff] %v6650_v49  ;;  %v6685_v34 = vld [vmem:[%s9958_s2 + $0x78] sm:$0xff]  ;;  %v6712_v37 = vld [vmem:[%s9958_s2 + $0x90] sm:$0xff] }
 0x1c6   : > { %10505 = vst [vmem:[#allocation125_spill] sm:$0xff] %v6657_v47 }
 0x1c7   : > { %1443 = vmatpush.msra.mxu1 %v1292_v12  ;;  %10506 = vst [vmem:[#allocation126_spill] sm:$0xff] %v6664_v33  ;;  %v6694_v12 = vld [vmem:[%s9958_s2 + $0x80] sm:$0xff] }
 0x1c8   : > { %v4784_v57 = vpop.eup %4783  ;;  %10507 = vst [vmem:[#allocation127_spill] sm:$0xff] %v6671_v4 }
 0x1c9   : > { %v1219_v24 = vmul.f32 0.5, %v4784_v57  ;;  %v4786_v30 = vpop.eup %4785  ;;  %10508 = vst [vmem:[#allocation128_spill] sm:$0xff] %v6678_v9  ;;  %v6703_v57 = vld [vmem:[%s9958_s2 + $0x88] sm:$0xff] }
 0x1ca   : > { %v4788_v63 = vpop.eup %4787  ;;  %10509 = vst [vmem:[#allocation129_spill] sm:$0xff] %v6685_v34 }
 0x1cb   : > { %v1243_v53 = vadd.f32 0.5, %v1219_v24  ;;  %v1290_v5 = vmul.f32 %v4788_v63, %v1242_v19  ;;  %10510 = vst [vmem:[#allocation130_spill] sm:$0xff] %v6694_v12 }
 0x1cc   : > { %10511 = vst [vmem:[#allocation131_spill] sm:$0xff] %v6703_v57 }
 0x1cd   : > { %v1291_v38 = vmul.f32 %v4786_v30, %v1243_v53  ;;  %10512 = vst [vmem:[#allocation132_spill] sm:$0xff] %v6712_v37  ;;  %v6721_v53 = vld [vmem:[%s9958_s2 + $0x98] sm:$0xff] }
 0x1ce   : > { %10513 = vst [vmem:[#allocation133_spill] sm:$0xff] %v6721_v53 }
 0x1cf   : > { %1444 = vmatpush.msra.mxu1 %v1291_v38  ;;  %v6730_v38 = vld [vmem:[%s9958_s2 + $0xa0] sm:$0xff] }
 0x1d0   : > { %10514 = vst [vmem:[#allocation134_spill] sm:$0xff] %v6730_v38 }
 0x1d1   : > { %1445 = vmatpush.msra.mxu1 %v1290_v5  ;;  %v6739_v5 = vld [vmem:[%s9958_s2 + $0xa8] sm:$0xff] }
 0x1d2   : > { %4378 = vmatmul.msk.f32.vlgmr.msra.gmra.mxu1 %vm912_vm0, %v6580_v26  ;;  %10515 = vst [vmem:[#allocation135_spill] sm:$0xff] %v6739_v5 }
 0x1da   : > { %4379 = vmatmul.msk.f32.gmra.mxu1 %vm912_vm0, %v6587_v15 }
 0x1e2   : > { %4380 = vmatmul.msk.f32.gmra.mxu1 %vm912_vm0, %v6594_v11  ;;  %v6830_v11 = vld [vmem:[%s5647_s27 + $0x1] ss:$0 sm:$0xff] }
 0x1e3   : > { %v1307_v8 = vmul.f32 %v6830_v11, %v10541_v35  ;;  %v1305_v42 = vmul.f32 %v6830_v11, %v10542_v2  ;;  %v10548_v35 = vld [vmem:[#allocation23_spill] sm:$0xff]  ;;  %v10552_v2 = vld [vmem:[#allocation14_spill] sm:$0xff] }
 0x1ea   : > { %4381 = vmatmul.msk.f32.gmra.mxu1 %vm912_vm0, %v6601_v1 }
 0x1f2   : > { %4382 = vmatmul.msk.f32.gmra.mxu1 %vm912_vm0, %v6608_v29 }
 0x1fa   : > { %4383 = vmatmul.msk.f32.gmra.mxu1 %vm912_vm0, %v6615_v22 }
 0x202   : > { %4384 = vmatmul.msk.f32.gmra.mxu1 %vm912_vm0, %v6622_v0 }
 0x20a   : > { %4385 = vmatmul.msk.f32.gmra.mxu1 %vm912_vm0, %v6629_v55 }
 0x212   : > { %4386 = vmatmul.msk.f32.gmra.mxu1 %vm912_vm0, %v6636_v3 }
 0x21a   : > { %4387 = vmatmul.msk.f32.gmra.mxu1 %vm912_vm0, %v6643_v13  ;;  %v10528_v13 = vld [vmem:[#allocation56_spill] sm:$0xff] }
 0x222   : > { %4388 = vmatmul.msk.f32.gmra.mxu1 %vm912_vm0, %v6650_v49  ;;  %v10526_v49 = vld [vmem:[#allocation52_spill] sm:$0xff] }
 0x22a   : > { %4389 = vmatmul.msk.f32.gmra.mxu1 %vm912_vm0, %v6657_v47 }
 0x232   : > { %4390 = vmatmul.msk.f32.gmra.mxu1 %vm912_vm0, %v6664_v33  ;;  %v10524_v33 = vld [vmem:[#allocation48_spill] sm:$0xff] }
 0x23a   : > { %4391 = vmatmul.msk.f32.gmra.mxu1 %vm912_vm0, %v6671_v4  ;;  %v6793_v4 = vld [vmem:[%s9958_s2 + $0xd8] sm:$0xff] }
 0x23b   : > { %10522 = vst [vmem:[#allocation142_spill] sm:$0xff] %v6793_v4 }
 0x242   : > { %4392 = vmatmul.msk.f32.gmra.mxu1 %vm912_vm0, %v6678_v9  ;;  %v6784_v9 = vld [vmem:[%s9958_s2 + $0xd0] sm:$0xff] }
 0x243   : > { %10520 = vst [vmem:[#allocation140_spill] sm:$0xff] %v6784_v9 }
 0x24a   : > { %4393 = vmatmul.msk.f32.gmra.mxu1 %vm912_vm0, %v6685_v34  ;;  %v6775_v34 = vld [vmem:[%s9958_s2 + $0xc8] sm:$0xff] }
 0x24b   : > { %10519 = vst [vmem:[#allocation139_spill] sm:$0xff] %v6775_v34 }
 0x24f   : > { %v6689_v7 = vpop.f32.mrf.mxu1 }
 0x252   : > { %4394 = vmatmul.msk.f32.gmra.mxu1 %vm912_vm0, %v6694_v12  ;;  %v6766_v12 = vld [vmem:[%s9958_s2 + $0xc0] sm:$0xff] }
 0x253   : > { %10518 = vst [vmem:[#allocation138_spill] sm:$0xff] %v6766_v12 }
 0x257   : > { %v6698_v36 = vpop.f32.mrf.mxu1 }
 0x25a   : > { %4395 = vmatmul.msk.f32.gmra.mxu1 %vm912_vm0, %v6703_v57  ;;  %v6757_v57 = vld [vmem:[%s9958_s2 + $0xb8] sm:$0xff] }
 0x25b   : > { %10517 = vst [vmem:[#allocation137_spill] sm:$0xff] %v6757_v57 }
 0x25f   : > { %v6707_v24 = vpop.f32.mrf.mxu1 }
 0x262   : > { %4396 = vmatmul.msk.f32.gmra.mxu1 %vm912_vm0, %v6712_v37  ;;  %v6748_v37 = vld [vmem:[%s9958_s2 + $0xb0] sm:$0xff] }
 0x263   : > { %10516 = vst [vmem:[#allocation136_spill] sm:$0xff] %v6748_v37 }
 0x267   : > { %v6716_v30 = vpop.f32.mrf.mxu1 }
 0x26a   : > { %4397 = vmatmul.msk.f32.gmra.mxu1 %vm912_vm0, %v6721_v53 }
 0x26f   : > { %v6725_v63 = vpop.f32.mrf.mxu1 }
 0x272   : > { %4398 = vmatmul.msk.f32.gmra.mxu1 %vm912_vm0, %v6730_v38 }
 0x277   : > { %v6734_v19 = vpop.f32.mrf.mxu1 }
 0x27a   : > { %4399 = vmatmul.msk.f32.gmra.mxu1 %vm912_vm0, %v6739_v5 }
 0x27f   : > { %v6743_v53 = vpop.f32.mrf.mxu1 }
 0x282   : > { %4400 = vmatmul.msk.f32.gmra.mxu1 %vm912_vm0, %v6748_v37 }
 0x287   : > { %v6752_v38 = vpop.f32.mrf.mxu1 }
 0x28a   : > { %4401 = vmatmul.msk.f32.gmra.mxu1 %vm912_vm0, %v6757_v57 }
 0x28f   : > { %v6761_v5 = vpop.f32.mrf.mxu1 }
 0x292   : > { %4402 = vmatmul.msk.f32.gmra.mxu1 %vm912_vm0, %v6766_v12 }
 0x297   : > { %v6770_v37 = vpop.f32.mrf.mxu1 }
 0x29a   : > { %4403 = vmatmul.msk.f32.gmra.mxu1 %vm912_vm0, %v6775_v34 }
 0x29f   : > { %v6779_v57 = vpop.f32.mrf.mxu1 }
 0x2a2   : > { %4404 = vmatmul.msk.f32.gmra.mxu1 %vm912_vm0, %v6784_v9 }
 0x2a7   : > { %v6788_v12 = vpop.f32.mrf.mxu1 }
 0x2a8   : > { %10521 = vst [vmem:[#allocation141_spill] sm:$0xff] %v6788_v12 }
 0x2aa   : > { %4405 = vmatmul.msk.f32.gmra.mxu1 %vm912_vm0, %v6793_v4  ;;  %v10530_v4 = vld [vmem:[#allocation61_spill] sm:$0xff] }
 0x2af   : > { %v6797_v34 = vpop.f32.mrf.mxu1 }
 0x2b0   : > { %10523 = vst [vmem:[#allocation143_spill] sm:$0xff] %v6797_v34  ;;  %v10584_v34 = vld [vmem:[#allocation44_spill] sm:$0xff] }
 0x2b2   : > { %4406 = vmatmul.msk.f32.gmra.mxu1 %vm912_vm0, %v10524_v33 }
 0x2b7   : > { %v6801_v47 = vpop.f32.mrf.mxu1 }
 0x2b8   : > { %10525 = vst [vmem:[#allocation48_spill] sm:$0xff] %v6801_v47 }
 0x2ba   : > { %4407 = vmatmul.msk.f32.gmra.mxu1 %vm912_vm0, %v10526_v49 }
 0x2bf   : > { %v6805_v9 = vpop.f32.mrf.mxu1 }
 0x2c0   : > { %10527 = vst [vmem:[#allocation52_spill] sm:$0xff] %v6805_v9 }
 0x2c2   : > { %4408 = vmatmul.msk.f32.gmra.mxu1 %vm912_vm0, %v10528_v13 }
 0x2c7   : > { %v6809_v3 = vpop.f32.mrf.mxu1 }
 0x2c8   : > { %10529 = vst [vmem:[#allocation56_spill] sm:$0xff] %v6809_v3 }
 0x2ca   : > { %4409 = vmatmul.msk.f32.gmra.mxu1 %vm912_vm0, %v10530_v4  ;;  %v10540_v4 = vld [vmem:[#allocation9_spill] sm:$0xff] }
 0x2cb   : > { %v1306_v26 = vmul.f32 %v6830_v11, %v10540_v4  ;;  %v10546_v4 = vld [vmem:[#allocation20_spill] sm:$0xff] }
 0x2cf   : > { %v6813_v55 = vpop.f32.mrf.mxu1 }
 0x2d0   : > { %10531 = vst [vmem:[#allocation61_spill] sm:$0xff] %v6813_v55  ;;  %v1315_v55 = vmul.f32 %v6830_v11, %v6094_v50  ;;  %v10549_v50 = vld [vmem:[#allocation6_spill] sm:$0xff] }
 0x2d1   : > { %v1339_v17 = vadd.f32 %v1307_v8, %v10549_v50  ;;  %v10554_v50 = vld [vmem:[#allocation15_spill] sm:$0xff] }
 0x2d7   : > { %v6815_v0 = vpop.f32.mrf.mxu1 }
 0x2d8   : > { %10532 = vst [vmem:[#allocation144_spill] sm:$0xff] %v6815_v0  ;;  %v10543_v0 = vld [vmem:[#allocation22_spill] sm:$0xff] }
 0x2d9   : > { %v1372_v56 = vmul.f32 %v6837_v27, %v10543_v0  ;;  %v1331_v0 = vmul.f32 %v6830_v11, %v6137_v62  ;;  %v10555_v62 = vld [vmem:[#allocation18_spill] sm:$0xff] }
 0x2df   : > { %v6817_v33 = vpop.f32.mrf.mxu1 }
 0x2e0   : > { %10533 = vst [vmem:[#allocation145_spill] sm:$0xff] %v6817_v33  ;;  %v10544_v33 = vld [vmem:[#allocation17_spill] sm:$0xff] }
 0x2e1   : > { %v1313_v58 = vmul.f32 %v6830_v11, %v10544_v33  ;;  %v1314_v33 = vmul.f32 %v6830_v11, %v5850_v59  ;;  %v1304_v59 = vmul.f32 %v6830_v11, %v10556_v25 }
 0x2e3   : > { %v1345_v32 = vadd.f32 %v1313_v58, %v10555_v62  ;;  %v10562_v62 = vld [vmem:[#allocation33_spill] sm:$0xff] }
 0x2e4   : > { %v1367_v25 = vmul.f32 %v6837_v27, %v10562_v62  ;;  %v10570_v62 = vld [vmem:[#allocation32_spill] sm:$0xff] }
 0x2e7   : > { %v6819_v22 = vpop.f32.mrf.mxu1 }
 0x2e8   : > { %10534 = vst [vmem:[#allocation146_spill] sm:$0xff] %v6819_v22  ;;  %v1373_v22 = vmul.f32 %v6837_v27, %v10546_v4 }
 0x2ef   : > { %v6821_v49 = vpop.f32.mrf.mxu1 }
 0x2f0   : > { %10535 = vst [vmem:[#allocation147_spill] sm:$0xff] %v6821_v49 }
 0x2f7   : > { %v6823_v29 = vpop.f32.mrf.mxu1 }
 0x2f8   : > { %10536 = vst [vmem:[#allocation148_spill] sm:$0xff] %v6823_v29  ;;  %v10547_v29 = vld [vmem:[#allocation28_spill] sm:$0xff] }
 0x2ff   : > { %v6825_v1 = vpop.f32.mrf.mxu1 }
 0x300   : > { %10537 = vst [vmem:[#allocation149_spill] sm:$0xff] %v6825_v1  ;;  %v1337_v1 = vadd.f32 %v1305_v42, %v10547_v29  ;;  %v1381_v42 = vmul.f32 %v6837_v27, %v10552_v2  ;;  %v10553_v29 = vld [vmem:[#allocation21_spill] sm:$0xff]  ;;  %v1330_v2 = vmul.f32 %v6830_v11, %v10559_v21  ;;  %v10566_v21 = vld [vmem:[#allocation40_spill] sm:$0xff] }
 0x307   : > { %v6827_v13 = vpop.f32.mrf.mxu1 }
 0x308   : > { %10538 = vst [vmem:[#allocation150_spill] sm:$0xff] %v6827_v13  ;;  %v1371_v13 = vmul.f32 %v6837_v27, %v10548_v35  ;;  %v1303_v35 = vmul.f32 %v6830_v11, %v10553_v29 }
 0x30a   : > { %v6881_v12 = vadd.f32 %v1371_v13, %v1337_v1  ;;  %v1369_v1 = vmul.f32 %v6837_v27, %v10566_v21  ;;  %v10573_v21 = vld [vmem:[#allocation36_spill] sm:$0xff] }
 0x30b   : > { %v1335_v3 = vadd.f32 %v1303_v35, %v10573_v21  ;;  %v10582_v21 = vld [vmem:[#allocation53_spill] sm:$0xff] }
 0x30f   : > { %v6832_v15 = vpop.f32.mrf.mxu1 }
 0x310   : > { %10539 = vst [vmem:[#allocation151_spill] sm:$0xff] %v6832_v15  ;;  %v10545_v15 = vld [vmem:[#allocation10_spill] sm:$0xff] }
 0x311   : > { %v1338_v49 = vadd.f32 %v1306_v26, %v10545_v15  ;;  %v1380_v26 = vmul.f32 %v6837_v27, %v5852_v60  ;;  %v10551_v15 = vld [vmem:[#allocation7_spill] sm:$0xff]  ;;  %v1379_v60 = vmul.f32 %v6837_v27, %v10557_v48  ;;  %v10564_v48 = vld [vmem:[#allocation29_spill] sm:$0xff] }
 0x312   : > { %v1347_v4 = vadd.f32 %v1315_v55, %v10551_v15  ;;  %v10558_v55 = vld [vmem:[#allocation49_spill] sm:$0xff] }
 0x313   : > { %v6869_v8 = vadd.f32 %v1372_v56, %v1338_v49  ;;  %v1346_v15 = vadd.f32 %v1314_v33, %v10558_v55  ;;  %v6883_v56 = vadd.f32 %v1373_v22, %v1339_v17  ;;  %v10560_v49 = vld [vmem:[#allocation27_spill] sm:$0xff]  ;;  %v1378_v33 = vmul.f32 %v6837_v27, %v10564_v48  ;;  %v10567_v17 = vld [vmem:[#allocation41_spill] sm:$0xff] }
 0x314   : > { %v1363_v29 = vadd.f32 %v1331_v0, %v10560_v49  ;;  %v6893_v55 = vadd.f32 %v1381_v42, %v1347_v4  ;;  %v1370_v22 = vmul.f32 %v6837_v27, %v10567_v17  ;;  %v10568_v0 = vld [vmem:[#allocation38_spill] sm:$0xff]  ;;  %v10572_v4 = vld [vmem:[#allocation47_spill] sm:$0xff] }
 0x315   : > { %v1388_v13 = vmul.f32 %v6837_v27, %v10568_v0  ;;  %v6907_v48 = vadd.f32 %v1380_v26, %v1346_v15  ;;  %v1329_v42 = vmul.f32 %v6830_v11, %v10572_v4  ;;  %v1311_v0 = vmul.f32 %v6830_v11, %v10575_v41  ;;  %v10580_v15 = vld [vmem:[#allocation51_spill] sm:$0xff] }
 0x316   : > { %10565 = vst [vmem:[#allocation153_spill] sm:$0xff] %v6893_v55  ;;  %v10574_v55 = vld [vmem:[#allocation58_spill] sm:$0xff]  ;;  %v1362_v26 = vadd.f32 %v1330_v2, %v10580_v15  ;;  %v10587_v2 = vld [vmem:[#allocation69_spill] sm:$0xff] }
 0x317   : > { %v6856_v43 = vpop.f32.mrf.mxu1  ;;  %v1336_v17 = vadd.f32 %v1304_v59, %v10574_v55  ;;  %v1376_v59 = vmul.f32 %v6837_v27, %v10582_v21  ;;  %v10583_v55 = vld [vmem:[#allocation65_spill] sm:$0xff]  ;;  %v1323_v15 = vmul.f32 %v6830_v11, %v10587_v2  ;;  %v10592_v21 = vld [vmem:[#allocation62_spill] sm:$0xff] }
 0x318   : > { %10550 = vst [vmem:[#allocation152_spill] sm:$0xff] %v6856_v43  ;;  %v1312_v43 = vmul.f32 %v6830_v11, %v10554_v50  ;;  %v10561_v50 = vld [vmem:[#allocation26_spill] sm:$0xff]  ;;  %v1343_v41 = vadd.f32 %v1311_v0, %v10583_v55  ;;  %v10591_v55 = vld [vmem:[#allocation73_spill] sm:$0xff] }
 0x319   : > { %v1397_v58 = vmul.f32 %v6837_v27, %v10561_v50  ;;  %v10569_v50 = vld [vmem:[#allocation30_spill] sm:$0xff]  ;;  %v1402_v35 = vadd.f32 %v1370_v22, %v1336_v17 }
 0x31a   : > { %v1344_v44 = vadd.f32 %v1312_v43, %v10563_v46  ;;  %v1395_v49 = vmul.f32 %v6837_v27, %v10569_v50  ;;  %v1310_v43 = vmul.f32 %v6830_v11, %v10570_v62  ;;  %v6905_v46 = vadd.f32 %v1379_v60, %v1345_v32  ;;  %v10579_v60 = vld [vmem:[#allocation77_spill] sm:$0xff]  ;;  %v10581_v62 = vld [vmem:[#allocation43_spill] sm:$0xff]  ;;  %v10590_v22 = vld [vmem:[#allocation50_spill] sm:$0xff] }
 0x31b   : > { %v6917_v50 = vadd.f32 %v1397_v58, %v1363_v29  ;;  %v1361_v32 = vadd.f32 %v1329_v42, %v10579_v60  ;;  %v1396_v4 = vmul.f32 %v6837_v27, %v10581_v62  ;;  %v1302_v29 = vmul.f32 %v6830_v11, %v10584_v34  ;;  %v10585_v58 = vld [vmem:[#allocation46_spill] sm:$0xff]  ;;  %v10588_v62 = vld [vmem:[#allocation59_spill] sm:$0xff] }
 0x31c   : > { %10571 = vst [vmem:[#allocation154_spill] sm:$0xff] %v6905_v46  ;;  %v6919_v31 = vadd.f32 %v1378_v33, %v1344_v44  ;;  %v1401_v46 = vadd.f32 %v1369_v1, %v1335_v3  ;;  %v1309_v44 = vmul.f32 %v6830_v11, %v10585_v58  ;;  %v10586_v33 = vld [vmem:[#allocation55_spill] sm:$0xff]  ;;  %v1301_v3 = vmul.f32 %v6830_v11, %v10588_v62  ;;  %v10593_v60 = vld [vmem:[#allocation86_spill] sm:$0xff] }
 0x31d   : > { %10577 = vst [vmem:[#allocation156_spill] sm:$0xff] %v6917_v50  ;;  %v1377_v42 = vmul.f32 %v6837_v27, %v10586_v33  ;;  %v10589_v1 = vld [vmem:[#allocation83_spill] sm:$0xff]  ;;  %v1342_v0 = vadd.f32 %v1310_v43, %v10590_v22  ;;  %v1328_v34 = vmul.f32 %v6830_v11, %v10591_v55  ;;  %v1300_v58 = vmul.f32 %v6830_v11, %v10592_v21  ;;  %v10598_v43 = vld [vmem:[#allocation72_spill] sm:$0xff] }
 0x31e   : > { %10578 = vst [vmem:[#allocation157_spill] sm:$0xff] %v6919_v31  ;;  %v1308_v17 = vmul.f32 %v6830_v11, %v10589_v1  ;;  %v1366_v33 = vmul.f32 %v6837_v27, %v10593_v60  ;;  %v6947_v50 = vadd.f32 %v1395_v49, %v1361_v32  ;;  %v6949_v2 = vadd.f32 %v1396_v4, %v1362_v26  ;;  %v10597_v31 = vld [vmem:[#allocation67_spill] sm:$0xff]  ;;  %v10599_v21 = vld [vmem:[#allocation76_spill] sm:$0xff]  ;;  %v10600_v49 = vld [vmem:[#allocation74_spill] sm:$0xff] }
 0x31f   : > { %v6915_v47 = vpop.f32.mrf.mxu1  ;;  %v1368_v1 = vmul.f32 %v6837_v27, %v10597_v31  ;;  %v1408_v40 = vadd.f32 %v1376_v59, %v1342_v0  ;;  %v1322_v22 = vmul.f32 %v6830_v11, %v10598_v43  ;;  %v1332_v55 = vadd.f32 %v1300_v58, %v10456_v54  ;;  %v10601_v32 = vld [vmem:[#allocation63_spill] sm:$0xff]  ;;  %v10604_v59 = vld [vmem:[#allocation57_spill] sm:$0xff] }
 0x320   : > { %10576 = vst [vmem:[#allocation155_spill] sm:$0xff] %v6915_v47  ;;  %v10596_v47 = vld [vmem:[#allocation66_spill] sm:$0xff]  ;;  %v6957_v9 = vadd.f32 %v1377_v42, %v1343_v41  ;;  %v1389_v60 = vmul.f32 %v6837_v27, %v10599_v21  ;;  %v1394_v4 = vmul.f32 %v6837_v27, %v10600_v49  ;;  %v1334_v26 = vadd.f32 %v1302_v29, %v10601_v32  ;;  %v10605_v58 = vld [vmem:[#allocation91_spill] sm:$0xff] }
 0x321   : > { %10594 = vst [vmem:[#allocation158_spill] sm:$0xff] %v6947_v50  ;;  %v1333_v62 = vadd.f32 %v1301_v3, %v10596_v47  ;;  %v10602_v3 = vld [vmem:[#allocation87_spill] sm:$0xff]  ;;  %v10603_v50 = vld [vmem:[#allocation78_spill] sm:$0xff]  ;;  %v1355_v0 = vadd.f32 %v1323_v15, %v10604_v59  ;;  %v1398_v43 = vadd.f32 %v1366_v33, %v1332_v55  ;;  %v6971_v41 = vmul.f32 %v6830_v11, %v10605_v58 }
 0x322   : > { %10595 = vst [vmem:[#allocation159_spill] sm:$0xff] %v6949_v2  ;;  %v1340_v47 = vadd.f32 %v1308_v17, %v10602_v3  ;;  %v1354_v31 = vadd.f32 %v1322_v22, %v10603_v50  ;;  %v6975_v42 = vmul.f32 %v6830_v11, %v10477_v51  ;;  %v10606_v49 = vld [vmem:[#allocation70_spill] sm:$0xff]  ;;  %v1400_v32 = vadd.f32 %v1368_v1, %v1334_v26  ;;  %v10607_v1 = vld [vmem:[#allocation80_spill] sm:$0xff] }
 0x323   : > { %v1360_v21 = vadd.f32 %v1328_v34, %v10606_v49  ;;  %v1399_v29 = vadd.f32 %v1367_v25, %v1333_v62  ;;  %v6980_v17 = vmul.f32 %v6830_v11, %v6310_v28  ;;  %v1324_v15 = vmul.f32 %v6830_v11, %v6331_v10 }
 0x324   : > { %v1543_v55 = vadd.f32 %v6689_v7, %v1398_v43  ;;  %v1375_v33 = vmul.f32 %v6837_v27, %v10461_v39  ;;  %v6987_v22 = vadd.f32 %v1389_v60, %v1355_v0  ;;  %v1318_v62 = vmul.f32 %v6830_v11, %v6371_v45 }
 0x325   : > { %v6989_v51 = vadd.f32 %v1394_v4, %v1360_v21  ;;  %v1544_v34 = vadd.f32 %v6698_v36, %v1399_v29  ;;  %v6994_v25 = vadd.f32 %v1388_v13, %v1354_v31  ;;  %v1327_v26 = vmul.f32 %v6830_v11, %v10607_v1  ;;  %v10608_v31 = vld [vmem:[#allocation98_spill] sm:$0xff] }
 0x326   : > { %v1545_v10 = vadd.f32 %v6707_v24, %v1400_v32  ;;  %v1374_v7 = vmul.f32 %v6837_v27, %v6318_v23  ;;  %v1341_v60 = vadd.f32 %v1309_v44, %v10464_v61  ;;  %v7003_v21 = vadd.f32 %v1324_v15, %v6418_v52  ;;  %v10609_v4 = vld [vmem:[#allocation90_spill] sm:$0xff]  ;;  %v10610_v23 = vld [vmem:[#allocation92_spill] sm:$0xff] }
 0x327   : > { %v6967_v2 = vpop.f32.mrf.mxu1  ;;  %v1546_v36 = vadd.f32 %v6716_v30, %v1401_v46  ;;  %v7007_v43 = vadd.f32 %v1318_v62, %v6466_v6  ;;  %v1359_v13 = vadd.f32 %v1327_v26, %v10608_v31  ;;  %v1393_v0 = vmul.f32 %v6837_v27, %v10609_v4  ;;  %v10611_v46 = vld [vmem:[#allocation94_spill] sm:$0xff] }
 0x328   : > { %v1575_v29 = vmul.f32 0.5, %v1543_v55  ;;  %v1547_v24 = vadd.f32 %v6725_v63, %v1402_v35  ;;  %v1407_v32 = vadd.f32 %v1375_v33, %v1341_v60  ;;  %v1321_v44 = vmul.f32 %v6830_v11, %v10610_v23 }
 0x329   : > { %v1576_v61 = vmul.f32 0.5, %v1544_v34  ;;  %v1548_v15 = vadd.f32 %v6734_v19, %v6881_v12  ;;  %v1387_v30 = vmul.f32 %v6837_v27, %v10611_v46  ;;  %v1326_v62 = vmul.f32 %v6830_v11, %v10468_v20  ;;  %v10612_v19 = vld [vmem:[#allocation102_spill] sm:$0xff] }
 0x32a   : > { %v1577_v4 = vmul.f32 0.5, %v1545_v10  ;;  %v1549_v63 = vadd.f32 %v6743_v53, %v6869_v8  ;;  %v1406_v35 = vadd.f32 %v1374_v7, %v1340_v47  ;;  %v1392_v55 = vmul.f32 %v6837_v27, %v6300_v16  ;;  %v10613_v7 = vld [vmem:[#allocation104_spill] sm:$0xff] }
 0x32b   : > { %v1578_v33 = vmul.f32 0.5, %v1546_v36  ;;  %v1550_v12 = vadd.f32 %v6752_v38, %v6883_v56  ;;  %v1386_v34 = vmul.f32 %v6837_v27, %v10612_v19  ;;  %v7031_v60 = vadd.f32 %v1393_v0, %v1359_v13  ;;  %v10629_v19 = vld [vmem:[#allocation13_spill] sm:$0xff] }
 0x32c   : > { %4789 = vtanh.f32 %v1575_v29  ;;  %v1579_v20 = vmul.f32 0.5, %v1547_v24  ;;  %v1551_v10 = vadd.f32 %v6761_v5, %v1406_v35  ;;  %v1391_v53 = vmul.f32 %v6837_v27, %v6358_v18  ;;  %v10614_v5 = vld [vmem:[#allocation52_spill] sm:$0xff]  ;;  %v10628_v18 = vld [vmem:[#allocation113_spill] sm:$0xff] }
 0x32d   : > { %4791 = vtanh.f32 %v1576_v61  ;;  %v1580_v47 = vmul.f32 0.5, %v1548_v15  ;;  %v1552_v8 = vadd.f32 %v6770_v37, %v1407_v32  ;;  %v1353_v36 = vadd.f32 %v1321_v44, %v10613_v7  ;;  %v10615_v24 = vld [vmem:[#allocation60_spill] sm:$0xff]  ;;  %v10616_v37 = vld [vmem:[#allocation157_spill] sm:$0xff]  ;;  %v10617_v32 = vld [vmem:[#allocation143_spill] sm:$0xff] }
 0x32e   : > { %4793 = vtanh.f32 %v1577_v4  ;;  %v1581_v38 = vmul.f32 0.5, %v1549_v63  ;;  %v1553_v56 = vadd.f32 %v6779_v57, %v1408_v40  ;;  %v7041_v13 = vmul.f32 %v6837_v27, %v6411_v14  ;;  %v10618_v4 = vld [vmem:[#allocation79_spill] sm:$0xff]  ;;  %v10619_v57 = vld [vmem:[#allocation154_spill] sm:$0xff]  ;;  %v10620_v35 = vld [vmem:[#allocation48_spill] sm:$0xff] }
 0x32f   : > { %v7021_v26 = vpop.f32.mrf.mxu1  ;;  %4795 = vtanh.f32 %v1578_v33  ;;  %v1582_v0 = vmul.f32 0.5, %v1550_v12  ;;  %v1557_v29 = vadd.f32 %v10614_v5, %v6907_v48  ;;  %v1358_v61 = vadd.f32 %v1326_v62, %v10615_v24  ;;  %v10621_v33 = vld [vmem:[#allocation16_spill] sm:$0xff]  ;;  %v10624_v24 = vld [vmem:[#allocation109_spill] sm:$0xff] }
 0x330   : > { %4797 = vtanh.f32 %v1579_v20  ;;  %v1583_v15 = vmul.f32 0.5, %v1551_v10  ;;  %v1555_v44 = vadd.f32 %v10617_v32, %v10616_v37  ;;  %v1316_v63 = vmul.f32 %v6830_v11, %v10618_v4  ;;  %v10622_v20 = vld [vmem:[#allocation153_spill] sm:$0xff]  ;;  %v10623_v10 = vld [vmem:[#allocation56_spill] sm:$0xff] }
 0x331   : > { %4799 = vtanh.f32 %v1580_v47  ;;  %v1584_v40 = vmul.f32 0.5, %v1552_v8  ;;  %v1556_v14 = vadd.f32 %v10620_v35, %v10619_v57  ;;  %v1317_v12 = vmul.f32 %v6830_v11, %v10621_v33  ;;  %v10625_v8 = vld [vmem:[#allocation112_spill] sm:$0xff]  ;;  %v10626_v57 = vld [vmem:[#allocation89_spill] sm:$0xff] }
 0x332   : > { %v4790_v48 = vpop.eup %4789  ;;  %4801 = vtanh.f32 %v1581_v38  ;;  %v1585_v62 = vmul.f32 0.5, %v1553_v56  ;;  %v1558_v5 = vadd.f32 %v10623_v10, %v10622_v20  ;;  %v1352_v37 = vadd.f32 %v6971_v41, %v10624_v24  ;;  %v10627_v38 = vld [vmem:[#allocation141_spill] sm:$0xff] }
 0x333   : > { %v4792_v32 = vpop.eup %4791  ;;  %4803 = vtanh.f32 %v1582_v0  ;;  %v1589_v47 = vmul.f32 0.5, %v1557_v29  ;;  %v1382_v4 = vmul.f32 %v6837_v27, %v10625_v8  ;;  %v1357_v35 = vadd.f32 %v6975_v42, %v10626_v57 }
 0x334   : > { %v4794_v11 = vpop.eup %4793  ;;  %4805 = vtanh.f32 %v1583_v15  ;;  %v1554_v56 = vadd.f32 %v10627_v38, %v6957_v9  ;;  %v1587_v33 = vmul.f32 0.5, %v1555_v44  ;;  %v1348_v20 = vadd.f32 %v1316_v63, %v10628_v18  ;;  %v10630_v9 = vld [vmem:[#allocation82_spill] sm:$0xff]  ;;  %v10631_v63 = vld [vmem:[#allocation35_spill] sm:$0xff] }
 0x335   : > { %v4796_v10 = vpop.eup %4795  ;;  %4807 = vtanh.f32 %v1584_v40  ;;  %v1588_v41 = vmul.f32 0.5, %v1556_v14  ;;  %v7065_v24 = vadd.f32 %v1387_v30, %v1353_v36  ;;  %v7067_v0 = vadd.f32 %v1392_v55, %v1358_v61  ;;  %v10632_v61 = vld [vmem:[#allocation97_spill] sm:$0xff] }
 0x336   : > { %v4798_v29 = vpop.eup %4797  ;;  %4809 = vtanh.f32 %v1585_v62  ;;  %v1590_v8 = vmul.f32 0.5, %v1558_v5  ;;  %v1349_v42 = vadd.f32 %v1317_v12, %v10629_v19  ;;  %v7070_v57 = vadd.f32 %v1386_v34, %v1352_v37  ;;  %v10633_v37 = vld [vmem:[#allocation93_spill] sm:$0xff] }
 0x337   : > { %v1534_v7 = vpop.f32.mrf.mxu1  ;;  %v4800_v15 = vpop.eup %4799  ;;  %4811 = vtanh.f32 %v1589_v47  ;;  %v1351_v44 = vadd.f32 %v6980_v17, %v10630_v9  ;;  %v1390_v40 = vmul.f32 %v6837_v27, %v10631_v63  ;;  %v7076_v14 = vadd.f32 %v1391_v53, %v1357_v35  ;;  %v10634_v35 = vld [vmem:[#allocation159_spill] sm:$0xff] }
 0x338   : > { %v4802_v30 = vpop.eup %4801  ;;  %v1586_v55 = vmul.f32 0.5, %v1554_v56  ;;  %4813 = vtanh.f32 %v1587_v33  ;;  %v7078_v36 = vadd.f32 %v1382_v4, %v1348_v20  ;;  %v1384_v12 = vmul.f32 %v6837_v27, %v10632_v61 }
 0x339   : > { %v4804_v34 = vpop.eup %4803  ;;  %v1623_v62 = vmul.f32 0.5, %v4790_v48  ;;  %v1625_v5 = vmul.f32 0.5, %v4794_v11  ;;  %4815 = vtanh.f32 %v1588_v41  ;;  %v1383_v17 = vmul.f32 %v6837_v27, %v10633_v37  ;;  %v10635_v27 = vld [vmem:[#allocation158_spill] sm:$0xff] }
 0x33a   : > { %v4806_v38 = vpop.eup %4805  ;;  %v1626_v63 = vmul.f32 0.5, %v4796_v10  ;;  %v1627_v53 = vmul.f32 0.5, %v4798_v29  ;;  %4817 = vtanh.f32 %v1590_v8  ;;  %v1628_v4 = vmul.f32 0.5, %v4800_v15 }
 0x33b   : > { %v4808_v33 = vpop.eup %4807  ;;  %v1629_v20 = vmul.f32 0.5, %v4802_v30  ;;  %v1417_v9 = vadd.f32 %v7041_v13, %v1351_v44  ;;  %v1422_v61 = vadd.f32 %v1390_v40, %v7003_v21  ;;  %v1630_v11 = vmul.f32 0.5, %v4804_v34 }
 0x33c   : > { %v4810_v48 = vpop.eup %4809  ;;  %4819 = vtanh.f32 %v1586_v55  ;;  %v1416_v41 = vadd.f32 %v1384_v12, %v7007_v43  ;;  %v1572_v37 = vadd.f32 %v1534_v7, %v10635_v27  ;;  %v7089_v10 = vadd.f32 0.5, %v1623_v62  ;;  %v10636_v7 = vld [vmem:[#allocation150_spill] sm:$0xff] }
 0x33d   : > { %v4812_v19 = vpop.eup %4811  ;;  %v7091_v8 = vmul.f32 0.5, %v4792_v32  ;;  %v1415_v29 = vadd.f32 %v1383_v17, %v1349_v42  ;;  %v7093_v30 = vadd.f32 0.5, %v1625_v5  ;;  %v7095_v13 = vadd.f32 0.5, %v1626_v63 }
 0x33e   : > { %v4814_v15 = vpop.eup %4813  ;;  %v1651_v21 = vadd.f32 0.5, %v1627_v53  ;;  %v1571_v44 = vadd.f32 %v7021_v26, %v6989_v51  ;;  %v1652_v43 = vadd.f32 0.5, %v1628_v4  ;;  %v1653_v55 = vadd.f32 0.5, %v1629_v20  ;;  %v10637_v51 = vld [vmem:[#allocation149_spill] sm:$0xff] }
 0x33f   : > { %v1537_v47 = vpop.f32.mrf.mxu1  ;;  %v4816_v40 = vpop.eup %4815  ;;  %v1566_v12 = vadd.f32 %v10636_v7, %v6987_v22  ;;  %v1570_v32 = vadd.f32 %v6967_v2, %v7031_v60  ;;  %v1654_v34 = vadd.f32 0.5, %v1630_v11  ;;  %v7103_v62 = vmul.f32 0.5, %v4806_v38  ;;  %v10638_v22 = vld [vmem:[#allocation155_spill] sm:$0xff]  ;;  %v10639_v2 = vld [vmem:[#allocation156_spill] sm:$0xff]  ;;  %v10641_v11 = vld [vmem:[#allocation146_spill] sm:$0xff] }
 0x340   : > { %v1573_v56 = vadd.f32 %v1537_v47, %v10634_v35  ;;  %v4818_v42 = vpop.eup %4817  ;;  %v1637_v5 = vmul.f32 0.5, %v4812_v19  ;;  %v1632_v63 = vmul.f32 0.5, %v4808_v33  ;;  %v1633_v17 = vmul.f32 0.5, %v4810_v48  ;;  %v10640_v19 = vld [vmem:[#allocation148_spill] sm:$0xff] }
 0x341   : > { %v1635_v47 = vmul.f32 0.5, %v4814_v15  ;;  %v1565_v26 = vadd.f32 %v10637_v51, %v6994_v25  ;;  %v1569_v4 = vadd.f32 %v10638_v22, %v7067_v0  ;;  %v1638_v38 = vmul.f32 0.5, %v4818_v42  ;;  %v10642_v25 = vld [vmem:[#allocation152_spill] sm:$0xff]  ;;  %v10643_v0 = vld [vmem:[#allocation147_spill] sm:$0xff] }
 0x342   : > { %4821 = vtanh.f32 %v1573_v56  ;;  %v4820_v35 = vpop.eup %4819  ;;  %v1636_v56 = vmul.f32 0.5, %v4816_v40  ;;  %v1598_v33 = vmul.f32 0.5, %v1566_v12  ;;  %v1661_v48 = vadd.f32 0.5, %v1637_v5  ;;  %v10644_v22 = vld [vmem:[#allocation151_spill] sm:$0xff] }
 0x343   : > { %4823 = vtanh.f32 %v1572_v37  ;;  %v1564_v37 = vadd.f32 %v10640_v19, %v7065_v24  ;;  %v1562_v27 = vadd.f32 %v10641_v11, %v1417_v9  ;;  %v1568_v15 = vadd.f32 %v10642_v25, %v7076_v14  ;;  %v10645_v19 = vld [vmem:[#allocation19_spill] sm:$0xff] }
 0x344   : > { %4825 = vtanh.f32 %v1571_v44  ;;  %v1657_v40 = vadd.f32 0.5, %v1633_v17  ;;  %v1634_v7 = vmul.f32 0.5, %v4820_v35  ;;  %v1563_v44 = vadd.f32 %v10643_v0, %v7070_v57 }
 0x345   : > { %4827 = vtanh.f32 %v1570_v32  ;;  %v1597_v51 = vmul.f32 0.5, %v1565_v26  ;;  %v1660_v42 = vadd.f32 0.5, %v1636_v56  ;;  %v1659_v12 = vadd.f32 0.5, %v1635_v47 }
 0x346   : > { %v1662_v32 = vadd.f32 0.5, %v1638_v38  ;;  %v1596_v5 = vmul.f32 0.5, %v1564_v37  ;;  %v1685_v14 = vmul.f32 %v1661_v48, %v10645_v19  ;;  %v1594_v35 = vmul.f32 0.5, %v1562_v27  ;;  %v10650_v38 = vld [vmem:[#allocation110_spill] sm:$0xff]  ;;  %v10651_v27 = vld [vmem:[#allocation75_spill] sm:$0xff] }
 0x347   : > { %v1540_v53 = vpop.f32.mrf.mxu1  ;;  %v1658_v57 = vadd.f32 0.5, %v1634_v7  ;;  %v1595_v26 = vmul.f32 0.5, %v1563_v44  ;;  %v10652_v7 = vld [vmem:[#allocation61_spill] sm:$0xff] }
 0x348   : > { %v1574_v60 = vadd.f32 %v1540_v53, %v10639_v2  ;;  %v4822_v20 = vpop.eup %4821  ;;  %v1567_v2 = vadd.f32 %v10644_v22, %v1422_v61  ;;  %v10647_v61 = vld [vmem:[#allocation39_spill] sm:$0xff]  ;;  %v1686_v37 = vmul.f32 %v1662_v32, %v10650_v38  ;;  %v1559_v0 = vadd.f32 %v10652_v7, %v7078_v36 }
 0x349   : > { %v4824_v53 = vpop.eup %4823  ;;  %v1693_v24 = vmul.f32 %v4822_v20, %v1653_v55  ;;  %v10648_v55 = vld [vmem:[#allocation144_spill] sm:$0xff] }
 0x34a   : > { %4829 = vtanh.f32 %v1574_v60  ;;  %v4826_v9 = vpop.eup %4825  ;;  %v10646_v60 = vld [vmem:[#allocation145_spill] sm:$0xff]  ;;  %v1692_v56 = vmul.f32 %v4824_v53, %v1652_v43  ;;  %v1560_v47 = vadd.f32 %v10648_v55, %v1415_v29  ;;  %v10661_v55 = vld [vmem:[#allocation68_spill] sm:$0xff] }
 0x34b   : > { %4831 = vtanh.f32 %v1569_v4  ;;  %v1561_v17 = vadd.f32 %v10646_v60, %v1416_v41  ;;  %v4828_v11 = vpop.eup %4827  ;;  %v1684_v4 = vmul.f32 %v1660_v42, %v10647_v61  ;;  %v7122_v20 = vadd.f32 %v1693_v24, %v1685_v14  ;;  %v10655_v24 = vld [vmem:[#allocation111_spill] sm:$0xff] }
 0x34c   : > { %4833 = vtanh.f32 %v1598_v33  ;;  %v1691_v33 = vmul.f32 %v4826_v9, %v1651_v21  ;;  %v1690_v29 = vmul.f32 %v4828_v11, %v7095_v13  ;;  %v1648_v21 = vadd.f32 0.5, %v7091_v8 }
 0x34d   : > { %4835 = vtanh.f32 %v1568_v15  ;;  %10649 = vst [vmem:[#allocation52_spill] sm:$0xff] %v7122_v20  ;;  %v1683_v15 = vmul.f32 %v1659_v12, %v10651_v27  ;;  %v1593_v43 = vmul.f32 0.5, %v1561_v17  ;;  %v7131_v53 = vadd.f32 %v1692_v56, %v1684_v4 }
 0x34e   : > { %4837 = vtanh.f32 %v1597_v51  ;;  %v1592_v22 = vmul.f32 0.5, %v1560_v47  ;;  %v1682_v36 = vmul.f32 %v1658_v57, %v10655_v24  ;;  %v1591_v9 = vmul.f32 0.5, %v1559_v0  ;;  %v10659_v57 = vld [vmem:[#allocation64_spill] sm:$0xff] }
 0x34f   : > { %4839 = vtanh.f32 %v1567_v2  ;;  %10654 = vst [vmem:[#allocation143_spill] sm:$0xff] %v7131_v53  ;;  %v7138_v32 = vadd.f32 %v1691_v33, %v1683_v15 }
 0x350   : > { %v4830_v25 = vpop.eup %4829  ;;  %4841 = vtanh.f32 %v1596_v5  ;;  %v1655_v5 = vadd.f32 0.5, %v7103_v62  ;;  %v7143_v17 = vadd.f32 %v1690_v29, %v1682_v36 }
 0x351   : > { %v1694_v41 = vmul.f32 %v4830_v25, %v1654_v34  ;;  %v4832_v48 = vpop.eup %4831  ;;  %4843 = vtanh.f32 %v1594_v35  ;;  %v1656_v34 = vadd.f32 0.5, %v1632_v63  ;;  %10656 = vst [vmem:[#allocation154_spill] sm:$0xff] %v7138_v32  ;;  %v10657_v63 = vld [vmem:[#allocation71_spill] sm:$0xff] }
 0x352   : > { %v4834_v44 = vpop.eup %4833  ;;  %4845 = vtanh.f32 %v1595_v26  ;;  %v1689_v12 = vmul.f32 %v4832_v48, %v7093_v30  ;;  %v1681_v14 = vmul.f32 %v1657_v40, %v10657_v63  ;;  %10658 = vst [vmem:[#allocation48_spill] sm:$0xff] %v7143_v17  ;;  %v1679_v47 = vmul.f32 %v1655_v5, %v10661_v55  ;;  %v10672_v55 = vld [vmem:[#allocation122_spill] sm:$0xff] }
 0x353   : > { %v7129_v51 = vadd.f32 %v1694_v41, %v1686_v37  ;;  %v4836_v42 = vpop.eup %4835  ;;  %4847 = vtanh.f32 %v7122_v20  ;;  %v1646_v19 = vmul.f32 0.5, %v4834_v44  ;;  %v1680_v26 = vmul.f32 %v1656_v34, %v10659_v57  ;;  %v10665_v57 = vld [vmem:[#allocation115_spill] sm:$0xff]  ;;  %v10727_v20 = vld [vmem:[#allocation14_spill] sm:$0xff] }
 0x354   : > { %v4838_v2 = vpop.eup %4837  ;;  %v1688_v60 = vmul.f32 %v4836_v42, %v1648_v21  ;;  %v7148_v62 = vadd.f32 %v1689_v12, %v1681_v14 }
 0x355   : > { %10653 = vst [vmem:[#allocation157_spill] sm:$0xff] %v7129_v51  ;;  %4849 = vtanh.f32 %v7129_v51  ;;  %v4840_v13 = vpop.eup %4839  ;;  %v1645_v30 = vmul.f32 0.5, %v4838_v2  ;;  %v1670_v40 = vadd.f32 0.5, %v1646_v19 }
 0x356   : > { %4851 = vtanh.f32 %v1593_v43  ;;  %v4842_v8 = vpop.eup %4841  ;;  %v1687_v56 = vmul.f32 %v4840_v13, %v7089_v10  ;;  %10660 = vst [vmem:[#allocation153_spill] sm:$0xff] %v7148_v62  ;;  %v7152_v38 = vadd.f32 %v1688_v60, %v1680_v26  ;;  %v10666_v26 = vld [vmem:[#allocation116_spill] sm:$0xff] }
 0x357   : > { %4853 = vtanh.f32 %v7131_v53  ;;  %v4844_v35 = vpop.eup %4843  ;;  %v1644_v61 = vmul.f32 0.5, %v4842_v8  ;;  %v1669_v41 = vadd.f32 0.5, %v1645_v30  ;;  %v10724_v53 = vld [vmem:[#allocation11_spill] sm:$0xff] }
 0x358   : > { %4855 = vtanh.f32 %v1592_v22  ;;  %v4846_v11 = vpop.eup %4845  ;;  %10662 = vst [vmem:[#allocation56_spill] sm:$0xff] %v7152_v38  ;;  %v7155_v27 = vadd.f32 %v1687_v56, %v1679_v47  ;;  %v1642_v43 = vmul.f32 0.5, %v4844_v35  ;;  %v10667_v56 = vld [vmem:[#allocation117_spill] sm:$0xff]  ;;  %v10673_v47 = vld [vmem:[#allocation123_spill] sm:$0xff] }
 0x359   : > { %4857 = vtanh.f32 %v7138_v32  ;;  %v4848_v25 = vpop.eup %4847  ;;  %v1643_v48 = vmul.f32 0.5, %v4846_v11  ;;  %v1668_v0 = vadd.f32 0.5, %v1644_v61  ;;  %v10664_v11 = vld [vmem:[#allocation114_spill] sm:$0xff]  ;;  %v10670_v61 = vld [vmem:[#allocation120_spill] sm:$0xff] }
 0x35a   : > { %4859 = vtanh.f32 %v1591_v9  ;;  %10663 = vst [vmem:[#allocation141_spill] sm:$0xff] %v7155_v27  ;;  %v1717_v7 = vmul.f32 %v4848_v25, %v1669_v41  ;;  %v1666_v24 = vadd.f32 0.5, %v1642_v43  ;;  %v10668_v25 = vld [vmem:[#allocation118_spill] sm:$0xff]  ;;  %v10681_v43 = vld [vmem:[#allocation131_spill] sm:$0xff] }
 0x35b   : > { %v4850_v4 = vpop.eup %4849  ;;  %4861 = vtanh.f32 %v7143_v17  ;;  %v1667_v21 = vadd.f32 0.5, %v1643_v48  ;;  %v10676_v41 = vld [vmem:[#allocation126_spill] sm:$0xff]  ;;  %v10677_v48 = vld [vmem:[#allocation127_spill] sm:$0xff] }
 0x35c   : > { %v4852_v37 = vpop.eup %4851  ;;  %v1718_v33 = vmul.f32 %v4850_v4, %v1670_v40  ;;  %4863 = vtanh.f32 %v7148_v62  ;;  %v10669_v40 = vld [vmem:[#allocation119_spill] sm:$0xff]  ;;  %v10671_v4 = vld [vmem:[#allocation121_spill] sm:$0xff] }
 0x35d   : > { %v4854_v10 = vpop.eup %4853  ;;  %4865 = vtanh.f32 %v7152_v38  ;;  %v1641_v34 = vmul.f32 0.5, %v4852_v37  ;;  %v10674_v37 = vld [vmem:[#allocation124_spill] sm:$0xff] }
 0x35e   : > { %v4856_v15 = vpop.eup %4855  ;;  %1859 = vmatpush.msra.mxu2 %v1718_v33  ;;  %v1716_v42 = vmul.f32 %v4854_v10, %v1668_v0  ;;  %4867 = vtanh.f32 %v7155_v27  ;;  %v10675_v33 = vld [vmem:[#allocation125_spill] sm:$0xff]  ;;  %v10678_v10 = vld [vmem:[#allocation128_spill] sm:$0xff]  ;;  %v10717_v27 = vld [vmem:[#allocation22_spill] sm:$0xff] }
 0x35f   : > { %v4858_v44 = vpop.eup %4857  ;;  %v1640_v36 = vmul.f32 0.5, %v4856_v15  ;;  %v1665_v5 = vadd.f32 0.5, %v1641_v34  ;;  %v10679_v15 = vld [vmem:[#allocation129_spill] sm:$0xff] }
 0x360   : > { %v4860_v29 = vpop.eup %4859  ;;  %1860 = vmatpush.msra.mxu2 %v1717_v7  ;;  %v1715_v2 = vmul.f32 %v4858_v44, %v1667_v21  ;;  %v10680_v7 = vld [vmem:[#allocation130_spill] sm:$0xff]  ;;  %v10683_v21 = vld [vmem:[#allocation133_spill] sm:$0xff] }
 0x361   : > { %v4862_v22 = vpop.eup %4861  ;;  %v1639_v9 = vmul.f32 0.5, %v4860_v29  ;;  %v1664_v63 = vadd.f32 0.5, %v1640_v36  ;;  %v10682_v29 = vld [vmem:[#allocation132_spill] sm:$0xff] }
 0x362   : > { %1861 = vmatpush.msra.mxu2 %v1716_v42  ;;  %v4864_v12 = vpop.eup %4863  ;;  %v1714_v13 = vmul.f32 %v4862_v22, %v1666_v24  ;;  %v10684_v22 = vld [vmem:[#allocation134_spill] sm:$0xff]  ;;  %v10685_v24 = vld [vmem:[#allocation135_spill] sm:$0xff] }
 0x363   : > { %v4866_v19 = vpop.eup %4865  ;;  %v1713_v8 = vmul.f32 %v4864_v12, %v1665_v5  ;;  %v1663_v35 = vadd.f32 0.5, %v1639_v9  ;;  %v10686_v12 = vld [vmem:[#allocation136_spill] sm:$0xff]  ;;  %v10687_v5 = vld [vmem:[#allocation137_spill] sm:$0xff] }
 0x364   : > { %1862 = vmatpush.msra.mxu2 %v1715_v2  ;;  %v4868_v14 = vpop.eup %4867  ;;  %v1712_v60 = vmul.f32 %v4866_v19, %v1664_v63  ;;  %v10688_v19 = vld [vmem:[#allocation138_spill] sm:$0xff]  ;;  %v10689_v63 = vld [vmem:[#allocation139_spill] sm:$0xff] }
 0x365   : > { %v1711_v30 = vmul.f32 %v4868_v14, %v1663_v35 }
 0x366   : > { %1863 = vmatpush.msra.mxu2 %v1714_v13 }
 0x368   : > { %1864 = vmatpush.msra.mxu2 %v1713_v8 }
 0x36a   : > { %1865 = vmatpush.msra.mxu2 %v1712_v60  ;;  %v10690_v60 = vld [vmem:[#allocation140_spill] sm:$0xff] }
 0x36c   : > { %1866 = vmatpush.msra.mxu2 %v1711_v30  ;;  %v10692_v30 = vld [vmem:[#allocation142_spill] sm:$0xff] }
 0x36d   : > { %4411 = vmatmul.msk.f32.vlgmr.msra.gmra.mxu2 %vm912_vm0, %v10664_v11 }
 0x375   : > { %4412 = vmatmul.msk.f32.gmra.mxu2 %vm912_vm0, %v10665_v57  ;;  %v7242_v57 = vld [vmem:[%s9958_s2 + $0xe0] sm:$0xff] }
 0x376   : > { %10694 = vst [vmem:[#allocation150_spill] sm:$0xff] %v7242_v57 }
 0x37d   : > { %4413 = vmatmul.msk.f32.gmra.mxu2 %vm912_vm0, %v10666_v26 }
 0x385   : > { %4414 = vmatmul.msk.f32.gmra.mxu2 %vm912_vm0, %v10667_v56  ;;  %v7251_v56 = vld [vmem:[%s9958_s2 + $0xe8] sm:$0xff] }
 0x386   : > { %10696 = vst [vmem:[#allocation155_spill] sm:$0xff] %v7251_v56 }
 0x38d   : > { %4415 = vmatmul.msk.f32.gmra.mxu2 %vm912_vm0, %v10668_v25 }
 0x395   : > { %4416 = vmatmul.msk.f32.gmra.mxu2 %vm912_vm0, %v10669_v40  ;;  %v7260_v40 = vld [vmem:[%s9958_s2 + $0xf0] sm:$0xff] }
 0x396   : > { %10698 = vst [vmem:[#allocation148_spill] sm:$0xff] %v7260_v40 }
 0x39d   : > { %4417 = vmatmul.msk.f32.gmra.mxu2 %vm912_vm0, %v10670_v61 }
 0x3a5   : > { %4418 = vmatmul.msk.f32.gmra.mxu2 %vm912_vm0, %v10671_v4  ;;  %v7269_v4 = vld [vmem:[%s9958_s2 + $0xf8] sm:$0xff] }
 0x3a6   : > { %10700 = vst [vmem:[#allocation152_spill] sm:$0xff] %v7269_v4 }
 0x3ad   : > { %4419 = vmatmul.msk.f32.gmra.mxu2 %vm912_vm0, %v10672_v55 }
 0x3b5   : > { %4420 = vmatmul.msk.f32.gmra.mxu2 %vm912_vm0, %v10673_v47 }
 0x3bd   : > { %4421 = vmatmul.msk.f32.gmra.mxu2 %vm912_vm0, %v10674_v37 }
 0x3c5   : > { %4422 = vmatmul.msk.f32.gmra.mxu2 %vm912_vm0, %v10675_v33 }
 0x3cd   : > { %4423 = vmatmul.msk.f32.gmra.mxu2 %vm912_vm0, %v10676_v41 }
 0x3d5   : > { %4424 = vmatmul.msk.f32.gmra.mxu2 %vm912_vm0, %v10677_v48 }
 0x3dd   : > { %4425 = vmatmul.msk.f32.gmra.mxu2 %vm912_vm0, %v10678_v10 }
 0x3e5   : > { %4426 = vmatmul.msk.f32.gmra.mxu2 %vm912_vm0, %v10679_v15 }
 0x3ed   : > { %4427 = vmatmul.msk.f32.gmra.mxu2 %vm912_vm0, %v10680_v7 }
 0x3f0   : > { %v7193_v0 = vpop.f32.mrf.mxu2 }
 0x3f5   : > { %4428 = vmatmul.msk.f32.gmra.mxu2 %vm912_vm0, %v10681_v43  ;;  %v7292_v43 = vld [vmem:[%s5647_s27 + $0x2] ss:$0 sm:$0xff] }
 0x3f8   : > { %v7197_v44 = vpop.f32.mrf.mxu2 }
 0x3fd   : > { %4429 = vmatmul.msk.f32.gmra.mxu2 %vm912_vm0, %v10682_v29 }
 0x400   : > { %v7201_v42 = vpop.f32.mrf.mxu2 }
 0x405   : > { %4430 = vmatmul.msk.f32.gmra.mxu2 %vm912_vm0, %v10683_v21  ;;  %v10711_v21 = vld [vmem:[#allocation9_spill] sm:$0xff] }
 0x408   : > { %v7205_v34 = vpop.f32.mrf.mxu2 }
 0x40d   : > { %4431 = vmatmul.msk.f32.gmra.mxu2 %vm912_vm0, %v10684_v22  ;;  %v1727_v22 = vmul.f32 %v7292_v43, %v10711_v21  ;;  %v10718_v21 = vld [vmem:[#allocation20_spill] sm:$0xff] }
 0x410   : > { %v7209_v2 = vpop.f32.mrf.mxu2 }
 0x415   : > { %4432 = vmatmul.msk.f32.gmra.mxu2 %vm912_vm0, %v10685_v24  ;;  %v10712_v24 = vld [vmem:[#allocation42_spill] sm:$0xff] }
 0x418   : > { %v7213_v36 = vpop.f32.mrf.mxu2 }
 0x41d   : > { %4433 = vmatmul.msk.f32.gmra.mxu2 %vm912_vm0, %v10686_v12  ;;  %v1728_v12 = vmul.f32 %v7292_v43, %v10712_v24  ;;  %v10719_v24 = vld [vmem:[#allocation28_spill] sm:$0xff] }
 0x420   : > { %v7217_v13 = vpop.f32.mrf.mxu2 }
 0x425   : > { %4434 = vmatmul.msk.f32.gmra.mxu2 %vm912_vm0, %v10687_v5  ;;  %v7301_v5 = vld [vmem:[%s5647_s27 + $0xa] ss:$0 sm:$0xff] }
 0x426   : > { %v1793_v38 = vmul.f32 %v7301_v5, %v10717_v27  ;;  %v1794_v62 = vmul.f32 %v7301_v5, %v10718_v21 }
 0x428   : > { %v7221_v9 = vpop.f32.mrf.mxu2 }
 0x42d   : > { %4435 = vmatmul.msk.f32.gmra.mxu2 %vm912_vm0, %v10688_v19  ;;  %v10713_v19 = vld [vmem:[#allocation45_spill] sm:$0xff] }
 0x430   : > { %v7225_v8 = vpop.f32.mrf.mxu2 }
 0x435   : > { %4436 = vmatmul.msk.f32.gmra.mxu2 %vm912_vm0, %v10689_v63  ;;  %v1736_v63 = vmul.f32 %v7292_v43, %v10713_v19  ;;  %v10721_v19 = vld [vmem:[#allocation6_spill] sm:$0xff] }
 0x436   : > { %v1760_v51 = vadd.f32 %v1728_v12, %v10721_v19  ;;  %v10729_v12 = vld [vmem:[#allocation15_spill] sm:$0xff] }
 0x437   : > { %v1733_v19 = vmul.f32 %v7292_v43, %v10729_v12  ;;  %v10735_v12 = vld [vmem:[#allocation27_spill] sm:$0xff] }
 0x438   : > { %v7229_v14 = vpop.f32.mrf.mxu2 }
 0x43d   : > { %4437 = vmatmul.msk.f32.gmra.mxu2 %vm912_vm0, %v10690_v60  ;;  %v10714_v60 = vld [vmem:[#allocation8_spill] sm:$0xff] }
 0x440   : > { %v7233_v35 = vpop.f32.mrf.mxu2 }
 0x441   : > { %10691 = vst [vmem:[#allocation159_spill] sm:$0xff] %v7233_v35 }
 0x445   : > { %4438 = vmatmul.msk.f32.gmra.mxu2 %vm912_vm0, %v10692_v30  ;;  %v1726_v30 = vmul.f32 %v7292_v43, %v10714_v60  ;;  %v10723_v60 = vld [vmem:[#allocation54_spill] sm:$0xff] }
 0x447   : > { %v1758_v17 = vadd.f32 %v1726_v30, %v10719_v24  ;;  %v1802_v30 = vmul.f32 %v7301_v5, %v10727_v20  ;;  %v10728_v24 = vld [vmem:[#allocation21_spill] sm:$0xff] }
 0x448   : > { %v7237_v11 = vpop.f32.mrf.mxu2 }
 0x449   : > { %10693 = vst [vmem:[#allocation158_spill] sm:$0xff] %v7237_v11 }
 0x44d   : > { %4439 = vmatmul.msk.f32.gmra.mxu2 %vm912_vm0, %v7242_v57 }
 0x450   : > { %v7246_v26 = vpop.f32.mrf.mxu2 }
 0x451   : > { %10695 = vst [vmem:[#allocation149_spill] sm:$0xff] %v7246_v26 }
 0x455   : > { %4440 = vmatmul.msk.f32.gmra.mxu2 %vm912_vm0, %v7251_v56  ;;  %v10716_v56 = vld [vmem:[#allocation10_spill] sm:$0xff] }
 0x456   : > { %v1759_v57 = vadd.f32 %v1727_v22, %v10716_v56  ;;  %v1735_v22 = vmul.f32 %v7292_v43, %v10724_v53  ;;  %v10725_v56 = vld [vmem:[#allocation12_spill] sm:$0xff]  ;;  %v10732_v53 = vld [vmem:[#allocation25_spill] sm:$0xff] }
 0x457   : > { %v1801_v27 = vmul.f32 %v7301_v5, %v10725_v56 }
 0x458   : > { %v7255_v25 = vpop.f32.mrf.mxu2  ;;  %v7338_v56 = vadd.f32 %v1793_v38, %v1759_v57  ;;  %v10739_v57 = vld [vmem:[#allocation29_spill] sm:$0xff] }
 0x459   : > { %10697 = vst [vmem:[#allocation156_spill] sm:$0xff] %v7255_v25  ;;  %v10756_v25 = vld [vmem:[#allocation51_spill] sm:$0xff] }
 0x45d   : > { %4441 = vmatmul.msk.f32.gmra.mxu2 %vm912_vm0, %v7260_v40 }
 0x460   : > { %v7264_v61 = vpop.f32.mrf.mxu2 }
 0x461   : > { %10699 = vst [vmem:[#allocation146_spill] sm:$0xff] %v7264_v61  ;;  %v10760_v61 = vld [vmem:[#allocation44_spill] sm:$0xff] }
 0x465   : > { %4442 = vmatmul.msk.f32.gmra.mxu2 %vm912_vm0, %v7269_v4  ;;  %v10715_v4 = vld [vmem:[#allocation17_spill] sm:$0xff] }
 0x466   : > { %v1734_v40 = vmul.f32 %v7292_v43, %v10715_v4  ;;  %v1752_v4 = vmul.f32 %v7292_v43, %v10723_v60  ;;  %v10731_v60 = vld [vmem:[#allocation31_spill] sm:$0xff] }
 0x468   : > { %v7273_v55 = vpop.f32.mrf.mxu2 }
 0x469   : > { %10701 = vst [vmem:[#allocation147_spill] sm:$0xff] %v7273_v55  ;;  %v10750_v55 = vld [vmem:[#allocation58_spill] sm:$0xff] }
 0x470   : > { %v7275_v47 = vpop.f32.mrf.mxu2 }
 0x471   : > { %10702 = vst [vmem:[#allocation151_spill] sm:$0xff] %v7275_v47  ;;  %v10720_v47 = vld [vmem:[#allocation23_spill] sm:$0xff] }
 0x472   : > { %v1792_v32 = vmul.f32 %v7301_v5, %v10720_v47  ;;  %v1724_v47 = vmul.f32 %v7292_v43, %v10728_v24  ;;  %v7345_v24 = vadd.f32 %v1794_v62, %v1760_v51  ;;  %v10742_v51 = vld [vmem:[#allocation41_spill] sm:$0xff] }
 0x478   : > { %v7277_v37 = vpop.f32.mrf.mxu2 }
 0x479   : > { %10703 = vst [vmem:[#allocation19_spill] sm:$0xff] %v7277_v37 }
 0x480   : > { %v7279_v33 = vpop.f32.mrf.mxu2 }
 0x481   : > { %10704 = vst [vmem:[#allocation145_spill] sm:$0xff] %v7279_v33  ;;  %v10726_v33 = vld [vmem:[#allocation7_spill] sm:$0xff] }
 0x482   : > { %v1768_v21 = vadd.f32 %v1736_v63, %v10726_v33  ;;  %v10733_v63 = vld [vmem:[#allocation49_spill] sm:$0xff] }
 0x483   : > { %v1767_v33 = vadd.f32 %v1735_v22, %v10733_v63  ;;  %v1799_v22 = vmul.f32 %v7301_v5, %v10739_v57 }
 0x484   : > { %v7355_v63 = vadd.f32 %v1802_v30, %v1768_v21  ;;  %v10748_v30 = vld [vmem:[#allocation30_spill] sm:$0xff] }
 0x485   : > { %v1816_v57 = vmul.f32 %v7301_v5, %v10748_v30 }
 0x486   : > { %10740 = vst [vmem:[#allocation64_spill] sm:$0xff] %v7355_v63 }
 0x488   : > { %v7281_v41 = vpop.f32.mrf.mxu2 }
 0x489   : > { %10705 = vst [vmem:[#allocation39_spill] sm:$0xff] %v7281_v41  ;;  %v1725_v41 = vmul.f32 %v7292_v43, %v10732_v53  ;;  %v10738_v53 = vld [vmem:[#allocation37_spill] sm:$0xff] }
 0x48a   : > { %v1765_v38 = vadd.f32 %v1733_v19, %v10738_v53  ;;  %v7367_v19 = vadd.f32 %v1801_v27, %v1767_v33  ;;  %v10747_v53 = vld [vmem:[#allocation47_spill] sm:$0xff]  ;;  %v10755_v27 = vld [vmem:[#allocation77_spill] sm:$0xff] }
 0x48b   : > { %v1750_v21 = vmul.f32 %v7292_v43, %v10747_v53 }
 0x48c   : > { %10746 = vst [vmem:[#allocation114_spill] sm:$0xff] %v7367_v19 }
 0x48d   : > { %v1782_v33 = vadd.f32 %v1750_v21, %v10755_v27  ;;  %v10763_v27 = vld [vmem:[#allocation55_spill] sm:$0xff] }
 0x490   : > { %v7283_v48 = vpop.f32.mrf.mxu2 }
 0x491   : > { %10706 = vst [vmem:[#allocation144_spill] sm:$0xff] %v7283_v48 }
 0x498   : > { %v7285_v10 = vpop.f32.mrf.mxu2 }
 0x499   : > { %10707 = vst [vmem:[#allocation110_spill] sm:$0xff] %v7285_v10  ;;  %v10734_v10 = vld [vmem:[#allocation24_spill] sm:$0xff] }
 0x49a   : > { %v1751_v20 = vmul.f32 %v7292_v43, %v10734_v10  ;;  %v10741_v10 = vld [vmem:[#allocation40_spill] sm:$0xff] }
 0x49c   : > { %v1783_v53 = vadd.f32 %v1751_v20, %v10756_v25  ;;  %v1798_v20 = vmul.f32 %v7301_v5, %v10763_v27  ;;  %v10764_v25 = vld [vmem:[#allocation59_spill] sm:$0xff] }
 0x4a0   : > { %v7287_v15 = vpop.f32.mrf.mxu2 }
 0x4a1   : > { %10708 = vst [vmem:[#allocation75_spill] sm:$0xff] %v7287_v15  ;;  %v7343_v15 = vadd.f32 %v1792_v32, %v1758_v17  ;;  %v1790_v32 = vmul.f32 %v7301_v5, %v10741_v10  ;;  %v1791_v17 = vmul.f32 %v7301_v5, %v10742_v51  ;;  %v10749_v10 = vld [vmem:[#allocation36_spill] sm:$0xff]  ;;  %v1757_v51 = vadd.f32 %v1725_v41, %v10750_v55  ;;  %v10759_v55 = vld [vmem:[#allocation65_spill] sm:$0xff] }
 0x4a2   : > { %v1756_v11 = vadd.f32 %v1724_v47, %v10749_v10  ;;  %v10758_v10 = vld [vmem:[#allocation53_spill] sm:$0xff] }
 0x4a3   : > { %v1823_v47 = vadd.f32 %v1791_v17, %v1757_v51  ;;  %v1797_v41 = vmul.f32 %v7301_v5, %v10758_v10  ;;  %v10766_v17 = vld [vmem:[#allocation69_spill] sm:$0xff]  ;;  %v10768_v10 = vld [vmem:[#allocation62_spill] sm:$0xff] }
 0x4a4   : > { %v1822_v26 = vadd.f32 %v1790_v32, %v1756_v11  ;;  %v1722_v11 = vmul.f32 %v7292_v43, %v10764_v25  ;;  %v10765_v32 = vld [vmem:[#allocation83_spill] sm:$0xff]  ;;  %v10770_v25 = vld [vmem:[#allocation66_spill] sm:$0xff] }
 0x4a5   : > { %v1729_v51 = vmul.f32 %v7292_v43, %v10765_v32 }
 0x4a8   : > { %v7289_v7 = vpop.f32.mrf.mxu2 }
 0x4a9   : > { %10709 = vst [vmem:[#allocation61_spill] sm:$0xff] %v7289_v7  ;;  %v1784_v7 = vadd.f32 %v1752_v4, %v10735_v12  ;;  %v10744_v4 = vld [vmem:[#allocation38_spill] sm:$0xff] }
 0x4aa   : > { %v1809_v12 = vmul.f32 %v7301_v5, %v10744_v4 }
 0x4b0   : > { %v7294_v29 = vpop.f32.mrf.mxu2 }
 0x4b1   : > { %10710 = vst [vmem:[#allocation111_spill] sm:$0xff] %v7294_v29  ;;  %v10730_v29 = vld [vmem:[#allocation18_spill] sm:$0xff] }
 0x4b2   : > { %v1766_v48 = vadd.f32 %v1734_v40, %v10730_v29  ;;  %v10736_v40 = vld [vmem:[#allocation26_spill] sm:$0xff] }
 0x4b3   : > { %v1818_v29 = vmul.f32 %v7301_v5, %v10736_v40  ;;  %v10745_v40 = vld [vmem:[#allocation32_spill] sm:$0xff] }
 0x4b5   : > { %v7379_v4 = vadd.f32 %v1818_v29, %v1784_v7  ;;  %v1723_v7 = vmul.f32 %v7292_v43, %v10760_v61  ;;  %v10761_v29 = vld [vmem:[#allocation46_spill] sm:$0xff] }
 0x4b7   : > { %10753 = vst [vmem:[#allocation116_spill] sm:$0xff] %v7379_v4  ;;  %v1754_v4 = vadd.f32 %v1722_v11, %v10770_v25  ;;  %v1761_v11 = vadd.f32 %v1729_v51, %v10602_v3  ;;  %v10777_v51 = vld [vmem:[#allocation103_spill] sm:$0xff] }
 0x4b8   : > { %v7318_v37 = vpop.f32.mrf.mxu2 }
 0x4b9   : > { %10722 = vst [vmem:[#allocation71_spill] sm:$0xff] %v7318_v37  ;;  %v1800_v37 = vmul.f32 %v7301_v5, %v10731_v60  ;;  %v10737_v60 = vld [vmem:[#allocation33_spill] sm:$0xff] }
 0x4ba   : > { %v1788_v18 = vmul.f32 %v7301_v5, %v10737_v60  ;;  %v1731_v60 = vmul.f32 %v7292_v43, %v10745_v40  ;;  %v7381_v40 = vadd.f32 %v1799_v22, %v1765_v38  ;;  %v1730_v38 = vmul.f32 %v7292_v43, %v10761_v29  ;;  %v10762_v22 = vld [vmem:[#allocation50_spill] sm:$0xff] }
 0x4bb   : > { %v7361_v62 = vadd.f32 %v1800_v37, %v1766_v48  ;;  %v10751_v37 = vld [vmem:[#allocation34_spill] sm:$0xff]  ;;  %v1721_v29 = vmul.f32 %v7292_v43, %v10768_v10  ;;  %v10773_v10 = vld [vmem:[#allocation76_spill] sm:$0xff] }
 0x4bc   : > { %v1732_v48 = vmul.f32 %v7292_v43, %v10751_v37  ;;  %10754 = vst [vmem:[#allocation117_spill] sm:$0xff] %v7381_v40  ;;  %v1763_v21 = vadd.f32 %v1731_v60, %v10762_v22  ;;  %v7409_v22 = vadd.f32 %v1816_v57, %v1782_v33  ;;  %v10774_v57 = vld [vmem:[#allocation74_spill] sm:$0xff] }
 0x4bd   : > { %10743 = vst [vmem:[#allocation68_spill] sm:$0xff] %v7361_v62  ;;  %v10757_v62 = vld [vmem:[#allocation43_spill] sm:$0xff] }
 0x4be   : > { %v1817_v30 = vmul.f32 %v7301_v5, %v10757_v62  ;;  %v1764_v37 = vadd.f32 %v1732_v48, %v10759_v55  ;;  %v1744_v48 = vmul.f32 %v7292_v43, %v10766_v17  ;;  %v10767_v55 = vld [vmem:[#allocation73_spill] sm:$0xff]  ;;  %v10769_v62 = vld [vmem:[#allocation86_spill] sm:$0xff]  ;;  %v1829_v40 = vadd.f32 %v1797_v41, %v1763_v21  ;;  %v10772_v17 = vld [vmem:[#allocation72_spill] sm:$0xff] }
 0x4bf   : > { %v1749_v61 = vmul.f32 %v7292_v43, %v10767_v55  ;;  %v1787_v60 = vmul.f32 %v7301_v5, %v10769_v62  ;;  %v1743_v19 = vmul.f32 %v7292_v43, %v10772_v17  ;;  %v1753_v55 = vadd.f32 %v1721_v29, %v10456_v54  ;;  %v10776_v29 = vld [vmem:[#allocation96_spill] sm:$0xff] }
 0x4c0   : > { %v7377_v63 = vpop.f32.mrf.mxu2  ;;  %v7411_v27 = vadd.f32 %v1817_v30, %v1783_v53  ;;  %v7419_v35 = vadd.f32 %v1798_v20, %v1764_v37  ;;  %v1810_v62 = vmul.f32 %v7301_v5, %v10773_v10  ;;  %v1815_v53 = vmul.f32 %v7301_v5, %v10774_v57  ;;  %v10775_v30 = vld [vmem:[#allocation63_spill] sm:$0xff] }
 0x4c1   : > { %10752 = vst [vmem:[#allocation115_spill] sm:$0xff] %v7377_v63  ;;  %v10771_v63 = vld [vmem:[#allocation67_spill] sm:$0xff]  ;;  %v1755_v33 = vadd.f32 %v1723_v7, %v10775_v30  ;;  %v1776_v41 = vadd.f32 %v1744_v48, %v10604_v59  ;;  %v1819_v17 = vadd.f32 %v1787_v60, %v1753_v55  ;;  %v7433_v37 = vmul.f32 %v7292_v43, %v10605_v58 }
 0x4c2   : > { %v1789_v32 = vmul.f32 %v7301_v5, %v10771_v63  ;;  %v1775_v63 = vadd.f32 %v1743_v19, %v10603_v50  ;;  %v7437_v20 = vmul.f32 %v7292_v43, %v10776_v29  ;;  %v1781_v57 = vadd.f32 %v1749_v61, %v10606_v49 }
 0x4c3   : > { %v1820_v7 = vadd.f32 %v1788_v18, %v1754_v4  ;;  %v7442_v19 = vmul.f32 %v7292_v43, %v6310_v28  ;;  %v1745_v48 = vmul.f32 %v7292_v43, %v10777_v51  ;;  %v1964_v55 = vadd.f32 %v7193_v0, %v1819_v17  ;;  %v10778_v0 = vld [vmem:[#allocation101_spill] sm:$0xff] }
 0x4c4   : > { %v1821_v30 = vadd.f32 %v1789_v32, %v1755_v33  ;;  %v1796_v60 = vmul.f32 %v7301_v5, %v10461_v39  ;;  %v7449_v58 = vadd.f32 %v1810_v62, %v1776_v41  ;;  %v7451_v29 = vadd.f32 %v1815_v53, %v1781_v57  ;;  %v10779_v39 = vld [vmem:[#allocation84_spill] sm:$0xff] }
 0x4c5   : > { %v1965_v61 = vadd.f32 %v7197_v44, %v1820_v7  ;;  %v1739_v18 = vmul.f32 %v7292_v43, %v6371_v45  ;;  %v7456_v4 = vadd.f32 %v1809_v12, %v1775_v63  ;;  %v1748_v32 = vmul.f32 %v7292_v43, %v10607_v1  ;;  %v10780_v63 = vld [vmem:[#allocation90_spill] sm:$0xff] }
 0x4c6   : > { %v1966_v33 = vadd.f32 %v7201_v42, %v1821_v30  ;;  %v1795_v17 = vmul.f32 %v7301_v5, %v10778_v0  ;;  %v1762_v62 = vadd.f32 %v1730_v38, %v10779_v39  ;;  %v7465_v57 = vadd.f32 %v1745_v48, %v6418_v52 }
 0x4c7   : > { %v1967_v44 = vadd.f32 %v7205_v34, %v1822_v26  ;;  %v7469_v53 = vadd.f32 %v1739_v18, %v6466_v6  ;;  %v1780_v12 = vadd.f32 %v1748_v32, %v10608_v31  ;;  %v1814_v41 = vmul.f32 %v7301_v5, %v10780_v63  ;;  %v10781_v26 = vld [vmem:[#allocation95_spill] sm:$0xff] }
 0x4c8   : > { %v7429_v21 = vpop.f32.mrf.mxu2  ;;  %v1996_v7 = vmul.f32 0.5, %v1964_v55  ;;  %v1968_v42 = vadd.f32 %v7209_v2, %v1823_v47  ;;  %v1828_v30 = vadd.f32 %v1796_v60, %v1762_v62  ;;  %v1742_v38 = vmul.f32 %v7292_v43, %v10610_v23  ;;  %v10802_v23 = vld [vmem:[#allocation113_spill] sm:$0xff] }
 0x4c9   : > { %v1997_v39 = vmul.f32 0.5, %v1965_v61  ;;  %v1969_v48 = vadd.f32 %v7213_v36, %v7343_v15  ;;  %v1808_v34 = vmul.f32 %v7301_v5, %v10611_v46  ;;  %v1747_v18 = vmul.f32 %v7292_v43, %v10781_v26  ;;  %v10782_v15 = vld [vmem:[#allocation102_spill] sm:$0xff]  ;;  %v10783_v46 = vld [vmem:[#allocation105_spill] sm:$0xff] }
 0x4ca   : > { %v1998_v63 = vmul.f32 0.5, %v1966_v33  ;;  %v1970_v2 = vadd.f32 %v7217_v13, %v7338_v56  ;;  %v1827_v47 = vadd.f32 %v1795_v17, %v1761_v11  ;;  %v1813_v55 = vmul.f32 %v7301_v5, %v6300_v16  ;;  %v10784_v17 = vld [vmem:[#allocation104_spill] sm:$0xff] }
 0x4cb   : > { %v1999_v60 = vmul.f32 0.5, %v1967_v44  ;;  %v1971_v36 = vadd.f32 %v7221_v9, %v7345_v24  ;;  %v1807_v61 = vmul.f32 %v7301_v5, %v10782_v15  ;;  %v7493_v62 = vadd.f32 %v1814_v41, %v1780_v12  ;;  %v10785_v24 = vld [vmem:[#allocation159_spill] sm:$0xff] }
 0x4cc   : > { %4869 = vtanh.f32 %v1996_v7  ;;  %v2000_v26 = vmul.f32 0.5, %v1968_v42  ;;  %v1972_v33 = vadd.f32 %v7225_v8, %v1827_v47  ;;  %v1812_v13 = vmul.f32 %v7301_v5, %v10783_v46  ;;  %v10786_v15 = vld [vmem:[#allocation107_spill] sm:$0xff]  ;;  %v10787_v8 = vld [vmem:[#allocation114_spill] sm:$0xff]  ;;  %v10789_v47 = vld [vmem:[#allocation60_spill] sm:$0xff] }
 0x4cd   : > { %4871 = vtanh.f32 %v1997_v39  ;;  %v2001_v56 = vmul.f32 0.5, %v1969_v48  ;;  %v1973_v11 = vadd.f32 %v7229_v14, %v1828_v30  ;;  %v1774_v44 = vadd.f32 %v1742_v38, %v10784_v17  ;;  %v10788_v7 = vld [vmem:[#allocation146_spill] sm:$0xff]  ;;  %v10790_v14 = vld [vmem:[#allocation117_spill] sm:$0xff] }
 0x4ce   : > { %4873 = vtanh.f32 %v1998_v63  ;;  %v2002_v9 = vmul.f32 0.5, %v1970_v2  ;;  %v1974_v16 = vadd.f32 %v10785_v24, %v1829_v40  ;;  %v7503_v12 = vmul.f32 %v7301_v5, %v10786_v15  ;;  %v10791_v30 = vld [vmem:[#allocation149_spill] sm:$0xff]  ;;  %v10792_v63 = vld [vmem:[#allocation79_spill] sm:$0xff]  ;;  %v10793_v24 = vld [vmem:[#allocation68_spill] sm:$0xff] }
 0x4cf   : > { %4875 = vtanh.f32 %v1999_v60  ;;  %v2003_v41 = vmul.f32 0.5, %v1971_v36  ;;  %v1978_v42 = vadd.f32 %v10788_v7, %v10787_v8  ;;  %v1779_v39 = vadd.f32 %v1747_v18, %v10789_v47  ;;  %v10794_v15 = vld [vmem:[#allocation156_spill] sm:$0xff]  ;;  %v10798_v47 = vld [vmem:[#allocation109_spill] sm:$0xff] }
 0x4d0   : > { %v7483_v32 = vpop.f32.mrf.mxu2  ;;  %4877 = vtanh.f32 %v2000_v26  ;;  %v2004_v48 = vmul.f32 0.5, %v1972_v33  ;;  %v1976_v38 = vadd.f32 %v10791_v30, %v10790_v14  ;;  %v1737_v2 = vmul.f32 %v7292_v43, %v10792_v63  ;;  %v10795_v60 = vld [vmem:[#allocation16_spill] sm:$0xff]  ;;  %v10797_v33 = vld [vmem:[#allocation147_spill] sm:$0xff] }
 0x4d1   : > { %4879 = vtanh.f32 %v2001_v56  ;;  %v2005_v40 = vmul.f32 0.5, %v1973_v11  ;;  %v1977_v17 = vadd.f32 %v10794_v15, %v10793_v24  ;;  %v1738_v36 = vmul.f32 %v7292_v43, %v10795_v60  ;;  %v10796_v26 = vld [vmem:[#allocation64_spill] sm:$0xff]  ;;  %v10800_v15 = vld [vmem:[#allocation89_spill] sm:$0xff] }
 0x4d2   : > { %v4870_v8 = vpop.eup %4869  ;;  %4881 = vtanh.f32 %v2002_v9  ;;  %v2006_v18 = vmul.f32 0.5, %v1974_v16  ;;  %v1979_v7 = vadd.f32 %v10797_v33, %v10796_v26  ;;  %v1773_v14 = vadd.f32 %v7433_v37, %v10798_v47  ;;  %v10799_v11 = vld [vmem:[#allocation112_spill] sm:$0xff]  ;;  %v10801_v9 = vld [vmem:[#allocation158_spill] sm:$0xff]  ;;  %v10803_v47 = vld [vmem:[#allocation13_spill] sm:$0xff] }
 0x4d3   : > { %v4872_v30 = vpop.eup %4871  ;;  %4883 = vtanh.f32 %v2003_v41  ;;  %v2010_v56 = vmul.f32 0.5, %v1978_v42  ;;  %v1803_v63 = vmul.f32 %v7301_v5, %v10799_v11  ;;  %v1778_v24 = vadd.f32 %v7437_v20, %v10800_v15  ;;  %v10804_v15 = vld [vmem:[#allocation82_spill] sm:$0xff] }
 0x4d4   : > { %v4874_v43 = vpop.eup %4873  ;;  %4885 = vtanh.f32 %v2004_v48  ;;  %v1975_v16 = vadd.f32 %v10801_v9, %v7419_v35  ;;  %v2008_v60 = vmul.f32 0.5, %v1976_v38  ;;  %v1769_v26 = vadd.f32 %v1737_v2, %v10802_v23  ;;  %v10805_v38 = vld [vmem:[#allocation35_spill] sm:$0xff] }
 0x4d5   : > { %v4876_v33 = vpop.eup %4875  ;;  %4887 = vtanh.f32 %v2005_v40  ;;  %v2009_v37 = vmul.f32 0.5, %v1977_v17  ;;  %v1770_v41 = vadd.f32 %v1738_v36, %v10803_v47  ;;  %v7528_v42 = vadd.f32 %v1808_v34, %v1774_v44  ;;  %v10806_v44 = vld [vmem:[#allocation97_spill] sm:$0xff]  ;;  %v10917_v47 = vld [vmem:[#allocation58_spill] sm:$0xff] }
 0x4d6   : > { %v4878_v31 = vpop.eup %4877  ;;  %4889 = vtanh.f32 %v2006_v18  ;;  %v2011_v11 = vmul.f32 0.5, %v1979_v7  ;;  %v7530_v6 = vadd.f32 %v1807_v61, %v1773_v14  ;;  %v1845_v20 = vadd.f32 %v1813_v55, %v1779_v39  ;;  %v10807_v7 = vld [vmem:[#allocation93_spill] sm:$0xff] }
 0x4d7   : > { %v4880_v48 = vpop.eup %4879  ;;  %4891 = vtanh.f32 %v2010_v56  ;;  %v1772_v35 = vadd.f32 %v7442_v19, %v10804_v15  ;;  %v1811_v2 = vmul.f32 %v7301_v5, %v10805_v38  ;;  %v7536_v40 = vadd.f32 %v1812_v13, %v1778_v24 }
 0x4d8   : > { %v1955_v46 = vpop.f32.mrf.mxu2  ;;  %v4882_v17 = vpop.eup %4881  ;;  %v2007_v36 = vmul.f32 0.5, %v1975_v16  ;;  %4893 = vtanh.f32 %v2008_v60  ;;  %v7538_v34 = vadd.f32 %v1803_v63, %v1769_v26  ;;  %v1805_v61 = vmul.f32 %v7301_v5, %v10806_v44 }
 0x4d9   : > { %v4884_v18 = vpop.eup %4883  ;;  %v2044_v55 = vmul.f32 0.5, %v4870_v8  ;;  %v2046_v39 = vmul.f32 0.5, %v4874_v43  ;;  %4895 = vtanh.f32 %v2009_v37  ;;  %v1804_v19 = vmul.f32 %v7301_v5, %v10807_v7 }
 0x4da   : > { %v4886_v56 = vpop.eup %4885  ;;  %v2047_v9 = vmul.f32 0.5, %v4876_v33  ;;  %v2048_v13 = vmul.f32 0.5, %v4878_v31  ;;  %4897 = vtanh.f32 %v2011_v11  ;;  %v2049_v63 = vmul.f32 0.5, %v4880_v48 }
 0x4db   : > { %v4888_v60 = vpop.eup %4887  ;;  %v2050_v16 = vmul.f32 0.5, %v4882_v17  ;;  %v1838_v26 = vadd.f32 %v7503_v12, %v1772_v35  ;;  %v1843_v44 = vadd.f32 %v1811_v2, %v7465_v57  ;;  %v2051_v43 = vmul.f32 0.5, %v4884_v18 }
 0x4dc   : > { %v4890_v8 = vpop.eup %4889  ;;  %4899 = vtanh.f32 %v2007_v36  ;;  %v1837_v37 = vadd.f32 %v1805_v61, %v7469_v53  ;;  %v1993_v5 = vadd.f32 %v1955_v46, %v7409_v22  ;;  %v7549_v33 = vadd.f32 0.5, %v2044_v55  ;;  %v10808_v46 = vld [vmem:[#allocation61_spill] sm:$0xff] }
 0x4dd   : > { %v4892_v7 = vpop.eup %4891  ;;  %v7551_v31 = vmul.f32 0.5, %v4872_v30  ;;  %v7553_v48 = vadd.f32 0.5, %v2046_v39  ;;  %v7555_v12 = vadd.f32 0.5, %v2047_v9  ;;  %v2072_v57 = vadd.f32 0.5, %v2048_v13 }
 0x4de   : > { %v4894_v11 = vpop.eup %4893  ;;  %v1992_v35 = vadd.f32 %v7483_v32, %v7451_v29  ;;  %v2073_v53 = vadd.f32 0.5, %v2049_v63  ;;  %v2074_v17 = vadd.f32 0.5, %v2050_v16  ;;  %v1987_v22 = vadd.f32 %v10808_v46, %v7449_v58  ;;  %v10809_v29 = vld [vmem:[#allocation75_spill] sm:$0xff]  ;;  %v10811_v63 = vld [vmem:[#allocation116_spill] sm:$0xff] }
 0x4df   : > { %v4896_v2 = vpop.eup %4895  ;;  %v1991_v30 = vadd.f32 %v7429_v21, %v7493_v62  ;;  %v2075_v36 = vadd.f32 0.5, %v2051_v43  ;;  %v7563_v61 = vmul.f32 0.5, %v4886_v56  ;;  %v2058_v18 = vmul.f32 0.5, %v4892_v7  ;;  %v10812_v56 = vld [vmem:[#allocation110_spill] sm:$0xff] }
 0x4e0   : > { %v1958_v14 = vpop.f32.mrf.mxu2  ;;  %v2053_v55 = vmul.f32 0.5, %v4888_v60  ;;  %v2054_v39 = vmul.f32 0.5, %v4890_v8  ;;  %v1986_v32 = vadd.f32 %v10809_v29, %v7456_v4  ;;  %v2057_v13 = vmul.f32 0.5, %v4896_v2  ;;  %v10813_v8 = vld [vmem:[#allocation39_spill] sm:$0xff] }
 0x4e1   : > { %v1994_v24 = vadd.f32 %v1958_v14, %v7411_v27  ;;  %v1836_v27 = vadd.f32 %v1804_v19, %v1770_v41  ;;  %v4898_v41 = vpop.eup %4897  ;;  %v2056_v19 = vmul.f32 0.5, %v4894_v11  ;;  %v1985_v7 = vadd.f32 %v10812_v56, %v7528_v42  ;;  %v10814_v4 = vld [vmem:[#allocation71_spill] sm:$0xff]  ;;  %v10817_v56 = vld [vmem:[#allocation52_spill] sm:$0xff] }
 0x4e2   : > { %v4900_v9 = vpop.eup %4899  ;;  %v2059_v16 = vmul.f32 0.5, %v4898_v41  ;;  %v2019_v43 = vmul.f32 0.5, %v1987_v22  ;;  %v2082_v60 = vadd.f32 0.5, %v2058_v18  ;;  %v1989_v11 = vadd.f32 %v10814_v4, %v7536_v40 }
 0x4e3   : > { %4901 = vtanh.f32 %v1994_v24  ;;  %v10810_v24 = vld [vmem:[#allocation115_spill] sm:$0xff]  ;;  %v2078_v2 = vadd.f32 0.5, %v2054_v39  ;;  %v2055_v46 = vmul.f32 0.5, %v4900_v9  ;;  %v2018_v29 = vmul.f32 0.5, %v1986_v32 }
 0x4e4   : > { %4903 = vtanh.f32 %v1993_v5  ;;  %v1990_v58 = vadd.f32 %v10810_v24, %v1845_v20  ;;  %v1983_v5 = vadd.f32 %v10813_v8, %v1838_v26  ;;  %v10815_v20 = vld [vmem:[#allocation144_spill] sm:$0xff]  ;;  %v2081_v41 = vadd.f32 0.5, %v2057_v13  ;;  %v10816_v24 = vld [vmem:[#allocation111_spill] sm:$0xff] }
 0x4e5   : > { %4905 = vtanh.f32 %v1992_v35  ;;  %v1984_v35 = vadd.f32 %v10815_v20, %v7530_v6  ;;  %v2080_v22 = vadd.f32 0.5, %v2056_v19  ;;  %v2017_v18 = vmul.f32 0.5, %v1985_v7 }
 0x4e6   : > { %4907 = vtanh.f32 %v1991_v30  ;;  %v2083_v30 = vadd.f32 0.5, %v2059_v16  ;;  %v2106_v40 = vmul.f32 %v2082_v60, %v10817_v56  ;;  %v2015_v9 = vmul.f32 0.5, %v1983_v5  ;;  %v10822_v16 = vld [vmem:[#allocation157_spill] sm:$0xff]  ;;  %v10823_v5 = vld [vmem:[#allocation154_spill] sm:$0xff] }
 0x4e7   : > { %v2079_v6 = vadd.f32 0.5, %v2055_v46  ;;  %v2016_v32 = vmul.f32 0.5, %v1984_v35  ;;  %v10824_v46 = vld [vmem:[#allocation151_spill] sm:$0xff] }
 0x4e8   : > { %v1961_v14 = vpop.f32.mrf.mxu2  ;;  %v2107_v7 = vmul.f32 %v2083_v30, %v10822_v16  ;;  %v1980_v20 = vadd.f32 %v10824_v46, %v7538_v34 }
 0x4e9   : > { %v1995_v21 = vadd.f32 %v1961_v14, %v10811_v63  ;;  %v4902_v62 = vpop.eup %4901  ;;  %v1988_v63 = vadd.f32 %v10816_v24, %v1843_v44  ;;  %v10819_v44 = vld [vmem:[#allocation143_spill] sm:$0xff] }
 0x4ea   : > { %v4904_v14 = vpop.eup %4903  ;;  %v2114_v42 = vmul.f32 %v4902_v62, %v2074_v17  ;;  %v10820_v17 = vld [vmem:[#allocation19_spill] sm:$0xff] }
 0x4eb   : > { %4909 = vtanh.f32 %v1995_v21  ;;  %v4906_v26 = vpop.eup %4905  ;;  %v10818_v21 = vld [vmem:[#allocation145_spill] sm:$0xff]  ;;  %v2113_v13 = vmul.f32 %v4904_v14, %v2073_v53  ;;  %v1981_v19 = vadd.f32 %v10820_v17, %v1836_v27 }
 0x4ec   : > { %4911 = vtanh.f32 %v1990_v58  ;;  %v1982_v39 = vadd.f32 %v10818_v21, %v1837_v37  ;;  %v4908_v8 = vpop.eup %4907  ;;  %v2105_v58 = vmul.f32 %v2081_v41, %v10819_v44  ;;  %v7581_v62 = vadd.f32 %v2114_v42, %v2106_v40  ;;  %v10827_v42 = vld [vmem:[#allocation48_spill] sm:$0xff]  ;;  %v10833_v17 = vld [vmem:[#allocation141_spill] sm:$0xff] }
 0x4ed   : > { %4913 = vtanh.f32 %v2019_v43  ;;  %v2112_v43 = vmul.f32 %v4906_v26, %v2072_v57  ;;  %v2111_v27 = vmul.f32 %v4908_v8, %v7555_v12  ;;  %v2069_v57 = vadd.f32 0.5, %v7551_v31 }
 0x4ee   : > { %4915 = vtanh.f32 %v1989_v11  ;;  %10821 = vst [vmem:[#allocation118_spill] sm:$0xff] %v7581_v62  ;;  %v2104_v11 = vmul.f32 %v2080_v22, %v10823_v5  ;;  %v2014_v53 = vmul.f32 0.5, %v1982_v39  ;;  %v7590_v14 = vadd.f32 %v2113_v13, %v2105_v58 }
 0x4ef   : > { %4917 = vtanh.f32 %v2018_v29  ;;  %v2013_v24 = vmul.f32 0.5, %v1981_v19  ;;  %v2103_v34 = vmul.f32 %v2079_v6, %v10827_v42  ;;  %v2012_v26 = vmul.f32 0.5, %v1980_v20  ;;  %v10831_v6 = vld [vmem:[#allocation56_spill] sm:$0xff] }
 0x4f0   : > { %4919 = vtanh.f32 %v1988_v63  ;;  %10826 = vst [vmem:[#allocation120_spill] sm:$0xff] %v7590_v14  ;;  %v7597_v30 = vadd.f32 %v2112_v43, %v2104_v11 }
 0x4f1   : > { %v4910_v4 = vpop.eup %4909  ;;  %4921 = vtanh.f32 %v2017_v18  ;;  %v2076_v18 = vadd.f32 0.5, %v7563_v61  ;;  %v7602_v39 = vadd.f32 %v2111_v27, %v2103_v34 }
 0x4f2   : > { %v2115_v37 = vmul.f32 %v4910_v4, %v2075_v36  ;;  %v4912_v60 = vpop.eup %4911  ;;  %4923 = vtanh.f32 %v2015_v9  ;;  %v2077_v36 = vadd.f32 0.5, %v2053_v55  ;;  %10828 = vst [vmem:[#allocation121_spill] sm:$0xff] %v7597_v30  ;;  %v10829_v55 = vld [vmem:[#allocation153_spill] sm:$0xff] }
 0x4f3   : > { %v4914_v35 = vpop.eup %4913  ;;  %4925 = vtanh.f32 %v2016_v32  ;;  %v2110_v22 = vmul.f32 %v4912_v60, %v7553_v48  ;;  %v2102_v40 = vmul.f32 %v2078_v2, %v10829_v55  ;;  %10830 = vst [vmem:[#allocation122_spill] sm:$0xff] %v7602_v39  ;;  %v2100_v19 = vmul.f32 %v2076_v18, %v10833_v17  ;;  %v7677_v17 = vld [vmem:[%s9958_s2 + $0x40] sm:$0xff] }
 0x4f4   : > { %v7588_v29 = vadd.f32 %v2115_v37, %v2107_v7  ;;  %v4916_v41 = vpop.eup %4915  ;;  %4927 = vtanh.f32 %v7581_v62  ;;  %v2067_v56 = vmul.f32 0.5, %v4914_v35  ;;  %v2101_v32 = vmul.f32 %v2077_v36, %v10831_v6  ;;  %v7628_v6 = vld [vmem:[%s9958_s2 + $0x8] sm:$0xff]  ;;  %10844 = vst [vmem:[#allocation134_spill] sm:$0xff] %v7677_v17  ;;  %v10899_v62 = vld [vmem:[#allocation18_spill] sm:$0xff] }
 0x4f5   : > { %v4918_v63 = vpop.eup %4917  ;;  %v2109_v21 = vmul.f32 %v4916_v41, %v2069_v57  ;;  %v7607_v61 = vadd.f32 %v2110_v22, %v2102_v40  ;;  %10837 = vst [vmem:[#allocation127_spill] sm:$0xff] %v7628_v6 }
 0x4f6   : > { %10825 = vst [vmem:[#allocation119_spill] sm:$0xff] %v7588_v29  ;;  %4929 = vtanh.f32 %v7588_v29  ;;  %v4920_v12 = vpop.eup %4919  ;;  %v2066_v48 = vmul.f32 0.5, %v4918_v63  ;;  %v2091_v2 = vadd.f32 0.5, %v2067_v56 }
 0x4f7   : > { %4931 = vtanh.f32 %v2014_v53  ;;  %v4922_v31 = vpop.eup %4921  ;;  %v2108_v13 = vmul.f32 %v4920_v12, %v7549_v33  ;;  %10832 = vst [vmem:[#allocation123_spill] sm:$0xff] %v7607_v61  ;;  %v7611_v16 = vadd.f32 %v2109_v21, %v2101_v32  ;;  %v7635_v32 = vld [vmem:[%s9958_s2 + $0x10] sm:$0xff] }
 0x4f8   : > { %4933 = vtanh.f32 %v7590_v14  ;;  %v4924_v9 = vpop.eup %4923  ;;  %v2065_v44 = vmul.f32 0.5, %v4922_v31  ;;  %v2090_v37 = vadd.f32 0.5, %v2066_v48  ;;  %10838 = vst [vmem:[#allocation128_spill] sm:$0xff] %v7635_v32  ;;  %v10894_v14 = vld [vmem:[#allocation12_spill] sm:$0xff] }
 0x4f9   : > { %4935 = vtanh.f32 %v2013_v24  ;;  %v4926_v8 = vpop.eup %4925  ;;  %10834 = vst [vmem:[#allocation124_spill] sm:$0xff] %v7611_v16  ;;  %v7614_v5 = vadd.f32 %v2108_v13, %v2100_v19  ;;  %v2063_v53 = vmul.f32 0.5, %v4924_v9  ;;  %v7642_v13 = vld [vmem:[%s9958_s2 + $0x18] sm:$0xff]  ;;  %v7684_v19 = vld [vmem:[%s9958_s2 + $0x48] sm:$0xff] }
 0x4fa   : > { %4937 = vtanh.f32 %v7597_v30  ;;  %v4928_v4 = vpop.eup %4927  ;;  %v2064_v60 = vmul.f32 0.5, %v4926_v8  ;;  %v2089_v20 = vadd.f32 0.5, %v2065_v44  ;;  %v7621_v8 = vld [vmem:[%s9958_s2] sm:$0xff]  ;;  %10839 = vst [vmem:[#allocation129_spill] sm:$0xff] %v7642_v13  ;;  %v7663_v44 = vld [vmem:[%s9958_s2 + $0x30] sm:$0xff] }
 0x4fb   : > { %4939 = vtanh.f32 %v2012_v26  ;;  %10835 = vst [vmem:[#allocation125_spill] sm:$0xff] %v7614_v5  ;;  %v2138_v46 = vmul.f32 %v4928_v4, %v2090_v37  ;;  %v2087_v42 = vadd.f32 0.5, %v2063_v53  ;;  %v7649_v4 = vld [vmem:[%s9958_s2 + $0x20] sm:$0xff]  ;;  %v7742_v53 = vld [vmem:[%s9958_s2 + $0x88] sm:$0xff] }
 0x4fc   : > { %v4930_v58 = vpop.eup %4929  ;;  %4941 = vtanh.f32 %v7602_v39  ;;  %v2088_v57 = vadd.f32 0.5, %v2064_v60  ;;  %10836 = vst [vmem:[#allocation126_spill] sm:$0xff] %v7621_v8  ;;  %v7705_v37 = vld [vmem:[%s9958_s2 + $0x60] sm:$0xff]  ;;  %v7712_v60 = vld [vmem:[%s9958_s2 + $0x68] sm:$0xff] }
 0x4fd   : > { %v4932_v7 = vpop.eup %4931  ;;  %v2139_v43 = vmul.f32 %v4930_v58, %v2091_v2  ;;  %4943 = vtanh.f32 %v7607_v61  ;;  %10840 = vst [vmem:[#allocation130_spill] sm:$0xff] %v7649_v4  ;;  %v7656_v2 = vld [vmem:[%s9958_s2 + $0x28] sm:$0xff]  ;;  %v7670_v58 = vld [vmem:[%s9958_s2 + $0x38] sm:$0xff] }
 0x4fe   : > { %v4934_v33 = vpop.eup %4933  ;;  %4945 = vtanh.f32 %v7611_v16  ;;  %v2062_v36 = vmul.f32 0.5, %v4932_v7  ;;  %10841 = vst [vmem:[#allocation131_spill] sm:$0xff] %v7656_v2  ;;  %v7691_v7 = vld [vmem:[%s9958_s2 + $0x50] sm:$0xff] }
 0x4ff   : > { %v4936_v11 = vpop.eup %4935  ;;  %2280 = vmatpush.msra.mxu3 %v2139_v43  ;;  %v2137_v41 = vmul.f32 %v4934_v33, %v2089_v20  ;;  %4947 = vtanh.f32 %v7614_v5  ;;  %10842 = vst [vmem:[#allocation132_spill] sm:$0xff] %v7663_v44  ;;  %v7698_v43 = vld [vmem:[%s9958_s2 + $0x58] sm:$0xff]  ;;  %v7719_v33 = vld [vmem:[%s9958_s2 + $0x70] sm:$0xff]  ;;  %v10886_v5 = vld [vmem:[#allocation11_spill] sm:$0xff] }
 0x500   : > { %v4938_v35 = vpop.eup %4937  ;;  %v2061_v34 = vmul.f32 0.5, %v4936_v11  ;;  %v2086_v18 = vadd.f32 0.5, %v2062_v36  ;;  %10843 = vst [vmem:[#allocation133_spill] sm:$0xff] %v7670_v58  ;;  %v7726_v11 = vld [vmem:[%s9958_s2 + $0x78] sm:$0xff] }
 0x501   : > { %v4940_v27 = vpop.eup %4939  ;;  %2281 = vmatpush.msra.mxu3 %v2138_v46  ;;  %v2136_v63 = vmul.f32 %v4938_v35, %v2088_v57  ;;  %10845 = vst [vmem:[#allocation135_spill] sm:$0xff] %v7684_v19  ;;  %v7733_v46 = vld [vmem:[%s9958_s2 + $0x80] sm:$0xff]  ;;  %v7760_v57 = vld [vmem:[%s9958_s2 + $0x98] sm:$0xff] }
 0x502   : > { %v4942_v24 = vpop.eup %4941  ;;  %v2060_v26 = vmul.f32 0.5, %v4940_v27  ;;  %v2085_v55 = vadd.f32 0.5, %v2061_v34  ;;  %10846 = vst [vmem:[#allocation136_spill] sm:$0xff] %v7691_v7  ;;  %v7751_v27 = vld [vmem:[%s9958_s2 + $0x90] sm:$0xff] }
 0x503   : > { %2282 = vmatpush.msra.mxu3 %v2137_v41  ;;  %v4944_v22 = vpop.eup %4943  ;;  %v2135_v12 = vmul.f32 %v4942_v24, %v2087_v42  ;;  %10847 = vst [vmem:[#allocation137_spill] sm:$0xff] %v7698_v43  ;;  %v7769_v24 = vld [vmem:[%s9958_s2 + $0xa0] sm:$0xff]  ;;  %v7778_v42 = vld [vmem:[%s9958_s2 + $0xa8] sm:$0xff] }
 0x504   : > { %v4946_v56 = vpop.eup %4945  ;;  %v2134_v31 = vmul.f32 %v4944_v22, %v2086_v18  ;;  %v2084_v9 = vadd.f32 0.5, %v2060_v26  ;;  %10848 = vst [vmem:[#allocation138_spill] sm:$0xff] %v7705_v37  ;;  %v7787_v22 = vld [vmem:[%s9958_s2 + $0xb0] sm:$0xff]  ;;  %v7796_v18 = vld [vmem:[%s9958_s2 + $0xb8] sm:$0xff] }
 0x505   : > { %2283 = vmatpush.msra.mxu3 %v2136_v63  ;;  %v4948_v40 = vpop.eup %4947  ;;  %v2133_v21 = vmul.f32 %v4946_v56, %v2085_v55  ;;  %10849 = vst [vmem:[#allocation139_spill] sm:$0xff] %v7712_v60  ;;  %v7805_v56 = vld [vmem:[%s9958_s2 + $0xc0] sm:$0xff]  ;;  %v7814_v55 = vld [vmem:[%s9958_s2 + $0xc8] sm:$0xff] }
 0x506   : > { %v2132_v48 = vmul.f32 %v4948_v40, %v2084_v9  ;;  %10850 = vst [vmem:[#allocation140_spill] sm:$0xff] %v7719_v33 }
 0x507   : > { %2284 = vmatpush.msra.mxu3 %v2135_v12  ;;  %10851 = vst [vmem:[#allocation142_spill] sm:$0xff] %v7726_v11 }
 0x508   : > { %10852 = vst [vmem:[#allocation159_spill] sm:$0xff] %v7733_v46 }
 0x509   : > { %2285 = vmatpush.msra.mxu3 %v2134_v31  ;;  %10853 = vst [vmem:[#allocation114_spill] sm:$0xff] %v7742_v53 }
 0x50a   : > { %10854 = vst [vmem:[#allocation146_spill] sm:$0xff] %v7751_v27 }
 0x50b   : > { %2286 = vmatpush.msra.mxu3 %v2133_v21  ;;  %10855 = vst [vmem:[#allocation117_spill] sm:$0xff] %v7760_v57  ;;  %v7823_v21 = vld [vmem:[%s9958_s2 + $0xd0] sm:$0xff] }
 0x50c   : > { %10856 = vst [vmem:[#allocation149_spill] sm:$0xff] %v7769_v24 }
 0x50d   : > { %2287 = vmatpush.msra.mxu3 %v2132_v48  ;;  %10857 = vst [vmem:[#allocation68_spill] sm:$0xff] %v7778_v42  ;;  %v7832_v48 = vld [vmem:[%s9958_s2 + $0xd8] sm:$0xff] }
 0x50e   : > { %4444 = vmatmul.msk.f32.vlgmr.msra.gmra.mxu3 %vm912_vm0, %v7621_v8  ;;  %10858 = vst [vmem:[#allocation156_spill] sm:$0xff] %v7787_v22 }
 0x50f   : > { %10859 = vst [vmem:[#allocation64_spill] sm:$0xff] %v7796_v18 }
 0x510   : > { %10860 = vst [vmem:[#allocation147_spill] sm:$0xff] %v7805_v56 }
 0x511   : > { %10861 = vst [vmem:[#allocation158_spill] sm:$0xff] %v7814_v55 }
 0x512   : > { %10862 = vst [vmem:[#allocation61_spill] sm:$0xff] %v7823_v21 }
 0x513   : > { %10863 = vst [vmem:[#allocation75_spill] sm:$0xff] %v7832_v48 }
 0x516   : > { %4445 = vmatmul.msk.f32.gmra.mxu3 %vm912_vm0, %v7628_v6  ;;  %v10885_v6 = vld [vmem:[#allocation22_spill] sm:$0xff] }
 0x51e   : > { %4446 = vmatmul.msk.f32.gmra.mxu3 %vm912_vm0, %v7635_v32 }
 0x526   : > { %4447 = vmatmul.msk.f32.gmra.mxu3 %vm912_vm0, %v7642_v13  ;;  %v10884_v13 = vld [vmem:[#allocation10_spill] sm:$0xff] }
 0x52e   : > { %4448 = vmatmul.msk.f32.gmra.mxu3 %vm912_vm0, %v7649_v4 }
 0x536   : > { %4449 = vmatmul.msk.f32.gmra.mxu3 %vm912_vm0, %v7656_v2  ;;  %v10883_v2 = vld [vmem:[#allocation17_spill] sm:$0xff] }
 0x53e   : > { %4450 = vmatmul.msk.f32.gmra.mxu3 %vm912_vm0, %v7663_v44 }
 0x546   : > { %4451 = vmatmul.msk.f32.gmra.mxu3 %vm912_vm0, %v7670_v58  ;;  %v10882_v58 = vld [vmem:[#allocation8_spill] sm:$0xff] }
 0x54e   : > { %4452 = vmatmul.msk.f32.gmra.mxu3 %vm912_vm0, %v7677_v17  ;;  %v7880_v17 = vld [vmem:[%s5647_s27 + $0xb] ss:$0 sm:$0xff] }
 0x54f   : > { %v2214_v8 = vmul.f32 %v7880_v17, %v10885_v6 }
 0x556   : > { %4453 = vmatmul.msk.f32.gmra.mxu3 %vm912_vm0, %v7684_v19 }
 0x55e   : > { %4454 = vmatmul.msk.f32.gmra.mxu3 %vm912_vm0, %v7691_v7  ;;  %v10881_v7 = vld [vmem:[#allocation42_spill] sm:$0xff] }
 0x566   : > { %4455 = vmatmul.msk.f32.gmra.mxu3 %vm912_vm0, %v7698_v43 }
 0x56e   : > { %4456 = vmatmul.msk.f32.gmra.mxu3 %vm912_vm0, %v7705_v37  ;;  %v10880_v37 = vld [vmem:[#allocation9_spill] sm:$0xff] }
 0x576   : > { %4457 = vmatmul.msk.f32.gmra.mxu3 %vm912_vm0, %v7712_v60  ;;  %v7871_v60 = vld [vmem:[%s5647_s27 + $0x3] ss:$0 sm:$0xff] }
 0x577   : > { %v2148_v43 = vmul.f32 %v7871_v60, %v10880_v37  ;;  %v2149_v19 = vmul.f32 %v7871_v60, %v10881_v7  ;;  %v2147_v44 = vmul.f32 %v7871_v60, %v10882_v58  ;;  %v2155_v4 = vmul.f32 %v7871_v60, %v10883_v2  ;;  %v10887_v37 = vld [vmem:[#allocation45_spill] sm:$0xff]  ;;  %v10888_v7 = vld [vmem:[#allocation28_spill] sm:$0xff]  ;;  %v10890_v58 = vld [vmem:[#allocation6_spill] sm:$0xff] }
 0x578   : > { %v2156_v16 = vmul.f32 %v7871_v60, %v10886_v5  ;;  %v2157_v61 = vmul.f32 %v7871_v60, %v10887_v37  ;;  %v2222_v5 = vmul.f32 %v7880_v17, %v10894_v14 }
 0x579   : > { %v2180_v32 = vadd.f32 %v2148_v43, %v10884_v13  ;;  %v2179_v39 = vadd.f32 %v2147_v44, %v10888_v7  ;;  %v2181_v29 = vadd.f32 %v2149_v19, %v10890_v58  ;;  %v10893_v13 = vld [vmem:[#allocation31_spill] sm:$0xff]  ;;  %v10896_v44 = vld [vmem:[#allocation54_spill] sm:$0xff] }
 0x57a   : > { %v2221_v6 = vmul.f32 %v7880_v17, %v10893_v13  ;;  %v2173_v7 = vmul.f32 %v7871_v60, %v10896_v44  ;;  %v10898_v58 = vld [vmem:[#allocation15_spill] sm:$0xff]  ;;  %v10901_v13 = vld [vmem:[#allocation25_spill] sm:$0xff] }
 0x57b   : > { %v7917_v14 = vadd.f32 %v2214_v8, %v2180_v32 }
 0x57e   : > { %4458 = vmatmul.msk.f32.gmra.mxu3 %vm912_vm0, %v7719_v33 }
 0x586   : > { %4459 = vmatmul.msk.f32.gmra.mxu3 %vm912_vm0, %v7726_v11 }
 0x58e   : > { %4460 = vmatmul.msk.f32.gmra.mxu3 %vm912_vm0, %v7733_v46 }
 0x591   : > { %v7737_v20 = vpop.f32.mrf.mxu3 }
 0x596   : > { %4461 = vmatmul.msk.f32.gmra.mxu3 %vm912_vm0, %v7742_v53 }
 0x599   : > { %v7746_v35 = vpop.f32.mrf.mxu3 }
 0x59e   : > { %4462 = vmatmul.msk.f32.gmra.mxu3 %vm912_vm0, %v7751_v27 }
 0x5a1   : > { %v7755_v41 = vpop.f32.mrf.mxu3 }
 0x5a6   : > { %4463 = vmatmul.msk.f32.gmra.mxu3 %vm912_vm0, %v7760_v57 }
 0x5a9   : > { %v7764_v36 = vpop.f32.mrf.mxu3 }
 0x5ae   : > { %4464 = vmatmul.msk.f32.gmra.mxu3 %vm912_vm0, %v7769_v24 }
 0x5b1   : > { %v7773_v63 = vpop.f32.mrf.mxu3 }
 0x5b6   : > { %4465 = vmatmul.msk.f32.gmra.mxu3 %vm912_vm0, %v7778_v42  ;;  %v10868_v42 = vld [vmem:[#allocation148_spill] sm:$0xff] }
 0x5b9   : > { %v7782_v34 = vpop.f32.mrf.mxu3 }
 0x5be   : > { %4466 = vmatmul.msk.f32.gmra.mxu3 %vm912_vm0, %v7787_v22  ;;  %v10866_v22 = vld [vmem:[#allocation155_spill] sm:$0xff] }
 0x5c1   : > { %v7791_v12 = vpop.f32.mrf.mxu3 }
 0x5c6   : > { %4467 = vmatmul.msk.f32.gmra.mxu3 %vm912_vm0, %v7796_v18 }
 0x5c9   : > { %v7800_v26 = vpop.f32.mrf.mxu3 }
 0x5ce   : > { %4468 = vmatmul.msk.f32.gmra.mxu3 %vm912_vm0, %v7805_v56  ;;  %v10865_v56 = vld [vmem:[#allocation150_spill] sm:$0xff] }
 0x5d1   : > { %v7809_v31 = vpop.f32.mrf.mxu3 }
 0x5d6   : > { %4469 = vmatmul.msk.f32.gmra.mxu3 %vm912_vm0, %v7814_v55 }
 0x5d9   : > { %v7818_v40 = vpop.f32.mrf.mxu3 }
 0x5de   : > { %4470 = vmatmul.msk.f32.gmra.mxu3 %vm912_vm0, %v7823_v21 }
 0x5e1   : > { %v7827_v9 = vpop.f32.mrf.mxu3 }
 0x5e6   : > { %4471 = vmatmul.msk.f32.gmra.mxu3 %vm912_vm0, %v7832_v48  ;;  %v10869_v48 = vld [vmem:[#allocation152_spill] sm:$0xff] }
 0x5e9   : > { %v7836_v55 = vpop.f32.mrf.mxu3 }
 0x5ea   : > { %10864 = vst [vmem:[#allocation115_spill] sm:$0xff] %v7836_v55 }
 0x5ee   : > { %4472 = vmatmul.msk.f32.gmra.mxu3 %vm912_vm0, %v10865_v56 }
 0x5f1   : > { %v7840_v18 = vpop.f32.mrf.mxu3 }
 0x5f6   : > { %4473 = vmatmul.msk.f32.gmra.mxu3 %vm912_vm0, %v10866_v22 }
 0x5f9   : > { %v7844_v21 = vpop.f32.mrf.mxu3 }
 0x5fa   : > { %10867 = vst [vmem:[#allocation116_spill] sm:$0xff] %v7844_v21 }
 0x5fe   : > { %4474 = vmatmul.msk.f32.gmra.mxu3 %vm912_vm0, %v10868_v42 }
 0x601   : > { %v7848_v24 = vpop.f32.mrf.mxu3 }
 0x606   : > { %4475 = vmatmul.msk.f32.gmra.mxu3 %vm912_vm0, %v10869_v48 }
 0x609   : > { %v7852_v57 = vpop.f32.mrf.mxu3 }
 0x60a   : > { %10870 = vst [vmem:[#allocation110_spill] sm:$0xff] %v7852_v57  ;;  %v10922_v57 = vld [vmem:[#allocation30_spill] sm:$0xff] }
 0x611   : > { %v7854_v56 = vpop.f32.mrf.mxu3 }
 0x612   : > { %10871 = vst [vmem:[#allocation39_spill] sm:$0xff] %v7854_v56  ;;  %v10889_v56 = vld [vmem:[#allocation23_spill] sm:$0xff] }
 0x613   : > { %v2213_v30 = vmul.f32 %v7880_v17, %v10889_v56  ;;  %v10897_v56 = vld [vmem:[#allocation21_spill] sm:$0xff] }
 0x614   : > { %v2145_v19 = vmul.f32 %v7871_v60, %v10897_v56 }
 0x615   : > { %v7924_v38 = vadd.f32 %v2213_v30, %v2179_v39 }
 0x619   : > { %v7856_v27 = vpop.f32.mrf.mxu3 }
 0x61a   : > { %10872 = vst [vmem:[#allocation71_spill] sm:$0xff] %v7856_v27  ;;  %v10891_v27 = vld [vmem:[#allocation20_spill] sm:$0xff] }
 0x61b   : > { %v2215_v2 = vmul.f32 %v7880_v17, %v10891_v27  ;;  %v2154_v27 = vmul.f32 %v7871_v60, %v10898_v58 }
 0x61d   : > { %v7926_v58 = vadd.f32 %v2215_v2, %v2181_v29  ;;  %v10911_v29 = vld [vmem:[#allocation34_spill] sm:$0xff] }
 0x61e   : > { %v2153_v39 = vmul.f32 %v7871_v60, %v10911_v29  ;;  %v10919_v29 = vld [vmem:[#allocation51_spill] sm:$0xff] }
 0x621   : > { %v7858_v53 = vpop.f32.mrf.mxu3 }
 0x622   : > { %10873 = vst [vmem:[#allocation144_spill] sm:$0xff] %v7858_v53  ;;  %v10895_v53 = vld [vmem:[#allocation14_spill] sm:$0xff] }
 0x623   : > { %v2223_v37 = vmul.f32 %v7880_v17, %v10895_v53 }
 0x629   : > { %v7860_v22 = vpop.f32.mrf.mxu3 }
 0x62a   : > { %10874 = vst [vmem:[#allocation111_spill] sm:$0xff] %v7860_v22  ;;  %v2146_v22 = vmul.f32 %v7871_v60, %v10901_v13  ;;  %v10907_v13 = vld [vmem:[#allocation29_spill] sm:$0xff] }
 0x62b   : > { %v2220_v8 = vmul.f32 %v7880_v17, %v10907_v13 }
 0x631   : > { %v7862_v46 = vpop.f32.mrf.mxu3 }
 0x632   : > { %10875 = vst [vmem:[#allocation52_spill] sm:$0xff] %v7862_v46  ;;  %v10900_v46 = vld [vmem:[#allocation49_spill] sm:$0xff] }
 0x639   : > { %v7864_v11 = vpop.f32.mrf.mxu3 }
 0x63a   : > { %10876 = vst [vmem:[#allocation145_spill] sm:$0xff] %v7864_v11  ;;  %v10902_v11 = vld [vmem:[#allocation7_spill] sm:$0xff] }
 0x63b   : > { %v2189_v53 = vadd.f32 %v2157_v61, %v10902_v11  ;;  %v10908_v61 = vld [vmem:[#allocation27_spill] sm:$0xff] }
 0x63c   : > { %v2205_v11 = vadd.f32 %v2173_v7, %v10908_v61  ;;  %v10915_v7 = vld [vmem:[#allocation47_spill] sm:$0xff] }
 0x63d   : > { %v2171_v61 = vmul.f32 %v7871_v60, %v10915_v7 }
 0x641   : > { %v7866_v42 = vpop.f32.mrf.mxu3 }
 0x642   : > { %10877 = vst [vmem:[#allocation143_spill] sm:$0xff] %v7866_v42  ;;  %v10903_v42 = vld [vmem:[#allocation24_spill] sm:$0xff] }
 0x643   : > { %v2172_v44 = vmul.f32 %v7871_v60, %v10903_v42  ;;  %v10909_v42 = vld [vmem:[#allocation40_spill] sm:$0xff] }
 0x644   : > { %v2211_v15 = vmul.f32 %v7880_v17, %v10909_v42  ;;  %v10916_v42 = vld [vmem:[#allocation36_spill] sm:$0xff] }
 0x645   : > { %v2177_v13 = vadd.f32 %v2145_v19, %v10916_v42  ;;  %v10924_v42 = vld [vmem:[#allocation53_spill] sm:$0xff] }
 0x647   : > { %v2243_v7 = vadd.f32 %v2211_v15, %v2177_v13  ;;  %v10931_v13 = vld [vmem:[#allocation50_spill] sm:$0xff] }
 0x649   : > { %v7868_v33 = vpop.f32.mrf.mxu3 }
 0x64a   : > { %10878 = vst [vmem:[#allocation19_spill] sm:$0xff] %v7868_v33  ;;  %v10904_v33 = vld [vmem:[#allocation33_spill] sm:$0xff] }
 0x64b   : > { %v2209_v56 = vmul.f32 %v7880_v17, %v10904_v33  ;;  %v10910_v33 = vld [vmem:[#allocation41_spill] sm:$0xff] }
 0x64c   : > { %v2212_v30 = vmul.f32 %v7880_v17, %v10910_v33  ;;  %v2178_v33 = vadd.f32 %v2146_v22, %v10917_v47  ;;  %v2218_v22 = vmul.f32 %v7880_v17, %v10924_v42  ;;  %v10925_v47 = vld [vmem:[#allocation65_spill] sm:$0xff] }
 0x64e   : > { %v2244_v19 = vadd.f32 %v2212_v30, %v2178_v33  ;;  %v10932_v30 = vld [vmem:[#allocation69_spill] sm:$0xff] }
 0x651   : > { %v7873_v48 = vpop.f32.mrf.mxu3 }
 0x652   : > { %10879 = vst [vmem:[#allocation157_spill] sm:$0xff] %v7873_v48  ;;  %v2187_v48 = vadd.f32 %v2155_v4, %v10899_v62  ;;  %v10905_v4 = vld [vmem:[#allocation26_spill] sm:$0xff] }
 0x654   : > { %v7933_v32 = vadd.f32 %v2221_v6, %v2187_v48  ;;  %v10914_v6 = vld [vmem:[#allocation38_spill] sm:$0xff] }
 0x655   : > { %v2230_v48 = vmul.f32 %v7880_v17, %v10914_v6  ;;  %v2237_v6 = vmul.f32 %v7880_v17, %v10922_v57 }
 0x659   : > { %v7899_v43 = vpop.f32.mrf.mxu3 }
 0x65a   : > { %10892 = vst [vmem:[#allocation154_spill] sm:$0xff] %v7899_v43  ;;  %v2188_v43 = vadd.f32 %v2156_v16, %v10900_v46  ;;  %v2239_v16 = vmul.f32 %v7880_v17, %v10905_v4  ;;  %v10906_v46 = vld [vmem:[#allocation37_spill] sm:$0xff]  ;;  %v10912_v4 = vld [vmem:[#allocation32_spill] sm:$0xff] }
 0x65b   : > { %v2186_v62 = vadd.f32 %v2154_v27, %v10906_v46  ;;  %v2152_v27 = vmul.f32 %v7871_v60, %v10912_v4  ;;  %v7946_v46 = vadd.f32 %v2223_v37, %v2189_v53  ;;  %v10921_v37 = vld [vmem:[#allocation77_spill] sm:$0xff] }
 0x65c   : > { %v7942_v2 = vadd.f32 %v2222_v5, %v2188_v43  ;;  %v2204_v5 = vadd.f32 %v2172_v44, %v10919_v29  ;;  %v10920_v43 = vld [vmem:[#allocation43_spill] sm:$0xff]  ;;  %v2203_v53 = vadd.f32 %v2171_v61, %v10921_v37 }
 0x65d   : > { %10913 = vst [vmem:[#allocation151_spill] sm:$0xff] %v7946_v46  ;;  %v2238_v55 = vmul.f32 %v7880_v17, %v10920_v43  ;;  %v7959_v4 = vadd.f32 %v2220_v8, %v2186_v62  ;;  %v7964_v46 = vadd.f32 %v2239_v16, %v2205_v11  ;;  %v10926_v44 = vld [vmem:[#allocation59_spill] sm:$0xff]  ;;  %v10927_v43 = vld [vmem:[#allocation44_spill] sm:$0xff]  ;;  %v10928_v8 = vld [vmem:[#allocation46_spill] sm:$0xff]  ;;  %v2184_v33 = vadd.f32 %v2152_v27, %v10931_v13 }
 0x65e   : > { %v2143_v29 = vmul.f32 %v7871_v60, %v10926_v44  ;;  %v2144_v62 = vmul.f32 %v7871_v60, %v10927_v43  ;;  %v2151_v61 = vmul.f32 %v7871_v60, %v10928_v8  ;;  %v10929_v37 = vld [vmem:[#allocation55_spill] sm:$0xff]  ;;  %v10933_v44 = vld [vmem:[#allocation62_spill] sm:$0xff]  ;;  %v10936_v27 = vld [vmem:[#allocation72_spill] sm:$0xff] }
 0x65f   : > { %10923 = vst [vmem:[#allocation153_spill] sm:$0xff] %v7964_v46  ;;  %v2219_v11 = vmul.f32 %v7880_v17, %v10929_v37  ;;  %v10930_v16 = vld [vmem:[#allocation83_spill] sm:$0xff]  ;;  %v2142_v42 = vmul.f32 %v7871_v60, %v10933_v44  ;;  %v10934_v43 = vld [vmem:[#allocation86_spill] sm:$0xff]  ;;  %v7989_v46 = vadd.f32 %v2237_v6, %v2203_v53  ;;  %v7993_v21 = vadd.f32 %v2218_v22, %v2184_v33 }
 0x660   : > { %v2150_v15 = vmul.f32 %v7871_v60, %v10930_v16  ;;  %v2208_v57 = vmul.f32 %v7880_v17, %v10934_v43  ;;  %v2175_v8 = vadd.f32 %v2143_v29, %v10770_v25  ;;  %v10935_v37 = vld [vmem:[#allocation67_spill] sm:$0xff]  ;;  %v2231_v29 = vmul.f32 %v7880_v17, %v10773_v10  ;;  %v10938_v6 = vld [vmem:[#allocation74_spill] sm:$0xff] }
 0x661   : > { %v7954_v23 = vpop.f32.mrf.mxu3  ;;  %v2210_v16 = vmul.f32 %v7880_v17, %v10935_v37  ;;  %v2174_v13 = vadd.f32 %v2142_v42, %v10456_v54  ;;  %v2236_v53 = vmul.f32 %v7880_v17, %v10938_v6  ;;  %v10939_v25 = vld [vmem:[#allocation63_spill] sm:$0xff] }
 0x662   : > { %10918 = vst [vmem:[#allocation48_spill] sm:$0xff] %v7954_v23  ;;  %v2185_v23 = vadd.f32 %v2153_v39, %v10925_v47  ;;  %v2165_v39 = vmul.f32 %v7871_v60, %v10932_v30  ;;  %v7982_v47 = vadd.f32 %v2238_v55, %v2204_v5  ;;  %v2164_v30 = vmul.f32 %v7871_v60, %v10936_v27  ;;  %v10937_v55 = vld [vmem:[#allocation73_spill] sm:$0xff] }
 0x663   : > { %v2170_v5 = vmul.f32 %v7871_v60, %v10937_v55  ;;  %v2176_v37 = vadd.f32 %v2144_v62, %v10939_v25  ;;  %v2182_v22 = vadd.f32 %v2150_v15, %v10602_v3  ;;  %v2240_v55 = vadd.f32 %v2208_v57, %v2174_v13 }
 0x664   : > { %v8000_v44 = vadd.f32 %v2219_v11, %v2185_v23  ;;  %v2196_v33 = vadd.f32 %v2164_v30, %v10603_v50  ;;  %v2197_v27 = vadd.f32 %v2165_v39, %v10604_v59  ;;  %v2241_v42 = vadd.f32 %v2209_v56, %v2175_v8  ;;  %v10940_v23 = vld [vmem:[#allocation91_spill] sm:$0xff]  ;;  %v10941_v30 = vld [vmem:[#allocation96_spill] sm:$0xff] }
 0x665   : > { %v8014_v11 = vmul.f32 %v7871_v60, %v10940_v23  ;;  %v2202_v10 = vadd.f32 %v2170_v5, %v10606_v49  ;;  %v2242_v54 = vadd.f32 %v2210_v16, %v2176_v37  ;;  %v8019_v62 = vmul.f32 %v7871_v60, %v6310_v28  ;;  %v10942_v56 = vld [vmem:[#allocation88_spill] sm:$0xff] }
 0x666   : > { %v2166_v15 = vmul.f32 %v7871_v60, %v10777_v51  ;;  %v8025_v39 = vmul.f32 %v7871_v60, %v10941_v30  ;;  %v2385_v57 = vadd.f32 %v7737_v20, %v2240_v55  ;;  %v2217_v8 = vmul.f32 %v7880_v17, %v10942_v56  ;;  %v10943_v55 = vld [vmem:[#allocation84_spill] sm:$0xff] }
 0x667   : > { %v8030_v13 = vadd.f32 %v2231_v29, %v2197_v27  ;;  %v8032_v5 = vadd.f32 %v2236_v53, %v2202_v10  ;;  %v2386_v37 = vadd.f32 %v7746_v35, %v2241_v42  ;;  %v2160_v16 = vmul.f32 %v7871_v60, %v6371_v45  ;;  %v10944_v29 = vld [vmem:[#allocation85_spill] sm:$0xff]  ;;  %v10946_v42 = vld [vmem:[#allocation90_spill] sm:$0xff]  ;;  %v10947_v56 = vld [vmem:[#allocation92_spill] sm:$0xff] }
 0x668   : > { %v8037_v28 = vadd.f32 %v2230_v48, %v2196_v33  ;;  %v2169_v49 = vmul.f32 %v7871_v60, %v10607_v1  ;;  %v2387_v30 = vadd.f32 %v7755_v41, %v2242_v54  ;;  %v2216_v20 = vmul.f32 %v7880_v17, %v10778_v0  ;;  %v10945_v48 = vld [vmem:[#allocation98_spill] sm:$0xff] }
 0x669   : > { %v8010_v43 = vpop.f32.mrf.mxu3  ;;  %v2183_v27 = vadd.f32 %v2151_v61, %v10943_v55  ;;  %v8046_v10 = vadd.f32 %v2166_v15, %v6418_v52  ;;  %v2388_v35 = vadd.f32 %v7764_v36, %v2243_v7  ;;  %v8050_v53 = vadd.f32 %v2160_v16, %v10944_v29  ;;  %v10948_v36 = vld [vmem:[#allocation94_spill] sm:$0xff]  ;;  %v10949_v16 = vld [vmem:[#allocation95_spill] sm:$0xff] }
 0x66a   : > { %v2201_v33 = vadd.f32 %v2169_v49, %v10945_v48  ;;  %v2235_v1 = vmul.f32 %v7880_v17, %v10946_v42  ;;  %v2417_v45 = vmul.f32 0.5, %v2385_v57  ;;  %v2389_v54 = vadd.f32 %v7773_v63, %v2244_v19  ;;  %v10950_v57 = vld [vmem:[#allocation99_spill] sm:$0xff] }
 0x66b   : > { %v2249_v41 = vadd.f32 %v2217_v8, %v2183_v27  ;;  %v2163_v61 = vmul.f32 %v7871_v60, %v10947_v56  ;;  %v2418_v55 = vmul.f32 0.5, %v2386_v37  ;;  %v2390_v15 = vadd.f32 %v7782_v34, %v7924_v38  ;;  %v10951_v34 = vld [vmem:[#allocation102_spill] sm:$0xff]  ;;  %v10952_v56 = vld [vmem:[#allocation105_spill] sm:$0xff] }
 0x66c   : > { %v2229_v7 = vmul.f32 %v7880_v17, %v10948_v36  ;;  %v2168_v49 = vmul.f32 %v7871_v60, %v10949_v16  ;;  %v2419_v42 = vmul.f32 0.5, %v2387_v30  ;;  %v2391_v63 = vadd.f32 %v7791_v12, %v7917_v14 }
 0x66d   : > { %v2248_v19 = vadd.f32 %v2216_v20, %v2182_v22  ;;  %v2234_v8 = vmul.f32 %v7880_v17, %v10950_v57  ;;  %v2420_v37 = vmul.f32 0.5, %v2388_v35  ;;  %v2392_v38 = vadd.f32 %v7800_v26, %v7926_v58  ;;  %v10953_v20 = vld [vmem:[#allocation104_spill] sm:$0xff] }
 0x66e   : > { %v2228_v27 = vmul.f32 %v7880_v17, %v10951_v34  ;;  %v8074_v36 = vadd.f32 %v2235_v1, %v2201_v33  ;;  %4949 = vtanh.f32 %v2417_v45  ;;  %v2421_v16 = vmul.f32 0.5, %v2389_v54  ;;  %v10954_v1 = vld [vmem:[#allocation107_spill] sm:$0xff] }
 0x66f   : > { %v2393_v30 = vadd.f32 %v7809_v31, %v2248_v19  ;;  %v2233_v14 = vmul.f32 %v7880_v17, %v10952_v56  ;;  %4951 = vtanh.f32 %v2418_v55  ;;  %v2422_v12 = vmul.f32 0.5, %v2390_v15  ;;  %v10955_v55 = vld [vmem:[#allocation60_spill] sm:$0xff] }
 0x670   : > { %v2394_v22 = vadd.f32 %v7818_v40, %v2249_v41  ;;  %v2195_v35 = vadd.f32 %v2163_v61, %v10953_v20  ;;  %4953 = vtanh.f32 %v2419_v42  ;;  %v2423_v58 = vmul.f32 0.5, %v2391_v63  ;;  %v10956_v41 = vld [vmem:[#allocation79_spill] sm:$0xff]  ;;  %v10958_v63 = vld [vmem:[#allocation16_spill] sm:$0xff] }
 0x671   : > { %v8064_v48 = vpop.f32.mrf.mxu3  ;;  %v2395_v26 = vadd.f32 %v7827_v9, %v7993_v21  ;;  %v8085_v45 = vmul.f32 %v7880_v17, %v10954_v1  ;;  %4955 = vtanh.f32 %v2420_v37  ;;  %v2424_v31 = vmul.f32 0.5, %v2392_v38  ;;  %v10957_v9 = vld [vmem:[#allocation116_spill] sm:$0xff] }
 0x672   : > { %v2399_v33 = vadd.f32 %v7848_v24, %v7942_v2  ;;  %v2200_v54 = vadd.f32 %v2168_v49, %v10955_v55  ;;  %4957 = vtanh.f32 %v2421_v16  ;;  %v2425_v40 = vmul.f32 0.5, %v2393_v30  ;;  %v10959_v16 = vld [vmem:[#allocation151_spill] sm:$0xff]  ;;  %v10960_v49 = vld [vmem:[#allocation110_spill] sm:$0xff]  ;;  %v10961_v30 = vld [vmem:[#allocation109_spill] sm:$0xff] }
 0x673   : > { %v2397_v42 = vadd.f32 %v7840_v18, %v7959_v4  ;;  %v2158_v61 = vmul.f32 %v7871_v60, %v10956_v41  ;;  %4959 = vtanh.f32 %v2422_v12  ;;  %v2426_v21 = vmul.f32 0.5, %v2394_v22  ;;  %v10962_v22 = vld [vmem:[#allocation112_spill] sm:$0xff]  ;;  %v10966_v55 = vld [vmem:[#allocation13_spill] sm:$0xff] }
 0x674   : > { %v2398_v15 = vadd.f32 %v10957_v9, %v7933_v32  ;;  %v2159_v19 = vmul.f32 %v7871_v60, %v10958_v63  ;;  %v4950_v24 = vpop.eup %4949  ;;  %4961 = vtanh.f32 %v2423_v58  ;;  %v2427_v2 = vmul.f32 0.5, %v2395_v26  ;;  %v10963_v32 = vld [vmem:[#allocation89_spill] sm:$0xff]  ;;  %v10964_v58 = vld [vmem:[#allocation115_spill] sm:$0xff] }
 0x675   : > { %v2400_v38 = vadd.f32 %v10960_v49, %v10959_v16  ;;  %v2194_v18 = vadd.f32 %v8014_v11, %v10961_v30  ;;  %v4952_v4 = vpop.eup %4951  ;;  %4963 = vtanh.f32 %v2424_v31  ;;  %v2431_v12 = vmul.f32 0.5, %v2399_v33  ;;  %v10965_v63 = vld [vmem:[#allocation113_spill] sm:$0xff] }
 0x676   : > { %v2224_v1 = vmul.f32 %v7880_v17, %v10962_v22  ;;  %v2199_v9 = vadd.f32 %v8025_v39, %v10963_v32  ;;  %v4954_v60 = vpop.eup %4953  ;;  %4965 = vtanh.f32 %v2425_v40  ;;  %v2396_v26 = vadd.f32 %v10964_v58, %v8000_v44  ;;  %v10967_v44 = vld [vmem:[#allocation82_spill] sm:$0xff] }
 0x677   : > { %v2429_v41 = vmul.f32 0.5, %v2397_v42  ;;  %v2190_v16 = vadd.f32 %v2158_v61, %v10965_v63  ;;  %v4956_v49 = vpop.eup %4955  ;;  %4967 = vtanh.f32 %v2426_v21  ;;  %v2430_v11 = vmul.f32 0.5, %v2398_v15  ;;  %v10968_v61 = vld [vmem:[#allocation35_spill] sm:$0xff] }
 0x678   : > { %v8109_v30 = vadd.f32 %v2229_v7, %v2195_v35  ;;  %v8111_v31 = vadd.f32 %v2234_v8, %v2200_v54  ;;  %v4958_v33 = vpop.eup %4957  ;;  %4969 = vtanh.f32 %v2427_v2  ;;  %v2432_v22 = vmul.f32 0.5, %v2400_v38  ;;  %v10969_v54 = vld [vmem:[#allocation97_spill] sm:$0xff] }
 0x679   : > { %v2376_v37 = vpop.f32.mrf.mxu3  ;;  %v2191_v39 = vadd.f32 %v2159_v19, %v10966_v55  ;;  %v8114_v32 = vadd.f32 %v2228_v27, %v2194_v18  ;;  %v4960_v40 = vpop.eup %4959  ;;  %4971 = vtanh.f32 %v2431_v12  ;;  %v2193_v42 = vadd.f32 %v8019_v62, %v10967_v44  ;;  %v10970_v18 = vld [vmem:[#allocation93_spill] sm:$0xff] }
 0x67a   : > { %v2232_v21 = vmul.f32 %v7880_v17, %v10968_v61  ;;  %v8120_v15 = vadd.f32 %v2233_v14, %v2199_v9  ;;  %v4962_v7 = vpop.eup %4961  ;;  %v2428_v8 = vmul.f32 0.5, %v2396_v26  ;;  %4973 = vtanh.f32 %v2429_v41 }
 0x67b   : > { %v8122_v35 = vadd.f32 %v2224_v1, %v2190_v16  ;;  %v2226_v19 = vmul.f32 %v7880_v17, %v10969_v54  ;;  %v4964_v27 = vpop.eup %4963  ;;  %v2465_v2 = vmul.f32 0.5, %v4950_v24  ;;  %v2467_v38 = vmul.f32 0.5, %v4954_v60 }
 0x67c   : > { %4975 = vtanh.f32 %v2430_v11  ;;  %v2225_v62 = vmul.f32 %v7880_v17, %v10970_v18  ;;  %v4966_v58 = vpop.eup %4965  ;;  %v2468_v63 = vmul.f32 0.5, %v4956_v49  ;;  %v2469_v14 = vmul.f32 0.5, %v4958_v33 }
 0x67d   : > { %4977 = vtanh.f32 %v2432_v22  ;;  %v4968_v41 = vpop.eup %4967  ;;  %v2470_v1 = vmul.f32 0.5, %v4960_v40  ;;  %v2471_v26 = vmul.f32 0.5, %v4962_v7  ;;  %v2259_v16 = vadd.f32 %v8085_v45, %v2193_v42 }
 0x67e   : > { %v2264_v54 = vadd.f32 %v2232_v21, %v8046_v10  ;;  %v4970_v24 = vpop.eup %4969  ;;  %v2472_v60 = vmul.f32 0.5, %v4964_v27  ;;  %4979 = vtanh.f32 %v2428_v8  ;;  %v2258_v11 = vadd.f32 %v2226_v19, %v8050_v53 }
 0x67f   : > { %v2414_v17 = vadd.f32 %v2376_v37, %v7989_v46  ;;  %v4972_v18 = vpop.eup %4971  ;;  %v8133_v49 = vadd.f32 0.5, %v2465_v2  ;;  %v8135_v22 = vmul.f32 0.5, %v4952_v4  ;;  %v8137_v40 = vadd.f32 0.5, %v2467_v38  ;;  %v10971_v46 = vld [vmem:[#allocation19_spill] sm:$0xff] }
 0x680   : > { %v4974_v33 = vpop.eup %4973  ;;  %v8139_v45 = vadd.f32 0.5, %v2468_v63  ;;  %v2493_v10 = vadd.f32 0.5, %v2469_v14  ;;  %v2413_v42 = vadd.f32 %v8064_v48, %v8032_v5  ;;  %v2494_v53 = vadd.f32 0.5, %v2470_v1  ;;  %v10972_v5 = vld [vmem:[#allocation143_spill] sm:$0xff] }
 0x681   : > { %v2379_v12 = vpop.f32.mrf.mxu3  ;;  %v2495_v7 = vadd.f32 0.5, %v2471_v26  ;;  %v2408_v37 = vadd.f32 %v10971_v46, %v8030_v13  ;;  %v2412_v4 = vadd.f32 %v8010_v43, %v8074_v36  ;;  %v2496_v8 = vadd.f32 0.5, %v2472_v60  ;;  %v10973_v13 = vld [vmem:[#allocation48_spill] sm:$0xff]  ;;  %v10974_v43 = vld [vmem:[#allocation153_spill] sm:$0xff]  ;;  %v10976_v60 = vld [vmem:[#allocation111_spill] sm:$0xff] }
 0x682   : > { %v2415_v9 = vadd.f32 %v2379_v12, %v7982_v47  ;;  %v2257_v47 = vadd.f32 %v2225_v62, %v2191_v39  ;;  %v4976_v21 = vpop.eup %4975  ;;  %v8147_v19 = vmul.f32 0.5, %v4966_v58  ;;  %v2479_v27 = vmul.f32 0.5, %v4972_v18  ;;  %v10975_v18 = vld [vmem:[#allocation145_spill] sm:$0xff] }
 0x683   : > { %v4978_v39 = vpop.eup %4977  ;;  %v2474_v63 = vmul.f32 0.5, %v4968_v41  ;;  %v2475_v2 = vmul.f32 0.5, %v4970_v24  ;;  %v2477_v38 = vmul.f32 0.5, %v4974_v33  ;;  %v2407_v48 = vadd.f32 %v10972_v5, %v8037_v28  ;;  %v10977_v28 = vld [vmem:[#allocation154_spill] sm:$0xff] }
 0x684   : > { %4981 = vtanh.f32 %v2415_v9  ;;  %v4980_v12 = vpop.eup %4979  ;;  %v2478_v14 = vmul.f32 0.5, %v4976_v21  ;;  %v2411_v9 = vadd.f32 %v10973_v13, %v8111_v31  ;;  %v2480_v58 = vmul.f32 0.5, %v4978_v39  ;;  %v10978_v31 = vld [vmem:[#allocation52_spill] sm:$0xff]  ;;  %v10979_v13 = vld [vmem:[#allocation157_spill] sm:$0xff] }
 0x685   : > { %4983 = vtanh.f32 %v2414_v17  ;;  %v2406_v26 = vadd.f32 %v10975_v18, %v8109_v30  ;;  %v2440_v41 = vmul.f32 0.5, %v2408_v37  ;;  %v2503_v24 = vadd.f32 0.5, %v2479_v27  ;;  %v10980_v18 = vld [vmem:[#allocation118_spill] sm:$0xff] }
 0x686   : > { %4985 = vtanh.f32 %v2413_v42  ;;  %v2404_v17 = vadd.f32 %v10976_v60, %v2259_v16  ;;  %v2410_v33 = vadd.f32 %v10977_v28, %v8120_v15  ;;  %v2499_v21 = vadd.f32 0.5, %v2475_v2 }
 0x687   : > { %4987 = vtanh.f32 %v2412_v4  ;;  %v2476_v46 = vmul.f32 0.5, %v4980_v12  ;;  %v2405_v42 = vadd.f32 %v10978_v31, %v8114_v32  ;;  %v2439_v5 = vmul.f32 0.5, %v2407_v48 }
 0x688   : > { %v2502_v39 = vadd.f32 0.5, %v2478_v14  ;;  %v2501_v37 = vadd.f32 0.5, %v2477_v38  ;;  %v2504_v4 = vadd.f32 0.5, %v2480_v58  ;;  %v2438_v27 = vmul.f32 0.5, %v2406_v26  ;;  %v10985_v58 = vld [vmem:[#allocation119_spill] sm:$0xff] }
 0x689   : > { %v2382_v62 = vpop.f32.mrf.mxu3  ;;  %v2527_v15 = vmul.f32 %v2503_v24, %v10980_v18  ;;  %v2436_v12 = vmul.f32 0.5, %v2404_v17  ;;  %v2500_v32 = vadd.f32 0.5, %v2476_v46  ;;  %v2437_v48 = vmul.f32 0.5, %v2405_v42  ;;  %v10986_v17 = vld [vmem:[#allocation121_spill] sm:$0xff]  ;;  %v10987_v46 = vld [vmem:[#allocation39_spill] sm:$0xff] }
 0x68a   : > { %v2416_v36 = vadd.f32 %v2382_v62, %v10974_v43  ;;  %v4982_v1 = vpop.eup %4981  ;;  %v2409_v43 = vadd.f32 %v10979_v13, %v2264_v54  ;;  %v10982_v54 = vld [vmem:[#allocation120_spill] sm:$0xff]  ;;  %v2528_v26 = vmul.f32 %v2504_v4, %v10985_v58  ;;  %v2401_v31 = vadd.f32 %v10987_v46, %v8122_v35 }
 0x68b   : > { %v4984_v62 = vpop.eup %4983  ;;  %v2535_v30 = vmul.f32 %v4982_v1, %v2495_v7  ;;  %v10983_v7 = vld [vmem:[#allocation71_spill] sm:$0xff] }
 0x68c   : > { %4989 = vtanh.f32 %v2416_v36  ;;  %v4986_v16 = vpop.eup %4985  ;;  %v10981_v36 = vld [vmem:[#allocation144_spill] sm:$0xff]  ;;  %v2534_v14 = vmul.f32 %v4984_v62, %v2494_v53  ;;  %v2402_v38 = vadd.f32 %v10983_v7, %v2257_v47  ;;  %v10996_v7 = vld [vmem:[#allocation125_spill] sm:$0xff] }
 0x68d   : > { %4991 = vtanh.f32 %v2411_v9  ;;  %v2403_v2 = vadd.f32 %v10981_v36, %v2258_v11  ;;  %v4988_v60 = vpop.eup %4987  ;;  %v2526_v9 = vmul.f32 %v2502_v39, %v10982_v54  ;;  %v8166_v1 = vadd.f32 %v2535_v30, %v2527_v15  ;;  %v10990_v30 = vld [vmem:[#allocation122_spill] sm:$0xff] }
 0x68e   : > { %4993 = vtanh.f32 %v2440_v41  ;;  %v2533_v41 = vmul.f32 %v4986_v16, %v2493_v10  ;;  %v2532_v47 = vmul.f32 %v4988_v60, %v8139_v45  ;;  %v2490_v10 = vadd.f32 0.5, %v8135_v22 }
 0x68f   : > { %4995 = vtanh.f32 %v2410_v33  ;;  %10984 = vst [vmem:[#allocation56_spill] sm:$0xff] %v8166_v1  ;;  %v2525_v33 = vmul.f32 %v2501_v37, %v10986_v17  ;;  %v2435_v53 = vmul.f32 0.5, %v2403_v2  ;;  %v8175_v62 = vadd.f32 %v2534_v14, %v2526_v9 }
 0x690   : > { %4997 = vtanh.f32 %v2439_v5  ;;  %v2434_v13 = vmul.f32 0.5, %v2402_v38  ;;  %v2524_v35 = vmul.f32 %v2500_v32, %v10990_v30  ;;  %v2433_v16 = vmul.f32 0.5, %v2401_v31  ;;  %v10994_v32 = vld [vmem:[#allocation124_spill] sm:$0xff] }
 0x691   : > { %4999 = vtanh.f32 %v2409_v43  ;;  %10989 = vst [vmem:[#allocation150_spill] sm:$0xff] %v8175_v62  ;;  %v8182_v4 = vadd.f32 %v2533_v41, %v2525_v33 }
 0x692   : > { %v4990_v28 = vpop.eup %4989  ;;  %5001 = vtanh.f32 %v2438_v27  ;;  %v2497_v27 = vadd.f32 0.5, %v8147_v19  ;;  %v8187_v2 = vadd.f32 %v2532_v47, %v2524_v35 }
 0x693   : > { %v2536_v11 = vmul.f32 %v4990_v28, %v2496_v8  ;;  %v4992_v24 = vpop.eup %4991  ;;  %5003 = vtanh.f32 %v2436_v12  ;;  %v2498_v8 = vadd.f32 0.5, %v2474_v63  ;;  %10991 = vst [vmem:[#allocation155_spill] sm:$0xff] %v8182_v4  ;;  %v10992_v63 = vld [vmem:[#allocation123_spill] sm:$0xff] }
 0x694   : > { %v4994_v42 = vpop.eup %4993  ;;  %5005 = vtanh.f32 %v2437_v48  ;;  %v2531_v37 = vmul.f32 %v4992_v24, %v8137_v40  ;;  %v2523_v15 = vmul.f32 %v2499_v21, %v10992_v63  ;;  %10993 = vst [vmem:[#allocation148_spill] sm:$0xff] %v8187_v2  ;;  %v2521_v38 = vmul.f32 %v2497_v27, %v10996_v7  ;;  %v11006_v7 = vld [vmem:[#allocation134_spill] sm:$0xff] }
 0x695   : > { %v8173_v5 = vadd.f32 %v2536_v11, %v2528_v26  ;;  %v4996_v39 = vpop.eup %4995  ;;  %5007 = vtanh.f32 %v8166_v1  ;;  %v2488_v18 = vmul.f32 0.5, %v4994_v42  ;;  %v2522_v48 = vmul.f32 %v2498_v8, %v10994_v32  ;;  %v10999_v32 = vld [vmem:[#allocation127_spill] sm:$0xff]  ;;  %v11072_v1 = vld [vmem:[#allocation33_spill] sm:$0xff] }
 0x696   : > { %v4998_v43 = vpop.eup %4997  ;;  %v2530_v36 = vmul.f32 %v4996_v39, %v2490_v10  ;;  %v8192_v19 = vadd.f32 %v2531_v37, %v2523_v15 }
 0x697   : > { %10988 = vst [vmem:[#allocation141_spill] sm:$0xff] %v8173_v5  ;;  %5009 = vtanh.f32 %v8173_v5  ;;  %v5000_v45 = vpop.eup %4999  ;;  %v2487_v40 = vmul.f32 0.5, %v4998_v43  ;;  %v2512_v21 = vadd.f32 0.5, %v2488_v18 }
 0x698   : > { %5011 = vtanh.f32 %v2435_v53  ;;  %v5002_v22 = vpop.eup %5001  ;;  %v2529_v14 = vmul.f32 %v5000_v45, %v8133_v49  ;;  %10995 = vst [vmem:[#allocation152_spill] sm:$0xff] %v8192_v19  ;;  %v8196_v58 = vadd.f32 %v2530_v36, %v2522_v48  ;;  %v11000_v48 = vld [vmem:[#allocation128_spill] sm:$0xff] }
 0x699   : > { %5013 = vtanh.f32 %v8175_v62  ;;  %v5004_v12 = vpop.eup %5003  ;;  %v2486_v54 = vmul.f32 0.5, %v5002_v22  ;;  %v2511_v11 = vadd.f32 0.5, %v2487_v40  ;;  %v11069_v62 = vld [vmem:[#allocation54_spill] sm:$0xff] }
 0x69a   : > { %5015 = vtanh.f32 %v2434_v13  ;;  %v5006_v60 = vpop.eup %5005  ;;  %10997 = vst [vmem:[#allocation116_spill] sm:$0xff] %v8196_v58  ;;  %v8199_v17 = vadd.f32 %v2529_v14, %v2521_v38  ;;  %v2484_v53 = vmul.f32 0.5, %v5004_v12  ;;  %v11001_v14 = vld [vmem:[#allocation129_spill] sm:$0xff]  ;;  %v11007_v38 = vld [vmem:[#allocation135_spill] sm:$0xff] }
 0x69b   : > { %5017 = vtanh.f32 %v8182_v4  ;;  %v5008_v28 = vpop.eup %5007  ;;  %v2485_v24 = vmul.f32 0.5, %v5006_v60  ;;  %v2510_v31 = vadd.f32 0.5, %v2486_v54  ;;  %v10998_v60 = vld [vmem:[#allocation126_spill] sm:$0xff]  ;;  %v11004_v54 = vld [vmem:[#allocation132_spill] sm:$0xff] }
 0x69c   : > { %5019 = vtanh.f32 %v2433_v16  ;;  %v2559_v46 = vmul.f32 %v5008_v28, %v2511_v11  ;;  %v2508_v30 = vadd.f32 0.5, %v2484_v53  ;;  %v11002_v28 = vld [vmem:[#allocation130_spill] sm:$0xff] }
 0x69d   : > { %v5010_v9 = vpop.eup %5009  ;;  %5021 = vtanh.f32 %v8187_v2  ;;  %v2509_v10 = vadd.f32 0.5, %v2485_v24  ;;  %v11010_v11 = vld [vmem:[#allocation138_spill] sm:$0xff]  ;;  %v11011_v24 = vld [vmem:[#allocation139_spill] sm:$0xff]  ;;  %v11060_v2 = vld [vmem:[#allocation12_spill] sm:$0xff] }
 0x69e   : > { %v5012_v26 = vpop.eup %5011  ;;  %v2560_v41 = vmul.f32 %v5010_v9, %v2512_v21  ;;  %5023 = vtanh.f32 %v8192_v19  ;;  %v11003_v21 = vld [vmem:[#allocation131_spill] sm:$0xff]  ;;  %v11005_v9 = vld [vmem:[#allocation133_spill] sm:$0xff] }
 0x69f   : > { %v5014_v49 = vpop.eup %5013  ;;  %5025 = vtanh.f32 %v8196_v58  ;;  %v2483_v8 = vmul.f32 0.5, %v5012_v26  ;;  %v11008_v26 = vld [vmem:[#allocation136_spill] sm:$0xff] }
 0x6a0   : > { %v5016_v33 = vpop.eup %5015  ;;  %2701 = vmatpush.msrb.mxu0 %v2560_v41  ;;  %v2558_v39 = vmul.f32 %v5014_v49, %v2510_v31  ;;  %5027 = vtanh.f32 %v8199_v17  ;;  %v11009_v41 = vld [vmem:[#allocation137_spill] sm:$0xff]  ;;  %v11012_v49 = vld [vmem:[#allocation140_spill] sm:$0xff]  ;;  %v11014_v31 = vld [vmem:[#allocation159_spill] sm:$0xff] }
 0x6a1   : > { %v5018_v42 = vpop.eup %5017  ;;  %v2482_v35 = vmul.f32 0.5, %v5016_v33  ;;  %v2507_v27 = vadd.f32 0.5, %v2483_v8  ;;  %v11013_v33 = vld [vmem:[#allocation142_spill] sm:$0xff]  ;;  %v11017_v8 = vld [vmem:[#allocation117_spill] sm:$0xff] }
 0x6a2   : > { %v5020_v47 = vpop.eup %5019  ;;  %2702 = vmatpush.msrb.mxu0 %v2559_v46  ;;  %v2557_v43 = vmul.f32 %v5018_v42, %v2509_v10  ;;  %v11015_v42 = vld [vmem:[#allocation114_spill] sm:$0xff] }
 0x6a3   : > { %v5022_v13 = vpop.eup %5021  ;;  %v2481_v16 = vmul.f32 0.5, %v5020_v47  ;;  %v2506_v63 = vadd.f32 0.5, %v2482_v35  ;;  %v11019_v35 = vld [vmem:[#allocation68_spill] sm:$0xff] }
 0x6a4   : > { %2703 = vmatpush.msrb.mxu0 %v2558_v39  ;;  %v5024_v37 = vpop.eup %5023  ;;  %v2556_v45 = vmul.f32 %v5022_v13, %v2508_v30  ;;  %v11016_v39 = vld [vmem:[#allocation146_spill] sm:$0xff] }
 0x6a5   : > { %v5026_v18 = vpop.eup %5025  ;;  %v2555_v22 = vmul.f32 %v5024_v37, %v2507_v27  ;;  %v2505_v12 = vadd.f32 0.5, %v2481_v16  ;;  %v11021_v16 = vld [vmem:[#allocation64_spill] sm:$0xff] }
 0x6a6   : > { %2704 = vmatpush.msrb.mxu0 %v2557_v43  ;;  %v5028_v15 = vpop.eup %5027  ;;  %v2554_v36 = vmul.f32 %v5026_v18, %v2506_v63  ;;  %v11018_v43 = vld [vmem:[#allocation149_spill] sm:$0xff] }
 0x6a7   : > { %v2553_v40 = vmul.f32 %v5028_v15, %v2505_v12  ;;  %v11023_v15 = vld [vmem:[#allocation158_spill] sm:$0xff]  ;;  %v11024_v12 = vld [vmem:[#allocation61_spill] sm:$0xff] }
 0x6a8   : > { %2705 = vmatpush.msrb.mxu0 %v2556_v45  ;;  %v11020_v45 = vld [vmem:[#allocation156_spill] sm:$0xff] }
 0x6aa   : > { %2706 = vmatpush.msrb.mxu0 %v2555_v22  ;;  %v11022_v22 = vld [vmem:[#allocation147_spill] sm:$0xff] }
 0x6ac   : > { %2707 = vmatpush.msrb.mxu0 %v2554_v36 }
 0x6ae   : > { %2708 = vmatpush.msrb.mxu0 %v2553_v40 }
 0x6af   : > { %4477 = vmatmul.msk.f32.vlgmr.msrb.gmra.mxu0 %vm912_vm0, %v10998_v60  ;;  %v11026_v60 = vld [vmem:[#allocation75_spill] sm:$0xff] }
 0x6b7   : > { %4478 = vmatmul.msk.f32.gmra.mxu0 %vm912_vm0, %v10999_v32 }
 0x6bf   : > { %4479 = vmatmul.msk.f32.gmra.mxu0 %vm912_vm0, %v11000_v48  ;;  %v8284_v48 = vld [vmem:[%s9958_s2 + $0xe0] sm:$0xff] }
 0x6c0   : > { %11027 = vst [vmem:[#allocation110_spill] sm:$0xff] %v8284_v48 }
 0x6c7   : > { %4480 = vmatmul.msk.f32.gmra.mxu0 %vm912_vm0, %v11001_v14 }
 0x6cf   : > { %4481 = vmatmul.msk.f32.gmra.mxu0 %vm912_vm0, %v11002_v28  ;;  %v8293_v28 = vld [vmem:[%s9958_s2 + $0xe8] sm:$0xff] }
 0x6d0   : > { %11028 = vst [vmem:[#allocation115_spill] sm:$0xff] %v8293_v28 }
 0x6d7   : > { %4482 = vmatmul.msk.f32.gmra.mxu0 %vm912_vm0, %v11003_v21 }
 0x6df   : > { %4483 = vmatmul.msk.f32.gmra.mxu0 %vm912_vm0, %v11004_v54  ;;  %v8302_v54 = vld [vmem:[%s9958_s2 + $0xf0] sm:$0xff] }
 0x6e0   : > { %11029 = vst [vmem:[#allocation19_spill] sm:$0xff] %v8302_v54 }
 0x6e7   : > { %4484 = vmatmul.msk.f32.gmra.mxu0 %vm912_vm0, %v11005_v9 }
 0x6ef   : > { %4485 = vmatmul.msk.f32.gmra.mxu0 %vm912_vm0, %v11006_v7  ;;  %v8311_v7 = vld [vmem:[%s9958_s2 + $0xf8] sm:$0xff] }
 0x6f0   : > { %11030 = vst [vmem:[#allocation143_spill] sm:$0xff] %v8311_v7 }
 0x6f7   : > { %4486 = vmatmul.msk.f32.gmra.mxu0 %vm912_vm0, %v11007_v38 }
 0x6ff   : > { %4487 = vmatmul.msk.f32.gmra.mxu0 %vm912_vm0, %v11008_v26 }
 0x707   : > { %4488 = vmatmul.msk.f32.gmra.mxu0 %vm912_vm0, %v11009_v41 }
 0x70f   : > { %4489 = vmatmul.msk.f32.gmra.mxu0 %vm912_vm0, %v11010_v11 }
 0x717   : > { %4490 = vmatmul.msk.f32.gmra.mxu0 %vm912_vm0, %v11011_v24 }
 0x71f   : > { %4491 = vmatmul.msk.f32.gmra.mxu0 %vm912_vm0, %v11012_v49  ;;  %v8326_v49 = vld [vmem:[%s5647_s27 + $0x4] ss:$0 sm:$0xff] }
 0x727   : > { %4492 = vmatmul.msk.f32.gmra.mxu0 %vm912_vm0, %v11013_v33 }
 0x72c   : > { %v2710_v46 = vpop.f32.mrf.mxu0 }
 0x72f   : > { %4493 = vmatmul.msk.f32.gmra.mxu0 %vm912_vm0, %v11014_v31  ;;  %v8331_v31 = vld [vmem:[%s5647_s27 + $0xc] ss:$0 sm:$0xff] }
 0x734   : > { %v8237_v53 = vpop.f32.mrf.mxu0 }
 0x737   : > { %4494 = vmatmul.msk.f32.gmra.mxu0 %vm912_vm0, %v11015_v42  ;;  %v11037_v42 = vld [vmem:[#allocation83_spill] sm:$0xff] }
 0x73c   : > { %v8241_v47 = vpop.f32.mrf.mxu0 }
 0x73f   : > { %4495 = vmatmul.msk.f32.gmra.mxu0 %vm912_vm0, %v11016_v39  ;;  %v2571_v39 = vmul.f32 %v8326_v49, %v11037_v42 }
 0x744   : > { %v8245_v10 = vpop.f32.mrf.mxu0 }
 0x747   : > { %4496 = vmatmul.msk.f32.gmra.mxu0 %vm912_vm0, %v11017_v8  ;;  %v2637_v8 = vmul.f32 %v8331_v31, %v10778_v0 }
 0x74c   : > { %v8249_v13 = vpop.f32.mrf.mxu0 }
 0x74f   : > { %4497 = vmatmul.msk.f32.gmra.mxu0 %vm912_vm0, %v11018_v43  ;;  %v11038_v43 = vld [vmem:[#allocation62_spill] sm:$0xff] }
 0x754   : > { %v8253_v30 = vpop.f32.mrf.mxu0 }
 0x757   : > { %4498 = vmatmul.msk.f32.gmra.mxu0 %vm912_vm0, %v11019_v35  ;;  %v2563_v35 = vmul.f32 %v8326_v49, %v11038_v43  ;;  %v2587_v43 = vmul.f32 %v8326_v49, %v10777_v51  ;;  %v11045_v51 = vld [vmem:[#allocation42_spill] sm:$0xff] }
 0x75c   : > { %v8257_v37 = vpop.f32.mrf.mxu0 }
 0x75f   : > { %4499 = vmatmul.msk.f32.gmra.mxu0 %vm912_vm0, %v11020_v45  ;;  %v11039_v45 = vld [vmem:[#allocation86_spill] sm:$0xff] }
 0x764   : > { %v8261_v27 = vpop.f32.mrf.mxu0 }
 0x767   : > { %4500 = vmatmul.msk.f32.gmra.mxu0 %vm912_vm0, %v11021_v16  ;;  %v2629_v16 = vmul.f32 %v8331_v31, %v11039_v45  ;;  %v11055_v45 = vld [vmem:[#allocation23_spill] sm:$0xff] }
 0x76c   : > { %v2734_v18 = vpop.f32.mrf.mxu0 }
 0x76f   : > { %4501 = vmatmul.msk.f32.gmra.mxu0 %vm912_vm0, %v11022_v22  ;;  %v2603_v22 = vadd.f32 %v2571_v39, %v10602_v3  ;;  %v2653_v39 = vmul.f32 %v8331_v31, %v10968_v61  ;;  %v2570_v61 = vmul.f32 %v8326_v49, %v11045_v51  ;;  %v11052_v51 = vld [vmem:[#allocation15_spill] sm:$0xff] }
 0x774   : > { %v8267_v63 = vpop.f32.mrf.mxu0 }
 0x777   : > { %4502 = vmatmul.msk.f32.gmra.mxu0 %vm912_vm0, %v11023_v15  ;;  %v11040_v15 = vld [vmem:[#allocation81_spill] sm:$0xff] }
 0x77c   : > { %v8271_v36 = vpop.f32.mrf.mxu0 }
 0x77f   : > { %4503 = vmatmul.msk.f32.gmra.mxu0 %vm912_vm0, %v11024_v12  ;;  %v2595_v12 = vadd.f32 %v2563_v35, %v11040_v15  ;;  %v2619_v35 = vadd.f32 %v2587_v43, %v6418_v52  ;;  %v11051_v52 = vld [vmem:[#allocation20_spill] sm:$0xff] }
 0x780   : > { %v2636_v3 = vmul.f32 %v8331_v31, %v11051_v52 }
 0x784   : > { %v8275_v40 = vpop.f32.mrf.mxu0 }
 0x785   : > { %11025 = vst [vmem:[#allocation151_spill] sm:$0xff] %v8275_v40 }
 0x787   : > { %4504 = vmatmul.msk.f32.gmra.mxu0 %vm912_vm0, %v11026_v60  ;;  %v2669_v60 = vadd.f32 %v2637_v8, %v2603_v22  ;;  %v2685_v22 = vadd.f32 %v2653_v39, %v2619_v35  ;;  %v11046_v35 = vld [vmem:[#allocation17_spill] sm:$0xff] }
 0x78c   : > { %v8279_v32 = vpop.f32.mrf.mxu0 }
 0x78f   : > { %4505 = vmatmul.msk.f32.gmra.mxu0 %vm912_vm0, %v8284_v48 }
 0x794   : > { %v8288_v14 = vpop.f32.mrf.mxu0 }
 0x797   : > { %4506 = vmatmul.msk.f32.gmra.mxu0 %vm912_vm0, %v8293_v28  ;;  %v2814_v28 = vadd.f32 %v2734_v18, %v2669_v60 }
 0x799   : > { %v2846_v42 = vmul.f32 0.5, %v2814_v28 }
 0x79b   : > { %5029 = vtanh.f32 %v2846_v42  ;;  %v11043_v42 = vld [vmem:[#allocation9_spill] sm:$0xff] }
 0x79c   : > { %v8297_v21 = vpop.f32.mrf.mxu0 }
 0x79f   : > { %4507 = vmatmul.msk.f32.gmra.mxu0 %vm912_vm0, %v8302_v54  ;;  %v2661_v54 = vadd.f32 %v2629_v16, %v2595_v12 }
 0x7a1   : > { %v2806_v48 = vadd.f32 %v2710_v46, %v2661_v54  ;;  %v5030_v8 = vpop.eup %5029 }
 0x7a2   : > { %v2894_v46 = vmul.f32 0.5, %v5030_v8  ;;  %v11047_v8 = vld [vmem:[#allocation8_spill] sm:$0xff] }
 0x7a3   : > { %v2838_v58 = vmul.f32 0.5, %v2806_v48 }
 0x7a4   : > { %v8306_v9 = vpop.f32.mrf.mxu0  ;;  %v2918_v28 = vadd.f32 0.5, %v2894_v46 }
 0x7a5   : > { %5031 = vtanh.f32 %v2838_v58  ;;  %v2569_v58 = vmul.f32 %v8326_v49, %v11043_v42 }
 0x7a6   : > { %v2942_v43 = vmul.f32 %v2918_v28, %v8199_v17  ;;  %v2575_v17 = vmul.f32 %v8326_v49, %v11052_v51  ;;  %v11053_v28 = vld [vmem:[#allocation11_spill] sm:$0xff]  ;;  %v2643_v51 = vmul.f32 %v8331_v31, %v11060_v2  ;;  %v11068_v2 = vld [vmem:[#allocation24_spill] sm:$0xff] }
 0x7a7   : > { %4508 = vmatmul.msk.f32.gmra.mxu0 %vm912_vm0, %v8311_v7 }
 0x7ab   : > { %v5032_v16 = vpop.eup %5031 }
 0x7ac   : > { %v8315_v38 = vpop.f32.mrf.mxu0  ;;  %v2886_v48 = vmul.f32 0.5, %v5032_v16  ;;  %v11048_v16 = vld [vmem:[#allocation10_spill] sm:$0xff] }
 0x7ad   : > { %11031 = vst [vmem:[#allocation48_spill] sm:$0xff] %v8315_v38  ;;  %v11061_v38 = vld [vmem:[#allocation14_spill] sm:$0xff] }
 0x7ae   : > { %v2910_v54 = vadd.f32 0.5, %v2886_v48  ;;  %v11050_v48 = vld [vmem:[#allocation22_spill] sm:$0xff] }
 0x7af   : > { %v2635_v42 = vmul.f32 %v8331_v31, %v11050_v48  ;;  %v11058_v48 = vld [vmem:[#allocation18_spill] sm:$0xff] }
 0x7b4   : > { %v8317_v26 = vpop.f32.mrf.mxu0 }
 0x7b5   : > { %11032 = vst [vmem:[#allocation153_spill] sm:$0xff] %v8317_v26 }
 0x7bc   : > { %v8319_v41 = vpop.f32.mrf.mxu0 }
 0x7bd   : > { %11033 = vst [vmem:[#allocation145_spill] sm:$0xff] %v8319_v41  ;;  %v11070_v41 = vld [vmem:[#allocation40_spill] sm:$0xff] }
 0x7c4   : > { %v8321_v11 = vpop.f32.mrf.mxu0 }
 0x7c5   : > { %11034 = vst [vmem:[#allocation111_spill] sm:$0xff] %v8321_v11  ;;  %v11075_v11 = vld [vmem:[#allocation58_spill] sm:$0xff] }
 0x7cc   : > { %v8323_v24 = vpop.f32.mrf.mxu0 }
 0x7cd   : > { %11035 = vst [vmem:[#allocation154_spill] sm:$0xff] %v8323_v24  ;;  %v2630_v24 = vmul.f32 %v8331_v31, %v11072_v1 }
 0x7d4   : > { %v8328_v33 = vpop.f32.mrf.mxu0 }
 0x7d5   : > { %11036 = vst [vmem:[#allocation52_spill] sm:$0xff] %v8328_v33  ;;  %v11076_v33 = vld [vmem:[#allocation32_spill] sm:$0xff] }
 0x7dc   : > { %v8343_v7 = vpop.f32.mrf.mxu0 }
 0x7dd   : > { %11041 = vst [vmem:[#allocation157_spill] sm:$0xff] %v8343_v7 }
 0x7e4   : > { %v8345_v19 = vpop.f32.mrf.mxu0 }
 0x7e5   : > { %11042 = vst [vmem:[#allocation118_spill] sm:$0xff] %v8345_v19 }
 0x7ec   : > { %v2782_v15 = vpop.f32.mrf.mxu0 }
 0x7ed   : > { %v2830_v18 = vadd.f32 %v2782_v15, %v2685_v22  ;;  %v2576_v15 = vmul.f32 %v8326_v49, %v11046_v35  ;;  %v2568_v22 = vmul.f32 %v8326_v49, %v11047_v8  ;;  %v2634_v8 = vmul.f32 %v8331_v31, %v11055_v45  ;;  %v11063_v45 = vld [vmem:[#allocation37_spill] sm:$0xff] }
 0x7ee   : > { %v2607_v4 = vadd.f32 %v2575_v17, %v11063_v45  ;;  %v2632_v17 = vmul.f32 %v8331_v31, %v11070_v41  ;;  %v2573_v41 = vmul.f32 %v8326_v49, %v11076_v33 }
 0x7ef   : > { %5033 = vtanh.f32 %v2830_v18  ;;  %v2601_v18 = vadd.f32 %v2569_v58, %v11048_v16  ;;  %v11056_v58 = vld [vmem:[#allocation6_spill] sm:$0xff]  ;;  %v2608_v0 = vadd.f32 %v2576_v15, %v11058_v48  ;;  %v11067_v48 = vld [vmem:[#allocation25_spill] sm:$0xff] }
 0x7f1   : > { %v8397_v26 = vadd.f32 %v2635_v42, %v2601_v18  ;;  %v11074_v18 = vld [vmem:[#allocation34_spill] sm:$0xff] }
 0x7f4   : > { %v8354_v12 = vpop.f32.mrf.mxu0 }
 0x7f5   : > { %11044 = vst [vmem:[#allocation144_spill] sm:$0xff] %v8354_v12  ;;  %v5034_v60 = vpop.eup %5033  ;;  %v2574_v12 = vmul.f32 %v8326_v49, %v11074_v18  ;;  %v11080_v18 = vld [vmem:[#allocation26_spill] sm:$0xff] }
 0x7f6   : > { %v2950_v39 = vmul.f32 %v5034_v60, %v2910_v54  ;;  %v2577_v54 = vmul.f32 %v8326_v49, %v11053_v28  ;;  %v11054_v60 = vld [vmem:[#allocation28_spill] sm:$0xff]  ;;  %v2644_v28 = vmul.f32 %v8331_v31, %v11061_v38  ;;  %v2593_v38 = vmul.f32 %v8326_v49, %v11068_v2 }
 0x7f7   : > { %v2600_v35 = vadd.f32 %v2568_v22, %v11054_v60  ;;  %v11062_v22 = vld [vmem:[#allocation21_spill] sm:$0xff] }
 0x7f8   : > { %v8364_v46 = vadd.f32 %v2950_v39, %v2942_v43  ;;  %v2602_v43 = vadd.f32 %v2570_v61, %v11056_v58  ;;  %v11057_v39 = vld [vmem:[#allocation45_spill] sm:$0xff]  ;;  %v2566_v60 = vmul.f32 %v8326_v49, %v11062_v22  ;;  %v2594_v22 = vmul.f32 %v8326_v49, %v11069_v62 }
 0x7f9   : > { %v2578_v16 = vmul.f32 %v8326_v49, %v11057_v39  ;;  %v11064_v61 = vld [vmem:[#allocation29_spill] sm:$0xff]  ;;  %v2666_v45 = vadd.f32 %v2634_v8, %v2600_v35  ;;  %v11077_v8 = vld [vmem:[#allocation38_spill] sm:$0xff] }
 0x7fa   : > { %11049 = vst [vmem:[#allocation120_spill] sm:$0xff] %v8364_v46  ;;  %v11059_v46 = vld [vmem:[#allocation31_spill] sm:$0xff]  ;;  %v2641_v58 = vmul.f32 %v8331_v31, %v11064_v61  ;;  %v11065_v39 = vld [vmem:[#allocation49_spill] sm:$0xff]  ;;  %v8405_v61 = vadd.f32 %v2636_v3, %v2602_v43 }
 0x7fb   : > { %v2642_v52 = vmul.f32 %v8331_v31, %v11059_v46  ;;  %v2609_v5 = vadd.f32 %v2577_v54, %v11065_v39  ;;  %v2567_v46 = vmul.f32 %v8326_v49, %v11067_v48  ;;  %v11071_v54 = vld [vmem:[#allocation7_spill] sm:$0xff]  ;;  %v11073_v48 = vld [vmem:[#allocation36_spill] sm:$0xff] }
 0x7fc   : > { %v8393_v15 = vpop.f32.mrf.mxu0  ;;  %v2610_v39 = vadd.f32 %v2578_v16, %v11071_v54  ;;  %v2598_v42 = vadd.f32 %v2566_v60, %v11073_v48  ;;  %v8418_v35 = vadd.f32 %v2641_v58, %v2607_v4  ;;  %v2651_v16 = vmul.f32 %v8331_v31, %v11077_v8  ;;  %v11078_v43 = vld [vmem:[#allocation47_spill] sm:$0xff]  ;;  %v11082_v4 = vld [vmem:[#allocation30_spill] sm:$0xff]  ;;  %v11084_v8 = vld [vmem:[#allocation77_spill] sm:$0xff] }
 0x7fd   : > { %11066 = vst [vmem:[#allocation71_spill] sm:$0xff] %v8393_v15  ;;  %v8413_v2 = vadd.f32 %v2642_v52, %v2608_v0  ;;  %v2599_v62 = vadd.f32 %v2567_v46, %v11075_v11  ;;  %v8420_v3 = vadd.f32 %v2643_v51, %v2609_v5  ;;  %v2592_v60 = vmul.f32 %v8326_v49, %v11078_v43  ;;  %v11079_v54 = vld [vmem:[#allocation27_spill] sm:$0xff]  ;;  %v11081_v46 = vld [vmem:[#allocation41_spill] sm:$0xff] }
 0x7fe   : > { %v2626_v48 = vadd.f32 %v2594_v22, %v11079_v54  ;;  %v2660_v52 = vmul.f32 %v8331_v31, %v11080_v18  ;;  %v2664_v0 = vadd.f32 %v2632_v17, %v2598_v42  ;;  %v2633_v11 = vmul.f32 %v8331_v31, %v11081_v46  ;;  %v11083_v5 = vld [vmem:[#allocation53_spill] sm:$0xff]  ;;  %v11085_v43 = vld [vmem:[#allocation51_spill] sm:$0xff]  ;;  %v11088_v42 = vld [vmem:[#allocation44_spill] sm:$0xff] }
 0x7ff   : > { %v8431_v33 = vadd.f32 %v2644_v28, %v2610_v39  ;;  %v2658_v51 = vmul.f32 %v8331_v31, %v11082_v4  ;;  %v2639_v58 = vmul.f32 %v8331_v31, %v11083_v5  ;;  %v2624_v1 = vadd.f32 %v2592_v60, %v11084_v8  ;;  %v11086_v22 = vld [vmem:[#allocation43_spill] sm:$0xff]  ;;  %v11090_v4 = vld [vmem:[#allocation65_spill] sm:$0xff]  ;;  %v11092_v5 = vld [vmem:[#allocation50_spill] sm:$0xff] }
 0x800   : > { %v2625_v15 = vadd.f32 %v2593_v38, %v11085_v43  ;;  %v2659_v54 = vmul.f32 %v8331_v31, %v11086_v22  ;;  %v11087_v18 = vld [vmem:[#allocation59_spill] sm:$0xff]  ;;  %v2565_v28 = vmul.f32 %v8326_v49, %v11088_v42  ;;  %v2606_v7 = vadd.f32 %v2574_v12, %v11090_v4  ;;  %v11094_v43 = vld [vmem:[#allocation69_spill] sm:$0xff] }
 0x801   : > { %v2564_v17 = vmul.f32 %v8326_v49, %v11087_v18  ;;  %v11089_v39 = vld [vmem:[#allocation67_spill] sm:$0xff]  ;;  %v2605_v60 = vadd.f32 %v2573_v41, %v11092_v5  ;;  %v2586_v22 = vmul.f32 %v8326_v49, %v11094_v43  ;;  %v8455_v55 = vadd.f32 %v2660_v52, %v2626_v48  ;;  %v11095_v18 = vld [vmem:[#allocation66_spill] sm:$0xff]  ;;  %v11098_v48 = vld [vmem:[#allocation76_spill] sm:$0xff] }
 0x802   : > { %v2631_v46 = vmul.f32 %v8331_v31, %v11089_v39  ;;  %v11093_v8 = vld [vmem:[#allocation55_spill] sm:$0xff]  ;;  %v2597_v42 = vadd.f32 %v2565_v28, %v10939_v25  ;;  %v2665_v40 = vadd.f32 %v2633_v11, %v2599_v62  ;;  %v11096_v39 = vld [vmem:[#allocation46_spill] sm:$0xff]  ;;  %v8465_v5 = vadd.f32 %v2658_v51, %v2624_v1 }
 0x803   : > { %v2640_v38 = vmul.f32 %v8331_v31, %v11093_v8  ;;  %v2596_v44 = vadd.f32 %v2564_v17, %v11095_v18  ;;  %v2572_v12 = vmul.f32 %v8326_v49, %v11096_v39  ;;  %v8461_v4 = vadd.f32 %v2639_v58, %v2605_v60  ;;  %v11099_v17 = vld [vmem:[#allocation73_spill] sm:$0xff] }
 0x804   : > { %v8448_v19 = vpop.f32.mrf.mxu0  ;;  %v8467_v8 = vadd.f32 %v2659_v54, %v2625_v15  ;;  %v2663_v43 = vadd.f32 %v2631_v46, %v2597_v42  ;;  %v2652_v52 = vmul.f32 %v8331_v31, %v11098_v48  ;;  %v2591_v28 = vmul.f32 %v8326_v49, %v11099_v17  ;;  %v11100_v46 = vld [vmem:[#allocation96_spill] sm:$0xff]  ;;  %v11101_v42 = vld [vmem:[#allocation70_spill] sm:$0xff] }
 0x805   : > { %11091 = vst [vmem:[#allocation119_spill] sm:$0xff] %v8448_v19  ;;  %v11097_v19 = vld [vmem:[#allocation72_spill] sm:$0xff]  ;;  %v2657_v62 = vmul.f32 %v8331_v31, %v10938_v6  ;;  %v2672_v11 = vadd.f32 %v2640_v38, %v2606_v7  ;;  %v2583_v58 = vmul.f32 %v8326_v49, %v10940_v23  ;;  %v2618_v1 = vadd.f32 %v2586_v22, %v10604_v59  ;;  %v11103_v38 = vld [vmem:[#allocation106_spill] sm:$0xff] }
 0x806   : > { %v2585_v41 = vmul.f32 %v8326_v49, %v11097_v19  ;;  %v2662_v15 = vadd.f32 %v2630_v24, %v2596_v44  ;;  %v2808_v54 = vadd.f32 %v8241_v47, %v2663_v43  ;;  %v2588_v51 = vmul.f32 %v8326_v49, %v11100_v46  ;;  %v11102_v19 = vld [vmem:[#allocation88_spill] sm:$0xff] }
 0x807   : > { %v2623_v48 = vadd.f32 %v2591_v28, %v11101_v42  ;;  %v2809_v17 = vadd.f32 %v8245_v10, %v2664_v0  ;;  %v2638_v7 = vmul.f32 %v8331_v31, %v11102_v19  ;;  %v2581_v23 = vmul.f32 %v8326_v49, %v11103_v38  ;;  %v11104_v6 = vld [vmem:[#allocation100_spill] sm:$0xff] }
 0x808   : > { %v2617_v60 = vadd.f32 %v2585_v41, %v10603_v50  ;;  %v8490_v41 = vmul.f32 %v8326_v49, %v11104_v6  ;;  %v2810_v44 = vadd.f32 %v8249_v13, %v2665_v40  ;;  %v8493_v47 = vadd.f32 %v2652_v52, %v2618_v1  ;;  %v11105_v24 = vld [vmem:[#allocation80_spill] sm:$0xff]  ;;  %v11107_v40 = vld [vmem:[#allocation98_spill] sm:$0xff] }
 0x809   : > { %v2590_v43 = vmul.f32 %v8326_v49, %v11105_v24  ;;  %v8497_v22 = vadd.f32 %v2657_v62, %v2623_v48  ;;  %v2811_v0 = vadd.f32 %v8253_v30, %v2666_v45  ;;  %v11106_v28 = vld [vmem:[#allocation84_spill] sm:$0xff]  ;;  %v8504_v38 = vadd.f32 %v2581_v23, %v10944_v29  ;;  %v11108_v1 = vld [vmem:[#allocation90_spill] sm:$0xff] }
 0x80a   : > { %v2604_v46 = vadd.f32 %v2572_v12, %v11106_v28  ;;  %v8506_v6 = vadd.f32 %v2651_v16, %v2617_v60  ;;  %v2840_v42 = vmul.f32 0.5, %v2808_v54  ;;  %v2812_v13 = vadd.f32 %v8257_v37, %v8397_v26  ;;  %v11109_v12 = vld [vmem:[#allocation92_spill] sm:$0xff]  ;;  %v11110_v54 = vld [vmem:[#allocation94_spill] sm:$0xff]  ;;  %v11111_v37 = vld [vmem:[#allocation95_spill] sm:$0xff] }
 0x80b   : > { %v2622_v52 = vadd.f32 %v2590_v43, %v11107_v40  ;;  %v2656_v48 = vmul.f32 %v8331_v31, %v11108_v1  ;;  %v2841_v62 = vmul.f32 0.5, %v2809_v17  ;;  %v2813_v30 = vadd.f32 %v8261_v27, %v8405_v61 }
 0x80c   : > { %v8499_v10 = vpop.f32.mrf.mxu0  ;;  %v2670_v45 = vadd.f32 %v2638_v7, %v2604_v46  ;;  %v2584_v23 = vmul.f32 %v8326_v49, %v11109_v12  ;;  %v2807_v16 = vadd.f32 %v8237_v53, %v2662_v15  ;;  %v2842_v60 = vmul.f32 0.5, %v2810_v44 }
 0x80d   : > { %v2650_v29 = vmul.f32 %v8331_v31, %v11110_v54  ;;  %v2589_v26 = vmul.f32 %v8326_v49, %v11111_v37  ;;  %v2843_v43 = vmul.f32 0.5, %v2811_v0  ;;  %v2649_v17 = vmul.f32 %v8331_v31, %v10951_v34 }
 0x80e   : > { %v2815_v1 = vadd.f32 %v8267_v63, %v2670_v45  ;;  %v2655_v27 = vmul.f32 %v8331_v31, %v10950_v57  ;;  %5035 = vtanh.f32 %v2840_v42  ;;  %v2844_v61 = vmul.f32 0.5, %v2812_v13 }
 0x80f   : > { %v2820_v53 = vadd.f32 %v8297_v21, %v8420_v3  ;;  %v8529_v15 = vadd.f32 %v2656_v48, %v2622_v52  ;;  %5037 = vtanh.f32 %v2841_v62  ;;  %v2845_v46 = vmul.f32 0.5, %v2813_v30  ;;  %v11112_v52 = vld [vmem:[#allocation60_spill] sm:$0xff] }
 0x810   : > { %v2818_v7 = vadd.f32 %v8279_v32, %v8418_v35  ;;  %v2654_v63 = vmul.f32 %v8331_v31, %v10952_v56  ;;  %v2839_v44 = vmul.f32 0.5, %v2807_v16  ;;  %5039 = vtanh.f32 %v2842_v60  ;;  %v11113_v62 = vld [vmem:[#allocation16_spill] sm:$0xff] }
 0x811   : > { %v2819_v0 = vadd.f32 %v8288_v14, %v8413_v2  ;;  %v2616_v42 = vadd.f32 %v2584_v23, %v10953_v20  ;;  %5041 = vtanh.f32 %v2843_v43  ;;  %v2847_v21 = vmul.f32 0.5, %v2815_v1  ;;  %v11114_v2 = vld [vmem:[#allocation151_spill] sm:$0xff]  ;;  %v11115_v23 = vld [vmem:[#allocation109_spill] sm:$0xff] }
 0x812   : > { %v2821_v3 = vadd.f32 %v8306_v9, %v8431_v33  ;;  %v2621_v48 = vadd.f32 %v2589_v26, %v11112_v52  ;;  %5043 = vtanh.f32 %v2844_v61  ;;  %v2816_v32 = vadd.f32 %v8271_v36, %v8461_v4  ;;  %v11116_v9 = vld [vmem:[#allocation79_spill] sm:$0xff]  ;;  %v11117_v26 = vld [vmem:[#allocation89_spill] sm:$0xff]  ;;  %v11233_v52 = vld [vmem:[#allocation44_spill] sm:$0xff] }
 0x813   : > { %v2852_v35 = vmul.f32 0.5, %v2820_v53  ;;  %v2580_v30 = vmul.f32 %v8326_v49, %v11113_v62  ;;  %5045 = vtanh.f32 %v2845_v46  ;;  %v2817_v14 = vadd.f32 %v11114_v2, %v2672_v11  ;;  %v11118_v4 = vld [vmem:[#allocation107_spill] sm:$0xff] }
 0x814   : > { %v2797_v13 = vpop.f32.mrf.mxu0  ;;  %v2850_v45 = vmul.f32 0.5, %v2818_v7  ;;  %v2615_v16 = vadd.f32 %v2583_v58, %v11115_v23  ;;  %v5036_v1 = vpop.eup %5035  ;;  %5047 = vtanh.f32 %v2839_v44  ;;  %v2851_v60 = vmul.f32 0.5, %v2819_v0  ;;  %v11119_v58 = vld [vmem:[#allocation82_spill] sm:$0xff]  ;;  %v11239_v62 = vld [vmem:[#allocation59_spill] sm:$0xff] }
 0x815   : > { %v2579_v33 = vmul.f32 %v8326_v49, %v11116_v9  ;;  %v2620_v43 = vadd.f32 %v2588_v51, %v11117_v26  ;;  %v5038_v61 = vpop.eup %5037  ;;  %5049 = vtanh.f32 %v2847_v21  ;;  %v2853_v36 = vmul.f32 0.5, %v2821_v3  ;;  %v11120_v49 = vld [vmem:[#allocation13_spill] sm:$0xff] }
 0x816   : > { %v2648_v53 = vmul.f32 %v8331_v31, %v11118_v4  ;;  %v8552_v46 = vadd.f32 %v2650_v29, %v2616_v42  ;;  %v5040_v11 = vpop.eup %5039  ;;  %v2848_v7 = vmul.f32 0.5, %v2816_v32  ;;  %5051 = vtanh.f32 %v2852_v35  ;;  %v11121_v3 = vld [vmem:[#allocation113_spill] sm:$0xff]  ;;  %v11122_v29 = vld [vmem:[#allocation112_spill] sm:$0xff] }
 0x817   : > { %v2614_v44 = vadd.f32 %v8490_v41, %v11119_v58  ;;  %v2687_v0 = vadd.f32 %v2655_v27, %v2621_v48  ;;  %v5042_v2 = vpop.eup %5041  ;;  %v2849_v23 = vmul.f32 0.5, %v2817_v14  ;;  %5053 = vtanh.f32 %v2850_v45  ;;  %v11123_v41 = vld [vmem:[#allocation93_spill] sm:$0xff] }
 0x818   : > { %v2612_v51 = vadd.f32 %v2580_v30, %v11120_v49  ;;  %v8557_v26 = vadd.f32 %v2649_v17, %v2615_v16  ;;  %v5044_v21 = vpop.eup %5043  ;;  %5055 = vtanh.f32 %v2851_v60  ;;  %v2611_v4 = vadd.f32 %v2579_v33, %v11121_v3  ;;  %v11124_v48 = vld [vmem:[#allocation97_spill] sm:$0xff] }
 0x819   : > { %v2645_v42 = vmul.f32 %v8331_v31, %v11122_v29  ;;  %v2686_v32 = vadd.f32 %v2654_v63, %v2620_v43  ;;  %v5046_v9 = vpop.eup %5045  ;;  %5057 = vtanh.f32 %v2853_v36  ;;  %v2646_v27 = vmul.f32 %v8331_v31, %v11123_v41  ;;  %v11231_v49 = vld [vmem:[#allocation29_spill] sm:$0xff] }
 0x81a   : > { %v2647_v14 = vmul.f32 %v8331_v31, %v11124_v48  ;;  %v5048_v30 = vpop.eup %5047  ;;  %v2888_v45 = vmul.f32 0.5, %v5036_v1  ;;  %v2889_v16 = vmul.f32 0.5, %v5038_v61  ;;  %5059 = vtanh.f32 %v2848_v7 }
 0x81b   : > { %v2680_v60 = vadd.f32 %v2648_v53, %v2614_v44  ;;  %v5050_v33 = vpop.eup %5049  ;;  %v2890_v3 = vmul.f32 0.5, %v5040_v11  ;;  %v2891_v29 = vmul.f32 0.5, %v5042_v2  ;;  %5061 = vtanh.f32 %v2849_v23 }
 0x81c   : > { %v2800_v35 = vpop.f32.mrf.mxu0  ;;  %v2835_v63 = vadd.f32 %v2797_v13, %v8465_v5  ;;  %v5052_v43 = vpop.eup %5051  ;;  %v2892_v36 = vmul.f32 0.5, %v5044_v21  ;;  %v2893_v58 = vmul.f32 0.5, %v5046_v9  ;;  %v8568_v41 = vadd.f32 %v2645_v42, %v2611_v4  ;;  %v11125_v5 = vld [vmem:[#allocation118_spill] sm:$0xff]  ;;  %v11126_v9 = vld [vmem:[#allocation119_spill] sm:$0xff] }
 0x81d   : > { %v2836_v17 = vadd.f32 %v2800_v35, %v8467_v8  ;;  %v5054_v31 = vpop.eup %5053  ;;  %v8570_v48 = vmul.f32 0.5, %v5048_v30  ;;  %v2678_v8 = vadd.f32 %v2646_v27, %v2612_v51  ;;  %v2679_v1 = vadd.f32 %v2647_v14, %v8504_v38  ;;  %v11128_v30 = vld [vmem:[#allocation71_spill] sm:$0xff] }
 0x81e   : > { %v2834_v61 = vadd.f32 %v8499_v10, %v8497_v22  ;;  %v5056_v53 = vpop.eup %5055  ;;  %v8575_v11 = vadd.f32 0.5, %v2888_v45  ;;  %v8577_v23 = vadd.f32 0.5, %v2889_v16  ;;  %v2829_v13 = vadd.f32 %v11125_v5, %v8493_v47  ;;  %v11127_v10 = vld [vmem:[#allocation157_spill] sm:$0xff] }
 0x81f   : > { %5063 = vtanh.f32 %v2836_v17  ;;  %v2833_v4 = vadd.f32 %v11126_v9, %v8529_v15  ;;  %v5058_v7 = vpop.eup %5057  ;;  %v2914_v44 = vadd.f32 0.5, %v2890_v3  ;;  %v2915_v2 = vadd.f32 0.5, %v2891_v29  ;;  %v11129_v29 = vld [vmem:[#allocation52_spill] sm:$0xff] }
 0x820   : > { %v2900_v51 = vmul.f32 0.5, %v5052_v43  ;;  %5065 = vtanh.f32 %v2835_v63  ;;  %v5060_v38 = vpop.eup %5059  ;;  %v2916_v21 = vadd.f32 0.5, %v2892_v36  ;;  %v2917_v42 = vadd.f32 0.5, %v2893_v58  ;;  %v11130_v43 = vld [vmem:[#allocation111_spill] sm:$0xff] }
 0x821   : > { %v2898_v22 = vmul.f32 0.5, %v5054_v31  ;;  %v2828_v35 = vadd.f32 %v11127_v10, %v8506_v6  ;;  %v5062_v14 = vpop.eup %5061  ;;  %v2899_v17 = vmul.f32 0.5, %v5056_v53  ;;  %v2832_v47 = vadd.f32 %v11128_v30, %v2687_v0  ;;  %v11131_v31 = vld [vmem:[#allocation144_spill] sm:$0xff]  ;;  %v11132_v0 = vld [vmem:[#allocation154_spill] sm:$0xff] }
 0x822   : > { %5067 = vtanh.f32 %v2834_v61  ;;  %v2901_v3 = vmul.f32 0.5, %v5058_v7  ;;  %v2827_v16 = vadd.f32 %v11129_v29, %v8552_v46  ;;  %v2861_v63 = vmul.f32 0.5, %v2829_v13 }
 0x823   : > { %5069 = vtanh.f32 %v2833_v4  ;;  %v2924_v58 = vadd.f32 0.5, %v2900_v51  ;;  %v2825_v36 = vadd.f32 %v11130_v43, %v2680_v60  ;;  %v2831_v6 = vadd.f32 %v11131_v31, %v2686_v32  ;;  %v11133_v60 = vld [vmem:[#allocation56_spill] sm:$0xff]  ;;  %v11134_v32 = vld [vmem:[#allocation145_spill] sm:$0xff] }
 0x824   : > { %v2803_v27 = vpop.f32.mrf.mxu0  ;;  %v2895_v5 = vmul.f32 0.5, %v5050_v33  ;;  %v2896_v53 = vmul.f32 0.5, %v5060_v38  ;;  %v2826_v61 = vadd.f32 %v11132_v0, %v8557_v26  ;;  %v2860_v9 = vmul.f32 0.5, %v2828_v35 }
 0x825   : > { %v2837_v15 = vadd.f32 %v2803_v27, %v8455_v55  ;;  %v5064_v45 = vpop.eup %5063  ;;  %v2897_v10 = vmul.f32 0.5, %v5062_v14  ;;  %v2923_v7 = vadd.f32 0.5, %v2899_v17  ;;  %v2922_v46 = vadd.f32 0.5, %v2898_v22  ;;  %v11136_v22 = vld [vmem:[#allocation153_spill] sm:$0xff] }
 0x826   : > { %v5066_v55 = vpop.eup %5065  ;;  %v2956_v27 = vmul.f32 %v5064_v45, %v2916_v21  ;;  %v2925_v13 = vadd.f32 0.5, %v2901_v3  ;;  %v2859_v4 = vmul.f32 0.5, %v2827_v16  ;;  %v2948_v30 = vmul.f32 %v2924_v58, %v11133_v60  ;;  %v11138_v16 = vld [vmem:[#allocation141_spill] sm:$0xff]  ;;  %v11145_v60 = vld [vmem:[#allocation152_spill] sm:$0xff] }
 0x827   : > { %5071 = vtanh.f32 %v2837_v15  ;;  %v2824_v15 = vadd.f32 %v11134_v32, %v2679_v1  ;;  %v2857_v33 = vmul.f32 0.5, %v2825_v36  ;;  %v2920_v29 = vadd.f32 0.5, %v2896_v53  ;;  %v11139_v36 = vld [vmem:[#allocation155_spill] sm:$0xff] }
 0x828   : > { %5073 = vtanh.f32 %v2832_v47  ;;  %v5068_v51 = vpop.eup %5067  ;;  %v2858_v26 = vmul.f32 0.5, %v2826_v61  ;;  %v2955_v35 = vmul.f32 %v5066_v55, %v2915_v2  ;;  %v2921_v17 = vadd.f32 0.5, %v2897_v10  ;;  %v11135_v47 = vld [vmem:[#allocation150_spill] sm:$0xff] }
 0x829   : > { %5075 = vtanh.f32 %v2861_v63  ;;  %v5070_v38 = vpop.eup %5069  ;;  %v2947_v21 = vmul.f32 %v2923_v7, %v11135_v47  ;;  %v2823_v45 = vadd.f32 %v11136_v22, %v2678_v8  ;;  %v8597_v3 = vadd.f32 %v2956_v27, %v2948_v30  ;;  %v11143_v27 = vld [vmem:[#allocation148_spill] sm:$0xff] }
 0x82a   : > { %5077 = vtanh.f32 %v2831_v6  ;;  %v2949_v63 = vmul.f32 %v2925_v13, %v11138_v16  ;;  %v2954_v58 = vmul.f32 %v5068_v51, %v2914_v44  ;;  %v2946_v31 = vmul.f32 %v2922_v46, %v11139_v36  ;;  %v11140_v6 = vld [vmem:[#allocation48_spill] sm:$0xff] }
 0x82b   : > { %5079 = vtanh.f32 %v2860_v9  ;;  %11137 = vst [vmem:[#allocation121_spill] sm:$0xff] %v8597_v3  ;;  %v2822_v53 = vadd.f32 %v11140_v6, %v8568_v41  ;;  %v2856_v2 = vmul.f32 0.5, %v2824_v15  ;;  %v2953_v61 = vmul.f32 %v5070_v38, %v8577_v23 }
 0x82c   : > { %5081 = vtanh.f32 %v2859_v4  ;;  %v8604_v8 = vadd.f32 %v2955_v35, %v2947_v21  ;;  %v2911_v44 = vadd.f32 0.5, %v8570_v48  ;;  %v2855_v10 = vmul.f32 0.5, %v2823_v45 }
 0x82d   : > { %v5072_v14 = vpop.eup %5071  ;;  %5083 = vtanh.f32 %v2857_v33  ;;  %v2945_v41 = vmul.f32 %v2921_v17, %v11143_v27  ;;  %v8612_v13 = vadd.f32 %v2954_v58, %v2946_v31  ;;  %v2854_v23 = vmul.f32 0.5, %v2822_v53 }
 0x82e   : > { %v2957_v1 = vmul.f32 %v5072_v14, %v2917_v42  ;;  %v5074_v43 = vpop.eup %5073  ;;  %5085 = vtanh.f32 %v2858_v26  ;;  %11141 = vst [vmem:[#allocation39_spill] sm:$0xff] %v8604_v8  ;;  %v2919_v42 = vadd.f32 0.5, %v2895_v5  ;;  %v2944_v30 = vmul.f32 %v2920_v29, %v11145_v60 }
 0x82f   : > { %v5076_v0 = vpop.eup %5075  ;;  %5087 = vtanh.f32 %v8597_v3  ;;  %v2952_v46 = vmul.f32 %v5074_v43, %v8575_v11  ;;  %11144 = vst [vmem:[#allocation123_spill] sm:$0xff] %v8612_v13  ;;  %v8616_v5 = vadd.f32 %v2953_v61, %v2945_v41  ;;  %v11147_v11 = vld [vmem:[#allocation116_spill] sm:$0xff] }
 0x830   : > { %v8606_v9 = vadd.f32 %v2957_v1, %v2949_v63  ;;  %v5078_v55 = vpop.eup %5077  ;;  %v2909_v4 = vmul.f32 0.5, %v5076_v0  ;;  %v2943_v38 = vmul.f32 %v2919_v42, %v11147_v11  ;;  %v8646_v11 = vld [vmem:[%s9958_s2 + $0x10] sm:$0xff] }
 0x831   : > { %v5080_v7 = vpop.eup %5079  ;;  %v2951_v48 = vmul.f32 %v5078_v55, %v2911_v44  ;;  %11146 = vst [vmem:[#allocation124_spill] sm:$0xff] %v8616_v5  ;;  %v8620_v26 = vadd.f32 %v2952_v46, %v2944_v30  ;;  %v11150_v55 = vld [vmem:[#allocation120_spill] sm:$0xff] }
 0x832   : > { %11142 = vst [vmem:[#allocation122_spill] sm:$0xff] %v8606_v9  ;;  %5089 = vtanh.f32 %v8606_v9  ;;  %v5082_v51 = vpop.eup %5081  ;;  %v2908_v15 = vmul.f32 0.5, %v5080_v7  ;;  %v2933_v17 = vadd.f32 0.5, %v2909_v4 }
 0x833   : > { %5091 = vtanh.f32 %v2856_v2  ;;  %v5084_v32 = vpop.eup %5083  ;;  %11148 = vst [vmem:[#allocation125_spill] sm:$0xff] %v8620_v26  ;;  %v2907_v14 = vmul.f32 0.5, %v5082_v51  ;;  %v8623_v47 = vadd.f32 %v2951_v48, %v2943_v38  ;;  %v8653_v38 = vld [vmem:[%s9958_s2 + $0x18] sm:$0xff] }
 0x834   : > { %5093 = vtanh.f32 %v8604_v8  ;;  %v5086_v33 = vpop.eup %5085  ;;  %v2932_v16 = vadd.f32 0.5, %v2908_v15  ;;  %v2905_v1 = vmul.f32 0.5, %v5084_v32  ;;  %v8632_v15 = vld [vmem:[%s9958_s2] sm:$0xff]  ;;  %11153 = vst [vmem:[#allocation129_spill] sm:$0xff] %v8646_v11  ;;  %v11219_v8 = vld [vmem:[#allocation41_spill] sm:$0xff] }
 0x835   : > { %5095 = vtanh.f32 %v2855_v10  ;;  %v5088_v35 = vpop.eup %5087  ;;  %11149 = vst [vmem:[#allocation126_spill] sm:$0xff] %v8623_v47  ;;  %v2906_v22 = vmul.f32 0.5, %v5086_v33  ;;  %v2931_v36 = vadd.f32 0.5, %v2907_v14  ;;  %v8639_v33 = vld [vmem:[%s9958_s2 + $0x8] sm:$0xff] }
 0x836   : > { %5097 = vtanh.f32 %v8612_v13  ;;  %v2980_v43 = vmul.f32 %v5088_v35, %v2932_v16  ;;  %v2929_v10 = vadd.f32 0.5, %v2905_v1  ;;  %11151 = vst [vmem:[#allocation127_spill] sm:$0xff] %v8632_v15  ;;  %v8660_v35 = vld [vmem:[%s9958_s2 + $0x20] sm:$0xff]  ;;  %v8667_v14 = vld [vmem:[%s9958_s2 + $0x28] sm:$0xff]  ;;  %v8709_v16 = vld [vmem:[%s9958_s2 + $0x58] sm:$0xff] }
 0x837   : > { %5099 = vtanh.f32 %v2854_v23  ;;  %v2930_v0 = vadd.f32 0.5, %v2906_v22  ;;  %11152 = vst [vmem:[#allocation128_spill] sm:$0xff] %v8639_v33  ;;  %v8695_v22 = vld [vmem:[%s9958_s2 + $0x48] sm:$0xff]  ;;  %v8730_v1 = vld [vmem:[%s9958_s2 + $0x70] sm:$0xff] }
 0x838   : > { %v5090_v29 = vpop.eup %5089  ;;  %5101 = vtanh.f32 %v8616_v5  ;;  %11154 = vst [vmem:[#allocation130_spill] sm:$0xff] %v8653_v38 }
 0x839   : > { %v5092_v21 = vpop.eup %5091  ;;  %v2981_v45 = vmul.f32 %v5090_v29, %v2933_v17  ;;  %5103 = vtanh.f32 %v8620_v26  ;;  %11155 = vst [vmem:[#allocation131_spill] sm:$0xff] %v8660_v35  ;;  %v8674_v17 = vld [vmem:[%s9958_s2 + $0x30] sm:$0xff]  ;;  %v8681_v29 = vld [vmem:[%s9958_s2 + $0x38] sm:$0xff] }
 0x83a   : > { %v5094_v63 = vpop.eup %5093  ;;  %5105 = vtanh.f32 %v8623_v47  ;;  %v2904_v53 = vmul.f32 0.5, %v5092_v21  ;;  %11156 = vst [vmem:[#allocation132_spill] sm:$0xff] %v8667_v14  ;;  %v8688_v21 = vld [vmem:[%s9958_s2 + $0x40] sm:$0xff] }
 0x83b   : > { %v5096_v58 = vpop.eup %5095  ;;  %3122 = vmatpush.msrb.mxu1 %v2981_v45  ;;  %v2979_v2 = vmul.f32 %v5094_v63, %v2931_v36  ;;  %5107 = vtanh.f32 %v11150_v55  ;;  %11157 = vst [vmem:[#allocation133_spill] sm:$0xff] %v8674_v17  ;;  %v8702_v45 = vld [vmem:[%s9958_s2 + $0x50] sm:$0xff]  ;;  %v8716_v63 = vld [vmem:[%s9958_s2 + $0x60] sm:$0xff] }
 0x83c   : > { %v5098_v31 = vpop.eup %5097  ;;  %v2903_v44 = vmul.f32 0.5, %v5096_v58  ;;  %v2928_v46 = vadd.f32 0.5, %v2904_v53  ;;  %11158 = vst [vmem:[#allocation134_spill] sm:$0xff] %v8681_v29  ;;  %v8723_v58 = vld [vmem:[%s9958_s2 + $0x68] sm:$0xff] }
 0x83d   : > { %v5100_v6 = vpop.eup %5099  ;;  %3123 = vmatpush.msrb.mxu1 %v2980_v43  ;;  %v2978_v42 = vmul.f32 %v5098_v31, %v2930_v0  ;;  %11159 = vst [vmem:[#allocation135_spill] sm:$0xff] %v8688_v21  ;;  %v8737_v43 = vld [vmem:[%s9958_s2 + $0x78] sm:$0xff]  ;;  %v8744_v31 = vld [vmem:[%s9958_s2 + $0x80] sm:$0xff]  ;;  %v8753_v53 = vld [vmem:[%s9958_s2 + $0x88] sm:$0xff] }
 0x83e   : > { %v5102_v61 = vpop.eup %5101  ;;  %v2902_v27 = vmul.f32 0.5, %v5100_v6  ;;  %v2927_v51 = vadd.f32 0.5, %v2903_v44  ;;  %11160 = vst [vmem:[#allocation136_spill] sm:$0xff] %v8695_v22  ;;  %v8762_v0 = vld [vmem:[%s9958_s2 + $0x90] sm:$0xff]  ;;  %v8771_v44 = vld [vmem:[%s9958_s2 + $0x98] sm:$0xff] }
 0x83f   : > { %3124 = vmatpush.msrb.mxu1 %v2979_v2  ;;  %v5104_v7 = vpop.eup %5103  ;;  %v2977_v41 = vmul.f32 %v5102_v61, %v2929_v10  ;;  %11161 = vst [vmem:[#allocation137_spill] sm:$0xff] %v8702_v45  ;;  %v8780_v10 = vld [vmem:[%s9958_s2 + $0xa0] sm:$0xff] }
 0x840   : > { %v5106_v23 = vpop.eup %5105  ;;  %v2976_v4 = vmul.f32 %v5104_v7, %v2928_v46  ;;  %v2926_v48 = vadd.f32 0.5, %v2902_v27  ;;  %11162 = vst [vmem:[#allocation138_spill] sm:$0xff] %v8709_v16  ;;  %v8789_v27 = vld [vmem:[%s9958_s2 + $0xa8] sm:$0xff]  ;;  %v8798_v46 = vld [vmem:[%s9958_s2 + $0xb0] sm:$0xff] }
 0x841   : > { %3125 = vmatpush.msrb.mxu1 %v2978_v42  ;;  %v5108_v60 = vpop.eup %5107  ;;  %v2975_v30 = vmul.f32 %v5106_v23, %v2927_v51  ;;  %11163 = vst [vmem:[#allocation139_spill] sm:$0xff] %v8716_v63 }
 0x842   : > { %v2974_v32 = vmul.f32 %v5108_v60, %v2926_v48  ;;  %11164 = vst [vmem:[#allocation140_spill] sm:$0xff] %v8723_v58  ;;  %v8814_v60 = vld [vmem:[%s9958_s2 + $0xc0] sm:$0xff]  ;;  %v8823_v48 = vld [vmem:[%s9958_s2 + $0xc8] sm:$0xff] }
 0x843   : > { %3126 = vmatpush.msrb.mxu1 %v2977_v41  ;;  %11165 = vst [vmem:[#allocation142_spill] sm:$0xff] %v8730_v1 }
 0x844   : > { %11166 = vst [vmem:[#allocation159_spill] sm:$0xff] %v8737_v43 }
 0x845   : > { %3127 = vmatpush.msrb.mxu1 %v2976_v4  ;;  %11167 = vst [vmem:[#allocation114_spill] sm:$0xff] %v8744_v31  ;;  %v8807_v4 = vld [vmem:[%s9958_s2 + $0xb8] sm:$0xff] }
 0x846   : > { %11168 = vst [vmem:[#allocation146_spill] sm:$0xff] %v8753_v53 }
 0x847   : > { %3128 = vmatpush.msrb.mxu1 %v2975_v30  ;;  %11169 = vst [vmem:[#allocation117_spill] sm:$0xff] %v8762_v0 }
 0x848   : > { %11170 = vst [vmem:[#allocation149_spill] sm:$0xff] %v8771_v44 }
 0x849   : > { %3129 = vmatpush.msrb.mxu1 %v2974_v32  ;;  %11171 = vst [vmem:[#allocation68_spill] sm:$0xff] %v8780_v10 }
 0x84a   : > { %4510 = vmatmul.msk.f32.vlgmr.msrb.gmra.mxu1 %vm912_vm0, %v8632_v15  ;;  %11172 = vst [vmem:[#allocation156_spill] sm:$0xff] %v8789_v27 }
 0x84b   : > { %11173 = vst [vmem:[#allocation64_spill] sm:$0xff] %v8798_v46 }
 0x84c   : > { %11174 = vst [vmem:[#allocation147_spill] sm:$0xff] %v8807_v4 }
 0x84d   : > { %11175 = vst [vmem:[#allocation158_spill] sm:$0xff] %v8814_v60 }
 0x84e   : > { %11176 = vst [vmem:[#allocation61_spill] sm:$0xff] %v8823_v48 }
 0x852   : > { %4511 = vmatmul.msk.f32.gmra.mxu1 %vm912_vm0, %v8639_v33 }
 0x85a   : > { %4512 = vmatmul.msk.f32.gmra.mxu1 %vm912_vm0, %v8646_v11  ;;  %v11197_v11 = vld [vmem:[#allocation81_spill] sm:$0xff] }
 0x862   : > { %4513 = vmatmul.msk.f32.gmra.mxu1 %vm912_vm0, %v8653_v38 }
 0x86a   : > { %4514 = vmatmul.msk.f32.gmra.mxu1 %vm912_vm0, %v8660_v35  ;;  %v11196_v35 = vld [vmem:[#allocation87_spill] sm:$0xff] }
 0x872   : > { %4515 = vmatmul.msk.f32.gmra.mxu1 %vm912_vm0, %v8667_v14 }
 0x87a   : > { %4516 = vmatmul.msk.f32.gmra.mxu1 %vm912_vm0, %v8674_v17  ;;  %v11195_v17 = vld [vmem:[#allocation86_spill] sm:$0xff] }
 0x882   : > { %4517 = vmatmul.msk.f32.gmra.mxu1 %vm912_vm0, %v8681_v29 }
 0x88a   : > { %4518 = vmatmul.msk.f32.gmra.mxu1 %vm912_vm0, %v8688_v21  ;;  %v11194_v21 = vld [vmem:[#allocation62_spill] sm:$0xff] }
 0x892   : > { %4519 = vmatmul.msk.f32.gmra.mxu1 %vm912_vm0, %v8695_v22 }
 0x89a   : > { %4520 = vmatmul.msk.f32.gmra.mxu1 %vm912_vm0, %v8702_v45 }
 0x8a2   : > { %4521 = vmatmul.msk.f32.gmra.mxu1 %vm912_vm0, %v8709_v16  ;;  %v11192_v16 = vld [vmem:[#allocation83_spill] sm:$0xff] }
 0x8aa   : > { %4522 = vmatmul.msk.f32.gmra.mxu1 %vm912_vm0, %v8716_v63 }
 0x8b2   : > { %4523 = vmatmul.msk.f32.gmra.mxu1 %vm912_vm0, %v8723_v58 }
 0x8ba   : > { %4524 = vmatmul.msk.f32.gmra.mxu1 %vm912_vm0, %v8730_v1 }
 0x8c2   : > { %4525 = vmatmul.msk.f32.gmra.mxu1 %vm912_vm0, %v8737_v43 }
 0x8c7   : > { %v3131_v36 = vpop.f32.mrf.mxu1 }
 0x8ca   : > { %4526 = vmatmul.msk.f32.gmra.mxu1 %vm912_vm0, %v8744_v31  ;;  %v11185_v31 = vld [vmem:[#allocation143_spill] sm:$0xff] }
 0x8cf   : > { %v8748_v6 = vpop.f32.mrf.mxu1 }
 0x8d2   : > { %4527 = vmatmul.msk.f32.gmra.mxu1 %vm912_vm0, %v8753_v53 }
 0x8d7   : > { %v8757_v2 = vpop.f32.mrf.mxu1 }
 0x8da   : > { %4528 = vmatmul.msk.f32.gmra.mxu1 %vm912_vm0, %v8762_v0  ;;  %v11183_v0 = vld [vmem:[#allocation19_spill] sm:$0xff] }
 0x8df   : > { %v8766_v61 = vpop.f32.mrf.mxu1 }
 0x8e2   : > { %4529 = vmatmul.msk.f32.gmra.mxu1 %vm912_vm0, %v8771_v44 }
 0x8e7   : > { %v8775_v42 = vpop.f32.mrf.mxu1 }
 0x8ea   : > { %4530 = vmatmul.msk.f32.gmra.mxu1 %vm912_vm0, %v8780_v10 }
 0x8ef   : > { %v8784_v7 = vpop.f32.mrf.mxu1 }
 0x8f2   : > { %4531 = vmatmul.msk.f32.gmra.mxu1 %vm912_vm0, %v8789_v27  ;;  %v11181_v27 = vld [vmem:[#allocation110_spill] sm:$0xff] }
 0x8f7   : > { %v8793_v41 = vpop.f32.mrf.mxu1 }
 0x8fa   : > { %4532 = vmatmul.msk.f32.gmra.mxu1 %vm912_vm0, %v8798_v46  ;;  %v8841_v46 = vld [vmem:[%s9958_s2 + $0xd8] sm:$0xff] }
 0x8fb   : > { %11180 = vst [vmem:[#allocation119_spill] sm:$0xff] %v8841_v46 }
 0x8ff   : > { %v8802_v23 = vpop.f32.mrf.mxu1 }
 0x902   : > { %4533 = vmatmul.msk.f32.gmra.mxu1 %vm912_vm0, %v8807_v4  ;;  %v8832_v4 = vld [vmem:[%s9958_s2 + $0xd0] sm:$0xff] }
 0x903   : > { %11178 = vst [vmem:[#allocation151_spill] sm:$0xff] %v8832_v4 }
 0x907   : > { %v3155_v51 = vpop.f32.mrf.mxu1 }
 0x90a   : > { %4534 = vmatmul.msk.f32.gmra.mxu1 %vm912_vm0, %v8814_v60 }
 0x90f   : > { %v8818_v30 = vpop.f32.mrf.mxu1 }
 0x912   : > { %4535 = vmatmul.msk.f32.gmra.mxu1 %vm912_vm0, %v8823_v48 }
 0x917   : > { %v8827_v32 = vpop.f32.mrf.mxu1 }
 0x918   : > { %11177 = vst [vmem:[#allocation75_spill] sm:$0xff] %v8827_v32 }
 0x91a   : > { %4536 = vmatmul.msk.f32.gmra.mxu1 %vm912_vm0, %v8832_v4  ;;  %v11182_v4 = vld [vmem:[#allocation115_spill] sm:$0xff] }
 0x91f   : > { %v8836_v60 = vpop.f32.mrf.mxu1 }
 0x920   : > { %11179 = vst [vmem:[#allocation118_spill] sm:$0xff] %v8836_v60 }
 0x922   : > { %4537 = vmatmul.msk.f32.gmra.mxu1 %vm912_vm0, %v8841_v46 }
 0x927   : > { %v8845_v48 = vpop.f32.mrf.mxu1 }
 0x92a   : > { %4538 = vmatmul.msk.f32.gmra.mxu1 %vm912_vm0, %v11181_v27 }
 0x92f   : > { %v8849_v10 = vpop.f32.mrf.mxu1 }
 0x932   : > { %4539 = vmatmul.msk.f32.gmra.mxu1 %vm912_vm0, %v11182_v4  ;;  %v8872_v4 = vld [vmem:[%s5647_s27 + $0x5] ss:$0 sm:$0xff] }
 0x933   : > { %v2992_v45 = vmul.f32 %v8872_v4, %v11192_v16  ;;  %v2984_v29 = vmul.f32 %v8872_v4, %v11194_v21  ;;  %v11200_v21 = vld [vmem:[#allocation103_spill] sm:$0xff] }
 0x935   : > { %v3024_v38 = vadd.f32 %v2992_v45, %v11196_v35  ;;  %v3016_v33 = vadd.f32 %v2984_v29, %v11197_v11  ;;  %v11202_v35 = vld [vmem:[#allocation108_spill] sm:$0xff] }
 0x937   : > { %v8853_v44 = vpop.f32.mrf.mxu1 }
 0x93a   : > { %4540 = vmatmul.msk.f32.gmra.mxu1 %vm912_vm0, %v11183_v0  ;;  %v8877_v0 = vld [vmem:[%s5647_s27 + $0xd] ss:$0 sm:$0xff] }
 0x93b   : > { %v3050_v14 = vmul.f32 %v8877_v0, %v11195_v17  ;;  %v11201_v17 = vld [vmem:[#allocation35_spill] sm:$0xff] }
 0x93c   : > { %v3074_v45 = vmul.f32 %v8877_v0, %v11201_v17 }
 0x93d   : > { %v3082_v26 = vadd.f32 %v3050_v14, %v3016_v33 }
 0x93f   : > { %v8857_v53 = vpop.f32.mrf.mxu1 }
 0x940   : > { %11184 = vst [vmem:[#allocation157_spill] sm:$0xff] %v8857_v53 }
 0x942   : > { %4541 = vmatmul.msk.f32.gmra.mxu1 %vm912_vm0, %v11185_v31  ;;  %v11193_v31 = vld [vmem:[#allocation101_spill] sm:$0xff] }
 0x943   : > { %v3058_v22 = vmul.f32 %v8877_v0, %v11193_v31  ;;  %v3008_v31 = vmul.f32 %v8872_v4, %v11200_v21  ;;  %v11205_v21 = vld [vmem:[#allocation17_spill] sm:$0xff] }
 0x945   : > { %v3090_v15 = vadd.f32 %v3058_v22, %v3024_v38  ;;  %v3040_v29 = vadd.f32 %v3008_v31, %v11202_v35  ;;  %v2997_v31 = vmul.f32 %v8872_v4, %v11205_v21  ;;  %v11211_v35 = vld [vmem:[#allocation42_spill] sm:$0xff] }
 0x947   : > { %v8861_v46 = vpop.f32.mrf.mxu1  ;;  %v3235_v5 = vadd.f32 %v3155_v51, %v3090_v15  ;;  %v3106_v22 = vadd.f32 %v3074_v45, %v3040_v29  ;;  %v11206_v29 = vld [vmem:[#allocation22_spill] sm:$0xff] }
 0x948   : > { %11186 = vst [vmem:[#allocation71_spill] sm:$0xff] %v8861_v46  ;;  %v3227_v46 = vadd.f32 %v3131_v36, %v3082_v26 }
 0x949   : > { %v3267_v16 = vmul.f32 0.5, %v3235_v5 }
 0x94a   : > { %v3259_v13 = vmul.f32 0.5, %v3227_v46 }
 0x94b   : > { %5109 = vtanh.f32 %v3267_v16  ;;  %v11203_v16 = vld [vmem:[#allocation9_spill] sm:$0xff] }
 0x94c   : > { %5111 = vtanh.f32 %v3259_v13  ;;  %v2990_v13 = vmul.f32 %v8872_v4, %v11203_v16 }
 0x94f   : > { %v8863_v43 = vpop.f32.mrf.mxu1 }
 0x950   : > { %11187 = vst [vmem:[#allocation52_spill] sm:$0xff] %v8863_v43 }
 0x951   : > { %v5110_v38 = vpop.eup %5109 }
 0x952   : > { %v5112_v33 = vpop.eup %5111  ;;  %v3315_v26 = vmul.f32 0.5, %v5110_v38  ;;  %v11207_v38 = vld [vmem:[#allocation8_spill] sm:$0xff] }
 0x953   : > { %v3307_v5 = vmul.f32 0.5, %v5112_v33  ;;  %v11208_v33 = vld [vmem:[#allocation10_spill] sm:$0xff] }
 0x954   : > { %v3339_v14 = vadd.f32 0.5, %v3315_v26 }
 0x955   : > { %v3331_v36 = vadd.f32 0.5, %v3307_v5  ;;  %v11210_v5 = vld [vmem:[#allocation21_spill] sm:$0xff] }
 0x956   : > { %v3363_v17 = vmul.f32 %v3339_v14, %v11150_v55  ;;  %v2987_v16 = vmul.f32 %v8872_v4, %v11210_v5  ;;  %v2991_v55 = vmul.f32 %v8872_v4, %v11211_v35  ;;  %v11212_v14 = vld [vmem:[#allocation11_spill] sm:$0xff] }
 0x957   : > { %v8865_v27 = vpop.f32.mrf.mxu1  ;;  %v2998_v21 = vmul.f32 %v8872_v4, %v11212_v14  ;;  %v3054_v14 = vmul.f32 %v8877_v0, %v11219_v8  ;;  %v11227_v8 = vld [vmem:[#allocation6_spill] sm:$0xff] }
 0x958   : > { %11188 = vst [vmem:[#allocation111_spill] sm:$0xff] %v8865_v27  ;;  %v11220_v27 = vld [vmem:[#allocation28_spill] sm:$0xff] }
 0x95f   : > { %v8867_v1 = vpop.f32.mrf.mxu1 }
 0x960   : > { %11189 = vst [vmem:[#allocation144_spill] sm:$0xff] %v8867_v1  ;;  %v11223_v1 = vld [vmem:[#allocation45_spill] sm:$0xff] }
 0x967   : > { %v8869_v58 = vpop.f32.mrf.mxu1 }
 0x968   : > { %11190 = vst [vmem:[#allocation154_spill] sm:$0xff] %v8869_v58  ;;  %v11221_v58 = vld [vmem:[#allocation36_spill] sm:$0xff] }
 0x96f   : > { %v8874_v63 = vpop.f32.mrf.mxu1 }
 0x970   : > { %11191 = vst [vmem:[#allocation56_spill] sm:$0xff] %v8874_v63 }
 0x977   : > { %v8889_v47 = vpop.f32.mrf.mxu1 }
 0x978   : > { %11198 = vst [vmem:[#allocation145_spill] sm:$0xff] %v8889_v47 }
 0x97f   : > { %v8891_v9 = vpop.f32.mrf.mxu1 }
 0x980   : > { %11199 = vst [vmem:[#allocation150_spill] sm:$0xff] %v8891_v9  ;;  %v3023_v9 = vadd.f32 %v2991_v55, %v11227_v8  ;;  %v11234_v55 = vld [vmem:[#allocation34_spill] sm:$0xff] }
 0x981   : > { %v2995_v8 = vmul.f32 %v8872_v4, %v11234_v55  ;;  %v11246_v55 = vld [vmem:[#allocation50_spill] sm:$0xff] }
 0x987   : > { %v3203_v11 = vpop.f32.mrf.mxu1 }
 0x988   : > { %v3251_v15 = vadd.f32 %v3203_v11, %v3106_v22  ;;  %v3056_v11 = vmul.f32 %v8877_v0, %v11206_v29  ;;  %v2989_v22 = vmul.f32 %v8872_v4, %v11207_v38  ;;  %v11214_v29 = vld [vmem:[#allocation40_spill] sm:$0xff]  ;;  %v11215_v38 = vld [vmem:[#allocation25_spill] sm:$0xff] }
 0x989   : > { %v3053_v43 = vmul.f32 %v8877_v0, %v11214_v29  ;;  %v3019_v29 = vadd.f32 %v2987_v16, %v11221_v58 }
 0x98a   : > { %5113 = vtanh.f32 %v3251_v15  ;;  %v3022_v15 = vadd.f32 %v2990_v13, %v11208_v33  ;;  %v2988_v13 = vmul.f32 %v8872_v4, %v11215_v38  ;;  %v11217_v33 = vld [vmem:[#allocation18_spill] sm:$0xff]  ;;  %v3021_v3 = vadd.f32 %v2989_v22, %v11220_v27  ;;  %v11228_v22 = vld [vmem:[#allocation20_spill] sm:$0xff] }
 0x98b   : > { %v3029_v5 = vadd.f32 %v2997_v31, %v11217_v33  ;;  %v11225_v31 = vld [vmem:[#allocation54_spill] sm:$0xff]  ;;  %v3085_v27 = vadd.f32 %v3053_v43, %v3019_v29  ;;  %v11237_v29 = vld [vmem:[#allocation27_spill] sm:$0xff] }
 0x98c   : > { %v3015_v33 = vmul.f32 %v8872_v4, %v11225_v31  ;;  %v2986_v31 = vmul.f32 %v8872_v4, %v11233_v52 }
 0x98f   : > { %v8900_v46 = vpop.f32.mrf.mxu1 }
 0x990   : > { %11204 = vst [vmem:[#allocation153_spill] sm:$0xff] %v8900_v46  ;;  %v5114_v51 = vpop.eup %5113  ;;  %v11222_v46 = vld [vmem:[#allocation15_spill] sm:$0xff] }
 0x991   : > { %v3371_v45 = vmul.f32 %v5114_v51, %v3331_v36  ;;  %v11213_v36 = vld [vmem:[#allocation14_spill] sm:$0xff]  ;;  %v2996_v38 = vmul.f32 %v8872_v4, %v11222_v46  ;;  %v11230_v46 = vld [vmem:[#allocation37_spill] sm:$0xff] }
 0x992   : > { %v3065_v51 = vmul.f32 %v8877_v0, %v11213_v36  ;;  %v8932_v36 = vadd.f32 %v3056_v11, %v3022_v15  ;;  %v3057_v11 = vmul.f32 %v8877_v0, %v11228_v22  ;;  %v11229_v15 = vld [vmem:[#allocation31_spill] sm:$0xff]  ;;  %v11235_v22 = vld [vmem:[#allocation12_spill] sm:$0xff] }
 0x993   : > { %v8910_v26 = vadd.f32 %v3371_v45, %v3363_v17  ;;  %v11216_v17 = vld [vmem:[#allocation23_spill] sm:$0xff]  ;;  %v3063_v16 = vmul.f32 %v8877_v0, %v11229_v15  ;;  %v3028_v58 = vadd.f32 %v2996_v38, %v11230_v46  ;;  %v3064_v32 = vmul.f32 %v8877_v0, %v11235_v22  ;;  %v11238_v46 = vld [vmem:[#allocation26_spill] sm:$0xff]  ;;  %v11242_v22 = vld [vmem:[#allocation53_spill] sm:$0xff] }
 0x994   : > { %v3055_v45 = vmul.f32 %v8877_v0, %v11216_v17  ;;  %v2999_v17 = vmul.f32 %v8872_v4, %v11223_v1  ;;  %v3062_v1 = vmul.f32 %v8877_v0, %v11231_v49  ;;  %v11236_v15 = vld [vmem:[#allocation7_spill] sm:$0xff]  ;;  %v3047_v38 = vadd.f32 %v3015_v33, %v11237_v29 }
 0x995   : > { %11209 = vst [vmem:[#allocation141_spill] sm:$0xff] %v8910_v26  ;;  %v11218_v26 = vld [vmem:[#allocation33_spill] sm:$0xff]  ;;  %v3081_v49 = vmul.f32 %v8877_v0, %v11238_v46  ;;  %v8965_v52 = vadd.f32 %v3063_v16, %v3029_v5  ;;  %v11243_v29 = vld [vmem:[#allocation67_spill] sm:$0xff] }
 0x996   : > { %v3051_v35 = vmul.f32 %v8877_v0, %v11218_v26  ;;  %v11226_v26 = vld [vmem:[#allocation58_spill] sm:$0xff]  ;;  %v3031_v43 = vadd.f32 %v2999_v17, %v11236_v15  ;;  %v3060_v17 = vmul.f32 %v8877_v0, %v11242_v22  ;;  %v8973_v15 = vadd.f32 %v3062_v1, %v3028_v58  ;;  %v11244_v5 = vld [vmem:[#allocation65_spill] sm:$0xff]  ;;  %v11245_v16 = vld [vmem:[#allocation47_spill] sm:$0xff] }
 0x997   : > { %v8939_v63 = vpop.f32.mrf.mxu1  ;;  %v3020_v47 = vadd.f32 %v2988_v13, %v11226_v26  ;;  %v3087_v26 = vadd.f32 %v3055_v45, %v3021_v3  ;;  %v11240_v3 = vld [vmem:[#allocation24_spill] sm:$0xff]  ;;  %v8990_v1 = vadd.f32 %v3081_v49, %v3047_v38 }
 0x998   : > { %11224 = vst [vmem:[#allocation155_spill] sm:$0xff] %v8939_v63  ;;  %v11232_v63 = vld [vmem:[#allocation49_spill] sm:$0xff]  ;;  %v8986_v22 = vadd.f32 %v3065_v51, %v3031_v43 }
 0x999   : > { %v3030_v60 = vadd.f32 %v2998_v21, %v11232_v63  ;;  %v3086_v13 = vadd.f32 %v3054_v14, %v3020_v47  ;;  %v2985_v21 = vmul.f32 %v8872_v4, %v11239_v62  ;;  %v3089_v63 = vadd.f32 %v3057_v11, %v3023_v9  ;;  %v11241_v14 = vld [vmem:[#allocation32_spill] sm:$0xff]  ;;  %v11252_v51 = vld [vmem:[#allocation69_spill] sm:$0xff] }
 0x99a   : > { %v3014_v47 = vmul.f32 %v8872_v4, %v11240_v3  ;;  %v2994_v45 = vmul.f32 %v8872_v4, %v11241_v14  ;;  %v3052_v9 = vmul.f32 %v8877_v0, %v11243_v29  ;;  %v3027_v11 = vadd.f32 %v2995_v8, %v11244_v5  ;;  %v11247_v14 = vld [vmem:[#allocation55_spill] sm:$0xff] }
 0x99b   : > { %v8975_v33 = vadd.f32 %v3064_v32, %v3030_v60  ;;  %v3017_v46 = vadd.f32 %v2985_v21, %v11095_v18  ;;  %v3013_v3 = vmul.f32 %v8872_v4, %v11245_v16  ;;  %v3061_v53 = vmul.f32 %v8877_v0, %v11247_v14  ;;  %v11248_v32 = vld [vmem:[#allocation77_spill] sm:$0xff]  ;;  %v11249_v29 = vld [vmem:[#allocation51_spill] sm:$0xff] }
 0x99c   : > { %v3026_v62 = vadd.f32 %v2994_v45, %v11246_v55  ;;  %v3018_v60 = vadd.f32 %v2986_v31, %v10939_v25  ;;  %v3046_v8 = vadd.f32 %v3014_v47, %v11249_v29  ;;  %v11250_v5 = vld [vmem:[#allocation43_spill] sm:$0xff]  ;;  %v11251_v45 = vld [vmem:[#allocation38_spill] sm:$0xff]  ;;  %v3007_v43 = vmul.f32 %v8872_v4, %v11252_v51  ;;  %v11254_v47 = vld [vmem:[#allocation72_spill] sm:$0xff] }
 0x99d   : > { %v3045_v21 = vadd.f32 %v3013_v3, %v11248_v32  ;;  %v3080_v16 = vmul.f32 %v8877_v0, %v11250_v5  ;;  %v3072_v14 = vmul.f32 %v8877_v0, %v11251_v45  ;;  %v11253_v55 = vld [vmem:[#allocation30_spill] sm:$0xff]  ;;  %v3083_v38 = vadd.f32 %v3051_v35, %v3017_v46  ;;  %v11256_v45 = vld [vmem:[#allocation73_spill] sm:$0xff] }
 0x99e   : > { %v8997_v18 = vadd.f32 %v3060_v17, %v3026_v62  ;;  %v3079_v49 = vmul.f32 %v8877_v0, %v11253_v55  ;;  %v3084_v31 = vadd.f32 %v3052_v9, %v3018_v60  ;;  %v2993_v3 = vmul.f32 %v8872_v4, %v11096_v39  ;;  %v11255_v62 = vld [vmem:[#allocation76_spill] sm:$0xff]  ;;  %v11257_v51 = vld [vmem:[#allocation74_spill] sm:$0xff] }
 0x99f   : > { %v8988_v58 = vpop.f32.mrf.mxu1  ;;  %v3006_v29 = vmul.f32 %v8872_v4, %v11254_v47  ;;  %v9009_v5 = vadd.f32 %v3061_v53, %v3027_v11  ;;  %v3073_v17 = vmul.f32 %v8877_v0, %v11255_v62  ;;  %v3012_v32 = vmul.f32 %v8872_v4, %v11256_v45  ;;  %v11258_v11 = vld [vmem:[#allocation91_spill] sm:$0xff]  ;;  %v11259_v55 = vld [vmem:[#allocation70_spill] sm:$0xff] }
 0x9a0   : > { %v3078_v25 = vmul.f32 %v8877_v0, %v11257_v51  ;;  %v3059_v35 = vmul.f32 %v8877_v0, %v11102_v19  ;;  %v9020_v9 = vadd.f32 %v3079_v49, %v3045_v21  ;;  %v9022_v60 = vadd.f32 %v3080_v16, %v3046_v8  ;;  %v11260_v19 = vld [vmem:[#allocation100_spill] sm:$0xff]  ;;  %v11262_v8 = vld [vmem:[#allocation106_spill] sm:$0xff] }
 0x9a1   : > { %v3038_v46 = vadd.f32 %v3006_v29, %v10603_v50  ;;  %v3229_v53 = vadd.f32 %v8757_v2, %v3084_v31  ;;  %v3004_v47 = vmul.f32 %v8872_v4, %v11258_v11  ;;  %v3039_v62 = vadd.f32 %v3007_v43, %v10604_v59  ;;  %v11261_v21 = vld [vmem:[#allocation96_spill] sm:$0xff] }
 0x9a2   : > { %v3044_v45 = vadd.f32 %v3012_v32, %v11259_v55  ;;  %v3230_v51 = vadd.f32 %v8766_v61, %v3085_v27  ;;  %v3025_v39 = vadd.f32 %v2993_v3, %v11106_v28  ;;  %v9033_v29 = vmul.f32 %v8872_v4, %v11260_v19 }
 0x9a3   : > { %v3009_v16 = vmul.f32 %v8872_v4, %v11261_v21  ;;  %v3231_v2 = vadd.f32 %v8775_v42, %v3086_v13  ;;  %v3002_v49 = vmul.f32 %v8872_v4, %v11262_v8  ;;  %v9040_v31 = vadd.f32 %v3073_v17, %v3039_v62  ;;  %v11263_v13 = vld [vmem:[#allocation85_spill] sm:$0xff] }
 0x9a4   : > { %v9042_v43 = vadd.f32 %v3078_v25, %v3044_v45  ;;  %v3232_v61 = vadd.f32 %v8784_v7, %v3087_v26  ;;  %v3091_v27 = vadd.f32 %v3059_v35, %v3025_v39  ;;  %v9047_v3 = vadd.f32 %v3072_v14, %v3038_v46  ;;  %v11264_v7 = vld [vmem:[#allocation90_spill] sm:$0xff] }
 0x9a5   : > { %v3011_v50 = vmul.f32 %v8872_v4, %v11105_v24  ;;  %v3261_v59 = vmul.f32 0.5, %v3229_v53  ;;  %v3233_v42 = vadd.f32 %v8793_v41, %v8932_v36  ;;  %v9054_v8 = vadd.f32 %v3002_v49, %v11263_v13 }
 0x9a6   : > { %v3005_v25 = vmul.f32 %v8872_v4, %v11109_v12  ;;  %v3262_v45 = vmul.f32 0.5, %v3230_v51  ;;  %v3234_v62 = vadd.f32 %v8802_v23, %v3089_v63  ;;  %v3077_v26 = vmul.f32 %v8877_v0, %v11264_v7 }
 0x9a7   : > { %v9044_v32 = vpop.f32.mrf.mxu1  ;;  %v3043_v39 = vadd.f32 %v3011_v50, %v11107_v40  ;;  %v3228_v14 = vadd.f32 %v8748_v6, %v3083_v38  ;;  %v3263_v17 = vmul.f32 0.5, %v3231_v2  ;;  %v3070_v41 = vmul.f32 %v8877_v0, %v10951_v34 }
 0x9a8   : > { %v3010_v36 = vmul.f32 %v8872_v4, %v11111_v37  ;;  %v3264_v35 = vmul.f32 0.5, %v3232_v61  ;;  %v3236_v46 = vadd.f32 %v8818_v30, %v3091_v27  ;;  %v3071_v63 = vmul.f32 %v8877_v0, %v11110_v54 }
 0x9a9   : > { %v3075_v50 = vmul.f32 %v8877_v0, %v10952_v56  ;;  %5115 = vtanh.f32 %v3261_v59  ;;  %v3265_v23 = vmul.f32 0.5, %v3233_v42  ;;  %v3241_v6 = vadd.f32 %v8853_v44, %v8975_v33  ;;  %v11265_v33 = vld [vmem:[#allocation157_spill] sm:$0xff]  ;;  %v11266_v42 = vld [vmem:[#allocation16_spill] sm:$0xff] }
 0x9aa   : > { %v3076_v51 = vmul.f32 %v8877_v0, %v10950_v57  ;;  %5117 = vtanh.f32 %v3262_v45  ;;  %v3266_v38 = vmul.f32 0.5, %v3234_v62  ;;  %v3239_v53 = vadd.f32 %v8845_v48, %v8973_v15  ;;  %v11267_v48 = vld [vmem:[#allocation75_spill] sm:$0xff] }
 0x9ab   : > { %v9078_v30 = vadd.f32 %v3077_v26, %v3043_v39  ;;  %v3260_v2 = vmul.f32 0.5, %v3228_v14  ;;  %5119 = vtanh.f32 %v3263_v17  ;;  %v3240_v49 = vadd.f32 %v8849_v10, %v8965_v52  ;;  %v11268_v39 = vld [vmem:[#allocation60_spill] sm:$0xff]  ;;  %v11269_v52 = vld [vmem:[#allocation118_spill] sm:$0xff]  ;;  %v11270_v14 = vld [vmem:[#allocation109_spill] sm:$0xff] }
 0x9ac   : > { %v3037_v59 = vadd.f32 %v3005_v25, %v10953_v20  ;;  %5121 = vtanh.f32 %v3264_v35  ;;  %v3268_v44 = vmul.f32 0.5, %v3236_v46  ;;  %v3242_v27 = vadd.f32 %v11265_v33, %v8986_v22  ;;  %v11271_v46 = vld [vmem:[#allocation79_spill] sm:$0xff] }
 0x9ad   : > { %v3001_v45 = vmul.f32 %v8872_v4, %v11266_v42  ;;  %5123 = vtanh.f32 %v3265_v23  ;;  %v3237_v15 = vadd.f32 %v11267_v48, %v8997_v18  ;;  %v3273_v62 = vmul.f32 0.5, %v3241_v6  ;;  %v11272_v23 = vld [vmem:[#allocation89_spill] sm:$0xff]  ;;  %v11273_v6 = vld [vmem:[#allocation107_spill] sm:$0xff] }
 0x9ae   : > { %v3042_v26 = vadd.f32 %v3010_v36, %v11268_v39  ;;  %5125 = vtanh.f32 %v3266_v38  ;;  %v3238_v10 = vadd.f32 %v11269_v52, %v9009_v5  ;;  %v3271_v25 = vmul.f32 0.5, %v3239_v53 }
 0x9af   : > { %v3218_v61 = vpop.f32.mrf.mxu1  ;;  %v3036_v17 = vadd.f32 %v3004_v47, %v11270_v14  ;;  %v5116_v35 = vpop.eup %5115  ;;  %5127 = vtanh.f32 %v3260_v2  ;;  %v3272_v22 = vmul.f32 0.5, %v3240_v49  ;;  %v3000_v33 = vmul.f32 %v8872_v4, %v11271_v46  ;;  %v11274_v47 = vld [vmem:[#allocation13_spill] sm:$0xff]  ;;  %v11275_v2 = vld [vmem:[#allocation82_spill] sm:$0xff] }
 0x9b0   : > { %v3041_v13 = vadd.f32 %v3009_v16, %v11272_v23  ;;  %v5118_v42 = vpop.eup %5117  ;;  %5129 = vtanh.f32 %v3268_v44  ;;  %v3274_v18 = vmul.f32 0.5, %v3242_v27  ;;  %v3069_v36 = vmul.f32 %v8877_v0, %v11273_v6  ;;  %v11276_v46 = vld [vmem:[#allocation113_spill] sm:$0xff] }
 0x9b1   : > { %v9098_v38 = vadd.f32 %v3071_v63, %v3037_v59  ;;  %v5120_v5 = vpop.eup %5119  ;;  %v3269_v53 = vmul.f32 0.5, %v3237_v15  ;;  %5131 = vtanh.f32 %v3273_v62  ;;  %v3033_v48 = vadd.f32 %v3001_v45, %v11274_v47  ;;  %v11277_v63 = vld [vmem:[#allocation112_spill] sm:$0xff]  ;;  %v11278_v45 = vld [vmem:[#allocation93_spill] sm:$0xff] }
 0x9b2   : > { %v3035_v49 = vadd.f32 %v9033_v29, %v11275_v2  ;;  %v5122_v52 = vpop.eup %5121  ;;  %v3270_v4 = vmul.f32 0.5, %v3238_v10  ;;  %5133 = vtanh.f32 %v3271_v25  ;;  %v9103_v16 = vadd.f32 %v3070_v41, %v3036_v17  ;;  %v11279_v47 = vld [vmem:[#allocation97_spill] sm:$0xff] }
 0x9b3   : > { %v3108_v44 = vadd.f32 %v3076_v51, %v3042_v26  ;;  %v5124_v27 = vpop.eup %5123  ;;  %5135 = vtanh.f32 %v3272_v22  ;;  %v3032_v34 = vadd.f32 %v3000_v33, %v11276_v46  ;;  %v3066_v59 = vmul.f32 %v8877_v0, %v11277_v63 }
 0x9b4   : > { %v3107_v15 = vadd.f32 %v3075_v50, %v3041_v13  ;;  %v5126_v6 = vpop.eup %5125  ;;  %5137 = vtanh.f32 %v3274_v18  ;;  %v3067_v29 = vmul.f32 %v8877_v0, %v11278_v45  ;;  %v3068_v10 = vmul.f32 %v8877_v0, %v11279_v47 }
 0x9b5   : > { %v5128_v51 = vpop.eup %5127  ;;  %v3309_v26 = vmul.f32 0.5, %v5116_v35  ;;  %v3310_v25 = vmul.f32 0.5, %v5118_v42  ;;  %5139 = vtanh.f32 %v3269_v53  ;;  %v3101_v17 = vadd.f32 %v3069_v36, %v3035_v49 }
 0x9b6   : > { %v5130_v22 = vpop.eup %5129  ;;  %v3311_v33 = vmul.f32 0.5, %v5120_v5  ;;  %v3312_v63 = vmul.f32 0.5, %v5122_v52  ;;  %5141 = vtanh.f32 %v3270_v4  ;;  %v3256_v13 = vadd.f32 %v3218_v61, %v9020_v9  ;;  %v11280_v9 = vld [vmem:[#allocation150_spill] sm:$0xff] }
 0x9b7   : > { %v3221_v62 = vpop.f32.mrf.mxu1  ;;  %v5132_v50 = vpop.eup %5131  ;;  %v3313_v18 = vmul.f32 0.5, %v5124_v27  ;;  %v3314_v46 = vmul.f32 0.5, %v5126_v6  ;;  %v9114_v45 = vadd.f32 %v3066_v59, %v3032_v34  ;;  %v9116_v47 = vmul.f32 0.5, %v5128_v51 }
 0x9b8   : > { %v3257_v41 = vadd.f32 %v3221_v62, %v9022_v60  ;;  %v5134_v0 = vpop.eup %5133  ;;  %v3099_v60 = vadd.f32 %v3067_v29, %v3033_v48  ;;  %v3100_v42 = vadd.f32 %v3068_v10, %v9054_v8  ;;  %v3255_v35 = vadd.f32 %v9044_v32, %v9042_v43  ;;  %v11281_v32 = vld [vmem:[#allocation145_spill] sm:$0xff] }
 0x9b9   : > { %v5136_v36 = vpop.eup %5135  ;;  %v9121_v5 = vadd.f32 0.5, %v3309_v26  ;;  %v9123_v53 = vadd.f32 0.5, %v3310_v25  ;;  %v3250_v61 = vadd.f32 %v11280_v9, %v9040_v31  ;;  %v3254_v34 = vadd.f32 %v8988_v58, %v9078_v30 }
 0x9ba   : > { %5143 = vtanh.f32 %v3257_v41  ;;  %v5138_v6 = vpop.eup %5137  ;;  %v3335_v49 = vadd.f32 0.5, %v3311_v33  ;;  %v3336_v52 = vadd.f32 0.5, %v3312_v63  ;;  %v3321_v48 = vmul.f32 0.5, %v5132_v50  ;;  %v11282_v41 = vld [vmem:[#allocation155_spill] sm:$0xff]  ;;  %v11283_v63 = vld [vmem:[#allocation56_spill] sm:$0xff]  ;;  %v11285_v50 = vld [vmem:[#allocation153_spill] sm:$0xff] }
 0x9bb   : > { %5145 = vtanh.f32 %v3256_v13  ;;  %v5140_v8 = vpop.eup %5139  ;;  %v3337_v4 = vadd.f32 0.5, %v3313_v18  ;;  %v3338_v27 = vadd.f32 0.5, %v3314_v46  ;;  %v3319_v43 = vmul.f32 0.5, %v5134_v0  ;;  %v11284_v33 = vld [vmem:[#allocation144_spill] sm:$0xff] }
 0x9bc   : > { %v3249_v59 = vadd.f32 %v11281_v32, %v9047_v3  ;;  %v5142_v29 = vpop.eup %5141  ;;  %v3320_v10 = vmul.f32 0.5, %v5136_v36  ;;  %v3253_v31 = vadd.f32 %v11282_v41, %v3108_v44  ;;  %5147 = vtanh.f32 %v3255_v35  ;;  %v11286_v44 = vld [vmem:[#allocation154_spill] sm:$0xff] }
 0x9bd   : > { %v3322_v51 = vmul.f32 0.5, %v5138_v6  ;;  %v3248_v26 = vadd.f32 %v11283_v63, %v9098_v38  ;;  %v3282_v25 = vmul.f32 0.5, %v3250_v61  ;;  %5149 = vtanh.f32 %v3254_v34  ;;  %v11292_v63 = vld [vmem:[#allocation122_spill] sm:$0xff] }
 0x9be   : > { %v3345_v46 = vadd.f32 0.5, %v3321_v48  ;;  %v3246_v13 = vadd.f32 %v11284_v33, %v3101_v17  ;;  %v3252_v3 = vadd.f32 %v11285_v50, %v3107_v15  ;;  %v3316_v18 = vmul.f32 0.5, %v5130_v22  ;;  %v11287_v17 = vld [vmem:[#allocation121_spill] sm:$0xff]  ;;  %v11288_v15 = vld [vmem:[#allocation111_spill] sm:$0xff] }
 0x9bf   : > { %v3224_v62 = vpop.f32.mrf.mxu1  ;;  %v3317_v0 = vmul.f32 0.5, %v5140_v8  ;;  %v3247_v35 = vadd.f32 %v11286_v44, %v9103_v16  ;;  %v3281_v36 = vmul.f32 0.5, %v3249_v59  ;;  %v3318_v9 = vmul.f32 0.5, %v5142_v29  ;;  %v11293_v33 = vld [vmem:[#allocation123_spill] sm:$0xff] }
 0x9c0   : > { %v3258_v58 = vadd.f32 %v3224_v62, %v8990_v1  ;;  %v5144_v30 = vpop.eup %5143  ;;  %v3344_v6 = vadd.f32 0.5, %v3320_v10  ;;  %v3343_v38 = vadd.f32 0.5, %v3319_v43  ;;  %v3346_v61 = vadd.f32 0.5, %v3322_v51  ;;  %v11290_v43 = vld [vmem:[#allocation52_spill] sm:$0xff]  ;;  %v11294_v50 = vld [vmem:[#allocation71_spill] sm:$0xff] }
 0x9c1   : > { %v5146_v1 = vpop.eup %5145  ;;  %v3377_v32 = vmul.f32 %v5144_v30, %v3337_v4  ;;  %v3280_v34 = vmul.f32 0.5, %v3248_v26  ;;  %v3369_v62 = vmul.f32 %v3345_v46, %v11287_v17  ;;  %v3245_v41 = vadd.f32 %v11288_v15, %v3100_v42 }
 0x9c2   : > { %5151 = vtanh.f32 %v3258_v58  ;;  %v5148_v48 = vpop.eup %5147  ;;  %v3278_v22 = vmul.f32 0.5, %v3246_v13  ;;  %v3341_v58 = vadd.f32 0.5, %v3317_v0  ;;  %v3279_v16 = vmul.f32 0.5, %v3247_v35 }
 0x9c3   : > { %5153 = vtanh.f32 %v3253_v31  ;;  %v5150_v8 = vpop.eup %5149  ;;  %v3376_v59 = vmul.f32 %v5146_v1, %v3336_v52  ;;  %v3342_v10 = vadd.f32 0.5, %v3318_v9  ;;  %v11289_v31 = vld [vmem:[#allocation39_spill] sm:$0xff]  ;;  %v3244_v30 = vadd.f32 %v11290_v43, %v3099_v60 }
 0x9c4   : > { %5155 = vtanh.f32 %v3282_v25  ;;  %v3368_v4 = vmul.f32 %v3344_v6, %v11289_v31  ;;  %v9143_v51 = vadd.f32 %v3377_v32, %v3369_v62  ;;  %v3370_v26 = vmul.f32 %v3346_v61, %v11292_v63  ;;  %v11296_v6 = vld [vmem:[#allocation124_spill] sm:$0xff] }
 0x9c5   : > { %5157 = vtanh.f32 %v3252_v3  ;;  %v3375_v25 = vmul.f32 %v5148_v48, %v3335_v49  ;;  %v3367_v13 = vmul.f32 %v3343_v38, %v11293_v33  ;;  %v3243_v3 = vadd.f32 %v11294_v50, %v9114_v45  ;;  %v11297_v48 = vld [vmem:[#allocation125_spill] sm:$0xff] }
 0x9c6   : > { %5159 = vtanh.f32 %v3281_v36  ;;  %11291 = vst [vmem:[#allocation48_spill] sm:$0xff] %v9143_v51  ;;  %v3277_v52 = vmul.f32 0.5, %v3245_v41  ;;  %v3374_v44 = vmul.f32 %v5150_v8, %v9123_v53  ;;  %v9150_v60 = vadd.f32 %v3376_v59, %v3368_v4 }
 0x9c7   : > { %5161 = vtanh.f32 %v3280_v34  ;;  %v3332_v49 = vadd.f32 0.5, %v9116_v47  ;;  %v3276_v1 = vmul.f32 0.5, %v3244_v30  ;;  %v3366_v45 = vmul.f32 %v3342_v10, %v11296_v6 }
 0x9c8   : > { %v5152_v29 = vpop.eup %5151  ;;  %5163 = vtanh.f32 %v3278_v22  ;;  %v9158_v38 = vadd.f32 %v3375_v25, %v3367_v13  ;;  %v3275_v53 = vmul.f32 0.5, %v3243_v3  ;;  %v3365_v17 = vmul.f32 %v3341_v58, %v11297_v48 }
 0x9c9   : > { %v3378_v42 = vmul.f32 %v5152_v29, %v3338_v27  ;;  %v5154_v46 = vpop.eup %5153  ;;  %5165 = vtanh.f32 %v3279_v16  ;;  %v3340_v27 = vadd.f32 0.5, %v3316_v18  ;;  %v9162_v18 = vadd.f32 %v3374_v44, %v3366_v45  ;;  %v11299_v44 = vld [vmem:[#allocation141_spill] sm:$0xff] }
 0x9ca   : > { %v5156_v0 = vpop.eup %5155  ;;  %5167 = vtanh.f32 %v9143_v51  ;;  %v3373_v32 = vmul.f32 %v5154_v46, %v9121_v5  ;;  %v11298_v5 = vld [vmem:[#allocation126_spill] sm:$0xff] }
 0x9cb   : > { %v9152_v35 = vadd.f32 %v3378_v42, %v3370_v26  ;;  %v5158_v36 = vpop.eup %5157  ;;  %v3330_v61 = vmul.f32 0.5, %v5156_v0  ;;  %v3364_v22 = vmul.f32 %v3340_v27, %v11298_v5  ;;  %v11303_v5 = vld [vmem:[#allocation130_spill] sm:$0xff] }
 0x9cc   : > { %v5160_v9 = vpop.eup %5159  ;;  %v3372_v47 = vmul.f32 %v5158_v36, %v3332_v49  ;;  %v9166_v8 = vadd.f32 %v3373_v32, %v3365_v17 }
 0x9cd   : > { %11295 = vst [vmem:[#allocation148_spill] sm:$0xff] %v9152_v35  ;;  %5169 = vtanh.f32 %v9152_v35  ;;  %v5162_v34 = vpop.eup %5161  ;;  %v3329_v15 = vmul.f32 0.5, %v5160_v9  ;;  %v3354_v29 = vadd.f32 0.5, %v3330_v61 }
 0x9ce   : > { %5171 = vtanh.f32 %v3277_v52  ;;  %v5164_v62 = vpop.eup %5163  ;;  %v3328_v59 = vmul.f32 0.5, %v5162_v34  ;;  %v9169_v10 = vadd.f32 %v3372_v47, %v3364_v22  ;;  %v11304_v22 = vld [vmem:[#allocation131_spill] sm:$0xff] }
 0x9cf   : > { %5173 = vtanh.f32 %v9150_v60  ;;  %v5166_v41 = vpop.eup %5165  ;;  %v3353_v30 = vadd.f32 0.5, %v3329_v15  ;;  %v3326_v25 = vmul.f32 0.5, %v5164_v62  ;;  %v11300_v62 = vld [vmem:[#allocation127_spill] sm:$0xff]  ;;  %v11301_v15 = vld [vmem:[#allocation128_spill] sm:$0xff] }
 0x9d0   : > { %5175 = vtanh.f32 %v3276_v1  ;;  %v5168_v16 = vpop.eup %5167  ;;  %v3327_v4 = vmul.f32 0.5, %v5166_v41  ;;  %v3352_v46 = vadd.f32 0.5, %v3328_v59  ;;  %v11302_v41 = vld [vmem:[#allocation129_spill] sm:$0xff] }
 0x9d1   : > { %5177 = vtanh.f32 %v9158_v38  ;;  %v3401_v42 = vmul.f32 %v5168_v16, %v3353_v30  ;;  %v3350_v27 = vadd.f32 0.5, %v3326_v25  ;;  %v11305_v16 = vld [vmem:[#allocation132_spill] sm:$0xff]  ;;  %v11306_v59 = vld [vmem:[#allocation133_spill] sm:$0xff]  ;;  %v11312_v30 = vld [vmem:[#allocation139_spill] sm:$0xff] }
 0x9d2   : > { %5179 = vtanh.f32 %v3275_v53  ;;  %v3351_v52 = vadd.f32 0.5, %v3327_v4  ;;  %v11310_v4 = vld [vmem:[#allocation137_spill] sm:$0xff]  ;;  %v11315_v25 = vld [vmem:[#allocation159_spill] sm:$0xff] }
 0x9d3   : > { %v5170_v58 = vpop.eup %5169  ;;  %5181 = vtanh.f32 %v9162_v18 }
 0x9d4   : > { %v5172_v31 = vpop.eup %5171  ;;  %v3402_v43 = vmul.f32 %v5170_v58, %v3354_v29  ;;  %5183 = vtanh.f32 %v9166_v8  ;;  %v11307_v29 = vld [vmem:[#allocation134_spill] sm:$0xff]  ;;  %v11308_v58 = vld [vmem:[#allocation135_spill] sm:$0xff] }
 0x9d5   : > { %v5174_v63 = vpop.eup %5173  ;;  %5185 = vtanh.f32 %v9169_v10  ;;  %v3325_v50 = vmul.f32 0.5, %v5172_v31  ;;  %v11309_v31 = vld [vmem:[#allocation136_spill] sm:$0xff] }
 0x9d6   : > { %v5176_v26 = vpop.eup %5175  ;;  %3543 = vmatpush.msrb.mxu2 %v3402_v43  ;;  %v3400_v3 = vmul.f32 %v5174_v63, %v3352_v46  ;;  %5187 = vtanh.f32 %v11299_v44  ;;  %v11311_v43 = vld [vmem:[#allocation138_spill] sm:$0xff]  ;;  %v11313_v63 = vld [vmem:[#allocation140_spill] sm:$0xff] }
 0x9d7   : > { %v5178_v33 = vpop.eup %5177  ;;  %v3324_v36 = vmul.f32 0.5, %v5176_v26  ;;  %v3349_v45 = vadd.f32 0.5, %v3325_v50  ;;  %v11314_v26 = vld [vmem:[#allocation142_spill] sm:$0xff]  ;;  %v11318_v50 = vld [vmem:[#allocation117_spill] sm:$0xff] }
 0x9d8   : > { %v5180_v13 = vpop.eup %5179  ;;  %3544 = vmatpush.msrb.mxu2 %v3401_v42  ;;  %v3399_v49 = vmul.f32 %v5178_v33, %v3351_v52  ;;  %v11316_v42 = vld [vmem:[#allocation114_spill] sm:$0xff]  ;;  %v11319_v52 = vld [vmem:[#allocation149_spill] sm:$0xff] }
 0x9d9   : > { %v5182_v0 = vpop.eup %5181  ;;  %v3323_v9 = vmul.f32 0.5, %v5180_v13  ;;  %v3348_v61 = vadd.f32 0.5, %v3324_v36  ;;  %v11317_v33 = vld [vmem:[#allocation146_spill] sm:$0xff]  ;;  %v11320_v36 = vld [vmem:[#allocation68_spill] sm:$0xff] }
 0x9da   : > { %3545 = vmatpush.msrb.mxu2 %v3400_v3  ;;  %v5184_v1 = vpop.eup %5183  ;;  %v3398_v6 = vmul.f32 %v5182_v0, %v3350_v27  ;;  %v11321_v27 = vld [vmem:[#allocation156_spill] sm:$0xff] }
 0x9db   : > { %v5186_v32 = vpop.eup %5185  ;;  %v3397_v53 = vmul.f32 %v5184_v1, %v3349_v45  ;;  %v3347_v17 = vadd.f32 0.5, %v3323_v9  ;;  %v11322_v9 = vld [vmem:[#allocation64_spill] sm:$0xff]  ;;  %v11323_v45 = vld [vmem:[#allocation147_spill] sm:$0xff] }
 0x9dc   : > { %3546 = vmatpush.msrb.mxu2 %v3399_v49  ;;  %v5188_v34 = vpop.eup %5187  ;;  %v3396_v48 = vmul.f32 %v5186_v32, %v3348_v61 }
 0x9dd   : > { %v3395_v47 = vmul.f32 %v5188_v34, %v3347_v17  ;;  %v11325_v34 = vld [vmem:[#allocation61_spill] sm:$0xff]  ;;  %v11326_v17 = vld [vmem:[#allocation151_spill] sm:$0xff] }
 0x9de   : > { %3547 = vmatpush.msrb.mxu2 %v3398_v6 }
 0x9e0   : > { %3548 = vmatpush.msrb.mxu2 %v3397_v53  ;;  %v11324_v53 = vld [vmem:[#allocation158_spill] sm:$0xff] }
 0x9e2   : > { %3549 = vmatpush.msrb.mxu2 %v3396_v48 }
 0x9e4   : > { %3550 = vmatpush.msrb.mxu2 %v3395_v47 }
 0x9e5   : > { %4543 = vmatmul.msk.f32.vlgmr.msrb.gmra.mxu2 %vm912_vm0, %v11300_v62  ;;  %v11327_v62 = vld [vmem:[#allocation119_spill] sm:$0xff] }
 0x9ed   : > { %4544 = vmatmul.msk.f32.gmra.mxu2 %vm912_vm0, %v11301_v15 }
 0x9f5   : > { %4545 = vmatmul.msk.f32.gmra.mxu2 %vm912_vm0, %v11302_v41  ;;  %v9252_v41 = vld [vmem:[%s9958_s2 + $0xe0] sm:$0xff] }
 0x9f6   : > { %11328 = vst [vmem:[#allocation152_spill] sm:$0xff] %v9252_v41 }
 0x9fd   : > { %4546 = vmatmul.msk.f32.gmra.mxu2 %vm912_vm0, %v11303_v5 }
 0xa05   : > { %4547 = vmatmul.msk.f32.gmra.mxu2 %vm912_vm0, %v11304_v22  ;;  %v9261_v22 = vld [vmem:[%s9958_s2 + $0xe8] sm:$0xff] }
 0xa06   : > { %11329 = vst [vmem:[#allocation116_spill] sm:$0xff] %v9261_v22 }
 0xa0d   : > { %4548 = vmatmul.msk.f32.gmra.mxu2 %vm912_vm0, %v11305_v16 }
 0xa15   : > { %4549 = vmatmul.msk.f32.gmra.mxu2 %vm912_vm0, %v11306_v59  ;;  %v9270_v59 = vld [vmem:[%s9958_s2 + $0xf0] sm:$0xff] }
 0xa16   : > { %11330 = vst [vmem:[#allocation120_spill] sm:$0xff] %v9270_v59 }
 0xa1d   : > { %4550 = vmatmul.msk.f32.gmra.mxu2 %vm912_vm0, %v11307_v29 }
 0xa25   : > { %4551 = vmatmul.msk.f32.gmra.mxu2 %vm912_vm0, %v11308_v58  ;;  %v9279_v58 = vld [vmem:[%s9958_s2 + $0xf8] sm:$0xff] }
 0xa26   : > { %11331 = vst [vmem:[#allocation110_spill] sm:$0xff] %v9279_v58 }
 0xa2d   : > { %4552 = vmatmul.msk.f32.gmra.mxu2 %vm912_vm0, %v11309_v31 }
 0xa35   : > { %4553 = vmatmul.msk.f32.gmra.mxu2 %vm912_vm0, %v11310_v4 }
 0xa3d   : > { %4554 = vmatmul.msk.f32.gmra.mxu2 %vm912_vm0, %v11311_v43 }
 0xa45   : > { %4555 = vmatmul.msk.f32.gmra.mxu2 %vm912_vm0, %v11312_v30 }
 0xa4d   : > { %4556 = vmatmul.msk.f32.gmra.mxu2 %vm912_vm0, %v11313_v63 }
 0xa55   : > { %4557 = vmatmul.msk.f32.gmra.mxu2 %vm912_vm0, %v11314_v26 }
 0xa5d   : > { %4558 = vmatmul.msk.f32.gmra.mxu2 %vm912_vm0, %v11315_v25  ;;  %v9296_v25 = vld [vmem:[%s5647_s27 + $0x6] ss:$0 sm:$0xff] }
 0xa65   : > { %4559 = vmatmul.msk.f32.gmra.mxu2 %vm912_vm0, %v11316_v42 }
 0xa68   : > { %v3552_v46 = vpop.f32.mrf.mxu2 }
 0xa6d   : > { %4560 = vmatmul.msk.f32.gmra.mxu2 %vm912_vm0, %v11317_v33  ;;  %v9301_v33 = vld [vmem:[%s5647_s27 + $0xe] ss:$0 sm:$0xff] }
 0xa70   : > { %v9211_v13 = vpop.f32.mrf.mxu2 }
 0xa75   : > { %4561 = vmatmul.msk.f32.gmra.mxu2 %vm912_vm0, %v11318_v50  ;;  %v11338_v50 = vld [vmem:[#allocation83_spill] sm:$0xff] }
 0xa78   : > { %v9215_v3 = vpop.f32.mrf.mxu2 }
 0xa7d   : > { %4562 = vmatmul.msk.f32.gmra.mxu2 %vm912_vm0, %v11319_v52  ;;  %v3413_v52 = vmul.f32 %v9296_v25, %v11338_v50 }
 0xa80   : > { %v9219_v0 = vpop.f32.mrf.mxu2 }
 0xa85   : > { %4563 = vmatmul.msk.f32.gmra.mxu2 %vm912_vm0, %v11320_v36  ;;  %v11339_v36 = vld [vmem:[#allocation101_spill] sm:$0xff] }
 0xa88   : > { %v9223_v49 = vpop.f32.mrf.mxu2 }
 0xa8d   : > { %4564 = vmatmul.msk.f32.gmra.mxu2 %vm912_vm0, %v11321_v27  ;;  %v3479_v27 = vmul.f32 %v9301_v33, %v11339_v36  ;;  %v11345_v36 = vld [vmem:[#allocation46_spill] sm:$0xff] }
 0xa90   : > { %v9227_v1 = vpop.f32.mrf.mxu2 }
 0xa95   : > { %4565 = vmatmul.msk.f32.gmra.mxu2 %vm912_vm0, %v11322_v9  ;;  %v11340_v9 = vld [vmem:[#allocation62_spill] sm:$0xff] }
 0xa98   : > { %v9231_v6 = vpop.f32.mrf.mxu2 }
 0xa9d   : > { %4566 = vmatmul.msk.f32.gmra.mxu2 %vm912_vm0, %v11323_v45  ;;  %v3405_v45 = vmul.f32 %v9296_v25, %v11340_v9  ;;  %v11346_v9 = vld [vmem:[#allocation88_spill] sm:$0xff] }
 0xaa0   : > { %v9235_v32 = vpop.f32.mrf.mxu2 }
 0xaa5   : > { %4567 = vmatmul.msk.f32.gmra.mxu2 %vm912_vm0, %v11324_v53  ;;  %v11341_v53 = vld [vmem:[#allocation86_spill] sm:$0xff] }
 0xaa8   : > { %v3576_v61 = vpop.f32.mrf.mxu2 }
 0xaad   : > { %4568 = vmatmul.msk.f32.gmra.mxu2 %vm912_vm0, %v11325_v34  ;;  %v3471_v34 = vmul.f32 %v9301_v33, %v11341_v53  ;;  %v11347_v53 = vld [vmem:[#allocation66_spill] sm:$0xff] }
 0xab0   : > { %v3579_v48 = vpop.f32.mrf.mxu2 }
 0xab5   : > { %4569 = vmatmul.msk.f32.gmra.mxu2 %vm912_vm0, %v11326_v17  ;;  %v11342_v17 = vld [vmem:[#allocation87_spill] sm:$0xff] }
 0xab8   : > { %v9243_v47 = vpop.f32.mrf.mxu2 }
 0xabd   : > { %4570 = vmatmul.msk.f32.gmra.mxu2 %vm912_vm0, %v11327_v62  ;;  %v3445_v62 = vadd.f32 %v3413_v52, %v11342_v17 }
 0xac0   : > { %v9247_v15 = vpop.f32.mrf.mxu2 }
 0xac5   : > { %4571 = vmatmul.msk.f32.gmra.mxu2 %vm912_vm0, %v9252_v41 }
 0xac8   : > { %v9256_v5 = vpop.f32.mrf.mxu2 }
 0xacd   : > { %4572 = vmatmul.msk.f32.gmra.mxu2 %vm912_vm0, %v9261_v22  ;;  %v3511_v22 = vadd.f32 %v3479_v27, %v3445_v62  ;;  %v11348_v27 = vld [vmem:[#allocation33_spill] sm:$0xff] }
 0xace   : > { %v3472_v62 = vmul.f32 %v9301_v33, %v11348_v27  ;;  %v11352_v27 = vld [vmem:[#allocation53_spill] sm:$0xff] }
 0xacf   : > { %v3656_v35 = vadd.f32 %v3576_v61, %v3511_v22 }
 0xad0   : > { %v9265_v16 = vpop.f32.mrf.mxu2 }
 0xad1   : > { %v3688_v52 = vmul.f32 0.5, %v3656_v35 }
 0xad3   : > { %5189 = vtanh.f32 %v3688_v52  ;;  %v11354_v52 = vld [vmem:[#allocation35_spill] sm:$0xff] }
 0xad5   : > { %4573 = vmatmul.msk.f32.gmra.mxu2 %vm912_vm0, %v9270_v59 }
 0xad8   : > { %v9274_v29 = vpop.f32.mrf.mxu2 }
 0xadd   : > { %4574 = vmatmul.msk.f32.gmra.mxu2 %vm912_vm0, %v9279_v58  ;;  %v11343_v58 = vld [vmem:[#allocation81_spill] sm:$0xff] }
 0xade   : > { %v3437_v59 = vadd.f32 %v3405_v45, %v11343_v58 }
 0xae0   : > { %v9283_v31 = vpop.f32.mrf.mxu2 }
 0xae8   : > { %v9285_v4 = vpop.f32.mrf.mxu2 }
 0xae9   : > { %11332 = vst [vmem:[#allocation115_spill] sm:$0xff] %v9285_v4  ;;  %v3503_v4 = vadd.f32 %v3471_v34, %v3437_v59 }
 0xaf0   : > { %v9287_v43 = vpop.f32.mrf.mxu2 }
 0xaf1   : > { %11333 = vst [vmem:[#allocation19_spill] sm:$0xff] %v9287_v43  ;;  %v11344_v43 = vld [vmem:[#allocation59_spill] sm:$0xff] }
 0xaf2   : > { %v3406_v50 = vmul.f32 %v9296_v25, %v11344_v43  ;;  %v11350_v43 = vld [vmem:[#allocation67_spill] sm:$0xff] }
 0xaf3   : > { %v3473_v35 = vmul.f32 %v9301_v33, %v11350_v43 }
 0xaf8   : > { %v9289_v30 = vpop.f32.mrf.mxu2 }
 0xaf9   : > { %11334 = vst [vmem:[#allocation143_spill] sm:$0xff] %v9289_v30  ;;  %v3648_v30 = vadd.f32 %v3552_v46, %v3503_v4 }
 0xafb   : > { %v3680_v59 = vmul.f32 0.5, %v3648_v30  ;;  %v3481_v30 = vmul.f32 %v9301_v33, %v11352_v27 }
 0xafd   : > { %5191 = vtanh.f32 %v3680_v59 }
 0xb00   : > { %v9291_v63 = vpop.f32.mrf.mxu2 }
 0xb01   : > { %11335 = vst [vmem:[#allocation157_spill] sm:$0xff] %v9291_v63  ;;  %v3480_v63 = vmul.f32 %v9301_v33, %v11346_v9 }
 0xb08   : > { %v9293_v26 = vpop.f32.mrf.mxu2 }
 0xb09   : > { %11336 = vst [vmem:[#allocation75_spill] sm:$0xff] %v9293_v26  ;;  %v3414_v26 = vmul.f32 %v9296_v25, %v11345_v36  ;;  %v11349_v36 = vld [vmem:[#allocation44_spill] sm:$0xff] }
 0xb0a   : > { %v3407_v9 = vmul.f32 %v9296_v25, %v11349_v36  ;;  %v11357_v36 = vld [vmem:[#allocation108_spill] sm:$0xff] }
 0xb0b   : > { %v3446_v45 = vadd.f32 %v3414_v26, %v11106_v28 }
 0xb0d   : > { %v3512_v61 = vadd.f32 %v3480_v63, %v3446_v45  ;;  %v11353_v63 = vld [vmem:[#allocation103_spill] sm:$0xff] }
 0xb0f   : > { %v3657_v46 = vadd.f32 %v3579_v48, %v3512_v61  ;;  %v3495_v48 = vmul.f32 %v9301_v33, %v11354_v52  ;;  %v11356_v61 = vld [vmem:[#allocation50_spill] sm:$0xff] }
 0xb10   : > { %v9298_v42 = vpop.f32.mrf.mxu2 }
 0xb11   : > { %11337 = vst [vmem:[#allocation118_spill] sm:$0xff] %v9298_v42  ;;  %v3438_v42 = vadd.f32 %v3406_v50, %v11347_v53  ;;  %v11351_v50 = vld [vmem:[#allocation32_spill] sm:$0xff] }
 0xb12   : > { %v3415_v26 = vmul.f32 %v9296_v25, %v11351_v50  ;;  %v5190_v50 = vpop.eup %5189 }
 0xb13   : > { %v3504_v22 = vadd.f32 %v3472_v62, %v3438_v42  ;;  %v3429_v42 = vmul.f32 %v9296_v25, %v11353_v63  ;;  %v3689_v62 = vmul.f32 0.5, %v3657_v46  ;;  %v5192_v51 = vpop.eup %5191  ;;  %v11358_v46 = vld [vmem:[#allocation21_spill] sm:$0xff] }
 0xb15   : > { %v3649_v4 = vadd.f32 %v9211_v13, %v3504_v22  ;;  %v11355_v13 = vld [vmem:[#allocation63_spill] sm:$0xff]  ;;  %v3447_v22 = vadd.f32 %v3415_v26, %v11356_v61  ;;  %v3461_v43 = vadd.f32 %v3429_v42, %v11357_v36  ;;  %5193 = vtanh.f32 %v3689_v62  ;;  %v11363_v62 = vld [vmem:[#allocation65_spill] sm:$0xff] }
 0xb16   : > { %v3439_v45 = vadd.f32 %v3407_v9, %v11355_v13  ;;  %v3430_v9 = vmul.f32 %v9296_v25, %v11261_v21  ;;  %v3408_v26 = vmul.f32 %v9296_v25, %v11358_v46 }
 0xb17   : > { %v3681_v28 = vmul.f32 0.5, %v3649_v4  ;;  %v3513_v59 = vadd.f32 %v3481_v30, %v3447_v22  ;;  %v3527_v58 = vadd.f32 %v3495_v48, %v3461_v43  ;;  %v11359_v4 = vld [vmem:[#allocation40_spill] sm:$0xff]  ;;  %v3736_v30 = vmul.f32 0.5, %v5190_v50  ;;  %v11360_v43 = vld [vmem:[#allocation34_spill] sm:$0xff] }
 0xb18   : > { %v9313_v41 = vpop.f32.mrf.mxu2  ;;  %v3505_v53 = vadd.f32 %v3473_v35, %v3439_v45  ;;  %v3474_v35 = vmul.f32 %v9301_v33, %v11359_v4  ;;  %v11362_v48 = vld [vmem:[#allocation36_spill] sm:$0xff] }
 0xb19   : > { %v3658_v63 = vadd.f32 %v9243_v47, %v3513_v59  ;;  %5195 = vtanh.f32 %v3681_v28  ;;  %v3462_v47 = vadd.f32 %v3430_v9, %v11272_v23  ;;  %v3440_v28 = vadd.f32 %v3408_v26, %v11362_v48 }
 0xb1a   : > { %v3650_v27 = vadd.f32 %v9215_v3, %v3505_v53  ;;  %v3416_v3 = vmul.f32 %v9296_v25, %v11360_v43  ;;  %v11361_v53 = vld [vmem:[#allocation55_spill] sm:$0xff]  ;;  %v3496_v59 = vmul.f32 %v9301_v33, %v10952_v56  ;;  %v3760_v50 = vadd.f32 0.5, %v3736_v30  ;;  %v11364_v43 = vld [vmem:[#allocation25_spill] sm:$0xff] }
 0xb1b   : > { %v3482_v42 = vmul.f32 %v9301_v33, %v11361_v53  ;;  %v3690_v45 = vmul.f32 0.5, %v3658_v63  ;;  %v5194_v21 = vpop.eup %5193  ;;  %v3506_v36 = vadd.f32 %v3474_v35, %v3440_v28  ;;  %v3409_v61 = vmul.f32 %v9296_v25, %v11364_v43  ;;  %v11366_v63 = vld [vmem:[#allocation15_spill] sm:$0xff]  ;;  %v11368_v56 = vld [vmem:[#allocation29_spill] sm:$0xff] }
 0xb1c   : > { %v3448_v22 = vadd.f32 %v3416_v3, %v11363_v62  ;;  %v3417_v26 = vmul.f32 %v9296_v25, %v11366_v63  ;;  %v3431_v28 = vmul.f32 %v9296_v25, %v11111_v37  ;;  %v3483_v23 = vmul.f32 %v9301_v33, %v11368_v56 }
 0xb1e   : > { %v3514_v53 = vadd.f32 %v3482_v42, %v3448_v22  ;;  %v3651_v42 = vadd.f32 %v9219_v0, %v3506_v36  ;;  %v11367_v22 = vld [vmem:[#allocation37_spill] sm:$0xff]  ;;  %v3497_v0 = vmul.f32 %v9301_v33, %v10950_v57 }
 0xb1f   : > { %v5196_v4 = vpop.eup %5195 }
 0xb20   : > { %v9325_v34 = vpop.f32.mrf.mxu2  ;;  %v3659_v30 = vadd.f32 %v9247_v15, %v3514_v53  ;;  %v3729_v63 = vmul.f32 0.5, %v5196_v4  ;;  %v11369_v15 = vld [vmem:[#allocation58_spill] sm:$0xff] }
 0xb21   : > { %v3441_v53 = vadd.f32 %v3409_v61, %v11369_v15  ;;  %v11371_v61 = vld [vmem:[#allocation28_spill] sm:$0xff] }
 0xb28   : > { %v3624_v17 = vpop.f32.mrf.mxu2 }
 0xb29   : > { %v3672_v52 = vadd.f32 %v3624_v17, %v3527_v58  ;;  %v3728_v58 = vmul.f32 0.5, %v5192_v51  ;;  %v3682_v17 = vmul.f32 0.5, %v3650_v27  ;;  %v11365_v51 = vld [vmem:[#allocation41_spill] sm:$0xff] }
 0xb2a   : > { %v3475_v27 = vmul.f32 %v9301_v33, %v11365_v51 }
 0xb2b   : > { %5197 = vtanh.f32 %v3672_v52  ;;  %v3528_v52 = vadd.f32 %v3496_v59, %v3462_v47  ;;  %v3752_v9 = vadd.f32 0.5, %v3728_v58  ;;  %v3784_v47 = vmul.f32 %v3760_v50, %v11299_v44 }
 0xb2c   : > { %5199 = vtanh.f32 %v3682_v17  ;;  %v3737_v58 = vmul.f32 0.5, %v5194_v21  ;;  %v3449_v59 = vadd.f32 %v3417_v26, %v11367_v22  ;;  %v3683_v21 = vmul.f32 0.5, %v3651_v42  ;;  %v11391_v22 = vld [vmem:[#allocation20_spill] sm:$0xff] }
 0xb2d   : > { %5201 = vtanh.f32 %v3690_v45  ;;  %v3463_v45 = vadd.f32 %v3431_v28, %v11268_v39  ;;  %v3507_v36 = vadd.f32 %v3475_v27, %v3441_v53  ;;  %v3753_v28 = vadd.f32 0.5, %v3729_v63 }
 0xb2f   : > { %v3529_v37 = vadd.f32 %v3497_v0, %v3463_v45  ;;  %v3652_v4 = vadd.f32 %v9223_v49, %v3507_v36  ;;  %v11373_v49 = vld [vmem:[#allocation31_spill] sm:$0xff] }
 0xb30   : > { %v3627_v3 = vpop.f32.mrf.mxu2  ;;  %v3484_v45 = vmul.f32 %v9301_v33, %v11373_v49  ;;  %v11381_v49 = vld [vmem:[#allocation74_spill] sm:$0xff] }
 0xb31   : > { %v5198_v62 = vpop.eup %5197  ;;  %v3673_v35 = vadd.f32 %v3627_v3, %v3528_v52  ;;  %v3691_v3 = vmul.f32 0.5, %v3659_v30 }
 0xb32   : > { %v3792_v17 = vmul.f32 %v5198_v62, %v3752_v9  ;;  %v5200_v44 = vpop.eup %5199  ;;  %v11370_v62 = vld [vmem:[#allocation8_spill] sm:$0xff]  ;;  %v3761_v9 = vadd.f32 0.5, %v3737_v58  ;;  %v3432_v58 = vmul.f32 %v9296_v25, %v11105_v24 }
 0xb33   : > { %5203 = vtanh.f32 %v3673_v35  ;;  %v3410_v50 = vmul.f32 %v9296_v25, %v11370_v62  ;;  %v5202_v26 = vpop.eup %5201  ;;  %v3515_v35 = vadd.f32 %v3483_v23, %v3449_v59  ;;  %v3730_v0 = vmul.f32 0.5, %v5200_v44 }
 0xb34   : > { %v9376_v52 = vadd.f32 %v3792_v17, %v3784_v47  ;;  %v11372_v17 = vld [vmem:[#allocation17_spill] sm:$0xff]  ;;  %5205 = vtanh.f32 %v3691_v3  ;;  %v3785_v23 = vmul.f32 %v3761_v9, %v9169_v10  ;;  %v3738_v63 = vmul.f32 0.5, %v5202_v26  ;;  %v11375_v10 = vld [vmem:[#allocation18_spill] sm:$0xff] }
 0xb35   : > { %v3442_v47 = vadd.f32 %v3410_v50, %v11371_v61  ;;  %v3418_v30 = vmul.f32 %v9296_v25, %v11372_v17  ;;  %v3660_v27 = vadd.f32 %v9256_v5, %v3515_v35  ;;  %5207 = vtanh.f32 %v3683_v21  ;;  %v11376_v35 = vld [vmem:[#allocation11_spill] sm:$0xff] }
 0xb36   : > { %v3464_v53 = vadd.f32 %v3432_v58, %v11107_v40  ;;  %v3498_v3 = vmul.f32 %v9301_v33, %v11264_v7  ;;  %v3684_v5 = vmul.f32 0.5, %v3652_v4  ;;  %v3754_v40 = vadd.f32 0.5, %v3730_v0  ;;  %v11377_v4 = vld [vmem:[#allocation9_spill] sm:$0xff]  ;;  %v11379_v0 = vld [vmem:[#allocation22_spill] sm:$0xff] }
 0xb37   : > { %v3692_v21 = vmul.f32 0.5, %v3660_v27  ;;  %v3450_v50 = vadd.f32 %v3418_v30, %v11375_v10  ;;  %v3411_v7 = vmul.f32 %v9296_v25, %v11377_v4  ;;  %v11378_v30 = vld [vmem:[#allocation49_spill] sm:$0xff] }
 0xb38   : > { %v3630_v39 = vpop.f32.mrf.mxu2 }
 0xb39   : > { %v5204_v57 = vpop.eup %5203  ;;  %v3674_v42 = vadd.f32 %v3630_v39, %v3529_v37  ;;  %v11374_v37 = vld [vmem:[#allocation23_spill] sm:$0xff]  ;;  %v3516_v26 = vadd.f32 %v3484_v45, %v3450_v50 }
 0xb3a   : > { %v3793_v59 = vmul.f32 %v5204_v57, %v3753_v28  ;;  %v3476_v39 = vmul.f32 %v9301_v33, %v11374_v37  ;;  %v3762_v57 = vadd.f32 0.5, %v3738_v63  ;;  %v5206_v9 = vpop.eup %5205  ;;  %v3419_v28 = vmul.f32 %v9296_v25, %v11376_v35 }
 0xb3b   : > { %5209 = vtanh.f32 %v3674_v42  ;;  %v3530_v42 = vadd.f32 %v3498_v3, %v3464_v53  ;;  %v5208_v58 = vpop.eup %5207  ;;  %v3661_v27 = vadd.f32 %v9265_v16, %v3516_v26  ;;  %v3739_v53 = vmul.f32 0.5, %v5206_v9  ;;  %v11382_v26 = vld [vmem:[#allocation12_spill] sm:$0xff] }
 0xb3c   : > { %v9397_v36 = vadd.f32 %v3793_v59, %v3785_v23  ;;  %5211 = vtanh.f32 %v3684_v5  ;;  %v3508_v44 = vadd.f32 %v3476_v39, %v3442_v47  ;;  %v3451_v63 = vadd.f32 %v3419_v28, %v11378_v30  ;;  %v11380_v5 = vld [vmem:[#allocation73_spill] sm:$0xff]  ;;  %v11385_v30 = vld [vmem:[#allocation42_spill] sm:$0xff] }
 0xb3d   : > { %5213 = vtanh.f32 %v3692_v21  ;;  %v3786_v50 = vmul.f32 %v3762_v57, %v9166_v8  ;;  %v3477_v47 = vmul.f32 %v9301_v33, %v11379_v0  ;;  %v3433_v39 = vmul.f32 %v9296_v25, %v11380_v5 }
 0xb3e   : > { %v3653_v45 = vadd.f32 %v9227_v1, %v3508_v44  ;;  %v3499_v21 = vmul.f32 %v9301_v33, %v11381_v49  ;;  %v3731_v16 = vmul.f32 0.5, %v5208_v58  ;;  %v11384_v1 = vld [vmem:[#allocation10_spill] sm:$0xff]  ;;  %v3693_v57 = vmul.f32 0.5, %v3661_v27  ;;  %v11386_v58 = vld [vmem:[#allocation45_spill] sm:$0xff] }
 0xb3f   : > { %v3443_v8 = vadd.f32 %v3411_v7, %v11384_v1  ;;  %v3763_v44 = vadd.f32 0.5, %v3739_v53  ;;  %v3412_v49 = vmul.f32 %v9296_v25, %v11385_v30  ;;  %v3420_v56 = vmul.f32 %v9296_v25, %v11386_v58  ;;  %v11387_v53 = vld [vmem:[#allocation47_spill] sm:$0xff] }
 0xb40   : > { %v3633_v24 = vpop.f32.mrf.mxu2 }
 0xb41   : > { %v5210_v23 = vpop.eup %5209  ;;  %v3675_v59 = vadd.f32 %v3633_v24, %v3530_v42  ;;  %v3485_v24 = vmul.f32 %v9301_v33, %v11382_v26  ;;  %v3685_v42 = vmul.f32 0.5, %v3653_v45  ;;  %v3509_v5 = vadd.f32 %v3477_v47, %v3443_v8 }
 0xb42   : > { %v3794_v3 = vmul.f32 %v5210_v23, %v3754_v40  ;;  %v3465_v40 = vadd.f32 %v3433_v39, %v11259_v55  ;;  %v5212_v9 = vpop.eup %5211  ;;  %v3787_v47 = vmul.f32 %v3763_v44, %v9162_v18  ;;  %v11388_v55 = vld [vmem:[#allocation6_spill] sm:$0xff] }
 0xb43   : > { %5215 = vtanh.f32 %v3675_v59  ;;  %v3517_v23 = vadd.f32 %v3485_v24, %v3451_v63  ;;  %v5214_v59 = vpop.eup %5213  ;;  %v3654_v39 = vadd.f32 %v9231_v6, %v3509_v5  ;;  %v3434_v63 = vmul.f32 %v9296_v25, %v11387_v53  ;;  %v11394_v44 = vld [vmem:[#allocation30_spill] sm:$0xff] }
 0xb44   : > { %v9416_v28 = vadd.f32 %v3794_v3, %v3786_v50  ;;  %v3531_v26 = vadd.f32 %v3499_v21, %v3465_v40  ;;  %v3755_v50 = vadd.f32 0.5, %v3731_v16  ;;  %5217 = vtanh.f32 %v3693_v57  ;;  %v11389_v21 = vld [vmem:[#allocation7_spill] sm:$0xff]  ;;  %v11396_v53 = vld [vmem:[#allocation54_spill] sm:$0xff] }
 0xb45   : > { %v3662_v3 = vadd.f32 %v9274_v29, %v3517_v23  ;;  %5219 = vtanh.f32 %v3685_v42  ;;  %v3740_v24 = vmul.f32 0.5, %v5214_v59  ;;  %v3444_v58 = vadd.f32 %v3412_v49, %v11388_v55  ;;  %v11390_v29 = vld [vmem:[#allocation77_spill] sm:$0xff]  ;;  %v11393_v42 = vld [vmem:[#allocation14_spill] sm:$0xff] }
 0xb46   : > { %11383 = vst [vmem:[#allocation150_spill] sm:$0xff] %v9416_v28  ;;  %v3452_v16 = vadd.f32 %v3420_v56, %v11389_v21  ;;  %v3466_v40 = vadd.f32 %v3434_v63, %v11390_v29  ;;  %v3732_v23 = vmul.f32 0.5, %v5212_v9  ;;  %v3478_v6 = vmul.f32 %v9301_v33, %v11391_v22  ;;  %v11395_v29 = vld [vmem:[#allocation24_spill] sm:$0xff]  ;;  %v11407_v21 = vld [vmem:[#allocation38_spill] sm:$0xff] }
 0xb47   : > { %v3694_v5 = vmul.f32 0.5, %v3662_v3  ;;  %v3686_v57 = vmul.f32 0.5, %v3654_v39  ;;  %v3486_v18 = vmul.f32 %v9301_v33, %v11393_v42  ;;  %v3500_v59 = vmul.f32 %v9301_v33, %v11394_v44 }
 0xb48   : > { %v3636_v7 = vpop.f32.mrf.mxu2  ;;  %v3764_v49 = vadd.f32 0.5, %v3740_v24  ;;  %v3510_v9 = vadd.f32 %v3478_v6, %v3444_v58  ;;  %v3435_v3 = vmul.f32 %v9296_v25, %v11395_v29  ;;  %v3436_v44 = vmul.f32 %v9296_v25, %v11396_v53  ;;  %v11397_v58 = vld [vmem:[#allocation51_spill] sm:$0xff] }
 0xb49   : > { %v5216_v27 = vpop.eup %5215  ;;  %v3676_v45 = vadd.f32 %v3636_v7, %v3531_v26  ;;  %v3518_v56 = vadd.f32 %v3486_v18, %v3452_v16  ;;  %v3532_v7 = vadd.f32 %v3500_v59, %v3466_v40 }
 0xb4a   : > { %v3795_v8 = vmul.f32 %v5216_v27, %v3755_v50  ;;  %v5218_v50 = vpop.eup %5217  ;;  %v3655_v24 = vadd.f32 %v9235_v32, %v3510_v9  ;;  %v3788_v16 = vmul.f32 %v3764_v49, %v9158_v38  ;;  %v3467_v6 = vadd.f32 %v3435_v3, %v11397_v58  ;;  %v11401_v9 = vld [vmem:[#allocation27_spill] sm:$0xff] }
 0xb4b   : > { %5221 = vtanh.f32 %v3676_v45  ;;  %v5220_v27 = vpop.eup %5219  ;;  %v3756_v45 = vadd.f32 0.5, %v3732_v23  ;;  %v3663_v39 = vadd.f32 %v9283_v31, %v3518_v56  ;;  %v3741_v40 = vmul.f32 0.5, %v5218_v50 }
 0xb4c   : > { %v9434_v26 = vadd.f32 %v3795_v8, %v3787_v47  ;;  %5223 = vtanh.f32 %v3694_v5  ;;  %v11398_v5 = vld [vmem:[#allocation43_spill] sm:$0xff]  ;;  %v3733_v59 = vmul.f32 0.5, %v5220_v27  ;;  %v3687_v53 = vmul.f32 0.5, %v3655_v24  ;;  %v11403_v27 = vld [vmem:[#allocation26_spill] sm:$0xff] }
 0xb4d   : > { %5225 = vtanh.f32 %v3686_v57  ;;  %v3501_v18 = vmul.f32 %v9301_v33, %v11398_v5  ;;  %v11399_v57 = vld [vmem:[#allocation69_spill] sm:$0xff]  ;;  %v3765_v32 = vadd.f32 0.5, %v3741_v40  ;;  %v3468_v38 = vadd.f32 %v3436_v44, %v11401_v9 }
 0xb4e   : > { %11392 = vst [vmem:[#allocation145_spill] sm:$0xff] %v9434_v26  ;;  %v3428_v31 = vmul.f32 %v9296_v25, %v11399_v57  ;;  %v3425_v50 = vmul.f32 %v9296_v25, %v11258_v11  ;;  %v3757_v57 = vadd.f32 0.5, %v3733_v59  ;;  %v11405_v40 = vld [vmem:[#allocation57_spill] sm:$0xff]  ;;  %v11406_v59 = vld [vmem:[#allocation78_spill] sm:$0xff] }
 0xb50   : > { %v3639_v63 = vpop.f32.mrf.mxu2  ;;  %v3460_v44 = vadd.f32 %v3428_v31, %v11405_v40 }
 0xb51   : > { %v5222_v47 = vpop.eup %5221  ;;  %v3677_v8 = vadd.f32 %v3639_v63, %v3532_v7  ;;  %v3695_v7 = vmul.f32 0.5, %v3663_v39  ;;  %v3424_v39 = vmul.f32 %v9296_v25, %v11260_v19 }
 0xb52   : > { %v3796_v23 = vmul.f32 %v5222_v47, %v3756_v45  ;;  %v5224_v63 = vpop.eup %5223  ;;  %v11402_v45 = vld [vmem:[#allocation76_spill] sm:$0xff]  ;;  %v3533_v47 = vadd.f32 %v3501_v18, %v3467_v6  ;;  %v3789_v18 = vmul.f32 %v3765_v32, %v9150_v60  ;;  %v3492_v60 = vmul.f32 %v9301_v33, %v11110_v54  ;;  %v11409_v32 = vld [vmem:[#allocation107_spill] sm:$0xff] }
 0xb53   : > { %5227 = vtanh.f32 %v3677_v8  ;;  %v5226_v49 = vpop.eup %5225  ;;  %v3494_v3 = vmul.f32 %v9301_v33, %v11402_v45  ;;  %v3502_v8 = vmul.f32 %v9301_v33, %v11403_v27  ;;  %v3742_v5 = vmul.f32 0.5, %v5224_v63 }
 0xb54   : > { %v9452_v56 = vadd.f32 %v3796_v23, %v3788_v16  ;;  %v11404_v16 = vld [vmem:[#allocation72_spill] sm:$0xff]  ;;  %5229 = vtanh.f32 %v3695_v7  ;;  %v3426_v45 = vmul.f32 %v9296_v25, %v11109_v12  ;;  %v3734_v40 = vmul.f32 0.5, %v5226_v49 }
 0xb55   : > { %v3427_v24 = vmul.f32 %v9296_v25, %v11404_v16  ;;  %5231 = vtanh.f32 %v3687_v53  ;;  %v3493_v16 = vmul.f32 %v9301_v33, %v11407_v21  ;;  %v3526_v31 = vadd.f32 %v3494_v3, %v3460_v44 }
 0xb56   : > { %11400 = vst [vmem:[#allocation155_spill] sm:$0xff] %v9452_v56  ;;  %v3458_v29 = vadd.f32 %v3426_v45, %v10953_v20  ;;  %v3456_v7 = vadd.f32 %v3424_v39, %v11275_v2  ;;  %v3457_v63 = vadd.f32 %v3425_v50, %v11270_v14  ;;  %v3766_v53 = vadd.f32 0.5, %v3742_v5  ;;  %v11412_v50 = vld [vmem:[#allocation106_spill] sm:$0xff] }
 0xb57   : > { %v3459_v27 = vadd.f32 %v3427_v24, %v11406_v59  ;;  %v3671_v3 = vadd.f32 %v9325_v34, %v3526_v31  ;;  %v11411_v24 = vld [vmem:[#allocation16_spill] sm:$0xff]  ;;  %v3534_v44 = vadd.f32 %v3502_v8, %v3468_v38  ;;  %v11414_v34 = vld [vmem:[#allocation79_spill] sm:$0xff] }
 0xb58   : > { %v3642_v23 = vpop.f32.mrf.mxu2  ;;  %v3422_v39 = vmul.f32 %v9296_v25, %v11411_v24  ;;  %v3524_v5 = vadd.f32 %v3492_v60, %v3458_v29  ;;  %v3421_v31 = vmul.f32 %v9296_v25, %v11414_v34  ;;  %v11416_v29 = vld [vmem:[#allocation118_spill] sm:$0xff] }
 0xb59   : > { %v5228_v9 = vpop.eup %5227  ;;  %v3678_v6 = vadd.f32 %v3642_v23, %v3533_v47  ;;  %v3525_v47 = vadd.f32 %v3493_v16, %v3459_v27  ;;  %v11413_v27 = vld [vmem:[#allocation48_spill] sm:$0xff]  ;;  %v3703_v8 = vmul.f32 0.5, %v3671_v3 }
 0xb5a   : > { %v3797_v58 = vmul.f32 %v5228_v9, %v3757_v57  ;;  %v3490_v57 = vmul.f32 %v9301_v33, %v11409_v32  ;;  %v11410_v9 = vld [vmem:[#allocation102_spill] sm:$0xff]  ;;  %v5230_v49 = vpop.eup %5229  ;;  %v3790_v16 = vmul.f32 %v3766_v53, %v11413_v27  ;;  %v3669_v38 = vadd.f32 %v11416_v29, %v3524_v5 }
 0xb5b   : > { %5233 = vtanh.f32 %v3678_v6  ;;  %v3491_v45 = vmul.f32 %v9301_v33, %v11410_v9  ;;  %v5232_v23 = vpop.eup %5231  ;;  %v3758_v6 = vadd.f32 0.5, %v3734_v40  ;;  %v3670_v59 = vadd.f32 %v9313_v41, %v3525_v47  ;;  %v11415_v9 = vld [vmem:[#allocation97_spill] sm:$0xff]  ;;  %v11420_v47 = vld [vmem:[#allocation75_spill] sm:$0xff] }
 0xb5c   : > { %v9475_v12 = vadd.f32 %v3797_v58, %v3789_v18  ;;  %v3423_v58 = vmul.f32 %v9296_v25, %v11412_v50  ;;  %v3522_v18 = vadd.f32 %v3490_v57, %v3456_v7  ;;  %v3489_v14 = vmul.f32 %v9301_v33, %v11415_v9  ;;  %v11417_v7 = vld [vmem:[#allocation93_spill] sm:$0xff] }
 0xb5d   : > { %v3523_v21 = vadd.f32 %v3491_v45, %v3457_v63  ;;  %v3743_v32 = vmul.f32 0.5, %v5230_v49  ;;  %v3488_v63 = vmul.f32 %v9301_v33, %v11417_v7  ;;  %v11418_v41 = vld [vmem:[#allocation85_spill] sm:$0xff]  ;;  %v3735_v53 = vmul.f32 0.5, %v5232_v23 }
 0xb5e   : > { %11408 = vst [vmem:[#allocation56_spill] sm:$0xff] %v9475_v12  ;;  %v3455_v60 = vadd.f32 %v3423_v58, %v11418_v41  ;;  %v11419_v57 = vld [vmem:[#allocation157_spill] sm:$0xff]  ;;  %v3702_v27 = vmul.f32 0.5, %v3670_v59  ;;  %v3701_v19 = vmul.f32 0.5, %v3669_v38 }
 0xb5f   : > { %v3667_v45 = vadd.f32 %v11419_v57, %v3522_v18  ;;  %v3668_v25 = vadd.f32 %v11420_v47, %v3523_v21  ;;  %v3767_v29 = vadd.f32 0.5, %v3743_v32  ;;  %v11425_v18 = vld [vmem:[#allocation143_spill] sm:$0xff]  ;;  %v3759_v57 = vadd.f32 0.5, %v3735_v53  ;;  %v11427_v47 = vld [vmem:[#allocation148_spill] sm:$0xff] }
 0xb60   : > { %v3645_v54 = vpop.f32.mrf.mxu2 }
 0xb61   : > { %v5234_v20 = vpop.eup %5233  ;;  %v3679_v11 = vadd.f32 %v3645_v54, %v3534_v44  ;;  %v11422_v54 = vld [vmem:[#allocation113_spill] sm:$0xff]  ;;  %v11423_v44 = vld [vmem:[#allocation112_spill] sm:$0xff]  ;;  %v3699_v23 = vmul.f32 0.5, %v3667_v45  ;;  %v3700_v21 = vmul.f32 0.5, %v3668_v25  ;;  %v3791_v41 = vmul.f32 %v3767_v29, %v11427_v47 }
 0xb62   : > { %v3798_v40 = vmul.f32 %v5234_v20, %v3758_v6  ;;  %v3453_v49 = vadd.f32 %v3421_v31, %v11422_v54  ;;  %v3487_v3 = vmul.f32 %v9301_v33, %v11423_v44  ;;  %v11424_v20 = vld [vmem:[#allocation13_spill] sm:$0xff]  ;;  %v3521_v6 = vadd.f32 %v3489_v14, %v3455_v60 }
 0xb63   : > { %5235 = vtanh.f32 %v3679_v11  ;;  %v3454_v5 = vadd.f32 %v3422_v39, %v11424_v20  ;;  %v11428_v39 = vld [vmem:[#allocation115_spill] sm:$0xff] }
 0xb64   : > { %v9500_v2 = vadd.f32 %v3798_v40, %v3790_v16  ;;  %5237 = vtanh.f32 %v3703_v8  ;;  %v3666_v11 = vadd.f32 %v11425_v18, %v3521_v6  ;;  %v3519_v16 = vadd.f32 %v3487_v3, %v3453_v49  ;;  %v11426_v40 = vld [vmem:[#allocation19_spill] sm:$0xff] }
 0xb65   : > { %v3520_v58 = vadd.f32 %v3488_v63, %v3454_v5  ;;  %5239 = vtanh.f32 %v3702_v27 }
 0xb66   : > { %11421 = vst [vmem:[#allocation144_spill] sm:$0xff] %v9500_v2  ;;  %5241 = vtanh.f32 %v3701_v19  ;;  %v3664_v14 = vadd.f32 %v11428_v39, %v3519_v16  ;;  %v3698_v32 = vmul.f32 0.5, %v3666_v11 }
 0xb67   : > { %v3665_v31 = vadd.f32 %v11426_v40, %v3520_v58  ;;  %5243 = vtanh.f32 %v3699_v23 }
 0xb68   : > { %5245 = vtanh.f32 %v3700_v21  ;;  %v3696_v45 = vmul.f32 0.5, %v3664_v14 }
 0xb69   : > { %v5236_v59 = vpop.eup %5235  ;;  %v3697_v63 = vmul.f32 0.5, %v3665_v31  ;;  %5247 = vtanh.f32 %v9500_v2  ;;  %v11443_v2 = vld [vmem:[#allocation86_spill] sm:$0xff] }
 0xb6a   : > { %v3799_v33 = vmul.f32 %v5236_v59, %v3759_v57  ;;  %v5238_v38 = vpop.eup %5237 }
 0xb6b   : > { %v5240_v60 = vpop.eup %5239  ;;  %v3751_v53 = vmul.f32 0.5, %v5238_v38 }
 0xb6c   : > { %v9510_v8 = vadd.f32 %v3799_v33, %v3791_v41  ;;  %v5242_v25 = vpop.eup %5241  ;;  %v3750_v27 = vmul.f32 0.5, %v5240_v60 }
 0xb6d   : > { %v5244_v19 = vpop.eup %5243  ;;  %v3749_v3 = vmul.f32 0.5, %v5242_v25  ;;  %v3775_v5 = vadd.f32 0.5, %v3751_v53 }
 0xb6e   : > { %11429 = vst [vmem:[#allocation153_spill] sm:$0xff] %v9510_v8  ;;  %5249 = vtanh.f32 %v9510_v8  ;;  %v5246_v49 = vpop.eup %5245  ;;  %v3774_v11 = vadd.f32 0.5, %v3750_v27  ;;  %v3747_v21 = vmul.f32 0.5, %v5244_v19 }
 0xb6f   : > { %5251 = vtanh.f32 %v3698_v32  ;;  %v5248_v41 = vpop.eup %5247  ;;  %v3748_v58 = vmul.f32 0.5, %v5246_v49  ;;  %v3773_v16 = vadd.f32 0.5, %v3749_v3 }
 0xb70   : > { %5253 = vtanh.f32 %v9475_v12  ;;  %v3822_v59 = vmul.f32 %v5248_v41, %v3774_v11  ;;  %v5448_v11 = vld [vmem:[%s9958_s2 + $0x18] sm:$0xff] }
 0xb71   : > { %5255 = vtanh.f32 %v3697_v63  ;;  %v3772_v39 = vadd.f32 0.5, %v3748_v58  ;;  %v3771_v63 = vadd.f32 0.5, %v3747_v21  ;;  %v5446_v58 = vld [vmem:[%s9958_s2 + $0x8] sm:$0xff]  ;;  %v5451_v21 = vld [vmem:[%s9958_s2 + $0x30] sm:$0xff] }
 0xb72   : > { %5257 = vtanh.f32 %v9452_v56  ;;  %v11444_v56 = vld [vmem:[#allocation87_spill] sm:$0xff] }
 0xb73   : > { %5259 = vtanh.f32 %v3696_v45 }
 0xb74   : > { %v5250_v6 = vpop.eup %5249  ;;  %5261 = vtanh.f32 %v9434_v26 }
 0xb75   : > { %v5252_v29 = vpop.eup %5251  ;;  %v3823_v18 = vmul.f32 %v5250_v6, %v3775_v5  ;;  %5263 = vtanh.f32 %v9416_v28  ;;  %v11446_v28 = vld [vmem:[#allocation59_spill] sm:$0xff] }
 0xb76   : > { %v5254_v23 = vpop.eup %5253  ;;  %5265 = vtanh.f32 %v9397_v36  ;;  %v3746_v47 = vmul.f32 0.5, %v5252_v29  ;;  %v5445_v29 = vld [vmem:[%s9958_s2] sm:$0xff] }
 0xb77   : > { %v5256_v57 = vpop.eup %5255  ;;  %3964 = vmatpush.msrb.mxu3 %v3823_v18  ;;  %v3821_v33 = vmul.f32 %v5254_v23, %v3773_v16  ;;  %5267 = vtanh.f32 %v9376_v52  ;;  %v5447_v18 = vld [vmem:[%s9958_s2 + $0x10] sm:$0xff]  ;;  %v5449_v23 = vld [vmem:[%s9958_s2 + $0x20] sm:$0xff] }
 0xb78   : > { %v5258_v40 = vpop.eup %5257  ;;  %v3745_v32 = vmul.f32 0.5, %v5256_v57  ;;  %v3770_v25 = vadd.f32 0.5, %v3746_v47  ;;  %v5450_v57 = vld [vmem:[%s9958_s2 + $0x28] sm:$0xff]  ;;  %v5453_v16 = vld [vmem:[%s9958_s2 + $0x40] sm:$0xff]  ;;  %v5456_v47 = vld [vmem:[%s9958_s2 + $0x58] sm:$0xff] }
 0xb79   : > { %v5260_v31 = vpop.eup %5259  ;;  %3965 = vmatpush.msrb.mxu3 %v3822_v59  ;;  %v3820_v38 = vmul.f32 %v5258_v40, %v3772_v39  ;;  %v5452_v59 = vld [vmem:[%s9958_s2 + $0x38] sm:$0xff]  ;;  %v5454_v40 = vld [vmem:[%s9958_s2 + $0x48] sm:$0xff] }
 0xb7a   : > { %v5262_v14 = vpop.eup %5261  ;;  %v3744_v45 = vmul.f32 0.5, %v5260_v31  ;;  %v3769_v49 = vadd.f32 0.5, %v3745_v32  ;;  %v5455_v31 = vld [vmem:[%s9958_s2 + $0x50] sm:$0xff]  ;;  %v5458_v39 = vld [vmem:[%s9958_s2 + $0x68] sm:$0xff]  ;;  %v5460_v32 = vld [vmem:[%s9958_s2 + $0x78] sm:$0xff] }
 0xb7b   : > { %3966 = vmatpush.msrb.mxu3 %v3821_v33  ;;  %v5264_v60 = vpop.eup %5263  ;;  %v3819_v53 = vmul.f32 %v5262_v14, %v3771_v63  ;;  %v5457_v33 = vld [vmem:[%s9958_s2 + $0x60] sm:$0xff]  ;;  %v5459_v14 = vld [vmem:[%s9958_s2 + $0x70] sm:$0xff] }
 0xb7c   : > { %v5266_v19 = vpop.eup %5265  ;;  %v3818_v27 = vmul.f32 %v5264_v60, %v3770_v25  ;;  %v3768_v5 = vadd.f32 0.5, %v3744_v45  ;;  %v5462_v60 = vld [vmem:[%s9958_s2 + $0x88] sm:$0xff] }
 0xb7d   : > { %3967 = vmatpush.msrb.mxu3 %v3820_v38  ;;  %v5268_v41 = vpop.eup %5267  ;;  %v3817_v3 = vmul.f32 %v5266_v19, %v3769_v49  ;;  %v5461_v38 = vld [vmem:[%s9958_s2 + $0x80] sm:$0xff]  ;;  %v5464_v19 = vld [vmem:[%s9958_s2 + $0x98] sm:$0xff] }
 0xb7e   : > { %v3816_v6 = vmul.f32 %v5268_v41, %v3768_v5  ;;  %v5465_v49 = vld [vmem:[%s9958_s2 + $0xa0] sm:$0xff] }
 0xb7f   : > { %3968 = vmatpush.msrb.mxu3 %v3819_v53  ;;  %v5463_v53 = vld [vmem:[%s9958_s2 + $0x90] sm:$0xff] }
 0xb81   : > { %3969 = vmatpush.msrb.mxu3 %v3818_v27 }
 0xb83   : > { %3970 = vmatpush.msrb.mxu3 %v3817_v3  ;;  %v5466_v3 = vld [vmem:[%s9958_s2 + $0xa8] sm:$0xff] }
 0xb85   : > { %3971 = vmatpush.msrb.mxu3 %v3816_v6  ;;  %v5467_v6 = vld [vmem:[%s9958_s2 + $0xb0] sm:$0xff] }
 0xb86   : > { %4576 = vmatmul.msk.f32.vlgmr.msrb.gmra.mxu3 %vm912_vm0, %v5445_v29 }
 0xb8e   : > { %4577 = vmatmul.msk.f32.gmra.mxu3 %vm912_vm0, %v5446_v58  ;;  %v5468_v58 = vld [vmem:[%s9958_s2 + $0xb8] sm:$0xff] }
 0xb96   : > { %4578 = vmatmul.msk.f32.gmra.mxu3 %vm912_vm0, %v5447_v18 }
 0xb9e   : > { %4579 = vmatmul.msk.f32.gmra.mxu3 %vm912_vm0, %v5448_v11  ;;  %v5469_v11 = vld [vmem:[%s9958_s2 + $0xc0] sm:$0xff] }
 0xba6   : > { %4580 = vmatmul.msk.f32.gmra.mxu3 %vm912_vm0, %v5449_v23 }
 0xbae   : > { %4581 = vmatmul.msk.f32.gmra.mxu3 %vm912_vm0, %v5450_v57  ;;  %v5470_v57 = vld [vmem:[%s9958_s2 + $0xc8] sm:$0xff] }
 0xbb6   : > { %4582 = vmatmul.msk.f32.gmra.mxu3 %vm912_vm0, %v5451_v21 }
 0xbbe   : > { %4583 = vmatmul.msk.f32.gmra.mxu3 %vm912_vm0, %v5452_v59  ;;  %v5471_v59 = vld [vmem:[%s9958_s2 + $0xd0] sm:$0xff] }
 0xbc6   : > { %4584 = vmatmul.msk.f32.gmra.mxu3 %vm912_vm0, %v5453_v16 }
 0xbce   : > { %4585 = vmatmul.msk.f32.gmra.mxu3 %vm912_vm0, %v5454_v40  ;;  %v5472_v40 = vld [vmem:[%s9958_s2 + $0xd8] sm:$0xff] }
 0xbd6   : > { %4586 = vmatmul.msk.f32.gmra.mxu3 %vm912_vm0, %v5455_v31 }
 0xbde   : > { %4587 = vmatmul.msk.f32.gmra.mxu3 %vm912_vm0, %v5456_v47  ;;  %v11432_v47 = vld [vmem:[#allocation152_spill] sm:$0xff] }
 0xbe6   : > { %4588 = vmatmul.msk.f32.gmra.mxu3 %vm912_vm0, %v5457_v33 }
 0xbee   : > { %4589 = vmatmul.msk.f32.gmra.mxu3 %vm912_vm0, %v5458_v39  ;;  %v11433_v39 = vld [vmem:[#allocation116_spill] sm:$0xff] }
 0xbf6   : > { %4590 = vmatmul.msk.f32.gmra.mxu3 %vm912_vm0, %v5459_v14 }
 0xbfe   : > { %4591 = vmatmul.msk.f32.gmra.mxu3 %vm912_vm0, %v5460_v32  ;;  %v11434_v32 = vld [vmem:[#allocation120_spill] sm:$0xff] }
 0xc06   : > { %4592 = vmatmul.msk.f32.gmra.mxu3 %vm912_vm0, %v5461_v38 }
 0xc09   : > { %v9588_v63 = vpop.f32.mrf.mxu3 }
 0xc0e   : > { %4593 = vmatmul.msk.f32.gmra.mxu3 %vm912_vm0, %v5462_v60  ;;  %v11436_v60 = vld [vmem:[#allocation110_spill] sm:$0xff] }
 0xc11   : > { %v9594_v45 = vpop.f32.mrf.mxu3 }
 0xc16   : > { %4594 = vmatmul.msk.f32.gmra.mxu3 %vm912_vm0, %v5463_v53 }
 0xc19   : > { %v9600_v25 = vpop.f32.mrf.mxu3 }
 0xc1e   : > { %4595 = vmatmul.msk.f32.gmra.mxu3 %vm912_vm0, %v5464_v19 }
 0xc21   : > { %v9606_v27 = vpop.f32.mrf.mxu3 }
 0xc26   : > { %4596 = vmatmul.msk.f32.gmra.mxu3 %vm912_vm0, %v5465_v49 }
 0xc29   : > { %v9612_v41 = vpop.f32.mrf.mxu3 }
 0xc2e   : > { %4597 = vmatmul.msk.f32.gmra.mxu3 %vm912_vm0, %v5466_v3 }
 0xc31   : > { %v9618_v5 = vpop.f32.mrf.mxu3 }
 0xc36   : > { %4598 = vmatmul.msk.f32.gmra.mxu3 %vm912_vm0, %v5467_v6 }
 0xc39   : > { %v9624_v29 = vpop.f32.mrf.mxu3 }
 0xc3a   : > { %11430 = vst [vmem:[#allocation154_spill] sm:$0xff] %v9624_v29 }
 0xc3e   : > { %4599 = vmatmul.msk.f32.gmra.mxu3 %vm912_vm0, %v5468_v58 }
 0xc41   : > { %v9630_v18 = vpop.f32.mrf.mxu3 }
 0xc42   : > { %11431 = vst [vmem:[#allocation121_spill] sm:$0xff] %v9630_v18 }
 0xc46   : > { %4600 = vmatmul.msk.f32.gmra.mxu3 %vm912_vm0, %v5469_v11  ;;  %v9681_v11 = vld [vmem:[%s5647_s27 + $0x7] ss:$0 sm:$0xff] }
 0xc49   : > { %v3997_v23 = vpop.f32.mrf.mxu3 }
 0xc4e   : > { %4601 = vmatmul.msk.f32.gmra.mxu3 %vm912_vm0, %v5470_v57 }
 0xc51   : > { %v9640_v21 = vpop.f32.mrf.mxu3 }
 0xc56   : > { %4602 = vmatmul.msk.f32.gmra.mxu3 %vm912_vm0, %v5471_v59  ;;  %v9686_v59 = vld [vmem:[%s5647_s27 + $0xf] ss:$0 sm:$0xff]  ;;  %s4343_s27 = sshll.u32 %s5640_s22, 6 }
 0xc57   : > { %v3892_v12 = vmul.f32 %v9686_v59, %v11443_v2  ;;  %s9852_s14 = scalar_lea.vmem [#allocation3], %s4343_s27 }
 0xc58   : > { %s4265_s30 = sshll.u32 %s9852_s14, 4  ;;  %s4266_s30 = int_to_ptr.vmem [resolvable:$true] %s4265_s30 }
 0xc59   : > { %v9646_v16 = vpop.f32.mrf.mxu3 }
 0xc5e   : > { %4603 = vmatmul.msk.f32.gmra.mxu3 %vm912_vm0, %v5472_v40  ;;  %v11440_v40 = vld [vmem:[#allocation83_spill] sm:$0xff] }
 0xc61   : > { %v9652_v31 = vpop.f32.mrf.mxu3 }
 0xc66   : > { %4604 = vmatmul.msk.f32.gmra.mxu3 %vm912_vm0, %v11432_v47  ;;  %v3834_v47 = vmul.f32 %v9681_v11, %v11440_v40  ;;  %v3832_v40 = vmul.f32 %v9681_v11, %v11377_v4 }
 0xc68   : > { %v3866_v18 = vadd.f32 %v3834_v47, %v11444_v56  ;;  %v3897_v56 = vmul.f32 %v9686_v59, %v11374_v37  ;;  %v3842_v37 = vmul.f32 %v9681_v11, %v11414_v34 }
 0xc69   : > { %v9656_v33 = vpop.f32.mrf.mxu3 }
 0xc6e   : > { %4605 = vmatmul.msk.f32.gmra.mxu3 %vm912_vm0, %v11433_v39  ;;  %v11441_v39 = vld [vmem:[#allocation101_spill] sm:$0xff] }
 0xc71   : > { %v9660_v14 = vpop.f32.mrf.mxu3 }
 0xc76   : > { %4606 = vmatmul.msk.f32.gmra.mxu3 %vm912_vm0, %v11434_v32  ;;  %v3900_v32 = vmul.f32 %v9686_v59, %v11441_v39 }
 0xc79   : > { %v9664_v38 = vpop.f32.mrf.mxu3 }
 0xc7a   : > { %11435 = vst [vmem:[#allocation111_spill] sm:$0xff] %v9664_v38  ;;  %v3932_v38 = vadd.f32 %v3900_v32, %v3866_v18  ;;  %v11447_v18 = vld [vmem:[#allocation46_spill] sm:$0xff]  ;;  %v11451_v32 = vld [vmem:[#allocation33_spill] sm:$0xff] }
 0xc7b   : > { %v3835_v4 = vmul.f32 %v9681_v11, %v11447_v18 }
 0xc7e   : > { %4607 = vmatmul.msk.f32.gmra.mxu3 %vm912_vm0, %v11436_v60  ;;  %v11442_v60 = vld [vmem:[#allocation62_spill] sm:$0xff] }
 0xc7f   : > { %v3826_v8 = vmul.f32 %v9681_v11, %v11442_v60  ;;  %v3827_v60 = vmul.f32 %v9681_v11, %v11446_v28  ;;  %v11449_v28 = vld [vmem:[#allocation66_spill] sm:$0xff] }
 0xc81   : > { %v9668_v53 = vpop.f32.mrf.mxu3 }
 0xc82   : > { %11437 = vst [vmem:[#allocation39_spill] sm:$0xff] %v9668_v53  ;;  %v11445_v53 = vld [vmem:[#allocation81_spill] sm:$0xff] }
 0xc83   : > { %v3858_v26 = vadd.f32 %v3826_v8, %v11445_v53  ;;  %v3898_v8 = vmul.f32 %v9686_v59, %v11379_v0  ;;  %v11448_v53 = vld [vmem:[#allocation88_spill] sm:$0xff]  ;;  %v3829_v0 = vmul.f32 %v9681_v11, %v11358_v46 }
 0xc85   : > { %v3924_v39 = vadd.f32 %v3892_v12, %v3858_v26  ;;  %v3901_v12 = vmul.f32 %v9686_v59, %v11448_v53  ;;  %v3839_v26 = vmul.f32 %v9681_v11, %v11372_v17  ;;  %v3830_v17 = vmul.f32 %v9681_v11, %v11364_v43  ;;  %v11453_v53 = vld [vmem:[#allocation67_spill] sm:$0xff] }
 0xc86   : > { %v3861_v18 = vadd.f32 %v3829_v0, %v11362_v48  ;;  %v3908_v43 = vmul.f32 %v9686_v59, %v11423_v44  ;;  %v3896_v0 = vmul.f32 %v9686_v59, %v11365_v51  ;;  %v11461_v51 = vld [vmem:[#allocation15_spill] sm:$0xff] }
 0xc87   : > { %v9736_v46 = vadd.f32 %v3839_v26, %v11375_v10  ;;  %v11455_v26 = vld [vmem:[#allocation53_spill] sm:$0xff] }
 0xc89   : > { %v9670_v19 = vpop.f32.mrf.mxu3 }
 0xc91   : > { %v9672_v49 = vpop.f32.mrf.mxu3 }
 0xc99   : > { %v9674_v3 = vpop.f32.mrf.mxu3 }
 0xca1   : > { %v9676_v6 = vpop.f32.mrf.mxu3 }
 0xca9   : > { %v9678_v58 = vpop.f32.mrf.mxu3 }
 0xcaa   : > { %11438 = vst [vmem:[#allocation52_spill] sm:$0xff] %v9678_v58  ;;  %v4077_v58 = vadd.f32 %v3997_v23, %v3932_v38  ;;  %v3859_v23 = vadd.f32 %v3827_v60, %v11449_v28 }
 0xcac   : > { %v4109_v38 = vmul.f32 0.5, %v4077_v58 }
 0xcae   : > { %5269 = vtanh.f32 %v4109_v38 }
 0xcb1   : > { %v9683_v57 = vpop.f32.mrf.mxu3 }
 0xcb2   : > { %11439 = vst [vmem:[#allocation122_spill] sm:$0xff] %v9683_v57  ;;  %v3831_v57 = vmul.f32 %v9681_v11, %v11370_v62  ;;  %v4069_v62 = vadd.f32 %v9588_v63, %v3924_v39  ;;  %v3833_v63 = vmul.f32 %v9681_v11, %v11385_v30  ;;  %v3893_v39 = vmul.f32 %v9686_v59, %v11451_v32 }
 0xcb3   : > { %v9740_v30 = vmul.f32 %v9681_v11, %v11376_v35  ;;  %v3843_v32 = vmul.f32 %v9681_v11, %v11411_v24 }
 0xcb4   : > { %v3863_v2 = vadd.f32 %v3831_v57, %v11371_v61  ;;  %v3864_v61 = vadd.f32 %v3832_v40, %v11384_v1  ;;  %v11450_v57 = vld [vmem:[#allocation84_spill] sm:$0xff]  ;;  %v4101_v34 = vmul.f32 0.5, %v4069_v62  ;;  %v3925_v58 = vadd.f32 %v3893_v39, %v3859_v23  ;;  %v11457_v23 = vld [vmem:[#allocation35_spill] sm:$0xff] }
 0xcb5   : > { %v3867_v47 = vadd.f32 %v3835_v4, %v11450_v57  ;;  %v3874_v4 = vadd.f32 %v3842_v37, %v11422_v54  ;;  %v11452_v62 = vld [vmem:[#allocation44_spill] sm:$0xff]  ;;  %v3894_v54 = vmul.f32 %v9686_v59, %v11453_v53  ;;  %v11459_v57 = vld [vmem:[#allocation50_spill] sm:$0xff] }
 0xcb6   : > { %v9731_v60 = vadd.f32 %v3897_v56, %v3863_v2  ;;  %v9733_v1 = vadd.f32 %v3898_v8, %v3864_v61  ;;  %v3862_v56 = vadd.f32 %v3830_v17, %v11369_v15  ;;  %v9750_v8 = vadd.f32 %v3833_v63, %v11388_v55  ;;  %v11456_v55 = vld [vmem:[#allocation103_spill] sm:$0xff]  ;;  %v11458_v61 = vld [vmem:[#allocation40_spill] sm:$0xff] }
 0xcb7   : > { %v3933_v40 = vadd.f32 %v3901_v12, %v3867_v47  ;;  %v4070_v35 = vadd.f32 %v9594_v45, %v3925_v58  ;;  %v3828_v48 = vmul.f32 %v9681_v11, %v11452_v62  ;;  %v11454_v12 = vld [vmem:[#allocation32_spill] sm:$0xff]  ;;  %5271 = vtanh.f32 %v4101_v34  ;;  %v5270_v62 = vpop.eup %5269 }
 0xcb8   : > { %v3836_v44 = vmul.f32 %v9681_v11, %v11454_v12  ;;  %v3902_v15 = vmul.f32 %v9686_v59, %v11455_v26  ;;  %v3850_v28 = vmul.f32 %v9681_v11, %v11456_v55  ;;  %v3895_v37 = vmul.f32 %v9686_v59, %v11458_v61  ;;  %v11460_v39 = vld [vmem:[#allocation108_spill] sm:$0xff] }
 0xcb9   : > { %v9702_v29 = vpop.f32.mrf.mxu3  ;;  %v4078_v10 = vadd.f32 %v9640_v21, %v3933_v40  ;;  %v3916_v21 = vmul.f32 %v9686_v59, %v11457_v23  ;;  %v3860_v45 = vadd.f32 %v3828_v48, %v11355_v13  ;;  %v3940_v63 = vadd.f32 %v3908_v43, %v3874_v4  ;;  %v11462_v12 = vld [vmem:[#allocation96_spill] sm:$0xff] }
 0xcba   : > { %v3868_v47 = vadd.f32 %v3836_v44, %v11459_v57  ;;  %v3882_v17 = vadd.f32 %v3850_v28, %v11460_v39  ;;  %v4102_v34 = vmul.f32 0.5, %v4070_v35  ;;  %v9777_v13 = vmul.f32 %v9686_v59, %v11391_v22 }
 0xcbb   : > { %v4110_v38 = vmul.f32 0.5, %v4078_v10  ;;  %v3926_v40 = vadd.f32 %v3894_v54, %v3860_v45  ;;  %v4085_v58 = vadd.f32 %v9670_v19, %v3940_v63  ;;  %v3838_v4 = vmul.f32 %v9681_v11, %v11461_v51 }
 0xcbc   : > { %v3934_v48 = vadd.f32 %v3902_v15, %v3868_v47  ;;  %v3909_v43 = vmul.f32 %v9686_v59, %v11417_v7  ;;  %v3948_v10 = vadd.f32 %v3916_v21, %v3882_v17  ;;  %v3927_v53 = vadd.f32 %v3895_v37, %v3861_v18  ;;  %v11463_v7 = vld [vmem:[#allocation34_spill] sm:$0xff]  ;;  %v11464_v18 = vld [vmem:[#allocation55_spill] sm:$0xff]  ;;  %v11465_v21 = vld [vmem:[#allocation89_spill] sm:$0xff] }
 0xcbd   : > { %v4071_v24 = vadd.f32 %v9600_v25, %v3926_v40  ;;  %v9785_v35 = vadd.f32 %v3896_v0, %v3862_v56  ;;  %v3851_v22 = vmul.f32 %v9681_v11, %v11462_v12  ;;  %v5272_v44 = vpop.eup %5271  ;;  %5273 = vtanh.f32 %v4110_v38  ;;  %v11466_v0 = vld [vmem:[#allocation65_spill] sm:$0xff] }
 0xcbe   : > { %v4079_v19 = vadd.f32 %v9646_v16, %v3934_v48  ;;  %v3875_v26 = vadd.f32 %v3843_v32, %v11424_v20  ;;  %5275 = vtanh.f32 %v4102_v34  ;;  %v4157_v55 = vmul.f32 0.5, %v5270_v62  ;;  %v11467_v38 = vld [vmem:[#allocation37_spill] sm:$0xff] }
 0xcbf   : > { %v3837_v28 = vmul.f32 %v9681_v11, %v11463_v7  ;;  %v4117_v25 = vmul.f32 0.5, %v4085_v58  ;;  %v3903_v56 = vmul.f32 %v9686_v59, %v11464_v18  ;;  %v3883_v45 = vadd.f32 %v3851_v22, %v11465_v21  ;;  %v11468_v32 = vld [vmem:[#allocation105_spill] sm:$0xff]  ;;  %v11472_v22 = vld [vmem:[#allocation95_spill] sm:$0xff] }
 0xcc0   : > { %v3941_v23 = vadd.f32 %v3909_v43, %v3875_v26  ;;  %v4149_v61 = vmul.f32 0.5, %v5272_v44  ;;  %v4103_v37 = vmul.f32 0.5, %v4071_v24  ;;  %v9799_v20 = vmul.f32 %v9686_v59, %v11393_v42  ;;  %v11469_v34 = vld [vmem:[#allocation29_spill] sm:$0xff]  ;;  %v11470_v42 = vld [vmem:[#allocation31_spill] sm:$0xff] }
 0xcc1   : > { %v9746_v2 = vpop.f32.mrf.mxu3  ;;  %v3869_v16 = vadd.f32 %v3837_v28, %v11466_v0  ;;  %v4111_v63 = vmul.f32 0.5, %v4079_v19  ;;  %v3870_v57 = vadd.f32 %v3838_v4, %v11467_v38  ;;  %v3917_v39 = vmul.f32 %v9686_v59, %v11468_v32  ;;  %v11471_v24 = vld [vmem:[#allocation85_spill] sm:$0xff]  ;;  %v11476_v0 = vld [vmem:[#allocation100_spill] sm:$0xff] }
 0xcc2   : > { %v4086_v47 = vadd.f32 %v9672_v49, %v3941_v23  ;;  %v4181_v17 = vadd.f32 0.5, %v4157_v55  ;;  %v3904_v40 = vmul.f32 %v9686_v59, %v11469_v34  ;;  %v3844_v58 = vmul.f32 %v9681_v11, %v11412_v50  ;;  %v11474_v23 = vld [vmem:[#allocation60_spill] sm:$0xff] }
 0xcc3   : > { %v5274_v62 = vpop.eup %5273  ;;  %v3935_v48 = vadd.f32 %v3903_v56, %v3869_v16  ;;  %v9811_v51 = vmul.f32 %v9686_v59, %v11470_v42  ;;  %v3910_v49 = vmul.f32 %v9686_v59, %v11415_v9  ;;  %v3949_v4 = vadd.f32 %v3917_v39, %v3883_v45  ;;  %v11478_v39 = vld [vmem:[#allocation80_spill] sm:$0xff] }
 0xcc4   : > { %v5276_v43 = vpop.eup %5275  ;;  %v3852_v44 = vmul.f32 %v9681_v11, %v11472_v22  ;;  %v4118_v26 = vmul.f32 0.5, %v4086_v47  ;;  %v4072_v55 = vadd.f32 %v9606_v27, %v3927_v53  ;;  %v4205_v9 = vmul.f32 %v4181_v17, %v9376_v52 }
 0xcc5   : > { %v4080_v19 = vadd.f32 %v9652_v31, %v3935_v48  ;;  %v4158_v7 = vmul.f32 0.5, %v5274_v62  ;;  %v3845_v16 = vmul.f32 %v9681_v11, %v11476_v0  ;;  %v3853_v17 = vmul.f32 %v9681_v11, %v11478_v39  ;;  %v11479_v48 = vld [vmem:[#allocation82_spill] sm:$0xff] }
 0xcc6   : > { %v3884_v21 = vadd.f32 %v3852_v44, %v11474_v23  ;;  %v4104_v47 = vmul.f32 0.5, %v4072_v55  ;;  %v11482_v55 = vld [vmem:[#allocation90_spill] sm:$0xff] }
 0xcc7   : > { %v4112_v53 = vmul.f32 0.5, %v4080_v19  ;;  %v4182_v32 = vadd.f32 0.5, %v4158_v7  ;;  %v3877_v42 = vadd.f32 %v3845_v16, %v11479_v48  ;;  %v11488_v48 = vld [vmem:[#allocation150_spill] sm:$0xff] }
 0xcc9   : > { %v4045_v54 = vpop.f32.mrf.mxu3 }
 0xcca   : > { %v4093_v15 = vadd.f32 %v4045_v54, %v3948_v10  ;;  %v4173_v10 = vadd.f32 0.5, %v4149_v61  ;;  %v3876_v54 = vadd.f32 %v3844_v58, %v11471_v24  ;;  %v4150_v61 = vmul.f32 0.5, %v5276_v43  ;;  %v11480_v43 = vld [vmem:[#allocation107_spill] sm:$0xff] }
 0xccb   : > { %v3936_v58 = vadd.f32 %v3904_v40, %v3870_v57  ;;  %v4206_v40 = vmul.f32 %v4182_v32, %v9397_v36  ;;  %v11486_v32 = vld [vmem:[#allocation102_spill] sm:$0xff] }
 0xccc   : > { %5277 = vtanh.f32 %v4093_v15  ;;  %v3942_v56 = vadd.f32 %v3910_v49, %v3876_v54  ;;  %v11481_v54 = vld [vmem:[#allocation98_spill] sm:$0xff] }
 0xccd   : > { %5279 = vtanh.f32 %v4117_v25  ;;  %v11473_v25 = vld [vmem:[#allocation49_spill] sm:$0xff]  ;;  %v4081_v44 = vadd.f32 %v9656_v33, %v3936_v58 }
 0xcce   : > { %5281 = vtanh.f32 %v4103_v37  ;;  %v3872_v18 = vadd.f32 %v9740_v30, %v11473_v25  ;;  %v11475_v37 = vld [vmem:[#allocation12_spill] sm:$0xff]  ;;  %v4087_v52 = vadd.f32 %v9674_v3, %v3942_v56  ;;  %v4073_v3 = vadd.f32 %v9612_v41, %v9785_v35  ;;  %v11483_v56 = vld [vmem:[#allocation91_spill] sm:$0xff] }
 0xccf   : > { %5283 = vtanh.f32 %v4111_v63  ;;  %v3906_v31 = vmul.f32 %v9686_v59, %v11475_v37  ;;  %v11477_v63 = vld [vmem:[#allocation99_spill] sm:$0xff]  ;;  %v3846_v33 = vmul.f32 %v9681_v11, %v11483_v56  ;;  %v3937_v37 = vadd.f32 %v9811_v51, %v9736_v46 }
 0xcd0   : > { %v3918_v30 = vmul.f32 %v9686_v59, %v11477_v63  ;;  %v4105_v25 = vmul.f32 0.5, %v4073_v3  ;;  %v11485_v63 = vld [vmem:[#allocation109_spill] sm:$0xff]  ;;  %v3912_v46 = vmul.f32 %v9686_v59, %v11486_v32 }
 0xcd1   : > { %v4048_v12 = vpop.f32.mrf.mxu3  ;;  %v3938_v0 = vadd.f32 %v3906_v31, %v3872_v18  ;;  %v11487_v18 = vld [vmem:[#allocation73_spill] sm:$0xff] }
 0xcd2   : > { %v5278_v50 = vpop.eup %5277  ;;  %v4094_v15 = vadd.f32 %v4048_v12, %v3949_v4  ;;  %v3950_v49 = vadd.f32 %v3918_v30, %v3884_v21  ;;  %v4174_v4 = vadd.f32 0.5, %v4150_v61  ;;  %v3885_v12 = vadd.f32 %v3853_v17, %v11481_v54  ;;  %v11500_v32 = vld [vmem:[#allocation145_spill] sm:$0xff] }
 0xcd3   : > { %v4213_v28 = vmul.f32 %v5278_v50, %v4173_v10  ;;  %v5280_v45 = vpop.eup %5279  ;;  %v3911_v10 = vmul.f32 %v9686_v59, %v11480_v43  ;;  %v4119_v50 = vmul.f32 0.5, %v4087_v52  ;;  %v4113_v21 = vmul.f32 0.5, %v4081_v44  ;;  %v11490_v44 = vld [vmem:[#allocation92_spill] sm:$0xff] }
 0xcd4   : > { %5285 = vtanh.f32 %v4094_v15  ;;  %v5282_v38 = vpop.eup %5281  ;;  %v4165_v62 = vmul.f32 0.5, %v5280_v45  ;;  %v3878_v30 = vadd.f32 %v3846_v33, %v11485_v63  ;;  %v3854_v31 = vmul.f32 %v9681_v11, %v11487_v18 }
 0xcd5   : > { %v4221_v27 = vadd.f32 %v4213_v28, %v4205_v9  ;;  %5287 = vtanh.f32 %v4118_v26  ;;  %v5284_v34 = vpop.eup %5283  ;;  %v3943_v35 = vadd.f32 %v3911_v10, %v3877_v42  ;;  %v3919_v9 = vmul.f32 %v9686_v59, %v11482_v55  ;;  %v11493_v55 = vld [vmem:[#allocation7_spill] sm:$0xff] }
 0xcd6   : > { %v4159_v19 = vmul.f32 0.5, %v5284_v34  ;;  %v4189_v41 = vadd.f32 0.5, %v4165_v62  ;;  %v4151_v28 = vmul.f32 0.5, %v5282_v38  ;;  %v4082_v17 = vadd.f32 %v9660_v14, %v3937_v37  ;;  %v11497_v37 = vld [vmem:[#allocation94_spill] sm:$0xff] }
 0xcd7   : > { %5289 = vtanh.f32 %v4221_v27  ;;  %v4088_v36 = vadd.f32 %v9676_v6, %v3943_v35  ;;  %v11484_v27 = vld [vmem:[#allocation45_spill] sm:$0xff]  ;;  %v3951_v38 = vadd.f32 %v3919_v9, %v3885_v12  ;;  %v4074_v62 = vadd.f32 %v9618_v5, %v9731_v60 }
 0xcd8   : > { %5291 = vtanh.f32 %v4112_v53  ;;  %v4183_v61 = vadd.f32 0.5, %v4159_v19  ;;  %v3841_v53 = vmul.f32 %v9681_v11, %v11484_v27  ;;  %v3944_v10 = vadd.f32 %v3912_v46, %v3878_v30  ;;  %v11499_v30 = vld [vmem:[#allocation111_spill] sm:$0xff] }
 0xcd9   : > { %v4051_v24 = vpop.f32.mrf.mxu3  ;;  %5293 = vtanh.f32 %v4104_v47  ;;  %v4175_v47 = vadd.f32 0.5, %v4151_v28  ;;  %v4120_v34 = vmul.f32 0.5, %v4088_v36  ;;  %v3847_v14 = vmul.f32 %v9681_v11, %v11490_v44 }
 0xcda   : > { %v5286_v22 = vpop.eup %5285  ;;  %v4095_v57 = vadd.f32 %v4051_v24, %v3950_v49  ;;  %v4207_v42 = vmul.f32 %v4183_v61, %v11488_v48  ;;  %v11489_v24 = vld [vmem:[#allocation74_spill] sm:$0xff]  ;;  %v4114_v60 = vmul.f32 0.5, %v4082_v17  ;;  %v3873_v9 = vadd.f32 %v3841_v53, %v11493_v55  ;;  %v11501_v17 = vld [vmem:[#allocation77_spill] sm:$0xff]  ;;  %v11508_v55 = vld [vmem:[#allocation39_spill] sm:$0xff] }
 0xcdb   : > { %v4214_v26 = vmul.f32 %v5286_v22, %v4174_v4  ;;  %v5288_v15 = vpop.eup %5287  ;;  %v3920_v54 = vmul.f32 %v9686_v59, %v11489_v24  ;;  %v3931_v24 = vadd.f32 %v9777_v13, %v9750_v8  ;;  %v11507_v13 = vld [vmem:[#allocation51_spill] sm:$0xff] }
 0xcdc   : > { %5295 = vtanh.f32 %v4095_v57  ;;  %v4166_v52 = vmul.f32 0.5, %v5288_v15  ;;  %v11491_v57 = vld [vmem:[#allocation70_spill] sm:$0xff] }
 0xcdd   : > { %v5290_v7 = vpop.eup %5289  ;;  %v4222_v23 = vadd.f32 %v4214_v26, %v4206_v40  ;;  %5297 = vtanh.f32 %v4119_v50  ;;  %v3886_v5 = vadd.f32 %v3854_v31, %v11491_v57  ;;  %v11492_v40 = vld [vmem:[#allocation52_spill] sm:$0xff]  ;;  %v11505_v57 = vld [vmem:[#allocation78_spill] sm:$0xff] }
 0xcde   : > { %v4237_v45 = vmul.f32 %v5290_v7, %v4189_v41  ;;  %v5292_v16 = vpop.eup %5291  ;;  %v4190_v43 = vadd.f32 0.5, %v4166_v52  ;;  %v4089_v19 = vadd.f32 %v11492_v40, %v3944_v10  ;;  %v4106_v41 = vmul.f32 0.5, %v4074_v62  ;;  %v11498_v52 = vld [vmem:[#allocation47_spill] sm:$0xff] }
 0xcdf   : > { %5299 = vtanh.f32 %v4222_v23  ;;  %v5294_v6 = vpop.eup %5293  ;;  %v4160_v49 = vmul.f32 0.5, %v5292_v16  ;;  %v3952_v33 = vadd.f32 %v3920_v54, %v3886_v5  ;;  %v11495_v23 = vld [vmem:[#allocation30_spill] sm:$0xff]  ;;  %v3913_v16 = vmul.f32 %v9686_v59, %v11497_v37  ;;  %v11511_v37 = vld [vmem:[#allocation43_spill] sm:$0xff] }
 0xce0   : > { %4245 = vst [vmem:[%s9852_s14] sm:$0xff] %v4237_v45  ;;  %5301 = vtanh.f32 %v4105_v25  ;;  %v4152_v22 = vmul.f32 0.5, %v5294_v6  ;;  %v11494_v25 = vld [vmem:[#allocation104_spill] sm:$0xff]  ;;  %v11496_v45 = vld [vmem:[#allocation154_spill] sm:$0xff]  ;;  %v3855_v53 = vmul.f32 %v9681_v11, %v11498_v52  ;;  %v4121_v6 = vmul.f32 0.5, %v4089_v19 }
 0xce1   : > { %v4054_v51 = vpop.f32.mrf.mxu3  ;;  %5303 = vtanh.f32 %v4113_v21  ;;  %v4184_v35 = vadd.f32 0.5, %v4160_v49  ;;  %v3879_v56 = vadd.f32 %v3847_v14, %v11494_v25  ;;  %v3921_v21 = vmul.f32 %v9686_v59, %v11495_v23 }
 0xce2   : > { %v5296_v39 = vpop.eup %5295  ;;  %v4096_v58 = vadd.f32 %v4054_v51, %v3951_v38  ;;  %v4176_v36 = vadd.f32 0.5, %v4152_v22  ;;  %v4075_v61 = vadd.f32 %v11496_v45, %v9733_v1  ;;  %v4083_v38 = vadd.f32 %v11499_v30, %v3938_v0 }
 0xce3   : > { %v4215_v4 = vmul.f32 %v5296_v39, %v4175_v47  ;;  %v5298_v3 = vpop.eup %5297  ;;  %v4208_v46 = vmul.f32 %v4184_v35, %v11500_v32  ;;  %v3945_v39 = vadd.f32 %v3913_v16, %v3879_v56  ;;  %v3939_v14 = vadd.f32 %v9799_v20, %v3873_v9  ;;  %v11509_v9 = vld [vmem:[#allocation121_spill] sm:$0xff]  ;;  %v11510_v56 = vld [vmem:[#allocation155_spill] sm:$0xff] }
 0xce4   : > { %5305 = vtanh.f32 %v4096_v58  ;;  %v4167_v28 = vmul.f32 0.5, %v5298_v3  ;;  %v4107_v48 = vmul.f32 0.5, %v4075_v61  ;;  %v11503_v3 = vld [vmem:[#allocation122_spill] sm:$0xff]  ;;  %v4076_v25 = vadd.f32 %v11509_v9, %v3931_v24 }
 0xce5   : > { %v5300_v12 = vpop.eup %5299  ;;  %v4223_v50 = vadd.f32 %v4215_v4, %v4207_v42  ;;  %5307 = vtanh.f32 %v4120_v34  ;;  %v3887_v34 = vadd.f32 %v3855_v53, %v11501_v17  ;;  %v11502_v42 = vld [vmem:[#allocation72_spill] sm:$0xff]  ;;  %v4115_v4 = vmul.f32 0.5, %v4083_v38  ;;  %v11512_v53 = vld [vmem:[#allocation69_spill] sm:$0xff] }
 0xce6   : > { %v4238_v26 = vmul.f32 %v5300_v12, %v4190_v43  ;;  %v5302_v15 = vpop.eup %5301  ;;  %v4191_v1 = vadd.f32 0.5, %v4167_v28  ;;  %v3848_v0 = vmul.f32 %v9681_v11, %v11502_v42  ;;  %v4090_v43 = vadd.f32 %v11503_v3, %v3945_v39  ;;  %v11504_v12 = vld [vmem:[#allocation24_spill] sm:$0xff]  ;;  %v11515_v42 = vld [vmem:[#allocation26_spill] sm:$0xff] }
 0xce7   : > { %5309 = vtanh.f32 %v4223_v50  ;;  %v5304_v7 = vpop.eup %5303  ;;  %v4153_v62 = vmul.f32 0.5, %v5302_v15  ;;  %v3856_v22 = vmul.f32 %v9681_v11, %v11504_v12  ;;  %v3922_v16 = vmul.f32 %v9686_v59, %v11511_v37 }
 0xce8   : > { %4246 = vst [vmem:[%s9852_s14 + $0x8] sm:$0xff] %v4238_v26  ;;  %5311 = vtanh.f32 %v4114_v60  ;;  %v4161_v51 = vmul.f32 0.5, %v5304_v7  ;;  %v3880_v5 = vadd.f32 %v3848_v0, %v11505_v57  ;;  %v3953_v60 = vadd.f32 %v3921_v21, %v3887_v34  ;;  %v11506_v26 = vld [vmem:[#allocation38_spill] sm:$0xff] }
 0xce9   : > { %v4057_v27 = vpop.f32.mrf.mxu3  ;;  %5313 = vtanh.f32 %v4106_v41  ;;  %v4177_v19 = vadd.f32 0.5, %v4153_v62  ;;  %v3914_v15 = vmul.f32 %v9686_v59, %v11506_v26  ;;  %v3888_v41 = vadd.f32 %v3856_v22, %v11507_v13  ;;  %v11514_v34 = vld [vmem:[#allocation54_spill] sm:$0xff] }
 0xcea   : > { %v5306_v63 = vpop.eup %5305  ;;  %v4097_v47 = vadd.f32 %v4057_v27, %v3952_v33  ;;  %v4185_v54 = vadd.f32 0.5, %v4161_v51  ;;  %v4084_v7 = vadd.f32 %v11508_v55, %v3939_v14  ;;  %v4122_v28 = vmul.f32 0.5, %v4090_v43  ;;  %v11518_v14 = vld [vmem:[#allocation27_spill] sm:$0xff] }
 0xceb   : > { %v4216_v18 = vmul.f32 %v5306_v63, %v4176_v36  ;;  %v5308_v31 = vpop.eup %5307  ;;  %v3946_v61 = vadd.f32 %v3914_v15, %v3880_v5  ;;  %v3849_v63 = vmul.f32 %v9681_v11, %v11512_v53  ;;  %v3954_v17 = vadd.f32 %v3922_v16, %v3888_v41 }
 0xcec   : > { %5315 = vtanh.f32 %v4097_v47  ;;  %v4168_v50 = vmul.f32 0.5, %v5308_v31  ;;  %v4209_v33 = vmul.f32 %v4185_v54, %v11510_v56  ;;  %v4116_v38 = vmul.f32 0.5, %v4084_v7 }
 0xced   : > { %v5310_v58 = vpop.eup %5309  ;;  %v4224_v49 = vadd.f32 %v4216_v18, %v4208_v46  ;;  %5317 = vtanh.f32 %v4121_v6  ;;  %v4091_v6 = vadd.f32 %v9702_v29, %v3946_v61  ;;  %v4108_v46 = vmul.f32 0.5, %v4076_v25 }
 0xcee   : > { %v4239_v10 = vmul.f32 %v5310_v58, %v4191_v1  ;;  %v5312_v44 = vpop.eup %5311  ;;  %v4192_v45 = vadd.f32 0.5, %v4168_v50  ;;  %v11513_v1 = vld [vmem:[#allocation76_spill] sm:$0xff]  ;;  %v3857_v58 = vmul.f32 %v9681_v11, %v11514_v34  ;;  %v3923_v29 = vmul.f32 %v9686_v59, %v11515_v42 }
 0xcef   : > { %5319 = vtanh.f32 %v4224_v49  ;;  %v5314_v40 = vpop.eup %5313  ;;  %v4162_v23 = vmul.f32 0.5, %v5312_v44  ;;  %v3915_v39 = vmul.f32 %v9686_v59, %v11513_v1  ;;  %v4123_v49 = vmul.f32 0.5, %v4091_v6 }
 0xcf0   : > { %4247 = vst [vmem:[%s9852_s14 + $0x10] sm:$0xff] %v4239_v10  ;;  %5321 = vtanh.f32 %v4107_v48  ;;  %v4154_v52 = vmul.f32 0.5, %v5314_v40  ;;  %v11517_v10 = vld [vmem:[#allocation56_spill] sm:$0xff]  ;;  %v3889_v50 = vadd.f32 %v3857_v58, %v11518_v14 }
 0xcf1   : > { %v4060_v8 = vpop.f32.mrf.mxu3  ;;  %5323 = vtanh.f32 %v4115_v4  ;;  %v4186_v51 = vadd.f32 0.5, %v4162_v23  ;;  %v11516_v4 = vld [vmem:[#allocation57_spill] sm:$0xff] }
 0xcf2   : > { %v5316_v35 = vpop.eup %5315  ;;  %v4098_v20 = vadd.f32 %v4060_v8, %v3953_v60  ;;  %v4178_v62 = vadd.f32 0.5, %v4154_v52  ;;  %v3881_v3 = vadd.f32 %v3849_v63, %v11516_v4  ;;  %v3955_v8 = vadd.f32 %v3923_v29, %v3889_v50  ;;  %v11520_v52 = vld [vmem:[#allocation153_spill] sm:$0xff] }
 0xcf3   : > { %v4217_v21 = vmul.f32 %v5316_v35, %v4177_v19  ;;  %v5318_v36 = vpop.eup %5317  ;;  %v4210_v24 = vmul.f32 %v4186_v51, %v11517_v10 }
 0xcf4   : > { %5325 = vtanh.f32 %v4098_v20  ;;  %v4169_v31 = vmul.f32 0.5, %v5318_v36  ;;  %v3947_v11 = vadd.f32 %v3915_v39, %v3881_v3  ;;  %v11519_v20 = vld [vmem:[#allocation144_spill] sm:$0xff] }
 0xcf5   : > { %v5320_v27 = vpop.eup %5319  ;;  %v4225_v30 = vadd.f32 %v4217_v21, %v4209_v33  ;;  %5327 = vtanh.f32 %v4122_v28 }
 0xcf6   : > { %v4240_v47 = vmul.f32 %v5320_v27, %v4192_v45  ;;  %v5322_v32 = vpop.eup %5321  ;;  %v4193_v44 = vadd.f32 0.5, %v4169_v31  ;;  %v4092_v60 = vadd.f32 %v9746_v2, %v3947_v11 }
 0xcf7   : > { %5329 = vtanh.f32 %v4225_v30  ;;  %v5324_v18 = vpop.eup %5323  ;;  %v4155_v59 = vmul.f32 0.5, %v5322_v32 }
 0xcf8   : > { %4248 = vst [vmem:[%s9852_s14 + $0x18] sm:$0xff] %v4240_v47  ;;  %5331 = vtanh.f32 %v4116_v38  ;;  %v4163_v54 = vmul.f32 0.5, %v5324_v18  ;;  %v4124_v7 = vmul.f32 0.5, %v4092_v60 }
 0xcf9   : > { %v4063_v48 = vpop.f32.mrf.mxu3  ;;  %5333 = vtanh.f32 %v4108_v46  ;;  %v4179_v41 = vadd.f32 0.5, %v4155_v59 }
 0xcfa   : > { %v5326_v0 = vpop.eup %5325  ;;  %v4099_v43 = vadd.f32 %v4063_v48, %v3954_v17  ;;  %v4187_v19 = vadd.f32 0.5, %v4163_v54 }
 0xcfb   : > { %v4218_v12 = vmul.f32 %v5326_v0, %v4178_v62  ;;  %v5328_v22 = vpop.eup %5327 }
 0xcfc   : > { %5335 = vtanh.f32 %v4099_v43  ;;  %v4170_v15 = vmul.f32 0.5, %v5328_v22  ;;  %v4211_v9 = vmul.f32 %v4187_v19, %v11519_v20 }
 0xcfd   : > { %v5330_v57 = vpop.eup %5329  ;;  %v4226_v5 = vadd.f32 %v4218_v12, %v4210_v24  ;;  %5337 = vtanh.f32 %v4123_v49 }
 0xcfe   : > { %v4241_v40 = vmul.f32 %v5330_v57, %v4193_v44  ;;  %v5332_v26 = vpop.eup %5331  ;;  %v4194_v2 = vadd.f32 0.5, %v4170_v15 }
 0xcff   : > { %5339 = vtanh.f32 %v4226_v5  ;;  %v5334_v13 = vpop.eup %5333  ;;  %v4164_v25 = vmul.f32 0.5, %v5332_v26 }
 0xd00   : > { %4249 = vst [vmem:[%s9852_s14 + $0x20] sm:$0xff] %v4241_v40  ;;  %v4156_v21 = vmul.f32 0.5, %v5334_v13 }
 0xd01   : > { %v4066_v35 = vpop.f32.mrf.mxu3  ;;  %v4188_v61 = vadd.f32 0.5, %v4164_v25 }
 0xd02   : > { %v5336_v55 = vpop.eup %5335  ;;  %v4100_v28 = vadd.f32 %v4066_v35, %v3955_v8  ;;  %v4180_v16 = vadd.f32 0.5, %v4156_v21 }
 0xd03   : > { %v4219_v56 = vmul.f32 %v5336_v55, %v4179_v41  ;;  %v5338_v33 = vpop.eup %5337  ;;  %v4212_v53 = vmul.f32 %v4188_v61, %v11520_v52 }
 0xd04   : > { %5341 = vtanh.f32 %v4100_v28  ;;  %v4171_v37 = vmul.f32 0.5, %v5338_v33 }
 0xd05   : > { %v5340_v23 = vpop.eup %5339  ;;  %v4227_v36 = vadd.f32 %v4219_v56, %v4211_v9  ;;  %5343 = vtanh.f32 %v4124_v7 }
 0xd06   : > { %v4242_v45 = vmul.f32 %v5340_v23, %v4194_v2  ;;  %v4195_v38 = vadd.f32 0.5, %v4171_v37 }
 0xd07   : > { %5345 = vtanh.f32 %v4227_v36 }
 0xd08   : > { %4250 = vst [vmem:[%s9852_s14 + $0x28] sm:$0xff] %v4242_v45 }
 0xd0a   : > { %v5342_v27 = vpop.eup %5341 }
 0xd0b   : > { %v4220_v63 = vmul.f32 %v5342_v27, %v4180_v16  ;;  %v5344_v30 = vpop.eup %5343 }
 0xd0c   : > { %v4172_v46 = vmul.f32 0.5, %v5344_v30 }
 0xd0d   : > { %v5346_v6 = vpop.eup %5345  ;;  %v4228_v47 = vadd.f32 %v4220_v63, %v4212_v53 }
 0xd0e   : > { %v4243_v32 = vmul.f32 %v5346_v6, %v4195_v38  ;;  %v4196_v51 = vadd.f32 0.5, %v4172_v46 }
 0xd0f   : > { %5347 = vtanh.f32 %v4228_v47 }
 0xd10   : > { %4251 = vst [vmem:[%s9852_s14 + $0x30] sm:$0xff] %v4243_v32 }
 0xd15   : > { %v5348_v18 = vpop.eup %5347 }
 0xd16   : > { %v4244_v31 = vmul.f32 %v5348_v18, %v4196_v51 }
 0xd18   : > { %4252 = vst [vmem:[%s9852_s14 + $0x38] sm:$0xff] %v4244_v31 }
 0xd19   : > { %5500 = shalt.err (!%p5497_p5)
}
 0xd1a   : > { %s5540_s22 = smov 128   ;;  %s5541_s13 = smov 256  }
 0xd1b   : > { %s5542_s27 = smov 8  }
 0xd1c   : > { %4612 = dma.vmem_to_hbm [thread:$0]  (%p5606_p6), %s4266_s30, 1024, %s4268_s5, %s4254_s19, %s5540_s22, %s5541_s13, %s5542_s27  }
 0xd1d PF: > { %s4282_s14 = sand.u32 1, %s5523_s15   ;;  %p4615_p7 = pnand %p4338_p9, %p5610_p8 }
 0xd1e   : > { %s4283_s20 = scalar_lea.sflag [#allocation4], %s4282_s14 }
 0xd1f   : > { %p4616_p10 = pneg %p4615_p7 }
 0xd21   : > { %5518 = dma.done.wait (%p4616_p10), %s4283_s20, 1024  }
 0xd22   : > { %5520 = vsyncadd (%p4616_p10), %s4283_s20, 4294966272  ;;  %p14_p11 = scmp.ge.s32.totalorder %s5591_s21, 4   ;;  %s11521_s15 = smov %s5527_s16 }
 0xd23   : > { %s11522_s16 = smov %s5531_s17  ;;  %s11523_s17 = smov %s5604_s24 }
 0xd24   : > { %s11524_s18 = smov %s5591_s21  ;;  %16 = sbr.rel (!%p14_p11) target bundleno = 3 (0x3), region = 115 }
 0xd29   :  { %4289 = vsyncpa [#allocation4], 1 }
 0xd2a   :  { %4291 = vsyncpa [#allocation4 + $0x1], 1 }

</bundles_post_ra>
